<compile_context>
chip_gen: v6e
topology: v6e:2x2x1
jax: 0.10.0
libtpu: 0.0.40
codegen_flags: <defaults>
</compile_context>

<pallas_src>
import jax
import jax.numpy as jnp
from jax.experimental import pallas as pl
from jax.experimental.pallas import tpu as pltpu


_SUBLANE = 8                     # f32 sublane count
_WEIGHT_DTYPE = jnp.bfloat16
_LANE = 128

# ---------------------------------------------------------------------------
# Static layer table and packed-parameter layout.
# ---------------------------------------------------------------------------

_LAYER_DIMS = {  # name -> (in_features, out_features); insertion order matters
    "text1": (768, 512), "text2": (512, 256), "text3": (256, 128), "text4": (128, 64),
    "image1": (2048, 1024), "image2": (1024, 512), "image3": (512, 256), "image4": (256, 128),
    "audio1": (128, 256), "audio2": (256, 128), "audio3": (128, 64), "audio4": (64, 32),
    "comb1": (224, 512), "comb2": (512, 256), "comb3": (256, 128), "comb4": (128, 64),
    "out": (64, 3),
}
_MANUAL_DMA = ("image1", "image2")        # multi-MiB weights: overlap manually
_SLAB_WIDTHS = (512, 256, 128, 64, 32)    # per-column-width weight slabs


def _slab_width(name):
    if name == "out":
        return 128                        # pad 3 -> 128 columns (lane-dense head)
    return _LAYER_DIMS[name][1]


def _build_layout():
    woff = {}                             # name -> (slab_idx, row_off, in_dim, out_dim)
    rows = {w: 0 for w in _SLAB_WIDTHS}
    for name, (din, dout) in _LAYER_DIMS.items():
        if name in _MANUAL_DMA:
            continue
        w = _slab_width(name)
        si = _SLAB_WIDTHS.index(w)
        woff[name] = (si, rows[w], din, dout)
        rows[w] += din
    boff = {}                             # name -> (lane_off, out_dim)
    off = 0
    for name, (_, dout) in _LAYER_DIMS.items():
        boff[name] = (off, dout)
        off += -(-dout // _LANE) * _LANE  # each bias gets a 128-lane-aligned slot
    return {
        "woff": woff,
        "slab_rows": tuple(rows[w] for w in _SLAB_WIDTHS),
        "boff": boff,
        "bias_len": off,
    }


_LAYOUT = _build_layout()
_W = _LAYOUT["woff"]
_B = _LAYOUT["boff"]

_VMEM = pl.BlockSpec(memory_space=pltpu.MemorySpace.VMEM)
_ANY = pl.BlockSpec(memory_space=pl.ANY)


# ---------------------------------------------------------------------------
# Fused Pallas kernel.
# ---------------------------------------------------------------------------

def _fused_kernel(t_ref, i_ref, a_ref,            # activations (VMEM)
                  iw1_hbm, iw2_hbm,               # big image weights (HBM)
                  s512, s256, s128, s64, s32,     # packed bf16 weight slabs
                  bias_ref,                        # packed f32 bias slab
                  o_ref,                           # (bp, 128) f32 output
                  iw1_vmem, iw2_vmem, sems):       # scratch
    slabs = (s512, s256, s128, s64, s32)

    # Kick off the dominant image-branch weight DMAs immediately; the text and
    # audio branches below compute while these ~5 MiB are in flight.
    cp1 = pltpu.make_async_copy(iw1_hbm, iw1_vmem, sems.at[0])
    cp2 = pltpu.make_async_copy(iw2_hbm, iw2_vmem, sems.at[1])
    cp1.start()
    cp2.start()

    def wslice(name):
        si, ro, din, _ = _W[name]
        return slabs[si][ro:ro + din, :]          # bf16, full slab lane width

    def bias(name, width=0):
        lo, dout = _B[name]
        return bias_ref[:, lo:lo + (width if width else dout)]

    def dense(h, name):                           # bf16 in -> relu -> bf16 out
        acc = jnp.dot(h, wslice(name), preferred_element_type=jnp.float32)
        return jnp.maximum(acc + bias(name), 0.0).astype(jnp.bfloat16)

    # ---- text branch (under the image-weight DMAs) ----
    t = t_ref[...].astype(jnp.bfloat16)
    for name in ("text1", "text2", "text3", "text4"):
        t = dense(t, name)

    # ---- audio branch (also under the image-weight DMAs) ----
    a = a_ref[...].astype(jnp.bfloat16)
    for name in ("audio1", "audio2", "audio3", "audio4"):
        a = dense(a, name)

    # ---- image branch: manually DMA'd fc1/fc2 weights ----
    im = i_ref[...].astype(jnp.bfloat16)
    cp1.wait()
    im = jnp.maximum(
        jnp.dot(im, iw1_vmem[...], preferred_element_type=jnp.float32)
        + bias("image1"), 0.0).astype(jnp.bfloat16)
    cp2.wait()
    im = jnp.maximum(
        jnp.dot(im, iw2_vmem[...], preferred_element_type=jnp.float32)
        + bias("image2"), 0.0).astype(jnp.bfloat16)
    im = dense(im, "image3")
    im = dense(im, "image4")

    # ---- combined stack: split-K matmul-accumulate instead of a
    #      lane-misaligned torch.cat(text 64 | image 128 | audio 32) ----
    si, ro, _, _ = _W["comb1"]
    c1 = slabs[si]
    acc = jnp.dot(t, c1[ro:ro + 64, :], preferred_element_type=jnp.float32)
    acc += jnp.dot(im, c1[ro + 64:ro + 192, :], preferred_element_type=jnp.float32)
    acc += jnp.dot(a, c1[ro + 192:ro + 224, :], preferred_element_type=jnp.float32)
    h = jnp.maximum(acc + bias("comb1"), 0.0).astype(jnp.bfloat16)
    for name in ("comb2", "comb3", "comb4"):
        h = dense(h, name)

    # ---- output head (weight/bias zero-padded 3 -> 128 lanes: unmasked store) ----
    out = jnp.dot(h, wslice("out"), preferred_element_type=jnp.float32)
    o_ref[...] = out + bias("out", width=_LANE)


# ---------------------------------------------------------------------------
# Parameter construction (deterministic, synthetic, f32 "module" params)
# ---------------------------------------------------------------------------

def _make_linear(key, in_dim, out_dim):
    kw, kb = jax.random.split(key)
    scale = 1.0 / jnp.sqrt(jnp.float32(in_dim))
    w = jax.random.uniform(kw, (in_dim, out_dim), jnp.float32, -scale, scale)
    b = jax.random.uniform(kb, (1, out_dim), jnp.float32, -scale, scale)
    return w, b


def make_params(seed=0):
    key = jax.random.PRNGKey(seed)
    dims = {
        "text":     [(768, 512), (512, 256), (256, 128), (128, 64)],
        "image":    [(2048, 1024), (1024, 512), (512, 256), (256, 128)],
        "audio":    [(128, 256), (256, 128), (128, 64), (64, 32)],
        "combined": [(64 + 128 + 32, 512), (512, 256), (256, 128), (128, 64)],
        "output":   [(64, 3)],
    }
    params = {}
    for name, layer_dims in dims.items():
        layers = []
        for (din, dout) in layer_dims:
            key, sub = jax.random.split(key)
            layers.append(_make_linear(sub, din, dout))
        params[name] = layers
    return params


# ---------------------------------------------------------------------------
# One-time packing of module params into the fused kernel's layout.
# ---------------------------------------------------------------------------

def prepare_kernel_params(params, weight_dtype=_WEIGHT_DTYPE):
    named = {}
    for branch, prefix in (("text", "text"), ("image", "image"),
                           ("audio", "audio"), ("combined", "comb")):
        for li, (w, b) in enumerate(params[branch], start=1):
            named[f"{prefix}{li}"] = (w, b)
    named["out"] = params["output"][0]

    # Big image-branch weights stay as standalone HBM arrays (manual DMA).
    iw1 = named["image1"][0].astype(weight_dtype)
    iw2 = named["image2"][0].astype(weight_dtype)

    # Row-stack everything else into per-column-width bf16 slabs.
    slab_parts = {w: [] for w in _SLAB_WIDTHS}
    for name, (si, _, _, dout) in _W.items():
        w = named[name][0]
        width = _SLAB_WIDTHS[si]
        if dout < width:                          # only the output head (3 -> 128)
            w = jnp.pad(w, ((0, 0), (0, width - dout)))
        slab_parts[width].append(w.astype(weight_dtype))
    slabs = tuple(jnp.concatenate(slab_parts[w], axis=0) for w in _SLAB_WIDTHS)

    # Pack all biases (f32) into one slab, each in a 128-lane-aligned slot.
    bias_parts = []
    for name, (_, dout) in _B.items():
        b = named[name][1].astype(jnp.float32).reshape(1, -1)
        slot = -(-dout // _LANE) * _LANE
        if slot > dout:
            b = jnp.pad(b, ((0, 0), (0, slot - dout)))
        bias_parts.append(b)
    bias = jnp.concatenate(bias_parts, axis=1)

    return {"iw1": iw1, "iw2": iw2, "slabs": slabs, "bias": bias}


# ---------------------------------------------------------------------------
# Forward pass (minimal wrapper glue + single fused pallas_call)
# ---------------------------------------------------------------------------

def multimodal_forward(kparams, text_input, image_input, audio_input):
    batch = text_input.shape[0]
    bp = max(_SUBLANE, -(-batch // _SUBLANE) * _SUBLANE)

    def prep(x, width):                            # original pad_or_trim + batch pad
        x = x.astype(jnp.float32)[:, :width]
        pr, pc = bp - x.shape[0], width - x.shape[1]
        if pr or pc:
            x = jnp.pad(x, ((0, pr), (0, pc)))
        return x

    t = prep(text_input, 768)
    i = prep(image_input, 2048)
    a = prep(audio_input, 128)

    out = pl.pallas_call(
        _fused_kernel,
        out_shape=jax.ShapeDtypeStruct((bp, _LANE), jnp.float32),
        in_specs=([_VMEM] * 3 + [_ANY] * 2 + [_VMEM] * (len(kparams["slabs"]) + 1)),
        out_specs=_VMEM,
        scratch_shapes=[
            pltpu.VMEM((2048, 1024), _WEIGHT_DTYPE),   # image_fc1 weight buffer
            pltpu.VMEM((1024, 512), _WEIGHT_DTYPE),    # image_fc2 weight buffer
            pltpu.SemaphoreType.DMA((2,)),
        ],
        compiler_params=pltpu.CompilerParams(vmem_limit_bytes=24 * 1024 * 1024),
    )(t, i, a, kparams["iw1"], kparams["iw2"], *kparams["slabs"], kparams["bias"])
    return out[:batch, :3]


# ---------------------------------------------------------------------------
# Pure-JAX references for correctness checking.
# ---------------------------------------------------------------------------

def _reference_forward(params, text_input, image_input, audio_input,
                       weight_dtype=jnp.float32):
    def dense(h, w, b):
        return jnp.dot(h.astype(weight_dtype), w.astype(weight_dtype),
                       preferred_element_type=jnp.float32) + b

    def mlp4(x, layers):
        h = x
        for w, b in layers:
            h = jnp.maximum(dense(h, w, b), 0.0)
        return h

    def pad_or_trim(x, size):
        n = x.shape[1]
        if n > size:
            return x[:, :size]
        if n < size:
            return jnp.concatenate(
                [x, jnp.zeros((x.shape[0], size - n), x.dtype)], axis=1)
        return x

    t = mlp4(pad_or_trim(text_input.astype(jnp.float32), 768), params["text"])
    i = mlp4(pad_or_trim(image_input.astype(jnp.float32), 2048), params["image"])
    a = mlp4(pad_or_trim(audio_input.astype(jnp.float32), 128), params["audio"])
    h = mlp4(jnp.concatenate([t, i, a], axis=1), params["combined"])
    wo, bo = params["output"][0]
    return dense(h, wo, bo)


# ---------------------------------------------------------------------------
# Main
# ---------------------------------------------------------------------------

if __name__ == "__main__":
    key = jax.random.PRNGKey(0)
    k_t, k_i, k_a = jax.random.split(key, 3)

    batch = 4
    # Exercise pad (700 -> 768), trim (2100 -> 2048) and exact (128) paths.
    text_input = jax.random.normal(k_t, (batch, 700), jnp.float32)
    image_input = jax.random.normal(k_i, (batch, 2100), jnp.float32)
    audio_input = jax.random.normal(k_a, (batch, 128), jnp.float32)

    params = make_params(seed=0)
    kparams = prepare_kernel_params(params)

    out = multimodal_forward(kparams, text_input, image_input, audio_input)
    out = jax.block_until_ready(out)
    assert out.shape == (batch, 3), out.shape

    # Comparable reference (same bf16 weights, f32 accumulation).
    ref_bf16 = _reference_forward(params, text_input, image_input, audio_input,
                                  weight_dtype=_WEIGHT_DTYPE)
    assert jnp.allclose(out, ref_bf16, atol=2e-3, rtol=2e-3), \
        "mismatch vs bf16-weight JAX reference"

    # Loose check against the original full-f32 module semantics.
    ref_f32 = _reference_forward(params, text_input, image_input, audio_input,
                                 weight_dtype=jnp.float32)
    assert jnp.allclose(out, ref_f32, atol=5e-2, rtol=5e-2), \
        "mismatch vs f32 JAX reference"

    print("KERNEL_OK")
</pallas_src>

<mosaic_0001>
module attributes {stable_mosaic.version = 11 : i64} {
  func.func @_fused_kernel(%arg0: memref<8x768xf32, #tpu.memory_space<vmem>>, %arg1: memref<8x2048xf32, #tpu.memory_space<vmem>>, %arg2: memref<8x128xf32, #tpu.memory_space<vmem>>, %arg3: memref<2048x1024xbf16, #tpu.memory_space<any>>, %arg4: memref<1024x512xbf16, #tpu.memory_space<any>>, %arg5: memref<992x512xbf16, #tpu.memory_space<vmem>>, %arg6: memref<1664x256xbf16, #tpu.memory_space<vmem>>, %arg7: memref<1088x128xbf16, #tpu.memory_space<vmem>>, %arg8: memref<384x64xbf16, #tpu.memory_space<vmem>>, %arg9: memref<64x32xbf16, #tpu.memory_space<vmem>>, %arg10: memref<1x4736xf32, #tpu.memory_space<vmem>>, %arg11: memref<8x128xf32, #tpu.memory_space<vmem>>, %arg12: memref<2048x1024xbf16, #tpu.memory_space<vmem>>, %arg13: memref<1024x512xbf16, #tpu.memory_space<vmem>>, %arg14: memref<2x!tpu.dma_semaphore, #tpu.memory_space<semaphore_mem>>) attributes {dimension_semantics = [], scalar_prefetch = 0 : i64, scratch_operands = 3 : i64, tpu.core_type = #tpu.core_type<tc>} {
    %c0_i32 = arith.constant 0 : i32
    %0 = tpu.memref_slice %arg14[%c0_i32] : memref<2x!tpu.dma_semaphore, #tpu.memory_space<semaphore_mem>> -> memref<1x!tpu.dma_semaphore, #tpu.memory_space<semaphore_mem>>
    %1 = tpu.memref_squeeze %0 : memref<1x!tpu.dma_semaphore, #tpu.memory_space<semaphore_mem>> -> memref<!tpu.dma_semaphore, #tpu.memory_space<semaphore_mem>>
    tpu.enqueue_dma source(%arg3 : memref<2048x1024xbf16, #tpu.memory_space<any>>) target(%arg12 : memref<2048x1024xbf16, #tpu.memory_space<vmem>>) target_semaphore(%1 : memref<!tpu.dma_semaphore, #tpu.memory_space<semaphore_mem>>)
    %c1_i32 = arith.constant 1 : i32
    %2 = tpu.memref_slice %arg14[%c1_i32] : memref<2x!tpu.dma_semaphore, #tpu.memory_space<semaphore_mem>> -> memref<1x!tpu.dma_semaphore, #tpu.memory_space<semaphore_mem>>
    %3 = tpu.memref_squeeze %2 : memref<1x!tpu.dma_semaphore, #tpu.memory_space<semaphore_mem>> -> memref<!tpu.dma_semaphore, #tpu.memory_space<semaphore_mem>>
    tpu.enqueue_dma source(%arg4 : memref<1024x512xbf16, #tpu.memory_space<any>>) target(%arg13 : memref<1024x512xbf16, #tpu.memory_space<vmem>>) target_semaphore(%3 : memref<!tpu.dma_semaphore, #tpu.memory_space<semaphore_mem>>)
    %c0 = arith.constant 0 : index
    %c0_0 = arith.constant 0 : index
    %4 = vector.load %arg0[%c0, %c0_0] : memref<8x768xf32, #tpu.memory_space<vmem>>, vector<8x768xf32>
    %5 = arith.truncf %4 : vector<8x768xf32> to vector<8x768xbf16>
    %c0_1 = arith.constant 0 : index
    %c0_2 = arith.constant 0 : index
    %6 = vector.load %arg5[%c0_1, %c0_2] : memref<992x512xbf16, #tpu.memory_space<vmem>>, vector<768x512xbf16>
    %cst = arith.constant dense<0.000000e+00> : vector<8x512xf32>
    %7 = tpu.matmul %5, %6, %cst {dimension_numbers = #tpu.dot_dimension_numbers<[1], [0], [0], [1], [0, 0, 1, 1], [], []>} : vector<8x768xbf16>, vector<768x512xbf16>, vector<8x512xf32> -> vector<8x512xf32>
    %c0_3 = arith.constant 0 : index
    %c0_4 = arith.constant 0 : index
    %8 = vector.load %arg10[%c0_3, %c0_4] : memref<1x4736xf32, #tpu.memory_space<vmem>>, vector<1x512xf32>
    %9 = vector.broadcast %8 : vector<1x512xf32> to vector<8x512xf32>
    %10 = arith.addf %7, %9 : vector<8x512xf32>
    %cst_5 = arith.constant 0.000000e+00 : f32
    %11 = vector.broadcast %cst_5 : f32 to vector<8x512xf32>
    %12 = arith.maximumf %10, %11 : vector<8x512xf32>
    %13 = arith.truncf %12 : vector<8x512xf32> to vector<8x512xbf16>
    %c0_6 = arith.constant 0 : index
    %c0_7 = arith.constant 0 : index
    %14 = vector.load %arg6[%c0_6, %c0_7] : memref<1664x256xbf16, #tpu.memory_space<vmem>>, vector<512x256xbf16>
    %cst_8 = arith.constant dense<0.000000e+00> : vector<8x256xf32>
    %15 = tpu.matmul %13, %14, %cst_8 {dimension_numbers = #tpu.dot_dimension_numbers<[1], [0], [0], [1], [0, 0, 1, 1], [], []>} : vector<8x512xbf16>, vector<512x256xbf16>, vector<8x256xf32> -> vector<8x256xf32>
    %c0_9 = arith.constant 0 : index
    %c512 = arith.constant 512 : index
    %16 = vector.load %arg10[%c0_9, %c512] : memref<1x4736xf32, #tpu.memory_space<vmem>>, vector<1x256xf32>
    %17 = vector.broadcast %16 : vector<1x256xf32> to vector<8x256xf32>
    %18 = arith.addf %15, %17 : vector<8x256xf32>
    %cst_10 = arith.constant 0.000000e+00 : f32
    %19 = vector.broadcast %cst_10 : f32 to vector<8x256xf32>
    %20 = arith.maximumf %18, %19 : vector<8x256xf32>
    %21 = arith.truncf %20 : vector<8x256xf32> to vector<8x256xbf16>
    %c0_11 = arith.constant 0 : index
    %c0_12 = arith.constant 0 : index
    %22 = vector.load %arg7[%c0_11, %c0_12] : memref<1088x128xbf16, #tpu.memory_space<vmem>>, vector<256x128xbf16>
    %cst_13 = arith.constant dense<0.000000e+00> : vector<8x128xf32>
    %23 = tpu.matmul %21, %22, %cst_13 {dimension_numbers = #tpu.dot_dimension_numbers<[1], [0], [0], [1], [0, 0, 1, 1], [], []>} : vector<8x256xbf16>, vector<256x128xbf16>, vector<8x128xf32> -> vector<8x128xf32>
    %c0_14 = arith.constant 0 : index
    %c768 = arith.constant 768 : index
    %24 = vector.load %arg10[%c0_14, %c768] : memref<1x4736xf32, #tpu.memory_space<vmem>>, vector<1x128xf32>
    %25 = vector.broadcast %24 : vector<1x128xf32> to vector<8x128xf32>
    %26 = arith.addf %23, %25 : vector<8x128xf32>
    %cst_15 = arith.constant 0.000000e+00 : f32
    %27 = vector.broadcast %cst_15 : f32 to vector<8x128xf32>
    %28 = arith.maximumf %26, %27 : vector<8x128xf32>
    %29 = arith.truncf %28 : vector<8x128xf32> to vector<8x128xbf16>
    %c0_16 = arith.constant 0 : index
    %c0_17 = arith.constant 0 : index
    %30 = vector.load %arg8[%c0_16, %c0_17] : memref<384x64xbf16, #tpu.memory_space<vmem>>, vector<128x64xbf16>
    %cst_18 = arith.constant dense<0.000000e+00> : vector<8x64xf32>
    %31 = tpu.matmul %29, %30, %cst_18 {dimension_numbers = #tpu.dot_dimension_numbers<[1], [0], [0], [1], [0, 0, 1, 1], [], []>} : vector<8x128xbf16>, vector<128x64xbf16>, vector<8x64xf32> -> vector<8x64xf32>
    %c0_19 = arith.constant 0 : index
    %c896 = arith.constant 896 : index
    %32 = vector.load %arg10[%c0_19, %c896] : memref<1x4736xf32, #tpu.memory_space<vmem>>, vector<1x64xf32>
    %33 = vector.broadcast %32 : vector<1x64xf32> to vector<8x64xf32>
    %34 = arith.addf %31, %33 : vector<8x64xf32>
    %cst_20 = arith.constant 0.000000e+00 : f32
    %35 = vector.broadcast %cst_20 : f32 to vector<8x64xf32>
    %36 = arith.maximumf %34, %35 : vector<8x64xf32>
    %37 = arith.truncf %36 : vector<8x64xf32> to vector<8x64xbf16>
    %c0_21 = arith.constant 0 : index
    %c0_22 = arith.constant 0 : index
    %38 = vector.load %arg2[%c0_21, %c0_22] : memref<8x128xf32, #tpu.memory_space<vmem>>, vector<8x128xf32>
    %39 = arith.truncf %38 : vector<8x128xf32> to vector<8x128xbf16>
    %c1024 = arith.constant 1024 : index
    %c0_23 = arith.constant 0 : index
    %40 = vector.load %arg6[%c1024, %c0_23] : memref<1664x256xbf16, #tpu.memory_space<vmem>>, vector<128x256xbf16>
    %cst_24 = arith.constant dense<0.000000e+00> : vector<8x256xf32>
    %41 = tpu.matmul %39, %40, %cst_24 {dimension_numbers = #tpu.dot_dimension_numbers<[1], [0], [0], [1], [0, 0, 1, 1], [], []>} : vector<8x128xbf16>, vector<128x256xbf16>, vector<8x256xf32> -> vector<8x256xf32>
    %c0_25 = arith.constant 0 : index
    %c2944 = arith.constant 2944 : index
    %42 = vector.load %arg10[%c0_25, %c2944] : memref<1x4736xf32, #tpu.memory_space<vmem>>, vector<1x256xf32>
    %43 = vector.broadcast %42 : vector<1x256xf32> to vector<8x256xf32>
    %44 = arith.addf %41, %43 : vector<8x256xf32>
    %cst_26 = arith.constant 0.000000e+00 : f32
    %45 = vector.broadcast %cst_26 : f32 to vector<8x256xf32>
    %46 = arith.maximumf %44, %45 : vector<8x256xf32>
    %47 = arith.truncf %46 : vector<8x256xf32> to vector<8x256xbf16>
    %c512_27 = arith.constant 512 : index
    %c0_28 = arith.constant 0 : index
    %48 = vector.load %arg7[%c512_27, %c0_28] : memref<1088x128xbf16, #tpu.memory_space<vmem>>, vector<256x128xbf16>
    %cst_29 = arith.constant dense<0.000000e+00> : vector<8x128xf32>
    %49 = tpu.matmul %47, %48, %cst_29 {dimension_numbers = #tpu.dot_dimension_numbers<[1], [0], [0], [1], [0, 0, 1, 1], [], []>} : vector<8x256xbf16>, vector<256x128xbf16>, vector<8x128xf32> -> vector<8x128xf32>
    %c0_30 = arith.constant 0 : index
    %c3200 = arith.constant 3200 : index
    %50 = vector.load %arg10[%c0_30, %c3200] : memref<1x4736xf32, #tpu.memory_space<vmem>>, vector<1x128xf32>
    %51 = vector.broadcast %50 : vector<1x128xf32> to vector<8x128xf32>
    %52 = arith.addf %49, %51 : vector<8x128xf32>
    %cst_31 = arith.constant 0.000000e+00 : f32
    %53 = vector.broadcast %cst_31 : f32 to vector<8x128xf32>
    %54 = arith.maximumf %52, %53 : vector<8x128xf32>
    %55 = arith.truncf %54 : vector<8x128xf32> to vector<8x128xbf16>
    %c128 = arith.constant 128 : index
    %c0_32 = arith.constant 0 : index
    %56 = vector.load %arg8[%c128, %c0_32] : memref<384x64xbf16, #tpu.memory_space<vmem>>, vector<128x64xbf16>
    %cst_33 = arith.constant dense<0.000000e+00> : vector<8x64xf32>
    %57 = tpu.matmul %55, %56, %cst_33 {dimension_numbers = #tpu.dot_dimension_numbers<[1], [0], [0], [1], [0, 0, 1, 1], [], []>} : vector<8x128xbf16>, vector<128x64xbf16>, vector<8x64xf32> -> vector<8x64xf32>
    %c0_34 = arith.constant 0 : index
    %c3328 = arith.constant 3328 : index
    %58 = vector.load %arg10[%c0_34, %c3328] : memref<1x4736xf32, #tpu.memory_space<vmem>>, vector<1x64xf32>
    %59 = vector.broadcast %58 : vector<1x64xf32> to vector<8x64xf32>
    %60 = arith.addf %57, %59 : vector<8x64xf32>
    %cst_35 = arith.constant 0.000000e+00 : f32
    %61 = vector.broadcast %cst_35 : f32 to vector<8x64xf32>
    %62 = arith.maximumf %60, %61 : vector<8x64xf32>
    %63 = arith.truncf %62 : vector<8x64xf32> to vector<8x64xbf16>
    %c0_36 = arith.constant 0 : index
    %c0_37 = arith.constant 0 : index
    %64 = vector.load %arg9[%c0_36, %c0_37] : memref<64x32xbf16, #tpu.memory_space<vmem>>, vector<64x32xbf16>
    %cst_38 = arith.constant dense<0.000000e+00> : vector<8x32xf32>
    %65 = tpu.matmul %63, %64, %cst_38 {dimension_numbers = #tpu.dot_dimension_numbers<[1], [0], [0], [1], [0, 0, 1, 1], [], []>} : vector<8x64xbf16>, vector<64x32xbf16>, vector<8x32xf32> -> vector<8x32xf32>
    %c0_39 = arith.constant 0 : index
    %c3456 = arith.constant 3456 : index
    %66 = vector.load %arg10[%c0_39, %c3456] : memref<1x4736xf32, #tpu.memory_space<vmem>>, vector<1x32xf32>
    %67 = vector.broadcast %66 : vector<1x32xf32> to vector<8x32xf32>
    %68 = arith.addf %65, %67 : vector<8x32xf32>
    %cst_40 = arith.constant 0.000000e+00 : f32
    %69 = vector.broadcast %cst_40 : f32 to vector<8x32xf32>
    %70 = arith.maximumf %68, %69 : vector<8x32xf32>
    %71 = arith.truncf %70 : vector<8x32xf32> to vector<8x32xbf16>
    %c0_41 = arith.constant 0 : index
    %c0_42 = arith.constant 0 : index
    %72 = vector.load %arg1[%c0_41, %c0_42] : memref<8x2048xf32, #tpu.memory_space<vmem>>, vector<8x2048xf32>
    %73 = arith.truncf %72 : vector<8x2048xf32> to vector<8x2048xbf16>
    %c0_i32_43 = arith.constant 0 : i32
    %74 = tpu.memref_slice %arg14[%c0_i32_43] : memref<2x!tpu.dma_semaphore, #tpu.memory_space<semaphore_mem>> -> memref<1x!tpu.dma_semaphore, #tpu.memory_space<semaphore_mem>>
    %75 = tpu.memref_squeeze %74 : memref<1x!tpu.dma_semaphore, #tpu.memory_space<semaphore_mem>> -> memref<!tpu.dma_semaphore, #tpu.memory_space<semaphore_mem>>
    tpu.wait_dma2 semaphore(%75 : memref<!tpu.dma_semaphore, #tpu.memory_space<semaphore_mem>>) src(%arg3 : memref<2048x1024xbf16, #tpu.memory_space<any>>) dst(%arg12 : memref<2048x1024xbf16, #tpu.memory_space<vmem>>)
    %c0_44 = arith.constant 0 : index
    %c0_45 = arith.constant 0 : index
    %76 = vector.load %arg12[%c0_44, %c0_45] : memref<2048x1024xbf16, #tpu.memory_space<vmem>>, vector<2048x1024xbf16>
    %cst_46 = arith.constant dense<0.000000e+00> : vector<8x1024xf32>
    %77 = tpu.matmul %73, %76, %cst_46 {dimension_numbers = #tpu.dot_dimension_numbers<[1], [0], [0], [1], [0, 0, 1, 1], [], []>} : vector<8x2048xbf16>, vector<2048x1024xbf16>, vector<8x1024xf32> -> vector<8x1024xf32>
    %c0_47 = arith.constant 0 : index
    %c1024_48 = arith.constant 1024 : index
    %78 = vector.load %arg10[%c0_47, %c1024_48] : memref<1x4736xf32, #tpu.memory_space<vmem>>, vector<1x1024xf32>
    %79 = vector.broadcast %78 : vector<1x1024xf32> to vector<8x1024xf32>
    %80 = arith.addf %77, %79 : vector<8x1024xf32>
    %cst_49 = arith.constant 0.000000e+00 : f32
    %81 = vector.broadcast %cst_49 : f32 to vector<8x1024xf32>
    %82 = arith.maximumf %80, %81 : vector<8x1024xf32>
    %83 = arith.truncf %82 : vector<8x1024xf32> to vector<8x1024xbf16>
    %c1_i32_50 = arith.constant 1 : i32
    %84 = tpu.memref_slice %arg14[%c1_i32_50] : memref<2x!tpu.dma_semaphore, #tpu.memory_space<semaphore_mem>> -> memref<1x!tpu.dma_semaphore, #tpu.memory_space<semaphore_mem>>
    %85 = tpu.memref_squeeze %84 : memref<1x!tpu.dma_semaphore, #tpu.memory_space<semaphore_mem>> -> memref<!tpu.dma_semaphore, #tpu.memory_space<semaphore_mem>>
    tpu.wait_dma2 semaphore(%85 : memref<!tpu.dma_semaphore, #tpu.memory_space<semaphore_mem>>) src(%arg4 : memref<1024x512xbf16, #tpu.memory_space<any>>) dst(%arg13 : memref<1024x512xbf16, #tpu.memory_space<vmem>>)
    %c0_51 = arith.constant 0 : index
    %c0_52 = arith.constant 0 : index
    %86 = vector.load %arg13[%c0_51, %c0_52] : memref<1024x512xbf16, #tpu.memory_space<vmem>>, vector<1024x512xbf16>
    %cst_53 = arith.constant dense<0.000000e+00> : vector<8x512xf32>
    %87 = tpu.matmul %83, %86, %cst_53 {dimension_numbers = #tpu.dot_dimension_numbers<[1], [0], [0], [1], [0, 0, 1, 1], [], []>} : vector<8x1024xbf16>, vector<1024x512xbf16>, vector<8x512xf32> -> vector<8x512xf32>
    %c0_54 = arith.constant 0 : index
    %c2048 = arith.constant 2048 : index
    %88 = vector.load %arg10[%c0_54, %c2048] : memref<1x4736xf32, #tpu.memory_space<vmem>>, vector<1x512xf32>
    %89 = vector.broadcast %88 : vector<1x512xf32> to vector<8x512xf32>
    %90 = arith.addf %87, %89 : vector<8x512xf32>
    %cst_55 = arith.constant 0.000000e+00 : f32
    %91 = vector.broadcast %cst_55 : f32 to vector<8x512xf32>
    %92 = arith.maximumf %90, %91 : vector<8x512xf32>
    %93 = arith.truncf %92 : vector<8x512xf32> to vector<8x512xbf16>
    %c512_56 = arith.constant 512 : index
    %c0_57 = arith.constant 0 : index
    %94 = vector.load %arg6[%c512_56, %c0_57] : memref<1664x256xbf16, #tpu.memory_space<vmem>>, vector<512x256xbf16>
    %cst_58 = arith.constant dense<0.000000e+00> : vector<8x256xf32>
    %95 = tpu.matmul %93, %94, %cst_58 {dimension_numbers = #tpu.dot_dimension_numbers<[1], [0], [0], [1], [0, 0, 1, 1], [], []>} : vector<8x512xbf16>, vector<512x256xbf16>, vector<8x256xf32> -> vector<8x256xf32>
    %c0_59 = arith.constant 0 : index
    %c2560 = arith.constant 2560 : index
    %96 = vector.load %arg10[%c0_59, %c2560] : memref<1x4736xf32, #tpu.memory_space<vmem>>, vector<1x256xf32>
    %97 = vector.broadcast %96 : vector<1x256xf32> to vector<8x256xf32>
    %98 = arith.addf %95, %97 : vector<8x256xf32>
    %cst_60 = arith.constant 0.000000e+00 : f32
    %99 = vector.broadcast %cst_60 : f32 to vector<8x256xf32>
    %100 = arith.maximumf %98, %99 : vector<8x256xf32>
    %101 = arith.truncf %100 : vector<8x256xf32> to vector<8x256xbf16>
    %c256 = arith.constant 256 : index
    %c0_61 = arith.constant 0 : index
    %102 = vector.load %arg7[%c256, %c0_61] : memref<1088x128xbf16, #tpu.memory_space<vmem>>, vector<256x128xbf16>
    %cst_62 = arith.constant dense<0.000000e+00> : vector<8x128xf32>
    %103 = tpu.matmul %101, %102, %cst_62 {dimension_numbers = #tpu.dot_dimension_numbers<[1], [0], [0], [1], [0, 0, 1, 1], [], []>} : vector<8x256xbf16>, vector<256x128xbf16>, vector<8x128xf32> -> vector<8x128xf32>
    %c0_63 = arith.constant 0 : index
    %c2816 = arith.constant 2816 : index
    %104 = vector.load %arg10[%c0_63, %c2816] : memref<1x4736xf32, #tpu.memory_space<vmem>>, vector<1x128xf32>
    %105 = vector.broadcast %104 : vector<1x128xf32> to vector<8x128xf32>
    %106 = arith.addf %103, %105 : vector<8x128xf32>
    %cst_64 = arith.constant 0.000000e+00 : f32
    %107 = vector.broadcast %cst_64 : f32 to vector<8x128xf32>
    %108 = arith.maximumf %106, %107 : vector<8x128xf32>
    %109 = arith.truncf %108 : vector<8x128xf32> to vector<8x128xbf16>
    %c768_65 = arith.constant 768 : index
    %c0_66 = arith.constant 0 : index
    %110 = vector.load %arg5[%c768_65, %c0_66] : memref<992x512xbf16, #tpu.memory_space<vmem>>, vector<64x512xbf16>
    %cst_67 = arith.constant dense<0.000000e+00> : vector<8x512xf32>
    %111 = tpu.matmul %37, %110, %cst_67 {dimension_numbers = #tpu.dot_dimension_numbers<[1], [0], [0], [1], [0, 0, 1, 1], [], []>} : vector<8x64xbf16>, vector<64x512xbf16>, vector<8x512xf32> -> vector<8x512xf32>
    %c832 = arith.constant 832 : index
    %c0_68 = arith.constant 0 : index
    %112 = vector.load %arg5[%c832, %c0_68] : memref<992x512xbf16, #tpu.memory_space<vmem>>, vector<128x512xbf16>
    %cst_69 = arith.constant dense<0.000000e+00> : vector<8x512xf32>
    %113 = tpu.matmul %109, %112, %cst_69 {dimension_numbers = #tpu.dot_dimension_numbers<[1], [0], [0], [1], [0, 0, 1, 1], [], []>} : vector<8x128xbf16>, vector<128x512xbf16>, vector<8x512xf32> -> vector<8x512xf32>
    %114 = arith.addf %111, %113 : vector<8x512xf32>
    %c960 = arith.constant 960 : index
    %c0_70 = arith.constant 0 : index
    %115 = vector.load %arg5[%c960, %c0_70] : memref<992x512xbf16, #tpu.memory_space<vmem>>, vector<32x512xbf16>
    %cst_71 = arith.constant dense<0.000000e+00> : vector<8x512xf32>
    %116 = tpu.matmul %71, %115, %cst_71 {dimension_numbers = #tpu.dot_dimension_numbers<[1], [0], [0], [1], [0, 0, 1, 1], [], []>} : vector<8x32xbf16>, vector<32x512xbf16>, vector<8x512xf32> -> vector<8x512xf32>
    %117 = arith.addf %114, %116 : vector<8x512xf32>
    %c0_72 = arith.constant 0 : index
    %c3584 = arith.constant 3584 : index
    %118 = vector.load %arg10[%c0_72, %c3584] : memref<1x4736xf32, #tpu.memory_space<vmem>>, vector<1x512xf32>
    %119 = vector.broadcast %118 : vector<1x512xf32> to vector<8x512xf32>
    %120 = arith.addf %117, %119 : vector<8x512xf32>
    %cst_73 = arith.constant 0.000000e+00 : f32
    %121 = vector.broadcast %cst_73 : f32 to vector<8x512xf32>
    %122 = arith.maximumf %120, %121 : vector<8x512xf32>
    %123 = arith.truncf %122 : vector<8x512xf32> to vector<8x512xbf16>
    %c1152 = arith.constant 1152 : index
    %c0_74 = arith.constant 0 : index
    %124 = vector.load %arg6[%c1152, %c0_74] : memref<1664x256xbf16, #tpu.memory_space<vmem>>, vector<512x256xbf16>
    %cst_75 = arith.constant dense<0.000000e+00> : vector<8x256xf32>
    %125 = tpu.matmul %123, %124, %cst_75 {dimension_numbers = #tpu.dot_dimension_numbers<[1], [0], [0], [1], [0, 0, 1, 1], [], []>} : vector<8x512xbf16>, vector<512x256xbf16>, vector<8x256xf32> -> vector<8x256xf32>
    %c0_76 = arith.constant 0 : index
    %c4096 = arith.constant 4096 : index
    %126 = vector.load %arg10[%c0_76, %c4096] : memref<1x4736xf32, #tpu.memory_space<vmem>>, vector<1x256xf32>
    %127 = vector.broadcast %126 : vector<1x256xf32> to vector<8x256xf32>
    %128 = arith.addf %125, %127 : vector<8x256xf32>
    %cst_77 = arith.constant 0.000000e+00 : f32
    %129 = vector.broadcast %cst_77 : f32 to vector<8x256xf32>
    %130 = arith.maximumf %128, %129 : vector<8x256xf32>
    %131 = arith.truncf %130 : vector<8x256xf32> to vector<8x256xbf16>
    %c768_78 = arith.constant 768 : index
    %c0_79 = arith.constant 0 : index
    %132 = vector.load %arg7[%c768_78, %c0_79] : memref<1088x128xbf16, #tpu.memory_space<vmem>>, vector<256x128xbf16>
    %cst_80 = arith.constant dense<0.000000e+00> : vector<8x128xf32>
    %133 = tpu.matmul %131, %132, %cst_80 {dimension_numbers = #tpu.dot_dimension_numbers<[1], [0], [0], [1], [0, 0, 1, 1], [], []>} : vector<8x256xbf16>, vector<256x128xbf16>, vector<8x128xf32> -> vector<8x128xf32>
    %c0_81 = arith.constant 0 : index
    %c4352 = arith.constant 4352 : index
    %134 = vector.load %arg10[%c0_81, %c4352] : memref<1x4736xf32, #tpu.memory_space<vmem>>, vector<1x128xf32>
    %135 = vector.broadcast %134 : vector<1x128xf32> to vector<8x128xf32>
    %136 = arith.addf %133, %135 : vector<8x128xf32>
    %cst_82 = arith.constant 0.000000e+00 : f32
    %137 = vector.broadcast %cst_82 : f32 to vector<8x128xf32>
    %138 = arith.maximumf %136, %137 : vector<8x128xf32>
    %139 = arith.truncf %138 : vector<8x128xf32> to vector<8x128xbf16>
    %c256_83 = arith.constant 256 : index
    %c0_84 = arith.constant 0 : index
    %140 = vector.load %arg8[%c256_83, %c0_84] : memref<384x64xbf16, #tpu.memory_space<vmem>>, vector<128x64xbf16>
    %cst_85 = arith.constant dense<0.000000e+00> : vector<8x64xf32>
    %141 = tpu.matmul %139, %140, %cst_85 {dimension_numbers = #tpu.dot_dimension_numbers<[1], [0], [0], [1], [0, 0, 1, 1], [], []>} : vector<8x128xbf16>, vector<128x64xbf16>, vector<8x64xf32> -> vector<8x64xf32>
    %c0_86 = arith.constant 0 : index
    %c4480 = arith.constant 4480 : index
    %142 = vector.load %arg10[%c0_86, %c4480] : memref<1x4736xf32, #tpu.memory_space<vmem>>, vector<1x64xf32>
    %143 = vector.broadcast %142 : vector<1x64xf32> to vector<8x64xf32>
    %144 = arith.addf %141, %143 : vector<8x64xf32>
    %cst_87 = arith.constant 0.000000e+00 : f32
    %145 = vector.broadcast %cst_87 : f32 to vector<8x64xf32>
    %146 = arith.maximumf %144, %145 : vector<8x64xf32>
    %147 = arith.truncf %146 : vector<8x64xf32> to vector<8x64xbf16>
    %c1024_88 = arith.constant 1024 : index
    %c0_89 = arith.constant 0 : index
    %148 = vector.load %arg7[%c1024_88, %c0_89] : memref<1088x128xbf16, #tpu.memory_space<vmem>>, vector<64x128xbf16>
    %cst_90 = arith.constant dense<0.000000e+00> : vector<8x128xf32>
    %149 = tpu.matmul %147, %148, %cst_90 {dimension_numbers = #tpu.dot_dimension_numbers<[1], [0], [0], [1], [0, 0, 1, 1], [], []>} : vector<8x64xbf16>, vector<64x128xbf16>, vector<8x128xf32> -> vector<8x128xf32>
    %c0_91 = arith.constant 0 : index
    %c4608 = arith.constant 4608 : index
    %150 = vector.load %arg10[%c0_91, %c4608] : memref<1x4736xf32, #tpu.memory_space<vmem>>, vector<1x128xf32>
    %151 = vector.broadcast %150 : vector<1x128xf32> to vector<8x128xf32>
    %152 = arith.addf %149, %151 : vector<8x128xf32>
    %c0_92 = arith.constant 0 : index
    %c0_93 = arith.constant 0 : index
    %153 = vector.load %arg11[%c0_92, %c0_93] : memref<8x128xf32, #tpu.memory_space<vmem>>, vector<8x128xf32>
    tpu.vector_store %arg11[%c0_92, %c0_93], %152 {strides = array<i32>} : memref<8x128xf32, #tpu.memory_space<vmem>>, vector<8x128xf32>,
    return
  }
}

</mosaic_0001>

<bundles_post_ra>
// kernel: tpu_custom_call.1
= control target key start
LH: loop header
LB: loop body
LE: loop exit
PB: predicated region body
PF: predicated region fallthrough
CT: control target
= control target key end

     0   :  { %16 = vsyncpa [#allocation6], 0  ;;  %s18488_s0 = inlined_call_operand.hbm [shape: f32[8,768], index: 0, kind: input, shape index: {}]   ;;  %s18489_s1 = inlined_call_operand.hbm [shape: f32[8,2048], index: 1, kind: input, shape index: {}]   ;;  %s18490_s2 = inlined_call_operand.hbm [shape: f32[8,128], index: 2, kind: input, shape index: {}]   ;;  %s18491_s3 = inlined_call_operand.hbm [shape: bf16[2048,1024], index: 3, kind: input, shape index: {}]   ;;  %s18492_s4 = inlined_call_operand.hbm [shape: bf16[1024,512], index: 4, kind: input, shape index: {}]   ;;  %s18493_s5 = inlined_call_operand.hbm [shape: bf16[992,512], index: 5, kind: input, shape index: {}]   ;;  %s18494_s6 = inlined_call_operand.hbm [shape: bf16[1664,256], index: 6, kind: input, shape index: {}]   ;;  %s18495_s7 = inlined_call_operand.hbm [shape: bf16[1088,128], index: 7, kind: input, shape index: {}]   ;;  %s18496_s8 = inlined_call_operand.vmem [shape: bf16[384,64], index: 8, kind: input, shape index: {}]   ;;  %s18497_s9 = inlined_call_operand.vmem [shape: bf16[64,32], index: 9, kind: input, shape index: {}]   ;;  %s18498_s10 = inlined_call_operand.hbm [shape: f32[1,4736], index: 10, kind: input, shape index: {}]   ;;  %s18499_s11 = inlined_call_operand.hbm [shape: f32[8,128], index: 11, kind: output, shape index: {}]  }
   0x1   :  { %17 = vsyncpa [#allocation9], 0 }
   0x2   :  { %18 = vsyncpa [#allocation12], 0 }
   0x3   :  { %19 = vsyncpa [#allocation15], 0 }
   0x4   :  { %20 = vsyncpa [#allocation7], 0  ;;  %s17966_s17 = smov [#allocation8]   ;;  %s17967_s19 = smov [#allocation11]  }
   0x5   :  { %s37_s18 = sshll.u32 %s17966_s17, 4  ;;  %s56_s20 = sshll.u32 %s17967_s19, 4  ;;  %s38_s18 = int_to_ptr.vmem [resolvable:$true] %s37_s18  ;;  %s57_s20 = int_to_ptr.vmem [resolvable:$true] %s56_s20 }
   0x6   :  { %s17760_s21 = scalar_lea.vmem %s38_s18, 2048  ;;  %p17765_p1 = scmp.lt.s32.totalorder %s38_s18, %s38_s18 }
   0x7   :  { %p17761_p0 = scmp.ne.s32.totalorder %s38_s18, %s17760_s21  ;;  %p17766_p2 = scmp.lt.s32.totalorder %s17760_s21, %s17760_s21 }
   0x9   :  { %p17767_p3 = por %p17766_p2, %p17765_p1 }
   0xb   :  { %p17768_p4 = pnand %p17767_p3, %p17761_p0 }
   0xd   :  { %17771 = shalt.err (!%p17768_p4)
}
   0xe   :  { %40 = dma.hbm_to_vmem [thread:$0]  %s18489_s1, 2048, %s38_s18, [#allocation9]  }
   0xf   :  { %s17780_s24 = scalar_lea.vmem %s57_s20, 31744  ;;  %p17785_p6 = scmp.lt.s32.totalorder %s57_s20, %s57_s20 }
  0x10   :  { %p17781_p5 = scmp.ne.s32.totalorder %s57_s20, %s17780_s24  ;;  %p17786_p7 = scmp.lt.s32.totalorder %s17780_s24, %s17780_s24 }
  0x12   :  { %p17787_p8 = por %p17786_p7, %p17785_p6 }
  0x14   :  { %p17788_p9 = pnand %p17787_p8, %p17781_p5 }
  0x16   :  { %17791 = shalt.err (!%p17788_p9)
}
  0x17   :  { %s17968_s25 = smov 256   ;;  %s17969_s26 = smov 16  }
  0x18   :  { %62 = dma.hbm_to_vmem [thread:$0]  %s18493_s5, 31744, %s57_s20, [#allocation12], %s17968_s25, %s17968_s25, %s17969_s26  }
  0x19   :  { %s17970_s29 = smov [#allocation14]  }
  0x1a   :  { %s80_s30 = sshll.u32 %s17970_s29, 4  ;;  %s81_s30 = int_to_ptr.vmem [resolvable:$true] %s80_s30 }
  0x1b   :  { %s17800_s12 = scalar_lea.vmem %s81_s30, 8704  ;;  %p17805_p11 = scmp.lt.s32.totalorder %s81_s30, %s81_s30 }
  0x1c   :  { %p17801_p10 = scmp.ne.s32.totalorder %s81_s30, %s17800_s12  ;;  %p17806_p12 = scmp.lt.s32.totalorder %s17800_s12, %s17800_s12 }
  0x1e   :  { %p17807_p13 = por %p17806_p12, %p17805_p11 }
  0x20   :  { %p17808_p0 = pnand %p17807_p13, %p17801_p10 }
  0x22   :  { %17811 = shalt.err (!%p17808_p0)
}
  0x23   :  { %s17971_s1 = smov 64   ;;  %s17972_s13 = smov 4  }
  0x24   :  { %86 = dma.hbm_to_vmem [thread:$0]  %s18495_s7, 8704, %s81_s30, [#allocation15], %s17971_s1, %s17971_s1, %s17972_s13  }
  0x25   :  { %s17973_s16 = smov [#allocation5]   ;;  %s17974_s5 = smov [#allocation10]  }
  0x26   :  { %s27_s17 = sshll.u32 %s17973_s16, 4  ;;  %s47_s18 = sshll.u32 %s17974_s5, 4  ;;  %s28_s17 = int_to_ptr.vmem [resolvable:$true] %s27_s17  ;;  %s48_s18 = int_to_ptr.vmem [resolvable:$true] %s47_s18 }
  0x27   :  { %s17820_s19 = scalar_lea.vmem %s28_s17, 768  ;;  %p17825_p2 = scmp.lt.s32.totalorder %s28_s17, %s28_s17 }
  0x28   :  { %p17821_p1 = scmp.ne.s32.totalorder %s28_s17, %s17820_s19  ;;  %p17826_p3 = scmp.lt.s32.totalorder %s17820_s19, %s17820_s19 }
  0x2a   :  { %p17827_p4 = por %p17826_p3, %p17825_p2 }
  0x2c   :  { %p17828_p5 = pnand %p17827_p4, %p17821_p1 }
  0x2e   :  { %17831 = shalt.err (!%p17828_p5)
}
  0x2f   :  { %30 = dma.hbm_to_vmem [thread:$0]  %s18488_s0, 768, %s28_s17, [#allocation6]  }
  0x30   :  { %s17840_s22 = scalar_lea.vmem %s48_s18, 128  ;;  %p17845_p7 = scmp.lt.s32.totalorder %s48_s18, %s48_s18 }
  0x31   :  { %p17841_p6 = scmp.ne.s32.totalorder %s48_s18, %s17840_s22  ;;  %p17846_p8 = scmp.lt.s32.totalorder %s17840_s22, %s17840_s22 }
  0x33   :  { %p17847_p9 = por %p17846_p8, %p17845_p7 }
  0x35   :  { %p17848_p10 = pnand %p17847_p9, %p17841_p6 }
  0x37   :  { %17851 = shalt.err (!%p17848_p10)
}
  0x38   :  { %50 = dma.hbm_to_vmem [thread:$0]  %s18490_s2, 128, %s48_s18, [#allocation9]  }
  0x39   :  { %s17975_s24 = smov [#allocation13]  }
  0x3a   :  { %s68_s25 = sshll.u32 %s17975_s24, 4  ;;  %s69_s25 = int_to_ptr.vmem [resolvable:$true] %s68_s25 }
  0x3b   :  { %s17860_s26 = scalar_lea.vmem %s69_s25, 26624  ;;  %p17865_p12 = scmp.lt.s32.totalorder %s69_s25, %s69_s25 }
  0x3c   :  { %p17861_p11 = scmp.ne.s32.totalorder %s69_s25, %s17860_s26  ;;  %p17866_p13 = scmp.lt.s32.totalorder %s17860_s26, %s17860_s26 }
  0x3e   :  { %p17867_p0 = por %p17866_p13, %p17865_p12 }
  0x40   :  { %p17868_p1 = pnand %p17867_p0, %p17861_p11 }
  0x42   :  { %17871 = shalt.err (!%p17868_p1)
}
  0x43   :  { %s17976_s0 = smov 128   ;;  %s17977_s27 = smov 8  }
  0x44   :  { %74 = dma.hbm_to_vmem [thread:$0]  %s18494_s6, 26624, %s69_s25, [#allocation12], %s17976_s0, %s17976_s0, %s17977_s27  }
  0x45   :  { %s17978_s30 = smov [#allocation16]  }
  0x46   :  { %s97_s12 = sshll.u32 %s17978_s30, 4  ;;  %s98_s12 = int_to_ptr.vmem [resolvable:$true] %s97_s12 }
  0x47   :  { %s17880_s2 = scalar_lea.vmem %s98_s12, 592  ;;  %s17884_s1 = scalar_lea.vmem %s98_s12, 608 }
  0x48   :  { %p17881_p2 = scmp.ne.s32.totalorder %s98_s12, %s17880_s2  ;;  %p17885_p3 = scmp.lt.s32.totalorder %s98_s12, %s98_s12 }
  0x49   :  { %p17886_p4 = scmp.lt.s32.totalorder %s17884_s1, %s17880_s2 }
  0x4b   :  { %p17887_p5 = por %p17886_p4, %p17885_p3 }
  0x4d   :  { %p17888_p6 = pnand %p17887_p5, %p17881_p2 }
  0x4f   :  { %17891 = shalt.err (!%p17888_p6)
}
  0x50   :  { %100 = dma.hbm_to_vmem [thread:$0]  %s18498_s10, 592, %s98_s12, [#allocation15]  }
  0x51   :  { %17952 = dma.done.wait [#allocation6], 768  }
  0x52   :  { %17953 = vsyncadd [#allocation6], 4294966528 }
  0x53   :  { %17954 = dma.done.wait [#allocation9], 2176  }
  0x54   :  { %17955 = vsyncadd [#allocation9], 4294965120 }
  0x55   :  { %17956 = dma.done.wait [#allocation12], 58368  }
  0x56   :  { %17957 = vsyncadd [#allocation12], 4294908928 }
  0x57   :  { %17958 = dma.done.wait [#allocation15], 9296  }
  0x58   :  { %17959 = vsyncadd [#allocation15], 4294958000  ;;  %v2888_v0 = vld [vmem:[#allocation8] sm:$0xff]  ;;  %v2889_v1 = vld [vmem:[#allocation8 + $0x8] sm:$0xff]  ;;  %vm17981_vm0 = vmmov 0   ;;  %vm2842_vm1 = vcmask 523264  }
  0x59   :  { %v2890_v2 = vld [vmem:[#allocation8 + $0x10] sm:$0xff]  ;;  %v2891_v3 = vld [vmem:[#allocation8 + $0x18] sm:$0xff]  ;;  %v2892_v4 = vld [vmem:[#allocation8 + $0x20] sm:$0xff]  ;;  %v18066_v6 = vpack.c.bf16 %v2888_v0, %v2888_v0  ;;  %v18068_v7 = vpack.c.bf16 %v2889_v1, %v2889_v1  ;;  %s17982_s25 = smov [#allocation2]   ;;  %s17983_s0 = smov [#allocation3]  }
  0x5a   :  { %v2893_v5 = vld [vmem:[#allocation8 + $0x28] sm:$0xff]  ;;  %v18070_v8 = vpack.c.bf16 %v2890_v2, %v2890_v2  ;;  %v2894_v9 = vld [vmem:[#allocation8 + $0x30] sm:$0xff]  ;;  %v2895_v10 = vld [vmem:[#allocation8 + $0x38] sm:$0xff]  ;;  %v18072_v12 = vpack.c.bf16 %v2891_v3, %v2891_v3  ;;  %v18074_v13 = vpack.c.bf16 %v2892_v4, %v2892_v4  ;;  %s130_s26 = sshll.u32 %s17982_s25, 4  ;;  %s142_s27 = sshll.u32 %s17983_s0, 4  ;;  %s131_s26 = int_to_ptr.vmem [resolvable:$true] %s130_s26  ;;  %s143_s27 = int_to_ptr.vmem [resolvable:$true] %s142_s27 }
  0x5b   :  { %v2896_v11 = vld [vmem:[#allocation8 + $0x40] sm:$0xff]  ;;  %v18076_v14 = vpack.c.bf16 %v2893_v5, %v2893_v5  ;;  %v2897_v15 = vld [vmem:[#allocation8 + $0x48] sm:$0xff]  ;;  %v2898_v16 = vld [vmem:[#allocation8 + $0x50] sm:$0xff]  ;;  %v18078_v18 = vpack.c.bf16 %v2894_v9, %v2894_v9  ;;  %v18080_v19 = vpack.c.bf16 %v2895_v10, %v2895_v10  ;;  %s17900_s28 = scalar_lea.vmem %s131_s26, 131072  ;;  %p17905_p8 = scmp.lt.s32.totalorder %s131_s26, %s131_s26 }
  0x5c   :  { %v2899_v17 = vld [vmem:[#allocation8 + $0x58] sm:$0xff]  ;;  %v18082_v20 = vpack.c.bf16 %v2896_v11, %v2896_v11  ;;  %v2900_v21 = vld [vmem:[#allocation8 + $0x60] sm:$0xff]  ;;  %v2901_v22 = vld [vmem:[#allocation8 + $0x68] sm:$0xff]  ;;  %v18084_v24 = vpack.c.bf16 %v2897_v15, %v2897_v15  ;;  %v18086_v25 = vpack.c.bf16 %v2898_v16, %v2898_v16  ;;  %p17901_p7 = scmp.ne.s32.totalorder %s131_s26, %s17900_s28  ;;  %p17906_p9 = scmp.lt.s32.totalorder %s17900_s28, %s17900_s28 }
  0x5d   :  { %v2902_v23 = vld [vmem:[#allocation8 + $0x70] sm:$0xff]  ;;  %v18088_v26 = vpack.c.bf16 %v2899_v17, %v2899_v17  ;;  %v2903_v27 = vld [vmem:[#allocation8 + $0x78] sm:$0xff]  ;;  %v18090_v28 = vpack.c.bf16 %v2900_v21, %v2900_v21  ;;  %v18092_v29 = vpack.c.bf16 %v2901_v22, %v2901_v22 }
  0x5e   :  { %v18094_v30 = vpack.c.bf16 %v2902_v23, %v2902_v23  ;;  %v18096_v31 = vpack.c.bf16 %v2903_v27, %v2903_v27  ;;  %v16585_v32 = vld [vmem:[#allocation11 + $0xe4] ss:$16 sps:$4 sm:$0xff]   ;;  %v16589_v34 = vld [vmem:[#allocation11 + $0xe0] ss:$16 sps:$4 sm:$0xff]   ;;  %p17907_p10 = por %p17906_p9, %p17905_p8 }
  0x5f   :  { %v16587_v33 = vld [vmem:[#allocation11 + $0x2e4] ss:$16 sps:$4 sm:$0xff]   ;;  %v16590_v35 = vld [vmem:[#allocation11 + $0x2e0] ss:$16 sps:$4 sm:$0xff]   ;;  %1332 = vmatprep.subr.bf16.mxu0 %v16585_v32 }
  0x60   :  { %v16591_v36 = vld [vmem:[#allocation11 + $0xc4] ss:$16 sps:$4 sm:$0xff]   ;;  %1373 = vmatprep.subr.bf16.mxu1 %v16587_v33  ;;  %1333 = vmatpush1.bf16.msra.mxu0 %v16589_v34  ;;  %v16595_v38 = vld [vmem:[#allocation11 + $0xc0] ss:$16 sps:$4 sm:$0xff]   ;;  %p17908_p11 = pnand %p17907_p10, %p17901_p7 }
  0x61   :  { %v16593_v37 = vld [vmem:[#allocation11 + $0x2c4] ss:$16 sps:$4 sm:$0xff]   ;;  %1374 = vmatpush1.bf16.msra.mxu1 %v16590_v35  ;;  %1334 = vmatprep.subr.bf16.mxu0 %v16591_v36  ;;  %v16596_v39 = vld [vmem:[#allocation11 + $0x2c0] ss:$16 sps:$4 sm:$0xff]  }
  0x62   :  { %1375 = vmatprep.subr.bf16.mxu1 %v16593_v37  ;;  %v16597_v40 = vld [vmem:[#allocation11 + $0xa4] ss:$16 sps:$4 sm:$0xff]   ;;  %v16601_v42 = vld [vmem:[#allocation11 + $0xa0] ss:$16 sps:$4 sm:$0xff]  }
  0x63   :  { %v16599_v41 = vld [vmem:[#allocation11 + $0x2a4] ss:$16 sps:$4 sm:$0xff]   ;;  %v16602_v43 = vld [vmem:[#allocation11 + $0x2a0] ss:$16 sps:$4 sm:$0xff]  }
  0x64   :  { %1335 = vmatpush1.bf16.msra.mxu0 %v16595_v38  ;;  %v16603_v44 = vld [vmem:[#allocation11 + $0x84] ss:$16 sps:$4 sm:$0xff]   ;;  %v16607_v46 = vld [vmem:[#allocation11 + $0x80] ss:$16 sps:$4 sm:$0xff]  }
  0x65   :  { %1376 = vmatpush1.bf16.msra.mxu1 %v16596_v39  ;;  %1336 = vmatprep.subr.bf16.mxu0 %v16597_v40  ;;  %v16605_v45 = vld [vmem:[#allocation11 + $0x284] ss:$16 sps:$4 sm:$0xff]   ;;  %v16608_v47 = vld [vmem:[#allocation11 + $0x280] ss:$16 sps:$4 sm:$0xff]  }
  0x66   :  { %1377 = vmatprep.subr.bf16.mxu1 %v16599_v41  ;;  %v16609_v48 = vld [vmem:[#allocation11 + $0x64] ss:$16 sps:$4 sm:$0xff]   ;;  %v16613_v50 = vld [vmem:[#allocation11 + $0x60] ss:$16 sps:$4 sm:$0xff]  }
  0x67   :  { %v16611_v49 = vld [vmem:[#allocation11 + $0x264] ss:$16 sps:$4 sm:$0xff]   ;;  %v16614_v51 = vld [vmem:[#allocation11 + $0x260] ss:$16 sps:$4 sm:$0xff]  }
  0x68   :  { %1337 = vmatpush1.bf16.msra.mxu0 %v16601_v42  ;;  %v16615_v52 = vld [vmem:[#allocation11 + $0x44] ss:$16 sps:$4 sm:$0xff]   ;;  %v16619_v54 = vld [vmem:[#allocation11 + $0x40] ss:$16 sps:$4 sm:$0xff]  }
  0x69   :  { %1378 = vmatpush1.bf16.msra.mxu1 %v16602_v43  ;;  %1338 = vmatprep.subr.bf16.mxu0 %v16603_v44  ;;  %v16617_v53 = vld [vmem:[#allocation11 + $0x244] ss:$16 sps:$4 sm:$0xff]   ;;  %v16620_v55 = vld [vmem:[#allocation11 + $0x240] ss:$16 sps:$4 sm:$0xff]  }
  0x6a   :  { %1379 = vmatprep.subr.bf16.mxu1 %v16605_v45  ;;  %v16621_v56 = vld [vmem:[#allocation11 + $0x24] ss:$16 sps:$4 sm:$0xff]   ;;  %v16625_v58 = vld [vmem:[#allocation11 + $0x20] ss:$16 sps:$4 sm:$0xff]  }
  0x6b   :  { %v16623_v57 = vld [vmem:[#allocation11 + $0x224] ss:$16 sps:$4 sm:$0xff]   ;;  %v16626_v59 = vld [vmem:[#allocation11 + $0x220] ss:$16 sps:$4 sm:$0xff]  }
  0x6c   :  { %1339 = vmatpush1.bf16.msra.mxu0 %v16607_v46  ;;  %v16627_v60 = vld [vmem:[#allocation11 + $0x4] ss:$16 sps:$4 sm:$0xff]   ;;  %v16631_v62 = vld [vmem:[#allocation11] ss:$16 sps:$4 sm:$0xff]  }
  0x6d   :  { %1380 = vmatpush1.bf16.msra.mxu1 %v16608_v47  ;;  %1340 = vmatprep.subr.bf16.mxu0 %v16609_v48  ;;  %v16629_v61 = vld [vmem:[#allocation11 + $0x204] ss:$16 sps:$4 sm:$0xff]   ;;  %v16632_v63 = vld [vmem:[#allocation11 + $0x200] ss:$16 sps:$4 sm:$0xff]  }
  0x6e   :  { %1381 = vmatprep.subr.bf16.mxu1 %v16611_v49  ;;  %v16633_v0 = vld [vmem:[#allocation11 + $0x1e4] ss:$16 sps:$4 sm:$0xff]   ;;  %v16637_v2 = vld [vmem:[#allocation11 + $0x1e0] ss:$16 sps:$4 sm:$0xff]  }
  0x6f   :  { %v16635_v1 = vld [vmem:[#allocation11 + $0x3e4] ss:$16 sps:$4 sm:$0xff]   ;;  %v16638_v3 = vld [vmem:[#allocation11 + $0x3e0] ss:$16 sps:$4 sm:$0xff]  }
  0x70   :  { %1341 = vmatpush1.bf16.msra.mxu0 %v16613_v50  ;;  %v16639_v4 = vld [vmem:[#allocation11 + $0x1c4] ss:$16 sps:$4 sm:$0xff]   ;;  %v16643_v9 = vld [vmem:[#allocation11 + $0x1c0] ss:$16 sps:$4 sm:$0xff]  }
  0x71   :  { %1382 = vmatpush1.bf16.msra.mxu1 %v16614_v51  ;;  %1342 = vmatprep.subr.bf16.mxu0 %v16615_v52  ;;  %v16641_v5 = vld [vmem:[#allocation11 + $0x3c4] ss:$16 sps:$4 sm:$0xff]   ;;  %v16644_v10 = vld [vmem:[#allocation11 + $0x3c0] ss:$16 sps:$4 sm:$0xff]   ;;  %v146_v52 = vld [vmem:[#allocation5] sm:$0xff] }
  0x72   :  { %1383 = vmatprep.subr.bf16.mxu1 %v16617_v53  ;;  %v16645_v11 = vld [vmem:[#allocation11 + $0x1a4] ss:$16 sps:$4 sm:$0xff]   ;;  %v16649_v16 = vld [vmem:[#allocation11 + $0x1a0] ss:$16 sps:$4 sm:$0xff]   ;;  %v148_v53 = vld [vmem:[#allocation5 + $0x10] sm:$0xff] }
  0x73   :  { %v16647_v15 = vld [vmem:[#allocation11 + $0x3a4] ss:$16 sps:$4 sm:$0xff]   ;;  %v16650_v17 = vld [vmem:[#allocation11 + $0x3a0] ss:$16 sps:$4 sm:$0xff]  }
  0x74   :  { %1343 = vmatpush1.bf16.msra.mxu0 %v16619_v54  ;;  %v16651_v21 = vld [vmem:[#allocation11 + $0x184] ss:$16 sps:$4 sm:$0xff]   ;;  %v16655_v32 = vld [vmem:[#allocation11 + $0x180] ss:$16 sps:$4 sm:$0xff]  }
  0x75   :  { %1384 = vmatpush1.bf16.msra.mxu1 %v16620_v55  ;;  %1344 = vmatprep.subr.bf16.mxu0 %v16621_v56  ;;  %v16653_v22 = vld [vmem:[#allocation11 + $0x384] ss:$16 sps:$4 sm:$0xff]   ;;  %v16656_v35 = vld [vmem:[#allocation11 + $0x380] ss:$16 sps:$4 sm:$0xff]   ;;  %v16686_v55 = vld [vmem:[#allocation11 + $0xec] ss:$16 sps:$4 sm:$0xff]   ;;  %v18104_v56 = vpack.c.bf16 %v146_v52, %v146_v52 }
  0x76   :  { %1385 = vmatprep.subr.bf16.mxu1 %v16623_v57  ;;  %v147_v23 = vld [vmem:[#allocation5 + $0x8] sm:$0xff]  ;;  %v149_v27 = vld [vmem:[#allocation5 + $0x18] sm:$0xff]  ;;  %v18106_v57 = vpack.c.bf16 %v148_v53, %v148_v53  ;;  %v16746_v52 = vld [vmem:[#allocation11 + $0x1ac] ss:$16 sps:$4 sm:$0xff]  }
  0x77   :  { %v18098_v33 = vpack.c.bf16 %v147_v23, %v147_v23  ;;  %v18100_v34 = vpack.c.bf16 %v149_v27, %v149_v27  ;;  %v16657_v36 = vld [vmem:[#allocation11 + $0x164] ss:$16 sps:$4 sm:$0xff]   ;;  %v16661_v38 = vld [vmem:[#allocation11 + $0x160] ss:$16 sps:$4 sm:$0xff]   ;;  %v16714_v27 = vld [vmem:[#allocation11 + $0x48] ss:$16 sps:$4 sm:$0xff]  }
  0x78   :  { %1345 = vmatpush1.bf16.msra.mxu0 %v16625_v58  ;;  %v16659_v37 = vld [vmem:[#allocation11 + $0x364] ss:$16 sps:$4 sm:$0xff]   ;;  %v16662_v39 = vld [vmem:[#allocation11 + $0x360] ss:$16 sps:$4 sm:$0xff]  }
  0x79   :  { %1386 = vmatpush1.bf16.msra.mxu1 %v16626_v59  ;;  %1346 = vmatprep.subr.bf16.mxu0 %v16627_v60  ;;  %v16663_v40 = vld [vmem:[#allocation11 + $0x144] ss:$16 sps:$4 sm:$0xff]   ;;  %v16667_v42 = vld [vmem:[#allocation11 + $0x140] ss:$16 sps:$4 sm:$0xff]   ;;  %v16684_v59 = vld [vmem:[#allocation11 + $0xe8] ss:$16 sps:$4 sm:$0xff]  }
  0x7a   :  { %1387 = vmatprep.subr.bf16.mxu1 %v16629_v61  ;;  %1364 = vmatprep.mubr.bf16.mxu0 %v18098_v33  ;;  %v16665_v41 = vld [vmem:[#allocation11 + $0x344] ss:$16 sps:$4 sm:$0xff]   ;;  %v16668_v43 = vld [vmem:[#allocation11 + $0x340] ss:$16 sps:$4 sm:$0xff]   ;;  %v16692_v61 = vld [vmem:[#allocation11 + $0xcc] ss:$16 sps:$4 sm:$0xff]  }
  0x7b   :  { %1405 = vmatprep.mubr.bf16.mxu1 %v18100_v34  ;;  %v16669_v44 = vld [vmem:[#allocation11 + $0x124] ss:$16 sps:$4 sm:$0xff]   ;;  %v16673_v46 = vld [vmem:[#allocation11 + $0x120] ss:$16 sps:$4 sm:$0xff]  }
  0x7c   :  { %1347 = vmatpush1.bf16.msra.mxu0 %v16631_v62  ;;  %v16671_v45 = vld [vmem:[#allocation11 + $0x324] ss:$16 sps:$4 sm:$0xff]   ;;  %v16674_v47 = vld [vmem:[#allocation11 + $0x320] ss:$16 sps:$4 sm:$0xff]  }
  0x7d   :  { %1388 = vmatpush1.bf16.msra.mxu1 %v16632_v63  ;;  %1348 = vmatprep.subr.bf16.mxu0 %v16633_v0  ;;  %v16675_v48 = vld [vmem:[#allocation11 + $0x104] ss:$16 sps:$4 sm:$0xff]   ;;  %v16679_v50 = vld [vmem:[#allocation11 + $0x100] ss:$16 sps:$4 sm:$0xff]   ;;  %v16690_v63 = vld [vmem:[#allocation11 + $0xc8] ss:$16 sps:$4 sm:$0xff]  }
  0x7e   :  { %1389 = vmatprep.subr.bf16.mxu1 %v16635_v1  ;;  %v16677_v49 = vld [vmem:[#allocation11 + $0x304] ss:$16 sps:$4 sm:$0xff]   ;;  %v16680_v51 = vld [vmem:[#allocation11 + $0x300] ss:$16 sps:$4 sm:$0xff]   ;;  %v16698_v1 = vld [vmem:[#allocation11 + $0xac] ss:$16 sps:$4 sm:$0xff]  }
  0x7f   :  { %v16683_v54 = vld [vmem:[#allocation11 + $0x4e4] ss:$16 sps:$4 sm:$0xff]   ;;  %v16681_v58 = vld [vmem:[#allocation11 + $0x4e0] ss:$16 sps:$4 sm:$0xff]  }
  0x80   :  { %1349 = vmatpush2.bf16.msra.mxu0 %v16637_v2  ;;  %v16689_v60 = vld [vmem:[#allocation11 + $0x4c4] ss:$16 sps:$4 sm:$0xff]   ;;  %v16687_v62 = vld [vmem:[#allocation11 + $0x4c0] ss:$16 sps:$4 sm:$0xff]  }
  0x81   :  { %1390 = vmatpush2.bf16.msra.mxu1 %v16638_v3  ;;  %1350 = vmatprep.subr.bf16.mxu0 %v16639_v4  ;;  %v16695_v0 = vld [vmem:[#allocation11 + $0x4a4] ss:$16 sps:$4 sm:$0xff]   ;;  %v16693_v2 = vld [vmem:[#allocation11 + $0x4a0] ss:$16 sps:$4 sm:$0xff]   ;;  %v16696_v3 = vld [vmem:[#allocation11 + $0xa8] ss:$16 sps:$4 sm:$0xff]  }
  0x82   :  { %1391 = vmatprep.subr.bf16.mxu1 %v16641_v5  ;;  %v16701_v4 = vld [vmem:[#allocation11 + $0x484] ss:$16 sps:$4 sm:$0xff]   ;;  %v16704_v5 = vld [vmem:[#allocation11 + $0x8c] ss:$16 sps:$4 sm:$0xff]   ;;  %v16711_v23 = vld [vmem:[#allocation11 + $0x440] ss:$16 sps:$4 sm:$0xff]  }
  0x83   :  { %v16741_v53 = vld [vmem:[#allocation11 + $0x5a0] ss:$16 sps:$4 sm:$0xff]  }
  0x84   :  { %1351 = vmatpush2.bf16.msra.mxu0 %v16643_v9  ;;  %v16699_v9 = vld [vmem:[#allocation11 + $0x480] ss:$16 sps:$4 sm:$0xff]  }
  0x85   :  { %1392 = vmatpush2.bf16.msra.mxu1 %v16644_v10  ;;  %1352 = vmatprep.subr.bf16.mxu0 %v16645_v11  ;;  %v16702_v10 = vld [vmem:[#allocation11 + $0x88] ss:$16 sps:$4 sm:$0xff]   ;;  %v16707_v11 = vld [vmem:[#allocation11 + $0x464] ss:$16 sps:$4 sm:$0xff]  }
  0x86   :  { %1393 = vmatprep.subr.bf16.mxu1 %v16647_v15  ;;  %v16710_v15 = vld [vmem:[#allocation11 + $0x6c] ss:$16 sps:$4 sm:$0xff]  }
  0x88   :  { %1353 = vmatpush2.bf16.msra.mxu0 %v16649_v16  ;;  %v16705_v16 = vld [vmem:[#allocation11 + $0x460] ss:$16 sps:$4 sm:$0xff]  }
  0x89   :  { %1394 = vmatpush2.bf16.msra.mxu1 %v16650_v17  ;;  %1354 = vmatprep.subr.bf16.mxu0 %v16651_v21  ;;  %v16708_v17 = vld [vmem:[#allocation11 + $0x68] ss:$16 sps:$4 sm:$0xff]   ;;  %v16713_v21 = vld [vmem:[#allocation11 + $0x444] ss:$16 sps:$4 sm:$0xff]  }
  0x8a   :  { %1395 = vmatprep.subr.bf16.mxu1 %v16653_v22  ;;  %v16716_v22 = vld [vmem:[#allocation11 + $0x4c] ss:$16 sps:$4 sm:$0xff]  }
  0x8c   :  { %1355 = vmatpush2.bf16.msra.mxu0 %v16655_v32  ;;  %v16719_v32 = vld [vmem:[#allocation11 + $0x424] ss:$16 sps:$4 sm:$0xff]  }
  0x8d   :  { %1396 = vmatpush2.bf16.msra.mxu1 %v16656_v35  ;;  %1356 = vmatprep.subr.bf16.mxu0 %v16657_v36  ;;  %v151_v35 = vld [vmem:[#allocation5 + $0x28] sm:$0xff] }
  0x8e   :  { %1397 = vmatprep.subr.bf16.mxu1 %v16659_v37  ;;  %v16717_v36 = vld [vmem:[#allocation11 + $0x420] ss:$16 sps:$4 sm:$0xff]   ;;  %v16720_v37 = vld [vmem:[#allocation11 + $0x28] ss:$16 sps:$4 sm:$0xff]  }
  0x90   :  { %1357 = vmatpush2.bf16.msra.mxu0 %v16661_v38  ;;  %v18111_v38 = vpack.c.bf16 %v151_v35, %v151_v35  ;;  %v16780_v35 = vld [vmem:[#allocation11 + $0x4e8] ss:$16 sps:$4 sm:$0xff]  }
  0x91   :  { %1398 = vmatpush2.bf16.msra.mxu1 %v16662_v39  ;;  %1358 = vmatprep.subr.bf16.mxu0 %v16663_v40  ;;  %v16725_v39 = vld [vmem:[#allocation11 + $0x404] ss:$16 sps:$4 sm:$0xff]   ;;  %v16728_v40 = vld [vmem:[#allocation11 + $0xc] ss:$16 sps:$4 sm:$0xff]  }
  0x92   :  { %1399 = vmatprep.subr.bf16.mxu1 %v16665_v41  ;;  %v16723_v41 = vld [vmem:[#allocation11 + $0x400] ss:$16 sps:$4 sm:$0xff]  }
  0x94   :  { %1359 = vmatpush2.bf16.msra.mxu0 %v16667_v42  ;;  %v16726_v42 = vld [vmem:[#allocation11 + $0x8] ss:$16 sps:$4 sm:$0xff]  }
  0x95   :  { %1400 = vmatpush2.bf16.msra.mxu1 %v16668_v43  ;;  %1360 = vmatprep.subr.bf16.mxu0 %v16669_v44  ;;  %v16731_v43 = vld [vmem:[#allocation11 + $0x5e4] ss:$16 sps:$4 sm:$0xff]   ;;  %v16734_v44 = vld [vmem:[#allocation11 + $0x1ec] ss:$16 sps:$4 sm:$0xff]  }
  0x96   :  { %1401 = vmatprep.subr.bf16.mxu1 %v16671_v45  ;;  %v16729_v45 = vld [vmem:[#allocation11 + $0x5e0] ss:$16 sps:$4 sm:$0xff]  }
  0x98   :  { %1361 = vmatpush2.bf16.msra.mxu0 %v16673_v46  ;;  %v16732_v46 = vld [vmem:[#allocation11 + $0x1e8] ss:$16 sps:$4 sm:$0xff]  }
  0x99   :  { %1402 = vmatpush2.bf16.msra.mxu1 %v16674_v47  ;;  %1362 = vmatprep.subr.bf16.mxu0 %v16675_v48  ;;  %v16737_v47 = vld [vmem:[#allocation11 + $0x5c4] ss:$16 sps:$4 sm:$0xff]   ;;  %v16740_v48 = vld [vmem:[#allocation11 + $0x1cc] ss:$16 sps:$4 sm:$0xff]  }
  0x9a   :  { %1403 = vmatprep.subr.bf16.mxu1 %v16677_v49  ;;  %v16735_v49 = vld [vmem:[#allocation11 + $0x5c0] ss:$16 sps:$4 sm:$0xff]  }
  0x9c   :  { %1363 = vmatpush2.bf16.msra.mxu0 %v16679_v50  ;;  %v16738_v50 = vld [vmem:[#allocation11 + $0x1c8] ss:$16 sps:$4 sm:$0xff]  }
  0x9d   :  { %1404 = vmatpush2.bf16.msra.mxu1 %v16680_v51  ;;  %1414 = vmatprep.subr.bf16.mxu0 %v16683_v54  ;;  %v16743_v51 = vld [vmem:[#allocation11 + $0x5a4] ss:$16 sps:$4 sm:$0xff]   ;;  %v16744_v54 = vld [vmem:[#allocation11 + $0x1a8] ss:$16 sps:$4 sm:$0xff]  }
  0x9e   :  { %1455 = vmatprep.subr.bf16.mxu1 %v16686_v55  ;;  %v16749_v55 = vld [vmem:[#allocation11 + $0x584] ss:$16 sps:$4 sm:$0xff]  }
  0x9f   :  { %1365 = vmatmul.mubr.bf16.vlgmr.msra.gmra.mxu0 %v18104_v56 }
  0xa0   :  { %1406 = vmatmul.mubr.bf16.vlgmr.msra.gmra.mxu1 %v18106_v57  ;;  %1415 = vmatpush1.bf16.msra.mxu0 %v16681_v58  ;;  %v16752_v58 = vld [vmem:[#allocation11 + $0x18c] ss:$16 sps:$4 sm:$0xff]  }
  0xa1   :  { %1456 = vmatpush1.bf16.msra.mxu1 %v16684_v59  ;;  %1416 = vmatprep.subr.bf16.mxu0 %v16689_v60  ;;  %v16747_v59 = vld [vmem:[#allocation11 + $0x580] ss:$16 sps:$4 sm:$0xff]   ;;  %v16750_v60 = vld [vmem:[#allocation11 + $0x188] ss:$16 sps:$4 sm:$0xff]  }
  0xa2   :  { %1457 = vmatprep.subr.bf16.mxu1 %v16692_v61  ;;  %1487 = vmatprep.mubr.bf16.mxu1 %v18098_v33  ;;  %v16722_v33 = vld [vmem:[#allocation11 + $0x2c] ss:$16 sps:$4 sm:$0xff]   ;;  %v16755_v61 = vld [vmem:[#allocation11 + $0x564] ss:$16 sps:$4 sm:$0xff]  }
  0xa3   :  { %1446 = vmatprep.mubr.bf16.mxu0 %v18111_v38 }
  0xa4   :  { %1417 = vmatpush1.bf16.msra.mxu0 %v16687_v62  ;;  %v16758_v62 = vld [vmem:[#allocation11 + $0x16c] ss:$16 sps:$4 sm:$0xff]  }
  0xa5   :  { %1458 = vmatpush1.bf16.msra.mxu1 %v16690_v63  ;;  %1418 = vmatprep.subr.bf16.mxu0 %v16695_v0  ;;  %v16753_v63 = vld [vmem:[#allocation11 + $0x560] ss:$16 sps:$4 sm:$0xff]   ;;  %v16756_v0 = vld [vmem:[#allocation11 + $0x168] ss:$16 sps:$4 sm:$0xff]  }
  0xa6   :  { %1459 = vmatprep.subr.bf16.mxu1 %v16698_v1  ;;  %v16761_v1 = vld [vmem:[#allocation11 + $0x544] ss:$16 sps:$4 sm:$0xff]  }
  0xa8   :  { %1419 = vmatpush1.bf16.msra.mxu0 %v16693_v2  ;;  %v16764_v2 = vld [vmem:[#allocation11 + $0x14c] ss:$16 sps:$4 sm:$0xff]  }
  0xa9   :  { %1460 = vmatpush1.bf16.msra.mxu1 %v16696_v3  ;;  %1420 = vmatprep.subr.bf16.mxu0 %v16701_v4  ;;  %v16759_v3 = vld [vmem:[#allocation11 + $0x540] ss:$16 sps:$4 sm:$0xff]   ;;  %v16762_v4 = vld [vmem:[#allocation11 + $0x148] ss:$16 sps:$4 sm:$0xff]  }
  0xaa   :  { %1461 = vmatprep.subr.bf16.mxu1 %v16704_v5  ;;  %v16767_v5 = vld [vmem:[#allocation11 + $0x524] ss:$16 sps:$4 sm:$0xff]  }
  0xac   :  { %1421 = vmatpush1.bf16.msra.mxu0 %v16699_v9  ;;  %v16770_v9 = vld [vmem:[#allocation11 + $0x12c] ss:$16 sps:$4 sm:$0xff]  }
  0xad   :  { %1462 = vmatpush1.bf16.msra.mxu1 %v16702_v10  ;;  %1422 = vmatprep.subr.bf16.mxu0 %v16707_v11  ;;  %v16765_v10 = vld [vmem:[#allocation11 + $0x520] ss:$16 sps:$4 sm:$0xff]   ;;  %v16768_v11 = vld [vmem:[#allocation11 + $0x128] ss:$16 sps:$4 sm:$0xff]  }
  0xae   :  { %1463 = vmatprep.subr.bf16.mxu1 %v16710_v15  ;;  %v16773_v15 = vld [vmem:[#allocation11 + $0x504] ss:$16 sps:$4 sm:$0xff]  }
  0xb0   :  { %1423 = vmatpush1.bf16.msra.mxu0 %v16705_v16  ;;  %v16776_v16 = vld [vmem:[#allocation11 + $0x10c] ss:$16 sps:$4 sm:$0xff]  }
  0xb1   :  { %1464 = vmatpush1.bf16.msra.mxu1 %v16708_v17  ;;  %1424 = vmatprep.subr.bf16.mxu0 %v16713_v21  ;;  %v16771_v17 = vld [vmem:[#allocation11 + $0x500] ss:$16 sps:$4 sm:$0xff]   ;;  %v16774_v21 = vld [vmem:[#allocation11 + $0x108] ss:$16 sps:$4 sm:$0xff]  }
  0xb2   :  { %1465 = vmatprep.subr.bf16.mxu1 %v16716_v22  ;;  %v150_v22 = vld [vmem:[#allocation5 + $0x20] sm:$0xff] }
  0xb4   :  { %1425 = vmatpush1.bf16.msra.mxu0 %v16711_v23  ;;  %v16779_v23 = vld [vmem:[#allocation11 + $0x2ec] ss:$16 sps:$4 sm:$0xff]  }
  0xb5   :  { %1466 = vmatpush1.bf16.msra.mxu1 %v16714_v27  ;;  %1426 = vmatprep.subr.bf16.mxu0 %v16719_v32  ;;  %v16782_v27 = vld [vmem:[#allocation11 + $0x4ec] ss:$16 sps:$4 sm:$0xff]   ;;  %v18114_v32 = vpack.c.bf16 %v150_v22, %v150_v22 }
  0xb6   :  { %1467 = vmatprep.subr.bf16.mxu1 %v16722_v33  ;;  %v16777_v33 = vld [vmem:[#allocation11 + $0x2e8] ss:$16 sps:$4 sm:$0xff]   ;;  %v16848_v22 = vld [vmem:[#allocation11 + $0x58c] ss:$16 sps:$4 sm:$0xff]  }
  0xb8   :  { %1427 = vmatpush1.bf16.msra.mxu0 %v16717_v36  ;;  %v16785_v36 = vld [vmem:[#allocation11 + $0x2cc] ss:$16 sps:$4 sm:$0xff]  }
  0xb9   :  { %1468 = vmatpush1.bf16.msra.mxu1 %v16720_v37  ;;  %1428 = vmatprep.subr.bf16.mxu0 %v16725_v39  ;;  %v16783_v37 = vld [vmem:[#allocation11 + $0x2c8] ss:$16 sps:$4 sm:$0xff]   ;;  %v16788_v39 = vld [vmem:[#allocation11 + $0x4cc] ss:$16 sps:$4 sm:$0xff]  }
  0xba   :  { %1469 = vmatprep.subr.bf16.mxu1 %v16728_v40  ;;  %v16786_v40 = vld [vmem:[#allocation11 + $0x4c8] ss:$16 sps:$4 sm:$0xff]  }
  0xbc   :  { %1429 = vmatpush1.bf16.msra.mxu0 %v16723_v41  ;;  %v16791_v41 = vld [vmem:[#allocation11 + $0x2ac] ss:$16 sps:$4 sm:$0xff]  }
  0xbd   :  { %1470 = vmatpush1.bf16.msra.mxu1 %v16726_v42  ;;  %1430 = vmatprep.subr.bf16.mxu0 %v16731_v43  ;;  %v16794_v42 = vld [vmem:[#allocation11 + $0x4ac] ss:$16 sps:$4 sm:$0xff]   ;;  %v16789_v43 = vld [vmem:[#allocation11 + $0x2a8] ss:$16 sps:$4 sm:$0xff]  }
  0xbe   :  { %1471 = vmatprep.subr.bf16.mxu1 %v16734_v44  ;;  %v16792_v44 = vld [vmem:[#allocation11 + $0x4a8] ss:$16 sps:$4 sm:$0xff]  }
  0xc0   :  { %1431 = vmatpush2.bf16.msra.mxu0 %v16729_v45  ;;  %v16797_v45 = vld [vmem:[#allocation11 + $0x28c] ss:$16 sps:$4 sm:$0xff]  }
  0xc1   :  { %1472 = vmatpush2.bf16.msra.mxu1 %v16732_v46  ;;  %1432 = vmatprep.subr.bf16.mxu0 %v16737_v47  ;;  %v16800_v46 = vld [vmem:[#allocation11 + $0x48c] ss:$16 sps:$4 sm:$0xff]   ;;  %v16795_v47 = vld [vmem:[#allocation11 + $0x288] ss:$16 sps:$4 sm:$0xff]  }
  0xc2   :  { %1473 = vmatprep.subr.bf16.mxu1 %v16740_v48  ;;  %v16803_v48 = vld [vmem:[#allocation11 + $0x26c] ss:$16 sps:$4 sm:$0xff]  }
  0xc4   :  { %1433 = vmatpush2.bf16.msra.mxu0 %v16735_v49  ;;  %v16806_v49 = vld [vmem:[#allocation11 + $0x46c] ss:$16 sps:$4 sm:$0xff]  }
  0xc5   :  { %1474 = vmatpush2.bf16.msra.mxu1 %v16738_v50  ;;  %1434 = vmatprep.subr.bf16.mxu0 %v16743_v51  ;;  %v16801_v50 = vld [vmem:[#allocation11 + $0x268] ss:$16 sps:$4 sm:$0xff]   ;;  %v16809_v51 = vld [vmem:[#allocation11 + $0x24c] ss:$16 sps:$4 sm:$0xff]  }
  0xc6   :  { %1475 = vmatprep.subr.bf16.mxu1 %v16746_v52  ;;  %v16807_v52 = vld [vmem:[#allocation11 + $0x248] ss:$16 sps:$4 sm:$0xff]  }
  0xc8   :  { %1435 = vmatpush2.bf16.msra.mxu0 %v16741_v53  ;;  %v16810_v53 = vld [vmem:[#allocation11 + $0x448] ss:$16 sps:$4 sm:$0xff]  }
  0xc9   :  { %1476 = vmatpush2.bf16.msra.mxu1 %v16744_v54  ;;  %1436 = vmatprep.subr.bf16.mxu0 %v16749_v55  ;;  %v16815_v54 = vld [vmem:[#allocation11 + $0x22c] ss:$16 sps:$4 sm:$0xff]  }
  0xca   :  { %1477 = vmatprep.subr.bf16.mxu1 %v16752_v58  ;;  %v16818_v55 = vld [vmem:[#allocation11 + $0x42c] ss:$16 sps:$4 sm:$0xff]   ;;  %v16813_v58 = vld [vmem:[#allocation11 + $0x228] ss:$16 sps:$4 sm:$0xff]  }
  0xcc   :  { %1437 = vmatpush2.bf16.msra.mxu0 %v16747_v59  ;;  %v16816_v59 = vld [vmem:[#allocation11 + $0x428] ss:$16 sps:$4 sm:$0xff]  }
  0xcd   :  { %1478 = vmatpush2.bf16.msra.mxu1 %v16750_v60  ;;  %1438 = vmatprep.subr.bf16.mxu0 %v16755_v61  ;;  %v16821_v60 = vld [vmem:[#allocation11 + $0x20c] ss:$16 sps:$4 sm:$0xff]  }
  0xce   :  { %1479 = vmatprep.subr.bf16.mxu1 %v16758_v62  ;;  %v16824_v61 = vld [vmem:[#allocation11 + $0x40c] ss:$16 sps:$4 sm:$0xff]   ;;  %v16819_v62 = vld [vmem:[#allocation11 + $0x208] ss:$16 sps:$4 sm:$0xff]  }
  0xd0   :  { %1439 = vmatpush2.bf16.msra.mxu0 %v16753_v63  ;;  %v16822_v63 = vld [vmem:[#allocation11 + $0x408] ss:$16 sps:$4 sm:$0xff]  }
  0xd1   :  { %1480 = vmatpush2.bf16.msra.mxu1 %v16756_v0  ;;  %1440 = vmatprep.subr.bf16.mxu0 %v16761_v1  ;;  %v16827_v0 = vld [vmem:[#allocation11 + $0x3ec] ss:$16 sps:$4 sm:$0xff]  }
  0xd2   :  { %1481 = vmatprep.subr.bf16.mxu1 %v16764_v2  ;;  %v16830_v1 = vld [vmem:[#allocation11 + $0x5ec] ss:$16 sps:$4 sm:$0xff]   ;;  %v16825_v2 = vld [vmem:[#allocation11 + $0x3e8] ss:$16 sps:$4 sm:$0xff]  }
  0xd4   :  { %1441 = vmatpush2.bf16.msra.mxu0 %v16759_v3  ;;  %v16828_v3 = vld [vmem:[#allocation11 + $0x5e8] ss:$16 sps:$4 sm:$0xff]  }
  0xd5   :  { %1482 = vmatpush2.bf16.msra.mxu1 %v16762_v4  ;;  %1442 = vmatprep.subr.bf16.mxu0 %v16767_v5  ;;  %v16833_v4 = vld [vmem:[#allocation11 + $0x3cc] ss:$16 sps:$4 sm:$0xff]  }
  0xd6   :  { %1483 = vmatprep.subr.bf16.mxu1 %v16770_v9  ;;  %v16836_v5 = vld [vmem:[#allocation11 + $0x5cc] ss:$16 sps:$4 sm:$0xff]   ;;  %v16831_v9 = vld [vmem:[#allocation11 + $0x3c8] ss:$16 sps:$4 sm:$0xff]  }
  0xd8   :  { %1443 = vmatpush2.bf16.msra.mxu0 %v16765_v10  ;;  %v16834_v10 = vld [vmem:[#allocation11 + $0x5c8] ss:$16 sps:$4 sm:$0xff]  }
  0xd9   :  { %1484 = vmatpush2.bf16.msra.mxu1 %v16768_v11  ;;  %1444 = vmatprep.subr.bf16.mxu0 %v16773_v15  ;;  %v16839_v11 = vld [vmem:[#allocation11 + $0x3ac] ss:$16 sps:$4 sm:$0xff]  }
  0xda   :  { %1485 = vmatprep.subr.bf16.mxu1 %v16776_v16  ;;  %v16842_v15 = vld [vmem:[#allocation11 + $0x5ac] ss:$16 sps:$4 sm:$0xff]   ;;  %v16837_v16 = vld [vmem:[#allocation11 + $0x3a8] ss:$16 sps:$4 sm:$0xff]  }
  0xdc   :  { %1445 = vmatpush2.bf16.msra.mxu0 %v16771_v17  ;;  %v16840_v17 = vld [vmem:[#allocation11 + $0x5a8] ss:$16 sps:$4 sm:$0xff]  }
  0xdd   :  { %1486 = vmatpush2.bf16.msra.mxu1 %v16774_v21  ;;  %1496 = vmatprep.subr.bf16.mxu0 %v16779_v23  ;;  %v16845_v21 = vld [vmem:[#allocation11 + $0x38c] ss:$16 sps:$4 sm:$0xff]   ;;  %v16843_v23 = vld [vmem:[#allocation11 + $0x388] ss:$16 sps:$4 sm:$0xff]  }
  0xde   :  { %1537 = vmatprep.subr.bf16.mxu1 %v16782_v27  ;;  %v16846_v27 = vld [vmem:[#allocation11 + $0x588] ss:$16 sps:$4 sm:$0xff]  }
  0xdf   :  { %1447 = vmatmul.mubr.bf16.vlgmr.msra.gmra.mxu0 %v18114_v32 }
  0xe0   :  { %1488 = vmatmul.mubr.bf16.vlgmr.msra.gmra.mxu1 %v18104_v56  ;;  %1497 = vmatpush1.bf16.msra.mxu0 %v16777_v33  ;;  %v16798_v56 = vld [vmem:[#allocation11 + $0x488] ss:$16 sps:$4 sm:$0xff]   ;;  %v16851_v33 = vld [vmem:[#allocation11 + $0x36c] ss:$16 sps:$4 sm:$0xff]  }
  0xe1   :  { %1538 = vmatpush1.bf16.msra.mxu1 %v16780_v35  ;;  %1498 = vmatprep.subr.bf16.mxu0 %v16785_v36  ;;  %v16854_v35 = vld [vmem:[#allocation11 + $0x56c] ss:$16 sps:$4 sm:$0xff]   ;;  %v16849_v36 = vld [vmem:[#allocation11 + $0x368] ss:$16 sps:$4 sm:$0xff]  }
  0xe2   :  { %1539 = vmatprep.subr.bf16.mxu1 %v16788_v39  ;;  %1528 = vmatprep.mubr.bf16.mxu0 %v18100_v34  ;;  %v16804_v34 = vld [vmem:[#allocation11 + $0x468] ss:$16 sps:$4 sm:$0xff]   ;;  %v16857_v39 = vld [vmem:[#allocation11 + $0x34c] ss:$16 sps:$4 sm:$0xff]  }
  0xe3   :  { %1569 = vmatprep.mubr.bf16.mxu1 %v18111_v38  ;;  %v16812_v38 = vld [vmem:[#allocation11 + $0x44c] ss:$16 sps:$4 sm:$0xff]  }
  0xe4   :  { %1499 = vmatpush1.bf16.msra.mxu0 %v16783_v37  ;;  %v16852_v37 = vld [vmem:[#allocation11 + $0x568] ss:$16 sps:$4 sm:$0xff]  }
  0xe5   :  { %1540 = vmatpush1.bf16.msra.mxu1 %v16786_v40  ;;  %1500 = vmatprep.subr.bf16.mxu0 %v16791_v41  ;;  %v16860_v40 = vld [vmem:[#allocation11 + $0x54c] ss:$16 sps:$4 sm:$0xff]   ;;  %v16855_v41 = vld [vmem:[#allocation11 + $0x348] ss:$16 sps:$4 sm:$0xff]  }
  0xe6   :  { %1541 = vmatprep.subr.bf16.mxu1 %v16794_v42  ;;  %v16858_v42 = vld [vmem:[#allocation11 + $0x548] ss:$16 sps:$4 sm:$0xff]  }
  0xe8   :  { %1501 = vmatpush1.bf16.msra.mxu0 %v16789_v43  ;;  %v16863_v43 = vld [vmem:[#allocation11 + $0x32c] ss:$16 sps:$4 sm:$0xff]  }
  0xe9   :  { %1542 = vmatpush1.bf16.msra.mxu1 %v16792_v44  ;;  %1502 = vmatprep.subr.bf16.mxu0 %v16797_v45  ;;  %v16866_v44 = vld [vmem:[#allocation11 + $0x52c] ss:$16 sps:$4 sm:$0xff]   ;;  %v16861_v45 = vld [vmem:[#allocation11 + $0x328] ss:$16 sps:$4 sm:$0xff]  }
  0xea   :  { %1543 = vmatprep.subr.bf16.mxu1 %v16800_v46  ;;  %v16864_v46 = vld [vmem:[#allocation11 + $0x528] ss:$16 sps:$4 sm:$0xff]  }
  0xec   :  { %1503 = vmatpush1.bf16.msra.mxu0 %v16795_v47  ;;  %v16869_v47 = vld [vmem:[#allocation11 + $0x30c] ss:$16 sps:$4 sm:$0xff]  }
  0xed   :  { %1544 = vmatpush1.bf16.msra.mxu1 %v16798_v56  ;;  %1504 = vmatprep.subr.bf16.mxu0 %v16803_v48  ;;  %v16872_v56 = vld [vmem:[#allocation11 + $0x50c] ss:$16 sps:$4 sm:$0xff]   ;;  %v16867_v48 = vld [vmem:[#allocation11 + $0x308] ss:$16 sps:$4 sm:$0xff]  }
  0xee   :  { %1545 = vmatprep.subr.bf16.mxu1 %v16806_v49  ;;  %v16870_v49 = vld [vmem:[#allocation11 + $0x508] ss:$16 sps:$4 sm:$0xff]  }
  0xf0   :  { %1505 = vmatpush1.bf16.msra.mxu0 %v16801_v50  ;;  %v16875_v50 = vld [vmem:[#allocation13 + $0x74] ss:$8 sps:$4 sm:$0xff]  }
  0xf1   :  { %1546 = vmatpush1.bf16.msra.mxu1 %v16804_v34  ;;  %1506 = vmatprep.subr.bf16.mxu0 %v16809_v51  ;;  %v16873_v34 = vld [vmem:[#allocation13 + $0x70] ss:$8 sps:$4 sm:$0xff]   ;;  %v16878_v51 = vld [vmem:[#allocation13 + $0x64] ss:$8 sps:$4 sm:$0xff]  }
  0xf2   :  { %1547 = vmatprep.subr.bf16.mxu1 %v16812_v38  ;;  %v16876_v38 = vld [vmem:[#allocation13 + $0x60] ss:$8 sps:$4 sm:$0xff]  }
  0xf4   :  { %1507 = vmatpush1.bf16.msra.mxu0 %v16807_v52  ;;  %v16881_v52 = vld [vmem:[#allocation13 + $0x54] ss:$8 sps:$4 sm:$0xff]  }
  0xf5   :  { %1548 = vmatpush1.bf16.msra.mxu1 %v16810_v53  ;;  %1508 = vmatprep.subr.bf16.mxu0 %v16815_v54  ;;  %v16879_v53 = vld [vmem:[#allocation13 + $0x50] ss:$8 sps:$4 sm:$0xff]   ;;  %v16884_v54 = vld [vmem:[#allocation13 + $0x44] ss:$8 sps:$4 sm:$0xff]  }
  0xf6   :  { %1549 = vmatprep.subr.bf16.mxu1 %v16818_v55  ;;  %v16882_v55 = vld [vmem:[#allocation13 + $0x40] ss:$8 sps:$4 sm:$0xff]  }
  0xf8   :  { %1509 = vmatpush1.bf16.msra.mxu0 %v16813_v58  ;;  %v16887_v58 = vld [vmem:[#allocation13 + $0x34] ss:$8 sps:$4 sm:$0xff]  }
  0xf9   :  { %1550 = vmatpush1.bf16.msra.mxu1 %v16816_v59  ;;  %1510 = vmatprep.subr.bf16.mxu0 %v16821_v60  ;;  %v16921_v59 = vld [vmem:[#allocation13 + $0x170] ss:$8 sps:$4 sm:$0xff]   ;;  %v16923_v60 = vld [vmem:[#allocation13 + $0x174] ss:$8 sps:$4 sm:$0xff]  }
  0xfa   :  { %1551 = vmatprep.subr.bf16.mxu1 %v16824_v61  ;;  %v16926_v61 = vld [vmem:[#allocation13 + $0x164] ss:$8 sps:$4 sm:$0xff]  }
  0xfc   :  { %1511 = vmatpush1.bf16.msra.mxu0 %v16819_v62  ;;  %v16890_v62 = vld [vmem:[#allocation13 + $0x24] ss:$8 sps:$4 sm:$0xff]  }
  0xfd   :  { %1552 = vmatpush1.bf16.msra.mxu1 %v16822_v63  ;;  %1512 = vmatprep.subr.bf16.mxu0 %v16827_v0  ;;  %v16929_v63 = vld [vmem:[#allocation13 + $0x154] ss:$8 sps:$4 sm:$0xff]   ;;  %v16888_v0 = vld [vmem:[#allocation13 + $0x20] ss:$8 sps:$4 sm:$0xff]  }
  0xfe   :  { %1553 = vmatprep.subr.bf16.mxu1 %v16830_v1  ;;  %v16927_v1 = vld [vmem:[#allocation13 + $0x150] ss:$8 sps:$4 sm:$0xff]  }
 0x100   :  { %1513 = vmatpush2.bf16.msra.mxu0 %v16825_v2  ;;  %v16893_v2 = vld [vmem:[#allocation13 + $0x14] ss:$8 sps:$4 sm:$0xff]  }
 0x101   :  { %1554 = vmatpush2.bf16.msra.mxu1 %v16828_v3  ;;  %1514 = vmatprep.subr.bf16.mxu0 %v16833_v4  ;;  %v16932_v3 = vld [vmem:[#allocation13 + $0x144] ss:$8 sps:$4 sm:$0xff]   ;;  %v16891_v4 = vld [vmem:[#allocation13 + $0x10] ss:$8 sps:$4 sm:$0xff]  }
 0x102   :  { %1555 = vmatprep.subr.bf16.mxu1 %v16836_v5  ;;  %v16930_v5 = vld [vmem:[#allocation13 + $0x140] ss:$8 sps:$4 sm:$0xff]  }
 0x104   :  { %1515 = vmatpush2.bf16.msra.mxu0 %v16831_v9  ;;  %v16896_v9 = vld [vmem:[#allocation13 + $0x4] ss:$8 sps:$4 sm:$0xff]  }
 0x105   :  { %1556 = vmatpush2.bf16.msra.mxu1 %v16834_v10  ;;  %1516 = vmatprep.subr.bf16.mxu0 %v16839_v11  ;;  %v16935_v10 = vld [vmem:[#allocation13 + $0x134] ss:$8 sps:$4 sm:$0xff]   ;;  %v16894_v11 = vld [vmem:[#allocation13] ss:$8 sps:$4 sm:$0xff]  }
 0x106   :  { %1557 = vmatprep.subr.bf16.mxu1 %v16842_v15  ;;  %v16933_v15 = vld [vmem:[#allocation13 + $0x130] ss:$8 sps:$4 sm:$0xff]  }
 0x108   :  { %1517 = vmatpush2.bf16.msra.mxu0 %v16837_v16  ;;  %v16899_v16 = vld [vmem:[#allocation13 + $0xf4] ss:$8 sps:$4 sm:$0xff]  }
 0x109   :  { %1558 = vmatpush2.bf16.msra.mxu1 %v16840_v17  ;;  %1518 = vmatprep.subr.bf16.mxu0 %v16845_v21  ;;  %v16938_v17 = vld [vmem:[#allocation13 + $0x124] ss:$8 sps:$4 sm:$0xff]   ;;  %v16897_v21 = vld [vmem:[#allocation13 + $0xf0] ss:$8 sps:$4 sm:$0xff]  }
 0x10a   :  { %1559 = vmatprep.subr.bf16.mxu1 %v16848_v22  ;;  %v16936_v22 = vld [vmem:[#allocation13 + $0x120] ss:$8 sps:$4 sm:$0xff]  }
 0x10c   :  { %1519 = vmatpush2.bf16.msra.mxu0 %v16843_v23  ;;  %v16902_v23 = vld [vmem:[#allocation13 + $0xe4] ss:$8 sps:$4 sm:$0xff]  }
 0x10d   :  { %1560 = vmatpush2.bf16.msra.mxu1 %v16846_v27  ;;  %1520 = vmatprep.subr.bf16.mxu0 %v16851_v33  ;;  %v16941_v27 = vld [vmem:[#allocation13 + $0x114] ss:$8 sps:$4 sm:$0xff]   ;;  %v16900_v33 = vld [vmem:[#allocation13 + $0xe0] ss:$8 sps:$4 sm:$0xff]  }
 0x10e   :  { %1561 = vmatprep.subr.bf16.mxu1 %v16854_v35  ;;  %v16939_v35 = vld [vmem:[#allocation13 + $0x110] ss:$8 sps:$4 sm:$0xff]  }
 0x110   :  { %1521 = vmatpush2.bf16.msra.mxu0 %v16849_v36  ;;  %v16905_v36 = vld [vmem:[#allocation13 + $0xd4] ss:$8 sps:$4 sm:$0xff]  }
 0x111   :  { %1562 = vmatpush2.bf16.msra.mxu1 %v16852_v37  ;;  %1522 = vmatprep.subr.bf16.mxu0 %v16857_v39  ;;  %v16944_v37 = vld [vmem:[#allocation13 + $0x104] ss:$8 sps:$4 sm:$0xff]   ;;  %v16903_v39 = vld [vmem:[#allocation13 + $0xd0] ss:$8 sps:$4 sm:$0xff]  }
 0x112   :  { %1563 = vmatprep.subr.bf16.mxu1 %v16860_v40  ;;  %v16942_v40 = vld [vmem:[#allocation13 + $0x100] ss:$8 sps:$4 sm:$0xff]  }
 0x114   :  { %1523 = vmatpush2.bf16.msra.mxu0 %v16855_v41  ;;  %v16908_v41 = vld [vmem:[#allocation13 + $0xc4] ss:$8 sps:$4 sm:$0xff]  }
 0x115   :  { %1564 = vmatpush2.bf16.msra.mxu1 %v16858_v42  ;;  %1524 = vmatprep.subr.bf16.mxu0 %v16863_v43  ;;  %v16947_v42 = vld [vmem:[#allocation13 + $0x1f4] ss:$8 sps:$4 sm:$0xff]   ;;  %v16906_v43 = vld [vmem:[#allocation13 + $0xc0] ss:$8 sps:$4 sm:$0xff]  }
 0x116   :  { %1565 = vmatprep.subr.bf16.mxu1 %v16866_v44  ;;  %v16945_v44 = vld [vmem:[#allocation13 + $0x1f0] ss:$8 sps:$4 sm:$0xff]  }
 0x118   :  { %1525 = vmatpush2.bf16.msra.mxu0 %v16861_v45  ;;  %v16911_v45 = vld [vmem:[#allocation13 + $0xb4] ss:$8 sps:$4 sm:$0xff]  }
 0x119   :  { %1566 = vmatpush2.bf16.msra.mxu1 %v16864_v46  ;;  %1526 = vmatprep.subr.bf16.mxu0 %v16869_v47  ;;  %v16950_v46 = vld [vmem:[#allocation13 + $0x1e4] ss:$8 sps:$4 sm:$0xff]   ;;  %v16909_v47 = vld [vmem:[#allocation13 + $0xb0] ss:$8 sps:$4 sm:$0xff]  }
 0x11a   :  { %1567 = vmatprep.subr.bf16.mxu1 %v16872_v56  ;;  %v16948_v56 = vld [vmem:[#allocation13 + $0x1e0] ss:$8 sps:$4 sm:$0xff]  }
 0x11c   :  { %1527 = vmatpush2.bf16.msra.mxu0 %v16867_v48  ;;  %v16914_v48 = vld [vmem:[#allocation13 + $0xa4] ss:$8 sps:$4 sm:$0xff]  }
 0x11d   :  { %1568 = vmatpush2.bf16.msra.mxu1 %v16870_v49  ;;  %1982 = vmatprep.subr.bf16.mxu0 %v16875_v50  ;;  %v16953_v49 = vld [vmem:[#allocation13 + $0x1d4] ss:$8 sps:$4 sm:$0xff]   ;;  %v16912_v50 = vld [vmem:[#allocation13 + $0xa0] ss:$8 sps:$4 sm:$0xff]  }
 0x11e   :  { %2023 = vmatprep.subr.bf16.mxu1 %v16923_v60  ;;  %v16962_v60 = vld [vmem:[#allocation13 + $0x1a4] ss:$8 sps:$4 sm:$0xff]  }
 0x11f   :  { %1529 = vmatmul.mubr.bf16.vlgmr.msra.gmra.mxu0 %v18106_v57  ;;  %v16885_v57 = vld [vmem:[#allocation13 + $0x30] ss:$8 sps:$4 sm:$0xff]  }
 0x120   :  { %1570 = vmatmul.mubr.bf16.vlgmr.msra.gmra.mxu1 %v18114_v32  ;;  %1983 = vmatpush1.bf16.msra.mxu0 %v16873_v34  ;;  %v16924_v32 = vld [vmem:[#allocation13 + $0x160] ss:$8 sps:$4 sm:$0xff]   ;;  %v16951_v34 = vld [vmem:[#allocation13 + $0x1d0] ss:$8 sps:$4 sm:$0xff]  }
 0x121   :  { %1984 = vmatprep.subr.bf16.mxu0 %v16878_v51  ;;  %2024 = vmatpush1.bf16.msra.mxu1 %v16921_v59  ;;  %v16917_v51 = vld [vmem:[#allocation13 + $0x94] ss:$8 sps:$4 sm:$0xff]   ;;  %v16957_v59 = vld [vmem:[#allocation13 + $0x1b0] ss:$8 sps:$4 sm:$0xff]  }
 0x122   :  { %2025 = vmatprep.subr.bf16.mxu1 %v16926_v61 }
 0x124   :  { %1985 = vmatpush1.bf16.msra.mxu0 %v16876_v38  ;;  %v16956_v38 = vld [vmem:[#allocation13 + $0x1c4] ss:$8 sps:$4 sm:$0xff]  }
 0x125   :  { %1986 = vmatprep.subr.bf16.mxu0 %v16881_v52  ;;  %2026 = vmatpush1.bf16.msra.mxu1 %v16924_v32  ;;  %v16915_v52 = vld [vmem:[#allocation13 + $0x90] ss:$8 sps:$4 sm:$0xff]  }
 0x126   :  { %2027 = vmatprep.subr.bf16.mxu1 %v16929_v63 }
 0x128   :  { %1987 = vmatpush1.bf16.msra.mxu0 %v16879_v53  ;;  %v16954_v53 = vld [vmem:[#allocation13 + $0x1c0] ss:$8 sps:$4 sm:$0xff]  }
 0x129   :  { %1988 = vmatprep.subr.bf16.mxu0 %v16884_v54  ;;  %2028 = vmatpush1.bf16.msra.mxu1 %v16927_v1  ;;  %v16920_v54 = vld [vmem:[#allocation13 + $0x84] ss:$8 sps:$4 sm:$0xff]  }
 0x12a   :  { %2029 = vmatprep.subr.bf16.mxu1 %v16932_v3 }
 0x12c   :  { %1989 = vmatpush1.bf16.msra.mxu0 %v16882_v55  ;;  %v16959_v55 = vld [vmem:[#allocation13 + $0x1b4] ss:$8 sps:$4 sm:$0xff]  }
 0x12d   :  { %1990 = vmatprep.subr.bf16.mxu0 %v16887_v58  ;;  %2030 = vmatpush1.bf16.msra.mxu1 %v16930_v5  ;;  %v16918_v58 = vld [vmem:[#allocation13 + $0x80] ss:$8 sps:$4 sm:$0xff]  }
 0x12e   :  { %2031 = vmatprep.subr.bf16.mxu1 %v16935_v10  ;;  %v16966_v10 = vld [vmem:[#allocation13 + $0x180] ss:$8 sps:$4 sm:$0xff]  }
 0x130   :  { %1991 = vmatpush1.bf16.msra.mxu0 %v16885_v57  ;;  %v16960_v57 = vld [vmem:[#allocation13 + $0x1a0] ss:$8 sps:$4 sm:$0xff]  }
 0x131   :  { %1992 = vmatprep.subr.bf16.mxu0 %v16890_v62  ;;  %2032 = vmatpush1.bf16.msra.mxu1 %v16933_v15 }
 0x132   :  { %2033 = vmatprep.subr.bf16.mxu1 %v16938_v17  ;;  %v350_v17 = vld [vmem:[#allocation16] sm:$0xf] }
 0x134   :  { %1993 = vmatpush1.bf16.msra.mxu0 %v16888_v0  ;;  %v16965_v0 = vld [vmem:[#allocation13 + $0x194] ss:$8 sps:$4 sm:$0xff]  }
 0x135   :  { %1994 = vmatprep.subr.bf16.mxu0 %v16893_v2  ;;  %2034 = vmatpush1.bf16.msra.mxu1 %v16936_v22  ;;  %v16963_v2 = vld [vmem:[#allocation13 + $0x190] ss:$8 sps:$4 sm:$0xff]  }
 0x136   :  { %2035 = vmatprep.subr.bf16.mxu1 %v16941_v27 }
 0x138   :  { %1995 = vmatpush1.bf16.msra.mxu0 %v16891_v4 }
 0x139   :  { %1996 = vmatprep.subr.bf16.mxu0 %v16896_v9  ;;  %2036 = vmatpush1.bf16.msra.mxu1 %v16939_v35  ;;  %v16968_v9 = vld [vmem:[#allocation13 + $0x184] ss:$8 sps:$4 sm:$0xff]  }
 0x13a   :  { %2037 = vmatprep.subr.bf16.mxu1 %v16944_v37 }
 0x13c   :  { %1997 = vmatpush1.bf16.msra.mxu0 %v16894_v11  ;;  %v352_v11 = vlaneseq }
 0x13d   :  { %1998 = vmatprep.subr.bf16.mxu0 %v16899_v16  ;;  %2038 = vmatpush1.bf16.msra.mxu1 %v16942_v40 }
 0x13e   :  { %2039 = vmatprep.subr.bf16.mxu1 %v16947_v42  ;;  %v18122_v15 = vshrl.u32 %v352_v11, 7  ;;  %v16970_v11 = vld [vmem:[#allocation14 + $0x38] sm:$0xff]  }
 0x140   :  { %1999 = vmatpush2.bf16.msra.mxu0 %v16897_v21  ;;  %v18125_v16 = vsub.s32 0, %v18122_v15  ;;  %v18128_v21 = vsub.s32 1, %v18122_v15 }
 0x141   :  { %2000 = vmatprep.subr.bf16.mxu0 %v16902_v23  ;;  %2040 = vmatpush2.bf16.msra.mxu1 %v16945_v44 }
 0x142   :  { %2041 = vmatprep.subr.bf16.mxu1 %v16950_v46  ;;  %v355_v22 = vrot.slane %v350_v17, %v18125_v16  ;;  %v359_v23 = vrot.slane %v350_v17, %v18128_v21 }
 0x144   :  { %2001 = vmatpush2.bf16.msra.mxu0 %v16900_v33 }
 0x145   :  { %2002 = vmatprep.subr.bf16.mxu0 %v16905_v36  ;;  %2042 = vmatpush2.bf16.msra.mxu1 %v16948_v56 }
 0x146   :  { %2043 = vmatprep.subr.bf16.mxu1 %v16953_v49 }
 0x148   :  { %2003 = vmatpush2.bf16.msra.mxu0 %v16903_v39 }
 0x149   :  { %2004 = vmatprep.subr.bf16.mxu0 %v16908_v41  ;;  %2044 = vmatpush2.bf16.msra.mxu1 %v16951_v34  ;;  %v18133_v34 = vsub.s32 2, %v18122_v15 }
 0x14a   :  { %2045 = vmatprep.subr.bf16.mxu1 %v16956_v38 }
 0x14b   :  { %v363_v38 = vrot.slane %v350_v17, %v18133_v34 }
 0x14c   :  { %2005 = vmatpush2.bf16.msra.mxu0 %v16906_v43 }
 0x14d   :  { %2006 = vmatprep.subr.bf16.mxu0 %v16911_v45  ;;  %2046 = vmatpush2.bf16.msra.mxu1 %v16954_v53 }
 0x14e   :  { %2047 = vmatprep.subr.bf16.mxu1 %v16959_v55 }
 0x150   :  { %2007 = vmatpush2.bf16.msra.mxu0 %v16909_v47 }
 0x151   :  { %2008 = vmatprep.subr.bf16.mxu0 %v16914_v48  ;;  %2048 = vmatpush2.bf16.msra.mxu1 %v16957_v59 }
 0x152   :  { %2049 = vmatprep.subr.bf16.mxu1 %v16962_v60 }
 0x154   :  { %2009 = vmatpush2.bf16.msra.mxu0 %v16912_v50 }
 0x155   :  { %2010 = vmatprep.subr.bf16.mxu0 %v16917_v51  ;;  %2050 = vmatpush2.bf16.msra.mxu1 %v16960_v57  ;;  %v18136_v51 = vsub.s32 3, %v18122_v15 }
 0x156   :  { %2051 = vmatprep.subr.bf16.mxu1 %v16965_v0 }
 0x158   :  { %2011 = vmatpush2.bf16.msra.mxu0 %v16915_v52  ;;  %v367_v52 = vrot.slane %v350_v17, %v18136_v51  ;;  %v16971_v17 = vld [vmem:[#allocation14 + $0x70] sm:$0xff]  }
 0x159   :  { %2012 = vmatprep.subr.bf16.mxu0 %v16920_v54  ;;  %2052 = vmatpush2.bf16.msra.mxu1 %v16963_v2 }
 0x15a   :  { %2053 = vmatprep.subr.bf16.mxu1 %v16968_v9 }
 0x15c   :  { %2013 = vmatpush2.bf16.msra.mxu0 %v16918_v58 }
 0x15d   :  { %2054 = vmatpush2.bf16.msra.mxu1 %v16966_v10  ;;  %v16969_v10 = vld [vmem:[#allocation14 + $0x78] sm:$0xff]  }
 0x15e   :  { %16357 = vmatprep.subr.bf16.mxu0 %v16969_v10 }
 0x15f   :  { %v1366_v61 = vpop.f32.mrf.mxu0 }
 0x160   :  { %v1407_v32 = vpop.f32.mrf.mxu1  ;;  %v1367_v27 = vadd.f32 %v1366_v61, %v355_v22  ;;  %v16972_v22 = vld [vmem:[#allocation14 + $0x30] sm:$0xff]  }
 0x161   :  { %v1368_v62 = vpop.f32.mrf.mxu0 }
 0x162   :  { %v1409_v63 = vpop.f32.mrf.mxu1  ;;  %v1369_v33 = vadd.f32 %v1368_v62, %v359_v23  ;;  %v1408_v35 = vadd.f32 %v1407_v32, %v1367_v27  ;;  %v16973_v23 = vld [vmem:[#allocation14 + $0x68] sm:$0xff]  }
 0x163   :  { %v1370_v1 = vpop.f32.mrf.mxu0  ;;  %v16974_v27 = vld [vmem:[#allocation14 + $0x28] sm:$0xff]  }
 0x164   :  { %v1411_v3 = vpop.f32.mrf.mxu1  ;;  %v1410_v37 = vadd.f32 %v1409_v63, %v1369_v33  ;;  %v16975_v33 = vld [vmem:[#allocation14 + $0x60] sm:$0xff]  }
 0x165   :  { %v1371_v4 = vpop.f32.mrf.mxu0 }
 0x166   :  { %v1412_v5 = vpop.f32.mrf.mxu1 }
 0x19f   :  { %v1448_v36 = vpop.f32.mrf.mxu0 }
 0x1a0   :  { %v1449_v39 = vadd.f32 %v1448_v36, %v1408_v35  ;;  %v1489_v40 = vpop.f32.mrf.mxu1  ;;  %v16976_v35 = vld [vmem:[#allocation14 + $0x20] sm:$0xff]   ;;  %v16977_v36 = vld [vmem:[#allocation14 + $0x58] sm:$0xff]  }
 0x1a1   :  { %v1450_v41 = vpop.f32.mrf.mxu0  ;;  %v1490_v53 = vadd.f32 %v1489_v40, %v363_v38  ;;  %v16980_v40 = vld [vmem:[#allocation14 + $0x10] sm:$0xff]   ;;  %v17014_v38 = vld [vmem:[%s18496_s8 + $0x10] sm:$0xff]  }
 0x1a2   :  { %v1451_v42 = vadd.f32 %v1450_v41, %v1410_v37  ;;  %v1491_v43 = vpop.f32.mrf.mxu1  ;;  %v1578_v44 = vmax.f32 %v1449_v39, 0.0  ;;  %v16978_v37 = vld [vmem:[#allocation14 + $0x18] sm:$0xff]   ;;  %v16979_v39 = vld [vmem:[#allocation14 + $0x50] sm:$0xff]   ;;  %v16981_v41 = vld [vmem:[#allocation14 + $0x48] sm:$0xff]  }
 0x1a3   :  { %v1452_v45 = vpop.f32.mrf.mxu0  ;;  %v1492_v55 = vadd.f32 %v1491_v43, %v367_v52  ;;  %v16983_v43 = vld [vmem:[#allocation14 + $0x40] sm:$0xff]  }
 0x1a4   :  { %v1579_v46 = vmax.f32 %v1451_v42, 0.0  ;;  %v1493_v47 = vpop.f32.mrf.mxu1  ;;  %v1582_v50 = vpack.c.bf16 %v1578_v44, %v1578_v44  ;;  %v16982_v42 = vld [vmem:[#allocation14 + $0x8] sm:$0xff]   ;;  %v16984_v44 = vld [vmem:[#allocation14] sm:$0xff]   ;;  %v16987_v45 = vld [vmem:[#allocation13 + $0x474] ss:$8 sps:$4 sm:$0xff]  }
 0x1a5   :  { %v1453_v56 = vpop.f32.mrf.mxu0  ;;  %v17979_v47 = vmov 0.0  }
 0x1a6   :  { %v1583_v48 = vpack.c.bf16 %v1579_v46, %v1579_v46  ;;  %v1494_v49 = vpop.f32.mrf.mxu1  ;;  %v17009_v46 = vld [vmem:[%s18496_s8 + $0x38] sm:$0xff]   ;;  %16482 = vmatprep.subr.bf16.mxu1 %v17979_v47  ;;  %v17010_v56 = vld [vmem:[%s18496_s8 + $0x30] sm:$0xff]  }
 0x1a7   :  { %v17012_v49 = vld [vmem:[%s18496_s8 + $0x20] sm:$0xff]  }
 0x1a8   :  { %2014 = vmatprep.mubr.bf16.mxu0 %v1583_v48  ;;  %v17011_v48 = vld [vmem:[%s18496_s8 + $0x28] sm:$0xff]  }
 0x1a9   :  { %2015 = vmatmul.mubr.bf16.vlgmr.msra.gmra.mxu0 %v1582_v50  ;;  %v17013_v50 = vld [vmem:[%s18496_s8 + $0x18] sm:$0xff]  }
 0x1aa   :  { %16358 = vmatpush3.bf16.msra.mxu0 %v16970_v11  ;;  %v16990_v11 = vld [vmem:[#allocation13 + $0x464] ss:$8 sps:$4 sm:$0xff]  }
 0x1ab   :  { %16359 = vmatprep.subr.bf16.mxu0 %v16971_v17  ;;  %v16988_v17 = vld [vmem:[#allocation13 + $0x460] ss:$8 sps:$4 sm:$0xff]  }
 0x1ae   :  { %16360 = vmatpush3.bf16.msra.mxu0 %v16972_v22  ;;  %v17980_v22 = vmov 0  }
 0x1af   :  { %16361 = vmatprep.subr.bf16.mxu0 %v16973_v23  ;;  %v16993_v23 = vld [vmem:[#allocation13 + $0x454] ss:$8 sps:$4 sm:$0xff]  }
 0x1b2   :  { %16362 = vmatpush3.bf16.msra.mxu0 %v16974_v27  ;;  %v16991_v27 = vld [vmem:[#allocation13 + $0x450] ss:$8 sps:$4 sm:$0xff]  }
 0x1b3   :  { %16363 = vmatprep.subr.bf16.mxu0 %v16975_v33  ;;  %v16996_v33 = vld [vmem:[#allocation13 + $0x444] ss:$8 sps:$4 sm:$0xff]  }
 0x1b6   :  { %16364 = vmatpush3.bf16.msra.mxu0 %v16976_v35  ;;  %v16994_v35 = vld [vmem:[#allocation13 + $0x440] ss:$8 sps:$4 sm:$0xff]  }
 0x1b7   :  { %16365 = vmatprep.subr.bf16.mxu0 %v16977_v36  ;;  %v16999_v36 = vld [vmem:[#allocation13 + $0x434] ss:$8 sps:$4 sm:$0xff]  }
 0x1ba   :  { %16366 = vmatpush3.bf16.msra.mxu0 %v16978_v37  ;;  %v16997_v37 = vld [vmem:[#allocation13 + $0x430] ss:$8 sps:$4 sm:$0xff]  }
 0x1bb   :  { %16367 = vmatprep.subr.bf16.mxu0 %v16979_v39  ;;  %v17002_v39 = vld [vmem:[#allocation13 + $0x424] ss:$8 sps:$4 sm:$0xff]  }
 0x1be   :  { %16368 = vmatpush3.bf16.msra.mxu0 %v16980_v40  ;;  %v17000_v40 = vld [vmem:[#allocation13 + $0x420] ss:$8 sps:$4 sm:$0xff]  }
 0x1bf   :  { %16369 = vmatprep.subr.bf16.mxu0 %v16981_v41  ;;  %v17005_v41 = vld [vmem:[#allocation13 + $0x414] ss:$8 sps:$4 sm:$0xff]  }
 0x1c2   :  { %16370 = vmatpush3.bf16.msra.mxu0 %v16982_v42  ;;  %v17003_v42 = vld [vmem:[#allocation13 + $0x410] ss:$8 sps:$4 sm:$0xff]  }
 0x1c3   :  { %16371 = vmatprep.subr.bf16.mxu0 %v16983_v43  ;;  %v17008_v43 = vld [vmem:[#allocation13 + $0x404] ss:$8 sps:$4 sm:$0xff]  }
 0x1c6   :  { %16372 = vmatpush3.bf16.msra.mxu0 %v16984_v44  ;;  %v17006_v44 = vld [vmem:[#allocation13 + $0x400] ss:$8 sps:$4 sm:$0xff]  }
 0x1c7   :  { %2468 = vmatprep.subr.bf16.mxu0 %v16987_v45  ;;  %v2358_v45 = vld [vmem:[#allocation10] sm:$0xff] }
 0x1df   :  { %v1530_v54 = vpop.f32.mrf.mxu0 }
 0x1e0   :  { %v1531_v58 = vadd.f32 %v1530_v54, %v1490_v53  ;;  %v1571_v59 = vpop.f32.mrf.mxu1 }
 0x1e1   :  { %v1532_v60 = vpop.f32.mrf.mxu0 }
 0x1e2   :  { %v1572_v61 = vadd.f32 %v1571_v59, %v1531_v58  ;;  %v1533_v57 = vadd.f32 %v1532_v60, %v1492_v55  ;;  %v1573_v32 = vpop.f32.mrf.mxu1  ;;  %v1650_v58 = vld [vmem:[#allocation16 + $0x4] sm:$0x3] }
 0x1e3   :  { %v1534_v62 = vpop.f32.mrf.mxu0  ;;  %v1655_v59 = vrot.slane %v1650_v58, %v18125_v16  ;;  %v1659_v60 = vrot.slane %v1650_v58, %v18128_v21 }
 0x1e4   :  { %v1574_v63 = vadd.f32 %v1573_v32, %v1533_v57  ;;  %v1575_v0 = vpop.f32.mrf.mxu1  ;;  %v1580_v1 = vmax.f32 %v1572_v61, 0.0 }
 0x1e5   :  { %v1535_v2 = vpop.f32.mrf.mxu0 }
 0x1e6   :  { %v1581_v3 = vmax.f32 %v1574_v63, 0.0  ;;  %v1576_v4 = vpop.f32.mrf.mxu1  ;;  %v1584_v9 = vpack.c.bf16 %v1580_v1, %v1580_v1 }
 0x1e8   :  { %v1585_v5 = vpack.c.bf16 %v1581_v3, %v1581_v3 }
 0x1ea   :  { %2055 = vmatprep.mubr.bf16.mxu1 %v1585_v5 }
 0x1eb   :  { %2056 = vmatmul.mubr.bf16.vlgmr.msra.gmra.mxu1 %v1584_v9  ;;  %v16985_v9 = vld [vmem:[#allocation13 + $0x470] ss:$8 sps:$4 sm:$0xff]  }
 0x1ec   :  { %16483 = vmatpush3.bf16.msra.mxu1 %v17009_v46  ;;  %v2359_v46 = vpack.c.bf16 %v2358_v45, %v2358_v45  ;;  %16498 = vmatprep.mubr.msk.bf16.mxu1 %vm17981_vm0, %v17979_v47 }
 0x1ed   :  { %16484 = vmatprep.subr.bf16.mxu1 %v17979_v47 }
 0x1f0   :  { %16485 = vmatpush3.bf16.msra.mxu1 %v17010_v56  ;;  %v17015_v56 = vld [vmem:[%s18496_s8 + $0x8] sm:$0xff]  }
 0x1f1   :  { %16486 = vmatprep.subr.bf16.mxu1 %v17979_v47 }
 0x1f4   :  { %16487 = vmatpush3.bf16.msra.mxu1 %v17011_v48  ;;  %v17016_v48 = vld [vmem:[%s18496_s8] sm:$0xff]  }
 0x1f5   :  { %16488 = vmatprep.subr.bf16.mxu1 %v17979_v47 }
 0x1f8   :  { %16489 = vmatpush3.bf16.msra.mxu1 %v17012_v49  ;;  %v17017_v49 = vld [vmem:[#allocation14 + $0x178] sm:$0xff]  }
 0x1f9   :  { %16490 = vmatprep.subr.bf16.mxu1 %v17979_v47 }
 0x1fc   :  { %16491 = vmatpush3.bf16.msra.mxu1 %v17013_v50 }
 0x1fd   :  { %16492 = vmatprep.subr.bf16.mxu1 %v17979_v47 }
 0x200   :  { %16493 = vmatpush3.bf16.msra.mxu1 %v17014_v38  ;;  %v14764_v38 = vld [vmem:[#allocation16 + $0x6] ss:$0 sm:$0xff] }
 0x201   :  { %16494 = vmatprep.subr.bf16.mxu1 %v17979_v47 }
 0x204   :  { %16495 = vmatpush3.bf16.msra.mxu1 %v17015_v56  ;;  %v17034_v56 = vld [vmem:[%s18496_s8 + $0x70] sm:$0xff]  }
 0x205   :  { %16496 = vmatprep.subr.bf16.mxu1 %v17979_v47 }
 0x208   :  { %16497 = vmatpush3.bf16.msra.mxu1 %v17016_v48  ;;  %v17035_v48 = vld [vmem:[%s18496_s8 + $0x68] sm:$0xff]  }
 0x209   :  { %16388 = vmatprep.subr.bf16.mxu1 %v17017_v49  ;;  %v17036_v49 = vld [vmem:[%s18496_s8 + $0x60] sm:$0xff]  }
 0x269   :  { %v2016_v52 = vpop.f32.mrf.mxu0 }
 0x26a   :  { %v2017_v61 = vadd.f32 %v2016_v52, %v1655_v59 }
 0x26b   :  { %v2018_v53 = vpop.f32.mrf.mxu0 }
 0x26c   :  { %v2019_v32 = vadd.f32 %v2018_v53, %v1659_v60  ;;  %v17018_v60 = vld [vmem:[#allocation14 + $0x138] sm:$0xff]  }
 0x26d   :  { %v2020_v54 = vpop.f32.mrf.mxu0 }
 0x26f   :  { %v2021_v55 = vpop.f32.mrf.mxu0 }
 0x2ab   :  { %v2057_v57 = vpop.f32.mrf.mxu1 }
 0x2ac   :  { %v2058_v62 = vadd.f32 %v2057_v57, %v2017_v61  ;;  %v17019_v57 = vld [vmem:[#allocation14 + $0x170] sm:$0xff]  }
 0x2ad   :  { %v2059_v63 = vpop.f32.mrf.mxu1 }
 0x2ae   :  { %v2060_v0 = vadd.f32 %v2059_v63, %v2019_v32  ;;  %v2064_v1 = vmax.f32 %v2058_v62, 0.0  ;;  %v17020_v32 = vld [vmem:[#allocation14 + $0x130] sm:$0xff]   ;;  %v17021_v62 = vld [vmem:[#allocation14 + $0x168] sm:$0xff]  }
 0x2af   :  { %v2061_v2 = vpop.f32.mrf.mxu1  ;;  %v17022_v63 = vld [vmem:[#allocation14 + $0x128] sm:$0xff]  }
 0x2b0   :  { %v2065_v3 = vmax.f32 %v2060_v0, 0.0  ;;  %v2066_v10 = vpack.c.bf16 %v2064_v1, %v2064_v1  ;;  %v17023_v0 = vld [vmem:[#allocation14 + $0x160] sm:$0xff]   ;;  %v17025_v2 = vld [vmem:[#allocation14 + $0x158] sm:$0xff]  }
 0x2b1   :  { %v2062_v4 = vpop.f32.mrf.mxu1  ;;  %v17024_v1 = vld [vmem:[#allocation14 + $0x120] sm:$0xff]  }
 0x2b2   :  { %v2067_v5 = vpack.c.bf16 %v2065_v3, %v2065_v3  ;;  %v17026_v3 = vld [vmem:[#allocation14 + $0x118] sm:$0xff]   ;;  %v17027_v4 = vld [vmem:[#allocation14 + $0x150] sm:$0xff]  }
 0x2b4   :  { %2235 = vmatprep.mubr.bf16.mxu0 %v2067_v5  ;;  %v2376_v5 = vld [vmem:[#allocation16 + $0x17] sm:$0x3] }
 0x2b5   :  { %2236 = vmatmul.mubr.bf16.vlgmr.msra.gmra.mxu0 %v2066_v10  ;;  %v2381_v10 = vrot.slane %v2376_v5, %v18125_v16 }
 0x2b6   :  { %2469 = vmatpush1.bf16.msra.mxu0 %v16985_v9  ;;  %2500 = vmatprep.mubr.bf16.mxu0 %v17980_v22  ;;  %v17028_v9 = vld [vmem:[#allocation14 + $0x110] sm:$0xff]  }
 0x2b7   :  { %2470 = vmatprep.subr.bf16.mxu0 %v16990_v11  ;;  %v17029_v11 = vld [vmem:[#allocation14 + $0x148] sm:$0xff]  }
 0x2ba   :  { %2471 = vmatpush1.bf16.msra.mxu0 %v16988_v17  ;;  %v2385_v17 = vrot.slane %v2376_v5, %v18128_v21 }
 0x2bb   :  { %2472 = vmatprep.subr.bf16.mxu0 %v16993_v23 }
 0x2be   :  { %2473 = vmatpush1.bf16.msra.mxu0 %v16991_v27  ;;  %v17030_v27 = vld [vmem:[#allocation14 + $0x108] sm:$0xff]  }
 0x2bf   :  { %2474 = vmatprep.subr.bf16.mxu0 %v16996_v33 }
 0x2c2   :  { %2475 = vmatpush1.bf16.msra.mxu0 %v16994_v35  ;;  %v17031_v35 = vld [vmem:[#allocation14 + $0x140] sm:$0xff]  }
 0x2c3   :  { %2476 = vmatprep.subr.bf16.mxu0 %v16999_v36 }
 0x2c6   :  { %2477 = vmatpush1.bf16.msra.mxu0 %v16997_v37 }
 0x2c7   :  { %2478 = vmatprep.subr.bf16.mxu0 %v17002_v39 }
 0x2ca   :  { %2479 = vmatpush1.bf16.msra.mxu0 %v17000_v40  ;;  %v17032_v40 = vld [vmem:[#allocation14 + $0x100] sm:$0xff]  }
 0x2cb   :  { %2480 = vmatprep.subr.bf16.mxu0 %v17005_v41 }
 0x2ce   :  { %2481 = vmatpush1.bf16.msra.mxu0 %v17003_v42 }
 0x2cf   :  { %2482 = vmatprep.subr.bf16.mxu0 %v17008_v43 }
 0x2d2   :  { %2483 = vmatpush1.bf16.msra.mxu0 %v17006_v44 }
 0x2d3   :  { %16502 = vmatprep.subr.bf16.mxu0 %v17979_v47 }
 0x2d5   :  { %2501 = vmatmul.mubr.bf16.vlgmr.msra.gmra.mxu0 %v2359_v46  ;;  %v17033_v46 = vld [vmem:[%s18496_s8 + $0x78] sm:$0xff]  }
 0x2d6   :  { %16518 = vmatprep.mubr.msk.bf16.mxu0 %vm17981_vm0, %v17979_v47  ;;  %16503 = vmatpush3.bf16.msra.mxu0 %v17033_v46 }
 0x2d7   :  { %16504 = vmatprep.subr.bf16.mxu0 %v17979_v47 }
 0x2da   :  { %16505 = vmatpush3.bf16.msra.mxu0 %v17034_v56 }
 0x2db   :  { %16506 = vmatprep.subr.bf16.mxu0 %v17979_v47 }
 0x2de   :  { %16507 = vmatpush3.bf16.msra.mxu0 %v17035_v48 }
 0x2df   :  { %16508 = vmatprep.subr.bf16.mxu0 %v17979_v47 }
 0x2e2   :  { %16509 = vmatpush3.bf16.msra.mxu0 %v17036_v49 }
 0x2e3   :  { %16510 = vmatprep.subr.bf16.mxu0 %v17979_v47 }
 0x375   :  { %v16373_v50 = vpop.f32.mrf.mxu0 }
 0x377   :  { %v16374_v52 = vpop.f32.mrf.mxu0 }
 0x378   :  { %v16375_v53 = vadd.f32 %v16374_v52, %v16373_v50  ;;  %v17037_v50 = vld [vmem:[%s18496_s8 + $0x58] sm:$0xff]   ;;  %v17039_v52 = vld [vmem:[%s18496_s8 + $0x48] sm:$0xff]  }
 0x379   :  { %v16376_v54 = vpop.f32.mrf.mxu0  ;;  %16511 = vmatpush3.bf16.msra.mxu0 %v17037_v50 }
 0x37a   :  { %v2238_v55 = vadd.f32 %v16375_v53, %v14764_v38  ;;  %16512 = vmatprep.subr.bf16.mxu0 %v17979_v47  ;;  %v17038_v38 = vld [vmem:[%s18496_s8 + $0x50] sm:$0xff]   ;;  %v17040_v53 = vld [vmem:[%s18496_s8 + $0x40] sm:$0xff]   ;;  %v17041_v54 = vld [vmem:[%s18497_s9 + $0x18] sm:$0xff]  }
 0x37b   :  { %v16377_v58 = vpop.f32.mrf.mxu0 }
 0x37c   :  { %v2243_v59 = vmax.f32 %v2238_v55, 0.0  ;;  %v17042_v55 = vld [vmem:[%s18497_s9 + $0x10] sm:$0xff]   ;;  %v14781_v58 = vld [vmem:[#allocation16 + $0x7] ss:$0 sm:$0xff] }
 0x37d   :  { %16513 = vmatpush3.bf16.msra.mxu0 %v17038_v38 }
 0x37e   :  { %v2244_v61 = vpack.c.bf16 %v2243_v59, %v2243_v59  ;;  %16514 = vmatprep.subr.bf16.mxu0 %v17979_v47 }
 0x380   :  { %16499 = vmatmul.mubr.bf16.vlgmr.msra.gmra.mxu1 %v2244_v61 }
 0x381   :  { %16389 = vmatpush3.bf16.msra.mxu1 %v17018_v60  ;;  %16515 = vmatpush3.bf16.msra.mxu0 %v17039_v52 }
 0x382   :  { %16390 = vmatprep.subr.bf16.mxu1 %v17019_v57  ;;  %16516 = vmatprep.subr.bf16.mxu0 %v17979_v47 }
 0x385   :  { %16391 = vmatpush3.bf16.msra.mxu1 %v17020_v32  ;;  %16517 = vmatpush3.bf16.msra.mxu0 %v17040_v53 }
 0x386   :  { %16392 = vmatprep.subr.bf16.mxu1 %v17021_v62 }
 0x389   :  { %16393 = vmatpush3.bf16.msra.mxu1 %v17022_v63 }
 0x38a   :  { %16394 = vmatprep.subr.bf16.mxu1 %v17023_v0 }
 0x38d   :  { %16395 = vmatpush3.bf16.msra.mxu1 %v17024_v1  ;;  %v14806_v1 = vld [vmem:[#allocation16 + $0x19] ss:$0 sm:$0xff] }
 0x38e   :  { %16396 = vmatprep.subr.bf16.mxu1 %v17025_v2 }
 0x391   :  { %16397 = vmatpush3.bf16.msra.mxu1 %v17026_v3 }
 0x392   :  { %16398 = vmatprep.subr.bf16.mxu1 %v17027_v4 }
 0x395   :  { %v2502_v23 = vpop.f32.mrf.mxu0  ;;  %16399 = vmatpush3.bf16.msra.mxu1 %v17028_v9 }
 0x396   :  { %v2503_v33 = vadd.f32 %v2502_v23, %v2381_v10  ;;  %16400 = vmatprep.subr.bf16.mxu1 %v17029_v11  ;;  %v17044_v23 = vld [vmem:[%s18497_s9] sm:$0xff]  }
 0x397   :  { %v2504_v36 = vpop.f32.mrf.mxu0 }
 0x398   :  { %v2505_v37 = vadd.f32 %v2504_v36, %v2385_v17  ;;  %v2509_v41 = vmax.f32 %v2503_v33, 0.0  ;;  %v17043_v17 = vld [vmem:[%s18497_s9 + $0x8] sm:$0xff]  }
 0x399   :  { %v2506_v39 = vpop.f32.mrf.mxu0  ;;  %16401 = vmatpush3.bf16.msra.mxu1 %v17030_v27  ;;  %v14823_v27 = vld [vmem:[#allocation16 + $0x1a] ss:$0 sm:$0xff] }
 0x39a   :  { %v2510_v42 = vmax.f32 %v2505_v37, 0.0  ;;  %16402 = vmatprep.subr.bf16.mxu1 %v17031_v35  ;;  %v2511_v45 = vpack.c.bf16 %v2509_v41, %v2509_v41 }
 0x39b   :  { %v2507_v43 = vpop.f32.mrf.mxu0 }
 0x39c   :  { %v2512_v44 = vpack.c.bf16 %v2510_v42, %v2510_v42 }
 0x39d   :  { %16403 = vmatpush3.bf16.msra.mxu1 %v17032_v40 }
 0x39e   :  { %2680 = vmatprep.mubr.bf16.mxu1 %v2512_v44  ;;  %16522 = vmatprep.subr.bf16.mxu1 %v17979_v47 }
 0x3a0   :  { %2681 = vmatmul.mubr.bf16.vlgmr.msra.gmra.mxu1 %v2511_v45 }
 0x3a1   :  { %16530 = vmatprep.mubr.msk.bf16.mxu1 %vm17981_vm0, %v17979_v47  ;;  %16523 = vmatpush3.bf16.msra.mxu1 %v17041_v54 }
 0x3a2   :  { %16524 = vmatprep.subr.bf16.mxu1 %v17979_v47 }
 0x3a5   :  { %16525 = vmatpush3.bf16.msra.mxu1 %v17042_v55 }
 0x3a6   :  { %16526 = vmatprep.subr.bf16.mxu1 %v17979_v47 }
 0x3a9   :  { %16527 = vmatpush3.bf16.msra.mxu1 %v17043_v17 }
 0x3aa   :  { %16528 = vmatprep.subr.bf16.mxu1 %v17979_v47 }
 0x3ad   :  { %16529 = vmatpush3.bf16.msra.mxu1 %v17044_v23 }
 0x440   :  { %v2350_v59 = vpop.f32.mrf.mxu1 }
 0x441   :  { %v2351_v60 = vadd.f32 %v14781_v58, %v2350_v59 }
 0x442   :  { %v16500_v61 = vpop.f32.mrf.mxu1 }
 0x443   :  { %v2356_v57 = vmax.f32 %v2351_v60, 0.0 }
 0x444   :  { %v2353_v32 = vpop.f32.mrf.mxu1 }
 0x445   :  { %v18224_v62 = vpack.c.bf16 %v2356_v57, %v2356_v57 }
 0x446   :  { %v16501_v63 = vpop.f32.mrf.mxu1 }
 0x460   :  { %v16404_v0 = vpop.f32.mrf.mxu1 }
 0x462   :  { %v16405_v2 = vpop.f32.mrf.mxu1 }
 0x463   :  { %v16406_v3 = vadd.f32 %v16405_v2, %v16404_v0 }
 0x464   :  { %v16407_v4 = vpop.f32.mrf.mxu1 }
 0x465   :  { %v2683_v5 = vadd.f32 %v16406_v3, %v14806_v1 }
 0x466   :  { %v16408_v9 = vpop.f32.mrf.mxu1 }
 0x467   :  { %v2688_v10 = vmax.f32 %v2683_v5, 0.0 }
 0x469   :  { %v2689_v11 = vpack.c.bf16 %v2688_v10, %v2688_v10 }
 0x46b   :  { %16519 = vmatmul.mubr.bf16.vlgmr.msra.gmra.mxu0 %v2689_v11 }
 0x52b   :  { %v2795_v33 = vpop.f32.mrf.mxu0 }
 0x52c   :  { %v2796_v35 = vadd.f32 %v14823_v27, %v2795_v33 }
 0x52d   :  { %v16520_v36 = vpop.f32.mrf.mxu0 }
 0x52e   :  { %v2801_v37 = vmax.f32 %v2796_v35, 0.0 }
 0x52f   :  { %v2798_v39 = vpop.f32.mrf.mxu0 }
 0x530   :  { %v2802_v40 = vpack.c.bf16 %v2801_v37, %v2801_v37 }
 0x531   :  { %v16521_v41 = vpop.f32.mrf.mxu0 }
 0x532   :  { %16531 = vmatmul.mubr.msk.bf16.vlgmr.msra.gmra.mxu1 %vm2842_vm1, %v2802_v40 }
 0x533   :  { %17911 = shalt.err (!%p17908_p11)  }
 0x534   :  { %133 = dma.hbm_to_vmem [thread:$0]  %s18491_s3, 131072, %s131_s26, [#allocation4] }
 0x535   :  { %s17920_s30 = scalar_lea.vmem %s143_s27, 32768  ;;  %p17925_p13 = scmp.lt.s32.totalorder %s143_s27, %s143_s27 }
 0x536   :  { %p17921_p12 = scmp.ne.s32.totalorder %s143_s27, %s17920_s30  ;;  %p17926_p0 = scmp.lt.s32.totalorder %s17920_s30, %s17920_s30 }
 0x538   :  { %p17927_p1 = por %p17926_p0, %p17925_p13 }
 0x53a   :  { %p17928_p2 = pnand %p17927_p1, %p17921_p12 }
 0x53c   :  { %17931 = shalt.err (!%p17928_p2)  }
 0x53d   :  { %145 = dma.hbm_to_vmem [thread:$0]  %s18492_s4, 32768, %s143_s27, [#allocation4 + $0x1]  ;;  %v14832_v42 = vld [vmem:[#allocation16 + $0x1b] ss:$0 sm:$0xff] }
 0x5f2   :  { %v2880_v43 = vpop.f32.mrf.mxu1 }
 0x5f3   :  { %v2881_v44 = vadd.f32 %v14832_v42, %v2880_v43 }
 0x5f4   :  { %v16532_v45 = vpop.f32.mrf.mxu1 }
 0x5f5   :  { %v2886_v46 = vmax.f32 %v2881_v44, 0.0 }
 0x5f6   :  { %v2883_v56 = vpop.f32.mrf.mxu1 }
 0x5f7   :  { %v18240_v48 = vpack.c.bf16 %v2886_v46, %v2886_v46 }
 0x5f8   :  { %v16533_v49 = vpop.f32.mrf.mxu1 }
 0x5f9   :  { %17960 = dma.done.wait [#allocation4], 131072 }
 0x5fa   :  { %17961 = vsyncadd [#allocation4], 4294836224  ;;  %9142 = vmatprep.mubr.bf16.mxu1 %v18068_v7  ;;  %9183 = vmatprep.mubr.bf16.mxu0 %v18072_v12  ;;  %v2980_v50 = vld [vmem:[#allocation2 + $0x1c0] sm:$0xff] }
 0x5fb   :  { %v2984_v38 = vld [vmem:[#allocation2 + $0x1e0] sm:$0xff] }
 0x5fc   :  { %v3108_v52 = vld [vmem:[#allocation2 + $0x5c0] sm:$0xff]  ;;  %v14895_v53 = vcombine.high %v2980_v50, %v2984_v38  ;;  %v14894_v55 = vcombine.low %v2980_v50, %v2984_v38 }
 0x5fd   :  { %v3112_v54 = vld [vmem:[#allocation2 + $0x5e0] sm:$0xff] }
 0x5fe   :  { %v2972_v58 = vld [vmem:[#allocation2 + $0x180] sm:$0xff]  ;;  %v15023_v60 = vcombine.high %v3108_v52, %v3112_v54  ;;  %v15022_v61 = vcombine.low %v3108_v52, %v3112_v54  ;;  %9110 = vmatprep.subr.bf16.mxu1 %v14895_v53 }
 0x5ff   :  { %v2976_v59 = vld [vmem:[#allocation2 + $0x1a0] sm:$0xff]  ;;  %9111 = vmatpush1.bf16.msra.mxu1 %v14894_v55 }
 0x600   :  { %v14887_v57 = vcombine.high %v2972_v58, %v2976_v59  ;;  %v3100_v32 = vld [vmem:[#allocation2 + $0x580] sm:$0xff]  ;;  %9151 = vmatprep.subr.bf16.mxu0 %v15023_v60  ;;  %v14886_v5 = vcombine.low %v2972_v58, %v2976_v59 }
 0x601   :  { %v3104_v63 = vld [vmem:[#allocation2 + $0x5a0] sm:$0xff]  ;;  %9152 = vmatpush1.bf16.msra.mxu0 %v15022_v61 }
 0x602   :  { %v2964_v0 = vld [vmem:[#allocation2 + $0x140] sm:$0xff]  ;;  %v15015_v1 = vcombine.high %v3100_v32, %v3104_v63  ;;  %9112 = vmatprep.subr.bf16.mxu1 %v14887_v57  ;;  %v15014_v9 = vcombine.low %v3100_v32, %v3104_v63 }
 0x603   :  { %v2968_v2 = vld [vmem:[#allocation2 + $0x160] sm:$0xff]  ;;  %9113 = vmatpush1.bf16.msra.mxu1 %v14886_v5 }
 0x604   :  { %v3092_v3 = vld [vmem:[#allocation2 + $0x540] sm:$0xff]  ;;  %v14879_v10 = vcombine.high %v2964_v0, %v2968_v2  ;;  %9153 = vmatprep.subr.bf16.mxu0 %v15015_v1  ;;  %v14878_v35 = vcombine.low %v2964_v0, %v2968_v2 }
 0x605   :  { %v3096_v4 = vld [vmem:[#allocation2 + $0x560] sm:$0xff]  ;;  %9154 = vmatpush1.bf16.msra.mxu0 %v15014_v9 }
 0x606   :  { %v15007_v11 = vcombine.high %v3092_v3, %v3096_v4  ;;  %v2956_v17 = vld [vmem:[#allocation2 + $0x100] sm:$0xff]  ;;  %9114 = vmatprep.subr.bf16.mxu1 %v14879_v10  ;;  %v15006_v36 = vcombine.low %v3092_v3, %v3096_v4 }
 0x607   :  { %v2960_v23 = vld [vmem:[#allocation2 + $0x120] sm:$0xff]  ;;  %9115 = vmatpush1.bf16.msra.mxu1 %v14878_v35 }
 0x608   :  { %v3084_v27 = vld [vmem:[#allocation2 + $0x500] sm:$0xff]  ;;  %v14871_v37 = vcombine.high %v2956_v17, %v2960_v23  ;;  %9155 = vmatprep.subr.bf16.mxu0 %v15007_v11  ;;  %v14870_v44 = vcombine.low %v2956_v17, %v2960_v23 }
 0x609   :  { %v3088_v33 = vld [vmem:[#allocation2 + $0x520] sm:$0xff]  ;;  %9156 = vmatpush1.bf16.msra.mxu0 %v15006_v36 }
 0x60a   :  { %v14999_v39 = vcombine.high %v3084_v27, %v3088_v33  ;;  %v2948_v40 = vld [vmem:[#allocation2 + $0xc0] sm:$0xff]  ;;  %9116 = vmatprep.subr.bf16.mxu1 %v14871_v37  ;;  %v14998_v45 = vcombine.low %v3084_v27, %v3088_v33 }
 0x60b   :  { %v2952_v41 = vld [vmem:[#allocation2 + $0xe0] sm:$0xff]  ;;  %9117 = vmatpush1.bf16.msra.mxu1 %v14870_v44 }
 0x60c   :  { %v3076_v42 = vld [vmem:[#allocation2 + $0x4c0] sm:$0xff]  ;;  %v14863_v46 = vcombine.high %v2948_v40, %v2952_v41  ;;  %9157 = vmatprep.subr.bf16.mxu0 %v14999_v39  ;;  %v14862_v53 = vcombine.low %v2948_v40, %v2952_v41 }
 0x60d   :  { %v3080_v43 = vld [vmem:[#allocation2 + $0x4e0] sm:$0xff]  ;;  %9158 = vmatpush1.bf16.msra.mxu0 %v14998_v45 }
 0x60e   :  { %v14991_v56 = vcombine.high %v3076_v42, %v3080_v43  ;;  %v2940_v49 = vld [vmem:[#allocation2 + $0x80] sm:$0xff]  ;;  %9118 = vmatprep.subr.bf16.mxu1 %v14863_v46  ;;  %v14990_v54 = vcombine.low %v3076_v42, %v3080_v43 }
 0x60f   :  { %v2944_v50 = vld [vmem:[#allocation2 + $0xa0] sm:$0xff]  ;;  %9119 = vmatpush1.bf16.msra.mxu1 %v14862_v53 }
 0x610   :  { %v3068_v38 = vld [vmem:[#allocation2 + $0x480] sm:$0xff]  ;;  %v14855_v55 = vcombine.high %v2940_v49, %v2944_v50  ;;  %9159 = vmatprep.subr.bf16.mxu0 %v14991_v56  ;;  %v14854_v32 = vcombine.low %v2940_v49, %v2944_v50 }
 0x611   :  { %v3072_v52 = vld [vmem:[#allocation2 + $0x4a0] sm:$0xff]  ;;  %9160 = vmatpush1.bf16.msra.mxu0 %v14990_v54 }
 0x612   :  { %v14983_v58 = vcombine.high %v3068_v38, %v3072_v52  ;;  %v2932_v59 = vld [vmem:[#allocation2 + $0x40] sm:$0xff]  ;;  %9120 = vmatprep.subr.bf16.mxu1 %v14855_v55  ;;  %v14982_v63 = vcombine.low %v3068_v38, %v3072_v52 }
 0x613   :  { %v2936_v60 = vld [vmem:[#allocation2 + $0x60] sm:$0xff]  ;;  %9121 = vmatpush1.bf16.msra.mxu1 %v14854_v32 }
 0x614   :  { %v3060_v61 = vld [vmem:[#allocation2 + $0x440] sm:$0xff]  ;;  %v14847_v0 = vcombine.high %v2932_v59, %v2936_v60  ;;  %9161 = vmatprep.subr.bf16.mxu0 %v14983_v58  ;;  %v14846_v9 = vcombine.low %v2932_v59, %v2936_v60 }
 0x615   :  { %v3064_v57 = vld [vmem:[#allocation2 + $0x460] sm:$0xff]  ;;  %9162 = vmatpush1.bf16.msra.mxu0 %v14982_v63 }
 0x616   :  { %v14975_v1 = vcombine.high %v3060_v61, %v3064_v57  ;;  %v2924_v2 = vld [vmem:[#allocation2] sm:$0xff]  ;;  %9122 = vmatprep.subr.bf16.mxu1 %v14847_v0  ;;  %v14974_v10 = vcombine.low %v3060_v61, %v3064_v57 }
 0x617   :  { %v2928_v3 = vld [vmem:[#allocation2 + $0x20] sm:$0xff]  ;;  %9123 = vmatpush1.bf16.msra.mxu1 %v14846_v9 }
 0x618   :  { %v3052_v4 = vld [vmem:[#allocation2 + $0x400] sm:$0xff]  ;;  %v14839_v11 = vcombine.high %v2924_v2, %v2928_v3  ;;  %9163 = vmatprep.subr.bf16.mxu0 %v14975_v1  ;;  %v14838_v36 = vcombine.low %v2924_v2, %v2928_v3 }
 0x619   :  { %v3056_v5 = vld [vmem:[#allocation2 + $0x420] sm:$0xff]  ;;  %9164 = vmatpush1.bf16.msra.mxu0 %v14974_v10 }
 0x61a   :  { %v14967_v17 = vcombine.high %v3052_v4, %v3056_v5  ;;  %v3044_v23 = vld [vmem:[#allocation2 + $0x3c0] sm:$0xff]  ;;  %9124 = vmatprep.subr.bf16.mxu1 %v14839_v11  ;;  %v14966_v37 = vcombine.low %v3052_v4, %v3056_v5 }
 0x61b   :  { %v3048_v27 = vld [vmem:[#allocation2 + $0x3e0] sm:$0xff]  ;;  %9125 = vmatpush1.bf16.msra.mxu1 %v14838_v36 }
 0x61c   :  { %v3172_v33 = vld [vmem:[#allocation2 + $0x7c0] sm:$0xff]  ;;  %v14959_v39 = vcombine.high %v3044_v23, %v3048_v27  ;;  %9165 = vmatprep.subr.bf16.mxu0 %v14967_v17  ;;  %v14958_v45 = vcombine.low %v3044_v23, %v3048_v27 }
 0x61d   :  { %v3176_v35 = vld [vmem:[#allocation2 + $0x7e0] sm:$0xff]  ;;  %9166 = vmatpush1.bf16.msra.mxu0 %v14966_v37 }
 0x61e   :  { %v15087_v40 = vcombine.high %v3172_v33, %v3176_v35  ;;  %v3036_v41 = vld [vmem:[#allocation2 + $0x380] sm:$0xff]  ;;  %9126 = vmatprep.subr.bf16.mxu1 %v14959_v39  ;;  %v15086_v46 = vcombine.low %v3172_v33, %v3176_v35 }
 0x61f   :  { %v3040_v42 = vld [vmem:[#allocation2 + $0x3a0] sm:$0xff]  ;;  %9127 = vmatpush2.bf16.msra.mxu1 %v14958_v45 }
 0x620   :  { %v3164_v43 = vld [vmem:[#allocation2 + $0x780] sm:$0xff]  ;;  %v14951_v56 = vcombine.high %v3036_v41, %v3040_v42  ;;  %9167 = vmatprep.subr.bf16.mxu0 %v15087_v40  ;;  %v14950_v54 = vcombine.low %v3036_v41, %v3040_v42 }
 0x621   :  { %v3168_v44 = vld [vmem:[#allocation2 + $0x7a0] sm:$0xff]  ;;  %9168 = vmatpush2.bf16.msra.mxu0 %v15086_v46 }
 0x622   :  { %v15079_v49 = vcombine.high %v3164_v43, %v3168_v44  ;;  %v3028_v50 = vld [vmem:[#allocation2 + $0x340] sm:$0xff]  ;;  %9128 = vmatprep.subr.bf16.mxu1 %v14951_v56  ;;  %v15078_v55 = vcombine.low %v3164_v43, %v3168_v44 }
 0x623   :  { %v3032_v38 = vld [vmem:[#allocation2 + $0x360] sm:$0xff]  ;;  %9129 = vmatpush2.bf16.msra.mxu1 %v14950_v54 }
 0x624   :  { %v3156_v52 = vld [vmem:[#allocation2 + $0x740] sm:$0xff]  ;;  %v14943_v58 = vcombine.high %v3028_v50, %v3032_v38  ;;  %9169 = vmatprep.subr.bf16.mxu0 %v15079_v49  ;;  %v14942_v63 = vcombine.low %v3028_v50, %v3032_v38 }
 0x625   :  { %v3160_v53 = vld [vmem:[#allocation2 + $0x760] sm:$0xff]  ;;  %9170 = vmatpush2.bf16.msra.mxu0 %v15078_v55 }
 0x626   :  { %v15071_v59 = vcombine.high %v3156_v52, %v3160_v53  ;;  %v3020_v60 = vld [vmem:[#allocation2 + $0x300] sm:$0xff]  ;;  %9130 = vmatprep.subr.bf16.mxu1 %v14943_v58  ;;  %v15070_v0 = vcombine.low %v3156_v52, %v3160_v53 }
 0x627   :  { %v3024_v61 = vld [vmem:[#allocation2 + $0x320] sm:$0xff]  ;;  %9131 = vmatpush2.bf16.msra.mxu1 %v14942_v63 }
 0x628   :  { %v3148_v57 = vld [vmem:[#allocation2 + $0x700] sm:$0xff]  ;;  %v14935_v1 = vcombine.high %v3020_v60, %v3024_v61  ;;  %9171 = vmatprep.subr.bf16.mxu0 %v15071_v59  ;;  %v14934_v10 = vcombine.low %v3020_v60, %v3024_v61 }
 0x629   :  { %v3152_v32 = vld [vmem:[#allocation2 + $0x720] sm:$0xff]  ;;  %9172 = vmatpush2.bf16.msra.mxu0 %v15070_v0 }
 0x62a   :  { %v15063_v2 = vcombine.high %v3148_v57, %v3152_v32  ;;  %v3012_v3 = vld [vmem:[#allocation2 + $0x2c0] sm:$0xff]  ;;  %9132 = vmatprep.subr.bf16.mxu1 %v14935_v1  ;;  %v15062_v11 = vcombine.low %v3148_v57, %v3152_v32 }
 0x62b   :  { %v3016_v4 = vld [vmem:[#allocation2 + $0x2e0] sm:$0xff]  ;;  %9133 = vmatpush2.bf16.msra.mxu1 %v14934_v10 }
 0x62c   :  { %v3140_v5 = vld [vmem:[#allocation2 + $0x6c0] sm:$0xff]  ;;  %v14927_v17 = vcombine.high %v3012_v3, %v3016_v4  ;;  %9173 = vmatprep.subr.bf16.mxu0 %v15063_v2  ;;  %v14926_v37 = vcombine.low %v3012_v3, %v3016_v4 }
 0x62d   :  { %v3144_v9 = vld [vmem:[#allocation2 + $0x6e0] sm:$0xff]  ;;  %9174 = vmatpush2.bf16.msra.mxu0 %v15062_v11 }
 0x62e   :  { %v15055_v23 = vcombine.high %v3140_v5, %v3144_v9  ;;  %v3004_v27 = vld [vmem:[#allocation2 + $0x280] sm:$0xff]  ;;  %9134 = vmatprep.subr.bf16.mxu1 %v14927_v17  ;;  %v15054_v39 = vcombine.low %v3140_v5, %v3144_v9 }
 0x62f   :  { %v3008_v33 = vld [vmem:[#allocation2 + $0x2a0] sm:$0xff]  ;;  %9135 = vmatpush2.bf16.msra.mxu1 %v14926_v37 }
 0x630   :  { %v3132_v35 = vld [vmem:[#allocation2 + $0x680] sm:$0xff]  ;;  %v14919_v40 = vcombine.high %v3004_v27, %v3008_v33  ;;  %9175 = vmatprep.subr.bf16.mxu0 %v15055_v23  ;;  %v14918_v46 = vcombine.low %v3004_v27, %v3008_v33 }
 0x631   :  { %v3136_v36 = vld [vmem:[#allocation2 + $0x6a0] sm:$0xff]  ;;  %9176 = vmatpush2.bf16.msra.mxu0 %v15054_v39 }
 0x632   :  { %v15047_v41 = vcombine.high %v3132_v35, %v3136_v36  ;;  %v2996_v42 = vld [vmem:[#allocation2 + $0x240] sm:$0xff]  ;;  %9136 = vmatprep.subr.bf16.mxu1 %v14919_v40  ;;  %v15046_v56 = vcombine.low %v3132_v35, %v3136_v36 }
 0x633   :  { %v3000_v43 = vld [vmem:[#allocation2 + $0x260] sm:$0xff]  ;;  %9137 = vmatpush2.bf16.msra.mxu1 %v14918_v46 }
 0x634   :  { %v3124_v44 = vld [vmem:[#allocation2 + $0x640] sm:$0xff]  ;;  %v14911_v49 = vcombine.high %v2996_v42, %v3000_v43  ;;  %9177 = vmatprep.subr.bf16.mxu0 %v15047_v41  ;;  %v14910_v55 = vcombine.low %v2996_v42, %v3000_v43 }
 0x635   :  { %v3128_v45 = vld [vmem:[#allocation2 + $0x660] sm:$0xff]  ;;  %9178 = vmatpush2.bf16.msra.mxu0 %v15046_v56 }
 0x636   :  { %v15039_v50 = vcombine.high %v3124_v44, %v3128_v45  ;;  %v2988_v38 = vld [vmem:[#allocation2 + $0x200] sm:$0xff]  ;;  %9138 = vmatprep.subr.bf16.mxu1 %v14911_v49  ;;  %v15038_v58 = vcombine.low %v3124_v44, %v3128_v45 }
 0x637   :  { %v2992_v52 = vld [vmem:[#allocation2 + $0x220] sm:$0xff]  ;;  %9139 = vmatpush2.bf16.msra.mxu1 %v14910_v55 }
 0x638   :  { %v3116_v53 = vld [vmem:[#allocation2 + $0x600] sm:$0xff]  ;;  %v14903_v59 = vcombine.high %v2988_v38, %v2992_v52  ;;  %9179 = vmatprep.subr.bf16.mxu0 %v15039_v50  ;;  %v14902_v0 = vcombine.low %v2988_v38, %v2992_v52 }
 0x639   :  { %v3120_v54 = vld [vmem:[#allocation2 + $0x620] sm:$0xff]  ;;  %9180 = vmatpush2.bf16.msra.mxu0 %v15038_v58 }
 0x63a   :  { %v15031_v60 = vcombine.high %v3116_v53, %v3120_v54  ;;  %v3236_v61 = vld [vmem:[#allocation2 + $0x9c0] sm:$0xff]  ;;  %9140 = vmatprep.subr.bf16.mxu1 %v14903_v59  ;;  %v15030_v1 = vcombine.low %v3116_v53, %v3120_v54 }
 0x63b   :  { %v3240_v57 = vld [vmem:[#allocation2 + $0x9e0] sm:$0xff]  ;;  %9141 = vmatpush2.bf16.msra.mxu1 %v14902_v0 }
 0x63c   :  { %v3364_v32 = vld [vmem:[#allocation2 + $0xdc0] sm:$0xff]  ;;  %v15151_v2 = vcombine.high %v3236_v61, %v3240_v57  ;;  %9181 = vmatprep.subr.bf16.mxu0 %v15031_v60  ;;  %v15150_v11 = vcombine.low %v3236_v61, %v3240_v57 }
 0x63d   :  { %v3368_v63 = vld [vmem:[#allocation2 + $0xde0] sm:$0xff]  ;;  %9182 = vmatpush2.bf16.msra.mxu0 %v15030_v1 }
 0x63e   :  { %v15279_v3 = vcombine.high %v3364_v32, %v3368_v63  ;;  %v3228_v4 = vld [vmem:[#allocation2 + $0x980] sm:$0xff]  ;;  %9192 = vmatprep.subr.bf16.mxu1 %v15151_v2  ;;  %v15278_v17 = vcombine.low %v3364_v32, %v3368_v63  ;;  %9143 = vmatmul.mubr.bf16.vlgmr.msra.gmra.mxu1 %v18066_v6 }
 0x63f   :  { %v3232_v5 = vld [vmem:[#allocation2 + $0x9a0] sm:$0xff]  ;;  %9193 = vmatpush1.bf16.msra.mxu1 %v15150_v11  ;;  %9224 = vmatprep.mubr.bf16.mxu1 %v18076_v14 }
 0x640   :  { %v3356_v9 = vld [vmem:[#allocation2 + $0xd80] sm:$0xff]  ;;  %v15143_v23 = vcombine.high %v3228_v4, %v3232_v5  ;;  %9233 = vmatprep.subr.bf16.mxu0 %v15279_v3  ;;  %9184 = vmatmul.mubr.bf16.vlgmr.msra.gmra.mxu0 %v18070_v8  ;;  %v15142_v39 = vcombine.low %v3228_v4, %v3232_v5 }
 0x641   :  { %v3360_v10 = vld [vmem:[#allocation2 + $0xda0] sm:$0xff]  ;;  %9234 = vmatpush1.bf16.msra.mxu0 %v15278_v17  ;;  %9265 = vmatprep.mubr.bf16.mxu0 %v18080_v19 }
 0x642   :  { %v15271_v27 = vcombine.high %v3356_v9, %v3360_v10  ;;  %v3220_v33 = vld [vmem:[#allocation2 + $0x940] sm:$0xff]  ;;  %9194 = vmatprep.subr.bf16.mxu1 %v15143_v23  ;;  %v15270_v40 = vcombine.low %v3356_v9, %v3360_v10 }
 0x643   :  { %v3224_v35 = vld [vmem:[#allocation2 + $0x960] sm:$0xff]  ;;  %9195 = vmatpush1.bf16.msra.mxu1 %v15142_v39 }
 0x644   :  { %v3348_v36 = vld [vmem:[#allocation2 + $0xd40] sm:$0xff]  ;;  %v15135_v41 = vcombine.high %v3220_v33, %v3224_v35  ;;  %9235 = vmatprep.subr.bf16.mxu0 %v15271_v27  ;;  %v15134_v56 = vcombine.low %v3220_v33, %v3224_v35 }
 0x645   :  { %v3352_v37 = vld [vmem:[#allocation2 + $0xd60] sm:$0xff]  ;;  %9236 = vmatpush1.bf16.msra.mxu0 %v15270_v40 }
 0x646   :  { %v15263_v42 = vcombine.high %v3348_v36, %v3352_v37  ;;  %v3212_v43 = vld [vmem:[#allocation2 + $0x900] sm:$0xff]  ;;  %9196 = vmatprep.subr.bf16.mxu1 %v15135_v41  ;;  %v15262_v49 = vcombine.low %v3348_v36, %v3352_v37 }
 0x647   :  { %v3216_v44 = vld [vmem:[#allocation2 + $0x920] sm:$0xff]  ;;  %9197 = vmatpush1.bf16.msra.mxu1 %v15134_v56 }
 0x648   :  { %v3340_v45 = vld [vmem:[#allocation2 + $0xd00] sm:$0xff]  ;;  %v15127_v50 = vcombine.high %v3212_v43, %v3216_v44  ;;  %9237 = vmatprep.subr.bf16.mxu0 %v15263_v42  ;;  %v15126_v58 = vcombine.low %v3212_v43, %v3216_v44 }
 0x649   :  { %v3344_v46 = vld [vmem:[#allocation2 + $0xd20] sm:$0xff]  ;;  %9238 = vmatpush1.bf16.msra.mxu0 %v15262_v49 }
 0x64a   :  { %v15255_v38 = vcombine.high %v3340_v45, %v3344_v46  ;;  %v3204_v52 = vld [vmem:[#allocation2 + $0x8c0] sm:$0xff]  ;;  %9198 = vmatprep.subr.bf16.mxu1 %v15127_v50  ;;  %v15254_v59 = vcombine.low %v3340_v45, %v3344_v46 }
 0x64b   :  { %v3208_v53 = vld [vmem:[#allocation2 + $0x8e0] sm:$0xff]  ;;  %9199 = vmatpush1.bf16.msra.mxu1 %v15126_v58 }
 0x64c   :  { %v3332_v54 = vld [vmem:[#allocation2 + $0xcc0] sm:$0xff]  ;;  %v15119_v60 = vcombine.high %v3204_v52, %v3208_v53  ;;  %9239 = vmatprep.subr.bf16.mxu0 %v15255_v38  ;;  %v15118_v1 = vcombine.low %v3204_v52, %v3208_v53 }
 0x64d   :  { %v3336_v55 = vld [vmem:[#allocation2 + $0xce0] sm:$0xff]  ;;  %9240 = vmatpush1.bf16.msra.mxu0 %v15254_v59 }
 0x64e   :  { %v15247_v61 = vcombine.high %v3332_v54, %v3336_v55  ;;  %v3196_v57 = vld [vmem:[#allocation2 + $0x880] sm:$0xff]  ;;  %9200 = vmatprep.subr.bf16.mxu1 %v15119_v60  ;;  %v15246_v2 = vcombine.low %v3332_v54, %v3336_v55 }
 0x64f   :  { %v3200_v32 = vld [vmem:[#allocation2 + $0x8a0] sm:$0xff]  ;;  %9201 = vmatpush1.bf16.msra.mxu1 %v15118_v1 }
 0x650   :  { %v3324_v63 = vld [vmem:[#allocation2 + $0xc80] sm:$0xff]  ;;  %v15111_v3 = vcombine.high %v3196_v57, %v3200_v32  ;;  %9241 = vmatprep.subr.bf16.mxu0 %v15247_v61  ;;  %v15110_v17 = vcombine.low %v3196_v57, %v3200_v32 }
 0x651   :  { %v3328_v0 = vld [vmem:[#allocation2 + $0xca0] sm:$0xff]  ;;  %9242 = vmatpush1.bf16.msra.mxu0 %v15246_v2 }
 0x652   :  { %v15239_v4 = vcombine.high %v3324_v63, %v3328_v0  ;;  %v3188_v5 = vld [vmem:[#allocation2 + $0x840] sm:$0xff]  ;;  %9202 = vmatprep.subr.bf16.mxu1 %v15111_v3  ;;  %v15238_v23 = vcombine.low %v3324_v63, %v3328_v0 }
 0x653   :  { %v3192_v9 = vld [vmem:[#allocation2 + $0x860] sm:$0xff]  ;;  %9203 = vmatpush1.bf16.msra.mxu1 %v15110_v17 }
 0x654   :  { %v3316_v10 = vld [vmem:[#allocation2 + $0xc40] sm:$0xff]  ;;  %v15103_v27 = vcombine.high %v3188_v5, %v3192_v9  ;;  %9243 = vmatprep.subr.bf16.mxu0 %v15239_v4  ;;  %v15102_v40 = vcombine.low %v3188_v5, %v3192_v9 }
 0x655   :  { %v3320_v11 = vld [vmem:[#allocation2 + $0xc60] sm:$0xff]  ;;  %9244 = vmatpush1.bf16.msra.mxu0 %v15238_v23 }
 0x656   :  { %v15231_v33 = vcombine.high %v3316_v10, %v3320_v11  ;;  %v3180_v35 = vld [vmem:[#allocation2 + $0x800] sm:$0xff]  ;;  %9204 = vmatprep.subr.bf16.mxu1 %v15103_v27  ;;  %v15230_v41 = vcombine.low %v3316_v10, %v3320_v11 }
 0x657   :  { %v3184_v36 = vld [vmem:[#allocation2 + $0x820] sm:$0xff]  ;;  %9205 = vmatpush1.bf16.msra.mxu1 %v15102_v40 }
 0x658   :  { %v3308_v37 = vld [vmem:[#allocation2 + $0xc00] sm:$0xff]  ;;  %v15095_v42 = vcombine.high %v3180_v35, %v3184_v36  ;;  %9245 = vmatprep.subr.bf16.mxu0 %v15231_v33  ;;  %v15094_v49 = vcombine.low %v3180_v35, %v3184_v36 }
 0x659   :  { %v3312_v39 = vld [vmem:[#allocation2 + $0xc20] sm:$0xff]  ;;  %9246 = vmatpush1.bf16.msra.mxu0 %v15230_v41 }
 0x65a   :  { %v15223_v43 = vcombine.high %v3308_v37, %v3312_v39  ;;  %v3300_v44 = vld [vmem:[#allocation2 + $0xbc0] sm:$0xff]  ;;  %9206 = vmatprep.subr.bf16.mxu1 %v15095_v42  ;;  %v15222_v50 = vcombine.low %v3308_v37, %v3312_v39 }
 0x65b   :  { %v3304_v45 = vld [vmem:[#allocation2 + $0xbe0] sm:$0xff]  ;;  %9207 = vmatpush1.bf16.msra.mxu1 %v15094_v49 }
 0x65c   :  { %v3428_v46 = vld [vmem:[#allocation2 + $0xfc0] sm:$0xff]  ;;  %v15215_v38 = vcombine.high %v3300_v44, %v3304_v45  ;;  %9247 = vmatprep.subr.bf16.mxu0 %v15223_v43  ;;  %v15214_v59 = vcombine.low %v3300_v44, %v3304_v45 }
 0x65d   :  { %v3432_v56 = vld [vmem:[#allocation2 + $0xfe0] sm:$0xff]  ;;  %9248 = vmatpush1.bf16.msra.mxu0 %v15222_v50 }
 0x65e   :  { %v15343_v52 = vcombine.high %v3428_v46, %v3432_v56  ;;  %v3292_v53 = vld [vmem:[#allocation2 + $0xb80] sm:$0xff]  ;;  %9208 = vmatprep.subr.bf16.mxu1 %v15215_v38  ;;  %v15342_v60 = vcombine.low %v3428_v46, %v3432_v56 }
 0x65f   :  { %v3296_v54 = vld [vmem:[#allocation2 + $0xba0] sm:$0xff]  ;;  %9209 = vmatpush2.bf16.msra.mxu1 %v15214_v59 }
 0x660   :  { %v3420_v55 = vld [vmem:[#allocation2 + $0xf80] sm:$0xff]  ;;  %v15207_v61 = vcombine.high %v3292_v53, %v3296_v54  ;;  %9249 = vmatprep.subr.bf16.mxu0 %v15343_v52  ;;  %v15206_v2 = vcombine.low %v3292_v53, %v3296_v54 }
 0x661   :  { %v3424_v58 = vld [vmem:[#allocation2 + $0xfa0] sm:$0xff]  ;;  %9250 = vmatpush2.bf16.msra.mxu0 %v15342_v60 }
 0x662   :  { %v15335_v57 = vcombine.high %v3420_v55, %v3424_v58  ;;  %v3284_v32 = vld [vmem:[#allocation2 + $0xb40] sm:$0xff]  ;;  %9210 = vmatprep.subr.bf16.mxu1 %v15207_v61  ;;  %v15334_v3 = vcombine.low %v3420_v55, %v3424_v58 }
 0x663   :  { %v3288_v63 = vld [vmem:[#allocation2 + $0xb60] sm:$0xff]  ;;  %9211 = vmatpush2.bf16.msra.mxu1 %v15206_v2 }
 0x664   :  { %v3412_v0 = vld [vmem:[#allocation2 + $0xf40] sm:$0xff]  ;;  %v15199_v4 = vcombine.high %v3284_v32, %v3288_v63  ;;  %9251 = vmatprep.subr.bf16.mxu0 %v15335_v57  ;;  %v15198_v23 = vcombine.low %v3284_v32, %v3288_v63 }
 0x665   :  { %v3416_v1 = vld [vmem:[#allocation2 + $0xf60] sm:$0xff]  ;;  %9252 = vmatpush2.bf16.msra.mxu0 %v15334_v3 }
 0x666   :  { %v15327_v5 = vcombine.high %v3412_v0, %v3416_v1  ;;  %v3276_v9 = vld [vmem:[#allocation2 + $0xb00] sm:$0xff]  ;;  %9212 = vmatprep.subr.bf16.mxu1 %v15199_v4  ;;  %v15326_v27 = vcombine.low %v3412_v0, %v3416_v1 }
 0x667   :  { %v3280_v10 = vld [vmem:[#allocation2 + $0xb20] sm:$0xff]  ;;  %9213 = vmatpush2.bf16.msra.mxu1 %v15198_v23 }
 0x668   :  { %v3404_v11 = vld [vmem:[#allocation2 + $0xf00] sm:$0xff]  ;;  %v15191_v33 = vcombine.high %v3276_v9, %v3280_v10  ;;  %9253 = vmatprep.subr.bf16.mxu0 %v15327_v5  ;;  %v15190_v41 = vcombine.low %v3276_v9, %v3280_v10 }
 0x669   :  { %v3408_v17 = vld [vmem:[#allocation2 + $0xf20] sm:$0xff]  ;;  %9254 = vmatpush2.bf16.msra.mxu0 %v15326_v27 }
 0x66a   :  { %v15319_v35 = vcombine.high %v3404_v11, %v3408_v17  ;;  %v3268_v36 = vld [vmem:[#allocation2 + $0xac0] sm:$0xff]  ;;  %9214 = vmatprep.subr.bf16.mxu1 %v15191_v33  ;;  %v15318_v42 = vcombine.low %v3404_v11, %v3408_v17 }
 0x66b   :  { %v3272_v37 = vld [vmem:[#allocation2 + $0xae0] sm:$0xff]  ;;  %9215 = vmatpush2.bf16.msra.mxu1 %v15190_v41 }
 0x66c   :  { %v3396_v39 = vld [vmem:[#allocation2 + $0xec0] sm:$0xff]  ;;  %v15183_v43 = vcombine.high %v3268_v36, %v3272_v37  ;;  %9255 = vmatprep.subr.bf16.mxu0 %v15319_v35  ;;  %v15182_v50 = vcombine.low %v3268_v36, %v3272_v37 }
 0x66d   :  { %v3400_v40 = vld [vmem:[#allocation2 + $0xee0] sm:$0xff]  ;;  %9256 = vmatpush2.bf16.msra.mxu0 %v15318_v42 }
 0x66e   :  { %v15311_v44 = vcombine.high %v3396_v39, %v3400_v40  ;;  %v3260_v45 = vld [vmem:[#allocation2 + $0xa80] sm:$0xff]  ;;  %9216 = vmatprep.subr.bf16.mxu1 %v15183_v43  ;;  %v15310_v38 = vcombine.low %v3396_v39, %v3400_v40 }
 0x66f   :  { %v3264_v46 = vld [vmem:[#allocation2 + $0xaa0] sm:$0xff]  ;;  %9217 = vmatpush2.bf16.msra.mxu1 %v15182_v50 }
 0x670   :  { %v3388_v56 = vld [vmem:[#allocation2 + $0xe80] sm:$0xff]  ;;  %v15175_v52 = vcombine.high %v3260_v45, %v3264_v46  ;;  %9257 = vmatprep.subr.bf16.mxu0 %v15311_v44  ;;  %v15174_v60 = vcombine.low %v3260_v45, %v3264_v46 }
 0x671   :  { %v3392_v49 = vld [vmem:[#allocation2 + $0xea0] sm:$0xff]  ;;  %9258 = vmatpush2.bf16.msra.mxu0 %v15310_v38 }
 0x672   :  { %v15303_v53 = vcombine.high %v3388_v56, %v3392_v49  ;;  %v3252_v54 = vld [vmem:[#allocation2 + $0xa40] sm:$0xff]  ;;  %9218 = vmatprep.subr.bf16.mxu1 %v15175_v52  ;;  %v15302_v61 = vcombine.low %v3388_v56, %v3392_v49 }
 0x673   :  { %v3256_v55 = vld [vmem:[#allocation2 + $0xa60] sm:$0xff]  ;;  %9219 = vmatpush2.bf16.msra.mxu1 %v15174_v60 }
 0x674   :  { %v3380_v58 = vld [vmem:[#allocation2 + $0xe40] sm:$0xff]  ;;  %v15167_v57 = vcombine.high %v3252_v54, %v3256_v55  ;;  %9259 = vmatprep.subr.bf16.mxu0 %v15303_v53  ;;  %v15166_v3 = vcombine.low %v3252_v54, %v3256_v55 }
 0x675   :  { %v3384_v59 = vld [vmem:[#allocation2 + $0xe60] sm:$0xff]  ;;  %9260 = vmatpush2.bf16.msra.mxu0 %v15302_v61 }
 0x676   :  { %v15295_v32 = vcombine.high %v3380_v58, %v3384_v59  ;;  %v3244_v63 = vld [vmem:[#allocation2 + $0xa00] sm:$0xff]  ;;  %9220 = vmatprep.subr.bf16.mxu1 %v15167_v57  ;;  %v15294_v4 = vcombine.low %v3380_v58, %v3384_v59 }
 0x677   :  { %v3248_v0 = vld [vmem:[#allocation2 + $0xa20] sm:$0xff]  ;;  %9221 = vmatpush2.bf16.msra.mxu1 %v15166_v3 }
 0x678   :  { %v3372_v1 = vld [vmem:[#allocation2 + $0xe00] sm:$0xff]  ;;  %v15159_v5 = vcombine.high %v3244_v63, %v3248_v0  ;;  %9261 = vmatprep.subr.bf16.mxu0 %v15295_v32  ;;  %v15158_v27 = vcombine.low %v3244_v63, %v3248_v0 }
 0x679   :  { %v3376_v2 = vld [vmem:[#allocation2 + $0xe20] sm:$0xff]  ;;  %9262 = vmatpush2.bf16.msra.mxu0 %v15294_v4 }
 0x67a   :  { %v15287_v9 = vcombine.high %v3372_v1, %v3376_v2  ;;  %v3492_v10 = vld [vmem:[#allocation2 + $0x11c0] sm:$0xff]  ;;  %9222 = vmatprep.subr.bf16.mxu1 %v15159_v5  ;;  %v15286_v33 = vcombine.low %v3372_v1, %v3376_v2 }
 0x67b   :  { %v3496_v11 = vld [vmem:[#allocation2 + $0x11e0] sm:$0xff]  ;;  %9223 = vmatpush2.bf16.msra.mxu1 %v15158_v27 }
 0x67c   :  { %v3620_v17 = vld [vmem:[#allocation2 + $0x15c0] sm:$0xff]  ;;  %v15407_v35 = vcombine.high %v3492_v10, %v3496_v11  ;;  %9263 = vmatprep.subr.bf16.mxu0 %v15287_v9  ;;  %v15406_v42 = vcombine.low %v3492_v10, %v3496_v11 }
 0x67d   :  { %v3624_v23 = vld [vmem:[#allocation2 + $0x15e0] sm:$0xff]  ;;  %9264 = vmatpush2.bf16.msra.mxu0 %v15286_v33 }
 0x67e   :  { %v15535_v36 = vcombine.high %v3620_v17, %v3624_v23  ;;  %v3484_v37 = vld [vmem:[#allocation2 + $0x1180] sm:$0xff]  ;;  %9274 = vmatprep.subr.bf16.mxu1 %v15407_v35  ;;  %v15534_v43 = vcombine.low %v3620_v17, %v3624_v23  ;;  %9225 = vmatmul.mubr.bf16.vlgmr.msra.gmra.mxu1 %v18074_v13 }
 0x67f   :  { %v3488_v39 = vld [vmem:[#allocation2 + $0x11a0] sm:$0xff]  ;;  %9275 = vmatpush1.bf16.msra.mxu1 %v15406_v42  ;;  %9306 = vmatprep.mubr.bf16.mxu1 %v18084_v24 }
 0x680   :  { %v3612_v40 = vld [vmem:[#allocation2 + $0x1580] sm:$0xff]  ;;  %v15399_v44 = vcombine.high %v3484_v37, %v3488_v39  ;;  %9315 = vmatprep.subr.bf16.mxu0 %v15535_v36  ;;  %9266 = vmatmul.mubr.bf16.vlgmr.msra.gmra.mxu0 %v18078_v18  ;;  %v15398_v38 = vcombine.low %v3484_v37, %v3488_v39 }
 0x681   :  { %v3616_v41 = vld [vmem:[#allocation2 + $0x15a0] sm:$0xff]  ;;  %9316 = vmatpush1.bf16.msra.mxu0 %v15534_v43  ;;  %9347 = vmatprep.mubr.bf16.mxu0 %v18088_v26 }
 0x682   :  { %v15527_v45 = vcombine.high %v3612_v40, %v3616_v41  ;;  %v3476_v46 = vld [vmem:[#allocation2 + $0x1140] sm:$0xff]  ;;  %9276 = vmatprep.subr.bf16.mxu1 %v15399_v44  ;;  %v15526_v52 = vcombine.low %v3612_v40, %v3616_v41 }
 0x683   :  { %v3480_v56 = vld [vmem:[#allocation2 + $0x1160] sm:$0xff]  ;;  %9277 = vmatpush1.bf16.msra.mxu1 %v15398_v38 }
 0x684   :  { %v3604_v49 = vld [vmem:[#allocation2 + $0x1540] sm:$0xff]  ;;  %v15391_v53 = vcombine.high %v3476_v46, %v3480_v56  ;;  %9317 = vmatprep.subr.bf16.mxu0 %v15527_v45  ;;  %v15390_v61 = vcombine.low %v3476_v46, %v3480_v56 }
 0x685   :  { %v3608_v50 = vld [vmem:[#allocation2 + $0x1560] sm:$0xff]  ;;  %9318 = vmatpush1.bf16.msra.mxu0 %v15526_v52 }
 0x686   :  { %v15519_v54 = vcombine.high %v3604_v49, %v3608_v50  ;;  %v3468_v55 = vld [vmem:[#allocation2 + $0x1100] sm:$0xff]  ;;  %9278 = vmatprep.subr.bf16.mxu1 %v15391_v53  ;;  %v15518_v57 = vcombine.low %v3604_v49, %v3608_v50 }
 0x687   :  { %v3472_v58 = vld [vmem:[#allocation2 + $0x1120] sm:$0xff]  ;;  %9279 = vmatpush1.bf16.msra.mxu1 %v15390_v61 }
 0x688   :  { %v3596_v59 = vld [vmem:[#allocation2 + $0x1500] sm:$0xff]  ;;  %v15383_v32 = vcombine.high %v3468_v55, %v3472_v58  ;;  %9319 = vmatprep.subr.bf16.mxu0 %v15519_v54  ;;  %v15382_v4 = vcombine.low %v3468_v55, %v3472_v58 }
 0x689   :  { %v3600_v60 = vld [vmem:[#allocation2 + $0x1520] sm:$0xff]  ;;  %9320 = vmatpush1.bf16.msra.mxu0 %v15518_v57 }
 0x68a   :  { %v15511_v63 = vcombine.high %v3596_v59, %v3600_v60  ;;  %v3460_v0 = vld [vmem:[#allocation2 + $0x10c0] sm:$0xff]  ;;  %9280 = vmatprep.subr.bf16.mxu1 %v15383_v32  ;;  %v15510_v5 = vcombine.low %v3596_v59, %v3600_v60 }
 0x68b   :  { %v3464_v1 = vld [vmem:[#allocation2 + $0x10e0] sm:$0xff]  ;;  %9281 = vmatpush1.bf16.msra.mxu1 %v15382_v4 }
 0x68c   :  { %v3588_v2 = vld [vmem:[#allocation2 + $0x14c0] sm:$0xff]  ;;  %v15375_v9 = vcombine.high %v3460_v0, %v3464_v1  ;;  %9321 = vmatprep.subr.bf16.mxu0 %v15511_v63  ;;  %v15374_v33 = vcombine.low %v3460_v0, %v3464_v1 }
 0x68d   :  { %v3592_v3 = vld [vmem:[#allocation2 + $0x14e0] sm:$0xff]  ;;  %9322 = vmatpush1.bf16.msra.mxu0 %v15510_v5 }
 0x68e   :  { %v15503_v10 = vcombine.high %v3588_v2, %v3592_v3  ;;  %v3452_v11 = vld [vmem:[#allocation2 + $0x1080] sm:$0xff]  ;;  %9282 = vmatprep.subr.bf16.mxu1 %v15375_v9  ;;  %v15502_v35 = vcombine.low %v3588_v2, %v3592_v3 }
 0x68f   :  { %v3456_v17 = vld [vmem:[#allocation2 + $0x10a0] sm:$0xff]  ;;  %9283 = vmatpush1.bf16.msra.mxu1 %v15374_v33 }
 0x690   :  { %v3580_v23 = vld [vmem:[#allocation2 + $0x1480] sm:$0xff]  ;;  %v15367_v36 = vcombine.high %v3452_v11, %v3456_v17  ;;  %9323 = vmatprep.subr.bf16.mxu0 %v15503_v10  ;;  %v15366_v43 = vcombine.low %v3452_v11, %v3456_v17 }
 0x691   :  { %v3584_v27 = vld [vmem:[#allocation2 + $0x14a0] sm:$0xff]  ;;  %9324 = vmatpush1.bf16.msra.mxu0 %v15502_v35 }
 0x692   :  { %v15495_v37 = vcombine.high %v3580_v23, %v3584_v27  ;;  %v3444_v39 = vld [vmem:[#allocation2 + $0x1040] sm:$0xff]  ;;  %9284 = vmatprep.subr.bf16.mxu1 %v15367_v36  ;;  %v15494_v44 = vcombine.low %v3580_v23, %v3584_v27 }
 0x693   :  { %v3448_v40 = vld [vmem:[#allocation2 + $0x1060] sm:$0xff]  ;;  %9285 = vmatpush1.bf16.msra.mxu1 %v15366_v43 }
 0x694   :  { %v3572_v41 = vld [vmem:[#allocation2 + $0x1440] sm:$0xff]  ;;  %v15359_v45 = vcombine.high %v3444_v39, %v3448_v40  ;;  %9325 = vmatprep.subr.bf16.mxu0 %v15495_v37  ;;  %v15358_v52 = vcombine.low %v3444_v39, %v3448_v40 }
 0x695   :  { %v3576_v42 = vld [vmem:[#allocation2 + $0x1460] sm:$0xff]  ;;  %9326 = vmatpush1.bf16.msra.mxu0 %v15494_v44 }
 0x696   :  { %v15487_v46 = vcombine.high %v3572_v41, %v3576_v42  ;;  %v3436_v56 = vld [vmem:[#allocation2 + $0x1000] sm:$0xff]  ;;  %9286 = vmatprep.subr.bf16.mxu1 %v15359_v45  ;;  %v15486_v53 = vcombine.low %v3572_v41, %v3576_v42 }
 0x697   :  { %v3440_v49 = vld [vmem:[#allocation2 + $0x1020] sm:$0xff]  ;;  %9287 = vmatpush1.bf16.msra.mxu1 %v15358_v52 }
 0x698   :  { %v3564_v50 = vld [vmem:[#allocation2 + $0x1400] sm:$0xff]  ;;  %v15351_v54 = vcombine.high %v3436_v56, %v3440_v49  ;;  %9327 = vmatprep.subr.bf16.mxu0 %v15487_v46  ;;  %v15350_v57 = vcombine.low %v3436_v56, %v3440_v49 }
 0x699   :  { %v3568_v38 = vld [vmem:[#allocation2 + $0x1420] sm:$0xff]  ;;  %9328 = vmatpush1.bf16.msra.mxu0 %v15486_v53 }
 0x69a   :  { %v15479_v55 = vcombine.high %v3564_v50, %v3568_v38  ;;  %v3556_v58 = vld [vmem:[#allocation2 + $0x13c0] sm:$0xff]  ;;  %9288 = vmatprep.subr.bf16.mxu1 %v15351_v54  ;;  %v15478_v32 = vcombine.low %v3564_v50, %v3568_v38 }
 0x69b   :  { %v3560_v59 = vld [vmem:[#allocation2 + $0x13e0] sm:$0xff]  ;;  %9289 = vmatpush1.bf16.msra.mxu1 %v15350_v57 }
 0x69c   :  { %v3684_v60 = vld [vmem:[#allocation2 + $0x17c0] sm:$0xff]  ;;  %v15471_v63 = vcombine.high %v3556_v58, %v3560_v59  ;;  %9329 = vmatprep.subr.bf16.mxu0 %v15479_v55  ;;  %v15470_v5 = vcombine.low %v3556_v58, %v3560_v59 }
 0x69d   :  { %v3688_v61 = vld [vmem:[#allocation2 + $0x17e0] sm:$0xff]  ;;  %9330 = vmatpush1.bf16.msra.mxu0 %v15478_v32 }
 0x69e   :  { %v15599_v0 = vcombine.high %v3684_v60, %v3688_v61  ;;  %v3548_v1 = vld [vmem:[#allocation2 + $0x1380] sm:$0xff]  ;;  %9290 = vmatprep.subr.bf16.mxu1 %v15471_v63  ;;  %v15598_v9 = vcombine.low %v3684_v60, %v3688_v61 }
 0x69f   :  { %v3552_v2 = vld [vmem:[#allocation2 + $0x13a0] sm:$0xff]  ;;  %9291 = vmatpush2.bf16.msra.mxu1 %v15470_v5 }
 0x6a0   :  { %v3676_v3 = vld [vmem:[#allocation2 + $0x1780] sm:$0xff]  ;;  %v15463_v10 = vcombine.high %v3548_v1, %v3552_v2  ;;  %9331 = vmatprep.subr.bf16.mxu0 %v15599_v0  ;;  %v15462_v35 = vcombine.low %v3548_v1, %v3552_v2 }
 0x6a1   :  { %v3680_v4 = vld [vmem:[#allocation2 + $0x17a0] sm:$0xff]  ;;  %9332 = vmatpush2.bf16.msra.mxu0 %v15598_v9 }
 0x6a2   :  { %v15591_v11 = vcombine.high %v3676_v3, %v3680_v4  ;;  %v3540_v17 = vld [vmem:[#allocation2 + $0x1340] sm:$0xff]  ;;  %9292 = vmatprep.subr.bf16.mxu1 %v15463_v10  ;;  %v15590_v36 = vcombine.low %v3676_v3, %v3680_v4 }
 0x6a3   :  { %v3544_v23 = vld [vmem:[#allocation2 + $0x1360] sm:$0xff]  ;;  %9293 = vmatpush2.bf16.msra.mxu1 %v15462_v35 }
 0x6a4   :  { %v3668_v27 = vld [vmem:[#allocation2 + $0x1740] sm:$0xff]  ;;  %v15455_v37 = vcombine.high %v3540_v17, %v3544_v23  ;;  %9333 = vmatprep.subr.bf16.mxu0 %v15591_v11  ;;  %v15454_v44 = vcombine.low %v3540_v17, %v3544_v23 }
 0x6a5   :  { %v3672_v33 = vld [vmem:[#allocation2 + $0x1760] sm:$0xff]  ;;  %9334 = vmatpush2.bf16.msra.mxu0 %v15590_v36 }
 0x6a6   :  { %v15583_v39 = vcombine.high %v3668_v27, %v3672_v33  ;;  %v3532_v40 = vld [vmem:[#allocation2 + $0x1300] sm:$0xff]  ;;  %9294 = vmatprep.subr.bf16.mxu1 %v15455_v37  ;;  %v15582_v45 = vcombine.low %v3668_v27, %v3672_v33 }
 0x6a7   :  { %v3536_v41 = vld [vmem:[#allocation2 + $0x1320] sm:$0xff]  ;;  %9295 = vmatpush2.bf16.msra.mxu1 %v15454_v44 }
 0x6a8   :  { %v3660_v42 = vld [vmem:[#allocation2 + $0x1700] sm:$0xff]  ;;  %v15447_v46 = vcombine.high %v3532_v40, %v3536_v41  ;;  %9335 = vmatprep.subr.bf16.mxu0 %v15583_v39  ;;  %v15446_v53 = vcombine.low %v3532_v40, %v3536_v41 }
 0x6a9   :  { %v3664_v43 = vld [vmem:[#allocation2 + $0x1720] sm:$0xff]  ;;  %9336 = vmatpush2.bf16.msra.mxu0 %v15582_v45 }
 0x6aa   :  { %v15575_v56 = vcombine.high %v3660_v42, %v3664_v43  ;;  %v3524_v49 = vld [vmem:[#allocation2 + $0x12c0] sm:$0xff]  ;;  %9296 = vmatprep.subr.bf16.mxu1 %v15447_v46  ;;  %v15574_v54 = vcombine.low %v3660_v42, %v3664_v43 }
 0x6ab   :  { %v3528_v50 = vld [vmem:[#allocation2 + $0x12e0] sm:$0xff]  ;;  %9297 = vmatpush2.bf16.msra.mxu1 %v15446_v53 }
 0x6ac   :  { %v3652_v38 = vld [vmem:[#allocation2 + $0x16c0] sm:$0xff]  ;;  %v15439_v55 = vcombine.high %v3524_v49, %v3528_v50  ;;  %9337 = vmatprep.subr.bf16.mxu0 %v15575_v56  ;;  %v15438_v32 = vcombine.low %v3524_v49, %v3528_v50 }
 0x6ad   :  { %v3656_v52 = vld [vmem:[#allocation2 + $0x16e0] sm:$0xff]  ;;  %9338 = vmatpush2.bf16.msra.mxu0 %v15574_v54 }
 0x6ae   :  { %v15567_v58 = vcombine.high %v3652_v38, %v3656_v52  ;;  %v3516_v59 = vld [vmem:[#allocation2 + $0x1280] sm:$0xff]  ;;  %9298 = vmatprep.subr.bf16.mxu1 %v15439_v55  ;;  %v15566_v63 = vcombine.low %v3652_v38, %v3656_v52 }
 0x6af   :  { %v3520_v60 = vld [vmem:[#allocation2 + $0x12a0] sm:$0xff]  ;;  %9299 = vmatpush2.bf16.msra.mxu1 %v15438_v32 }
 0x6b0   :  { %v3644_v61 = vld [vmem:[#allocation2 + $0x1680] sm:$0xff]  ;;  %v15431_v0 = vcombine.high %v3516_v59, %v3520_v60  ;;  %9339 = vmatprep.subr.bf16.mxu0 %v15567_v58  ;;  %v15430_v9 = vcombine.low %v3516_v59, %v3520_v60 }
 0x6b1   :  { %v3648_v57 = vld [vmem:[#allocation2 + $0x16a0] sm:$0xff]  ;;  %9340 = vmatpush2.bf16.msra.mxu0 %v15566_v63 }
 0x6b2   :  { %v15559_v1 = vcombine.high %v3644_v61, %v3648_v57  ;;  %v3508_v2 = vld [vmem:[#allocation2 + $0x1240] sm:$0xff]  ;;  %9300 = vmatprep.subr.bf16.mxu1 %v15431_v0  ;;  %v15558_v10 = vcombine.low %v3644_v61, %v3648_v57 }
 0x6b3   :  { %v3512_v3 = vld [vmem:[#allocation2 + $0x1260] sm:$0xff]  ;;  %9301 = vmatpush2.bf16.msra.mxu1 %v15430_v9 }
 0x6b4   :  { %v3636_v4 = vld [vmem:[#allocation2 + $0x1640] sm:$0xff]  ;;  %v15423_v11 = vcombine.high %v3508_v2, %v3512_v3  ;;  %9341 = vmatprep.subr.bf16.mxu0 %v15559_v1  ;;  %v15422_v36 = vcombine.low %v3508_v2, %v3512_v3 }
 0x6b5   :  { %v3640_v5 = vld [vmem:[#allocation2 + $0x1660] sm:$0xff]  ;;  %9342 = vmatpush2.bf16.msra.mxu0 %v15558_v10 }
 0x6b6   :  { %v15551_v17 = vcombine.high %v3636_v4, %v3640_v5  ;;  %v3500_v23 = vld [vmem:[#allocation2 + $0x1200] sm:$0xff]  ;;  %9302 = vmatprep.subr.bf16.mxu1 %v15423_v11  ;;  %v15550_v37 = vcombine.low %v3636_v4, %v3640_v5 }
 0x6b7   :  { %v3504_v27 = vld [vmem:[#allocation2 + $0x1220] sm:$0xff]  ;;  %9303 = vmatpush2.bf16.msra.mxu1 %v15422_v36 }
 0x6b8   :  { %v3628_v33 = vld [vmem:[#allocation2 + $0x1600] sm:$0xff]  ;;  %v15415_v39 = vcombine.high %v3500_v23, %v3504_v27  ;;  %9343 = vmatprep.subr.bf16.mxu0 %v15551_v17  ;;  %v15414_v45 = vcombine.low %v3500_v23, %v3504_v27 }
 0x6b9   :  { %v3632_v35 = vld [vmem:[#allocation2 + $0x1620] sm:$0xff]  ;;  %9344 = vmatpush2.bf16.msra.mxu0 %v15550_v37 }
 0x6ba   :  { %v15543_v40 = vcombine.high %v3628_v33, %v3632_v35  ;;  %v3748_v41 = vld [vmem:[#allocation2 + $0x19c0] sm:$0xff]  ;;  %9304 = vmatprep.subr.bf16.mxu1 %v15415_v39  ;;  %v15542_v46 = vcombine.low %v3628_v33, %v3632_v35 }
 0x6bb   :  { %v3752_v42 = vld [vmem:[#allocation2 + $0x19e0] sm:$0xff]  ;;  %9305 = vmatpush2.bf16.msra.mxu1 %v15414_v45 }
 0x6bc   :  { %v3876_v43 = vld [vmem:[#allocation2 + $0x1dc0] sm:$0xff]  ;;  %v15663_v56 = vcombine.high %v3748_v41, %v3752_v42  ;;  %9345 = vmatprep.subr.bf16.mxu0 %v15543_v40  ;;  %v15662_v54 = vcombine.low %v3748_v41, %v3752_v42 }
 0x6bd   :  { %v3880_v44 = vld [vmem:[#allocation2 + $0x1de0] sm:$0xff]  ;;  %9346 = vmatpush2.bf16.msra.mxu0 %v15542_v46 }
 0x6be   :  { %v15791_v49 = vcombine.high %v3876_v43, %v3880_v44  ;;  %v3740_v50 = vld [vmem:[#allocation2 + $0x1980] sm:$0xff]  ;;  %9356 = vmatprep.subr.bf16.mxu1 %v15663_v56  ;;  %v15790_v55 = vcombine.low %v3876_v43, %v3880_v44  ;;  %9307 = vmatmul.mubr.bf16.vlgmr.msra.gmra.mxu1 %v18082_v20 }
 0x6bf   :  { %v3744_v38 = vld [vmem:[#allocation2 + $0x19a0] sm:$0xff]  ;;  %9357 = vmatpush1.bf16.msra.mxu1 %v15662_v54  ;;  %9388 = vmatprep.mubr.bf16.mxu1 %v18092_v29 }
 0x6c0   :  { %v3868_v52 = vld [vmem:[#allocation2 + $0x1d80] sm:$0xff]  ;;  %v15655_v58 = vcombine.high %v3740_v50, %v3744_v38  ;;  %9397 = vmatprep.subr.bf16.mxu0 %v15791_v49  ;;  %9348 = vmatmul.mubr.bf16.vlgmr.msra.gmra.mxu0 %v18086_v25  ;;  %v15654_v63 = vcombine.low %v3740_v50, %v3744_v38 }
 0x6c1   :  { %v3872_v53 = vld [vmem:[#allocation2 + $0x1da0] sm:$0xff]  ;;  %9398 = vmatpush1.bf16.msra.mxu0 %v15790_v55  ;;  %9429 = vmatprep.mubr.bf16.mxu0 %v18096_v31 }
 0x6c2   :  { %v15783_v59 = vcombine.high %v3868_v52, %v3872_v53  ;;  %v3732_v60 = vld [vmem:[#allocation2 + $0x1940] sm:$0xff]  ;;  %9358 = vmatprep.subr.bf16.mxu1 %v15655_v58  ;;  %v15782_v0 = vcombine.low %v3868_v52, %v3872_v53 }
 0x6c3   :  { %v3736_v61 = vld [vmem:[#allocation2 + $0x1960] sm:$0xff]  ;;  %9359 = vmatpush1.bf16.msra.mxu1 %v15654_v63 }
 0x6c4   :  { %v3860_v57 = vld [vmem:[#allocation2 + $0x1d40] sm:$0xff]  ;;  %v15647_v1 = vcombine.high %v3732_v60, %v3736_v61  ;;  %9399 = vmatprep.subr.bf16.mxu0 %v15783_v59  ;;  %v15646_v10 = vcombine.low %v3732_v60, %v3736_v61 }
 0x6c5   :  { %v3864_v32 = vld [vmem:[#allocation2 + $0x1d60] sm:$0xff]  ;;  %9400 = vmatpush1.bf16.msra.mxu0 %v15782_v0 }
 0x6c6   :  { %v15775_v2 = vcombine.high %v3860_v57, %v3864_v32  ;;  %v3724_v3 = vld [vmem:[#allocation2 + $0x1900] sm:$0xff]  ;;  %9360 = vmatprep.subr.bf16.mxu1 %v15647_v1  ;;  %v15774_v11 = vcombine.low %v3860_v57, %v3864_v32 }
 0x6c7   :  { %v3728_v4 = vld [vmem:[#allocation2 + $0x1920] sm:$0xff]  ;;  %9361 = vmatpush1.bf16.msra.mxu1 %v15646_v10 }
 0x6c8   :  { %v3852_v5 = vld [vmem:[#allocation2 + $0x1d00] sm:$0xff]  ;;  %v15639_v17 = vcombine.high %v3724_v3, %v3728_v4  ;;  %9401 = vmatprep.subr.bf16.mxu0 %v15775_v2  ;;  %v15638_v37 = vcombine.low %v3724_v3, %v3728_v4 }
 0x6c9   :  { %v3856_v9 = vld [vmem:[#allocation2 + $0x1d20] sm:$0xff]  ;;  %9402 = vmatpush1.bf16.msra.mxu0 %v15774_v11 }
 0x6ca   :  { %v15767_v23 = vcombine.high %v3852_v5, %v3856_v9  ;;  %v3716_v27 = vld [vmem:[#allocation2 + $0x18c0] sm:$0xff]  ;;  %9362 = vmatprep.subr.bf16.mxu1 %v15639_v17  ;;  %v15766_v39 = vcombine.low %v3852_v5, %v3856_v9 }
 0x6cb   :  { %v3720_v33 = vld [vmem:[#allocation2 + $0x18e0] sm:$0xff]  ;;  %9363 = vmatpush1.bf16.msra.mxu1 %v15638_v37 }
 0x6cc   :  { %v3844_v35 = vld [vmem:[#allocation2 + $0x1cc0] sm:$0xff]  ;;  %v15631_v40 = vcombine.high %v3716_v27, %v3720_v33  ;;  %9403 = vmatprep.subr.bf16.mxu0 %v15767_v23  ;;  %v15630_v46 = vcombine.low %v3716_v27, %v3720_v33 }
 0x6cd   :  { %v3848_v36 = vld [vmem:[#allocation2 + $0x1ce0] sm:$0xff]  ;;  %9404 = vmatpush1.bf16.msra.mxu0 %v15766_v39 }
 0x6ce   :  { %v15759_v41 = vcombine.high %v3844_v35, %v3848_v36  ;;  %v3708_v42 = vld [vmem:[#allocation2 + $0x1880] sm:$0xff]  ;;  %9364 = vmatprep.subr.bf16.mxu1 %v15631_v40  ;;  %v15758_v56 = vcombine.low %v3844_v35, %v3848_v36 }
 0x6cf   :  { %v3712_v43 = vld [vmem:[#allocation2 + $0x18a0] sm:$0xff]  ;;  %9365 = vmatpush1.bf16.msra.mxu1 %v15630_v46 }
 0x6d0   :  { %v3836_v44 = vld [vmem:[#allocation2 + $0x1c80] sm:$0xff]  ;;  %v15623_v49 = vcombine.high %v3708_v42, %v3712_v43  ;;  %9405 = vmatprep.subr.bf16.mxu0 %v15759_v41  ;;  %v15622_v55 = vcombine.low %v3708_v42, %v3712_v43 }
 0x6d1   :  { %v3840_v45 = vld [vmem:[#allocation2 + $0x1ca0] sm:$0xff]  ;;  %9406 = vmatpush1.bf16.msra.mxu0 %v15758_v56 }
 0x6d2   :  { %v15751_v50 = vcombine.high %v3836_v44, %v3840_v45  ;;  %v3700_v38 = vld [vmem:[#allocation2 + $0x1840] sm:$0xff]  ;;  %9366 = vmatprep.subr.bf16.mxu1 %v15623_v49  ;;  %v15750_v58 = vcombine.low %v3836_v44, %v3840_v45 }
 0x6d3   :  { %v3704_v52 = vld [vmem:[#allocation2 + $0x1860] sm:$0xff]  ;;  %9367 = vmatpush1.bf16.msra.mxu1 %v15622_v55 }
 0x6d4   :  { %v3828_v53 = vld [vmem:[#allocation2 + $0x1c40] sm:$0xff]  ;;  %v15615_v59 = vcombine.high %v3700_v38, %v3704_v52  ;;  %9407 = vmatprep.subr.bf16.mxu0 %v15751_v50  ;;  %v15614_v0 = vcombine.low %v3700_v38, %v3704_v52 }
 0x6d5   :  { %v3832_v54 = vld [vmem:[#allocation2 + $0x1c60] sm:$0xff]  ;;  %9408 = vmatpush1.bf16.msra.mxu0 %v15750_v58 }
 0x6d6   :  { %v15743_v60 = vcombine.high %v3828_v53, %v3832_v54  ;;  %v3692_v61 = vld [vmem:[#allocation2 + $0x1800] sm:$0xff]  ;;  %9368 = vmatprep.subr.bf16.mxu1 %v15615_v59  ;;  %v15742_v1 = vcombine.low %v3828_v53, %v3832_v54 }
 0x6d7   :  { %v3696_v57 = vld [vmem:[#allocation2 + $0x1820] sm:$0xff]  ;;  %9369 = vmatpush1.bf16.msra.mxu1 %v15614_v0 }
 0x6d8   :  { %v3820_v32 = vld [vmem:[#allocation2 + $0x1c00] sm:$0xff]  ;;  %v15607_v2 = vcombine.high %v3692_v61, %v3696_v57  ;;  %9409 = vmatprep.subr.bf16.mxu0 %v15743_v60  ;;  %v15606_v11 = vcombine.low %v3692_v61, %v3696_v57 }
 0x6d9   :  { %v3824_v63 = vld [vmem:[#allocation2 + $0x1c20] sm:$0xff]  ;;  %9410 = vmatpush1.bf16.msra.mxu0 %v15742_v1 }
 0x6da   :  { %v15735_v3 = vcombine.high %v3820_v32, %v3824_v63  ;;  %v3812_v4 = vld [vmem:[#allocation2 + $0x1bc0] sm:$0xff]  ;;  %9370 = vmatprep.subr.bf16.mxu1 %v15607_v2  ;;  %v15734_v17 = vcombine.low %v3820_v32, %v3824_v63 }
 0x6db   :  { %v3816_v5 = vld [vmem:[#allocation2 + $0x1be0] sm:$0xff]  ;;  %9371 = vmatpush1.bf16.msra.mxu1 %v15606_v11 }
 0x6dc   :  { %v3940_v9 = vld [vmem:[#allocation2 + $0x1fc0] sm:$0xff]  ;;  %v15727_v23 = vcombine.high %v3812_v4, %v3816_v5  ;;  %9411 = vmatprep.subr.bf16.mxu0 %v15735_v3  ;;  %v15726_v39 = vcombine.low %v3812_v4, %v3816_v5 }
 0x6dd   :  { %v3944_v10 = vld [vmem:[#allocation2 + $0x1fe0] sm:$0xff]  ;;  %9412 = vmatpush1.bf16.msra.mxu0 %v15734_v17 }
 0x6de   :  { %v15855_v27 = vcombine.high %v3940_v9, %v3944_v10  ;;  %v3804_v33 = vld [vmem:[#allocation2 + $0x1b80] sm:$0xff]  ;;  %9372 = vmatprep.subr.bf16.mxu1 %v15727_v23  ;;  %v15854_v40 = vcombine.low %v3940_v9, %v3944_v10 }
 0x6df   :  { %v3808_v35 = vld [vmem:[#allocation2 + $0x1ba0] sm:$0xff]  ;;  %9373 = vmatpush2.bf16.msra.mxu1 %v15726_v39 }
 0x6e0   :  { %v3932_v36 = vld [vmem:[#allocation2 + $0x1f80] sm:$0xff]  ;;  %v15719_v41 = vcombine.high %v3804_v33, %v3808_v35  ;;  %9413 = vmatprep.subr.bf16.mxu0 %v15855_v27  ;;  %v15718_v56 = vcombine.low %v3804_v33, %v3808_v35 }
 0x6e1   :  { %v3936_v37 = vld [vmem:[#allocation2 + $0x1fa0] sm:$0xff]  ;;  %9414 = vmatpush2.bf16.msra.mxu0 %v15854_v40 }
 0x6e2   :  { %v15847_v42 = vcombine.high %v3932_v36, %v3936_v37  ;;  %v3796_v43 = vld [vmem:[#allocation2 + $0x1b40] sm:$0xff]  ;;  %9374 = vmatprep.subr.bf16.mxu1 %v15719_v41  ;;  %v15846_v49 = vcombine.low %v3932_v36, %v3936_v37 }
 0x6e3   :  { %v3800_v44 = vld [vmem:[#allocation2 + $0x1b60] sm:$0xff]  ;;  %9375 = vmatpush2.bf16.msra.mxu1 %v15718_v56 }
 0x6e4   :  { %v3924_v45 = vld [vmem:[#allocation2 + $0x1f40] sm:$0xff]  ;;  %v15711_v50 = vcombine.high %v3796_v43, %v3800_v44  ;;  %9415 = vmatprep.subr.bf16.mxu0 %v15847_v42  ;;  %v15710_v58 = vcombine.low %v3796_v43, %v3800_v44 }
 0x6e5   :  { %v3928_v46 = vld [vmem:[#allocation2 + $0x1f60] sm:$0xff]  ;;  %9416 = vmatpush2.bf16.msra.mxu0 %v15846_v49 }
 0x6e6   :  { %v15839_v38 = vcombine.high %v3924_v45, %v3928_v46  ;;  %v3788_v52 = vld [vmem:[#allocation2 + $0x1b00] sm:$0xff]  ;;  %9376 = vmatprep.subr.bf16.mxu1 %v15711_v50  ;;  %v15838_v59 = vcombine.low %v3924_v45, %v3928_v46 }
 0x6e7   :  { %v3792_v53 = vld [vmem:[#allocation2 + $0x1b20] sm:$0xff]  ;;  %9377 = vmatpush2.bf16.msra.mxu1 %v15710_v58  ;;  %v3113_v58 = vld [vmem:[#allocation2 + $0x5e8] sm:$0xff] }
 0x6e8   :  { %v3916_v54 = vld [vmem:[#allocation2 + $0x1f00] sm:$0xff]  ;;  %v15703_v60 = vcombine.high %v3788_v52, %v3792_v53  ;;  %9417 = vmatprep.subr.bf16.mxu0 %v15839_v38  ;;  %v15702_v1 = vcombine.low %v3788_v52, %v3792_v53  ;;  %v2981_v53 = vld [vmem:[#allocation2 + $0x1c8] sm:$0xff] }
 0x6e9   :  { %v3920_v55 = vld [vmem:[#allocation2 + $0x1f20] sm:$0xff]  ;;  %9418 = vmatpush2.bf16.msra.mxu0 %v15838_v59 }
 0x6ea   :  { %v15831_v61 = vcombine.high %v3916_v54, %v3920_v55  ;;  %v3780_v57 = vld [vmem:[#allocation2 + $0x1ac0] sm:$0xff]  ;;  %9378 = vmatprep.subr.bf16.mxu1 %v15703_v60  ;;  %v15830_v2 = vcombine.low %v3916_v54, %v3920_v55  ;;  %v2985_v54 = vld [vmem:[#allocation2 + $0x1e8] sm:$0xff] }
 0x6eb   :  { %v3784_v32 = vld [vmem:[#allocation2 + $0x1ae0] sm:$0xff]  ;;  %9379 = vmatpush2.bf16.msra.mxu1 %v15702_v1  ;;  %v3109_v55 = vld [vmem:[#allocation2 + $0x5c8] sm:$0xff] }
 0x6ec   :  { %v3908_v63 = vld [vmem:[#allocation2 + $0x1ec0] sm:$0xff]  ;;  %v15695_v3 = vcombine.high %v3780_v57, %v3784_v32  ;;  %9419 = vmatprep.subr.bf16.mxu0 %v15831_v61  ;;  %v15694_v17 = vcombine.low %v3780_v57, %v3784_v32  ;;  %v14897_v57 = vcombine.high %v2981_v53, %v2985_v54  ;;  %v15025_v32 = vcombine.high %v3109_v55, %v3113_v58  ;;  %v3101_v1 = vld [vmem:[#allocation2 + $0x588] sm:$0xff] }
 0x6ed   :  { %v3912_v0 = vld [vmem:[#allocation2 + $0x1ee0] sm:$0xff]  ;;  %9420 = vmatpush2.bf16.msra.mxu0 %v15830_v2  ;;  %v3105_v2 = vld [vmem:[#allocation2 + $0x5a8] sm:$0xff] }
 0x6ee   :  { %v15823_v4 = vcombine.high %v3908_v63, %v3912_v0  ;;  %v3772_v5 = vld [vmem:[#allocation2 + $0x1a80] sm:$0xff]  ;;  %9380 = vmatprep.subr.bf16.mxu1 %v15695_v3  ;;  %v15822_v23 = vcombine.low %v3908_v63, %v3912_v0  ;;  %v2973_v63 = vld [vmem:[#allocation2 + $0x188] sm:$0xff] }
 0x6ef   :  { %v3776_v9 = vld [vmem:[#allocation2 + $0x1aa0] sm:$0xff]  ;;  %9381 = vmatpush2.bf16.msra.mxu1 %v15694_v17  ;;  %v2977_v0 = vld [vmem:[#allocation2 + $0x1a8] sm:$0xff] }
 0x6f0   :  { %v3900_v10 = vld [vmem:[#allocation2 + $0x1e80] sm:$0xff]  ;;  %v15687_v27 = vcombine.high %v3772_v5, %v3776_v9  ;;  %9421 = vmatprep.subr.bf16.mxu0 %v15823_v4  ;;  %v15686_v40 = vcombine.low %v3772_v5, %v3776_v9  ;;  %v14896_v4 = vcombine.low %v2981_v53, %v2985_v54  ;;  %v15024_v5 = vcombine.low %v3109_v55, %v3113_v58  ;;  %v2965_v17 = vld [vmem:[#allocation2 + $0x148] sm:$0xff] }
 0x6f1   :  { %v3904_v11 = vld [vmem:[#allocation2 + $0x1ea0] sm:$0xff]  ;;  %9422 = vmatpush2.bf16.msra.mxu0 %v15822_v23  ;;  %v14889_v9 = vcombine.high %v2973_v63, %v2977_v0  ;;  %v2969_v23 = vld [vmem:[#allocation2 + $0x168] sm:$0xff] }
 0x6f2   :  { %v15815_v33 = vcombine.high %v3900_v10, %v3904_v11  ;;  %v3764_v35 = vld [vmem:[#allocation2 + $0x1a40] sm:$0xff]  ;;  %9382 = vmatprep.subr.bf16.mxu1 %v15687_v27  ;;  %v15814_v41 = vcombine.low %v3900_v10, %v3904_v11  ;;  %v15017_v11 = vcombine.high %v3101_v1, %v3105_v2  ;;  %v14880_v55 = vcombine.low %v2965_v17, %v2969_v23 }
 0x6f3   :  { %v3768_v36 = vld [vmem:[#allocation2 + $0x1a60] sm:$0xff]  ;;  %9383 = vmatpush2.bf16.msra.mxu1 %v15686_v40 }
 0x6f4   :  { %v3892_v37 = vld [vmem:[#allocation2 + $0x1e40] sm:$0xff]  ;;  %v15679_v42 = vcombine.high %v3764_v35, %v3768_v36  ;;  %9423 = vmatprep.subr.bf16.mxu0 %v15815_v33  ;;  %v15678_v49 = vcombine.low %v3764_v35, %v3768_v36  ;;  %v3093_v33 = vld [vmem:[#allocation2 + $0x548] sm:$0xff] }
 0x6f5   :  { %v3896_v39 = vld [vmem:[#allocation2 + $0x1e60] sm:$0xff]  ;;  %9424 = vmatpush2.bf16.msra.mxu0 %v15814_v41  ;;  %v3097_v35 = vld [vmem:[#allocation2 + $0x568] sm:$0xff]  ;;  %v15016_v41 = vcombine.low %v3101_v1, %v3105_v2 }
 0x6f6   :  { %v15807_v43 = vcombine.high %v3892_v37, %v3896_v39  ;;  %v3756_v44 = vld [vmem:[#allocation2 + $0x1a00] sm:$0xff]  ;;  %9384 = vmatprep.subr.bf16.mxu1 %v15679_v42  ;;  %v15806_v50 = vcombine.low %v3892_v37, %v3896_v39  ;;  %v14888_v39 = vcombine.low %v2973_v63, %v2977_v0  ;;  %v14881_v42 = vcombine.high %v2965_v17, %v2969_v23  ;;  %v2953_v63 = vld [vmem:[#allocation2 + $0xe8] sm:$0xff] }
 0x6f7   :  { %v3760_v45 = vld [vmem:[#allocation2 + $0x1a20] sm:$0xff]  ;;  %9385 = vmatpush2.bf16.msra.mxu1 %v15678_v49  ;;  %v2961_v49 = vld [vmem:[#allocation2 + $0x128] sm:$0xff] }
 0x6f8   :  { %v3884_v46 = vld [vmem:[#allocation2 + $0x1e00] sm:$0xff]  ;;  %v15671_v38 = vcombine.high %v3756_v44, %v3760_v45  ;;  %9425 = vmatprep.subr.bf16.mxu0 %v15807_v43  ;;  %v15670_v59 = vcombine.low %v3756_v44, %v3760_v45  ;;  %v3077_v0 = vld [vmem:[#allocation2 + $0x4c8] sm:$0xff] }
 0x6f9   :  { %v3888_v56 = vld [vmem:[#allocation2 + $0x1e20] sm:$0xff]  ;;  %9426 = vmatpush2.bf16.msra.mxu0 %v15806_v50  ;;  %v3081_v1 = vld [vmem:[#allocation2 + $0x4e8] sm:$0xff] }
 0x6fa   :  { %v15799_v52 = vcombine.high %v3884_v46, %v3888_v56  ;;  %9386 = vmatprep.subr.bf16.mxu1 %v15671_v38  ;;  %v15798_v60 = vcombine.low %v3884_v46, %v3888_v56  ;;  %v3948_v61 = vld [vmem:[#allocation16 + $0x8] sm:$0xff]  ;;  %v15009_v46 = vcombine.high %v3093_v33, %v3097_v35  ;;  %v2957_v56 = vld [vmem:[#allocation2 + $0x108] sm:$0xff] }
 0x6fb   :  { %9387 = vmatpush2.bf16.msra.mxu1 %v15670_v59  ;;  %v3953_v3 = vrot.slane %v3948_v61, %v18125_v16  ;;  %v3957_v10 = vrot.slane %v3948_v61, %v18128_v21  ;;  %v3085_v38 = vld [vmem:[#allocation2 + $0x508] sm:$0xff]  ;;  %v15008_v59 = vcombine.low %v3093_v33, %v3097_v35  ;;  %v14872_v2 = vcombine.low %v2957_v56, %v2961_v49 }
 0x6fc   :  { %9427 = vmatprep.subr.bf16.mxu0 %v15799_v52  ;;  %9438 = vmatprep.subr.bf16.mxu1 %v14897_v57  ;;  %v3089_v52 = vld [vmem:[#allocation2 + $0x528] sm:$0xff] }
 0x6fd   :  { %9428 = vmatpush2.bf16.msra.mxu0 %v15798_v60  ;;  %v14873_v60 = vcombine.high %v2957_v56, %v2961_v49  ;;  %v15001_v57 = vcombine.high %v3085_v38, %v3089_v52  ;;  %v3073_v17 = vld [vmem:[#allocation2 + $0x4a8] sm:$0xff] }
 0x6fe   :  { %9479 = vmatprep.subr.bf16.mxu0 %v15025_v32  ;;  %v9144_v27 = vpop.f32.mrf.mxu1  ;;  %9389 = vmatmul.mubr.bf16.vlgmr.msra.gmra.mxu1 %v18090_v28  ;;  %v2949_v32 = vld [vmem:[#allocation2 + $0xc8] sm:$0xff] }
 0x6ff   :  { %v9145_v36 = vadd.f32 %v9144_v27, %v3953_v3  ;;  %9439 = vmatpush1.bf16.msra.mxu1 %v14896_v4  ;;  %9470 = vmatprep.mubr.bf16.mxu1 %v18068_v7  ;;  %v15000_v3 = vcombine.low %v3085_v38, %v3089_v52  ;;  %v14865_v4 = vcombine.high %v2949_v32, %v2953_v63  ;;  %v2929_v56 = vld [vmem:[#allocation2 + $0x28] sm:$0xff] }
 0x700   :  { %v9185_v37 = vpop.f32.mrf.mxu0  ;;  %9430 = vmatmul.mubr.bf16.vlgmr.msra.gmra.mxu0 %v18094_v30  ;;  %v9146_v40 = vpop.f32.mrf.mxu1  ;;  %9440 = vmatprep.subr.bf16.mxu1 %v14889_v9  ;;  %v2941_v9 = vld [vmem:[#allocation2 + $0x88] sm:$0xff]  ;;  %v14864_v23 = vcombine.low %v2949_v32, %v2953_v63  ;;  %v14992_v27 = vcombine.low %v3077_v0, %v3081_v1 }
 0x701   :  { %9480 = vmatpush1.bf16.msra.mxu0 %v15024_v5  ;;  %v18260_v43 = vadd.f32 %v9185_v37, %v9145_v36  ;;  %v9147_v44 = vadd.f32 %v9146_v40, %v3957_v10  ;;  %9511 = vmatprep.mubr.bf16.mxu0 %v18072_v12  ;;  %v14993_v5 = vcombine.high %v3077_v0, %v3081_v1  ;;  %v2945_v10 = vld [vmem:[#allocation2 + $0xa8] sm:$0xff] }
 0x702   :  { %v9187_v45 = vpop.f32.mrf.mxu0  ;;  %9481 = vmatprep.subr.bf16.mxu0 %v15017_v11  ;;  %v9148_v50 = vpop.f32.mrf.mxu1  ;;  %v3069_v11 = vld [vmem:[#allocation2 + $0x488] sm:$0xff]  ;;  %v14857_v33 = vcombine.high %v2941_v9, %v2945_v10 }
 0x703   :  { %v18264_v53 = vadd.f32 %v9187_v45, %v9147_v44  ;;  %9441 = vmatpush1.bf16.msra.mxu1 %v14888_v39  ;;  %v14985_v35 = vcombine.high %v3069_v11, %v3073_v17  ;;  %v2933_v36 = vld [vmem:[#allocation2 + $0x48] sm:$0xff] }
 0x704   :  { %v9189_v54 = vpop.f32.mrf.mxu0  ;;  %v9149_v58 = vpop.f32.mrf.mxu1  ;;  %9442 = vmatprep.subr.bf16.mxu1 %v14881_v42  ;;  %v2937_v37 = vld [vmem:[#allocation2 + $0x68] sm:$0xff]  ;;  %v14984_v42 = vcombine.low %v3069_v11, %v3073_v17 }
 0x705   :  { %9482 = vmatpush1.bf16.msra.mxu0 %v15016_v41  ;;  %v3061_v39 = vld [vmem:[#allocation2 + $0x448] sm:$0xff]  ;;  %v14856_v41 = vcombine.low %v2941_v9, %v2945_v10  ;;  %v14849_v44 = vcombine.high %v2933_v36, %v2937_v37  ;;  %v14848_v38 = vcombine.low %v2933_v36, %v2937_v37 }
 0x706   :  { %v9190_v61 = vpop.f32.mrf.mxu0  ;;  %9483 = vmatprep.subr.bf16.mxu0 %v15009_v46  ;;  %v3065_v40 = vld [vmem:[#allocation2 + $0x468] sm:$0xff] }
 0x707   :  { %9443 = vmatpush1.bf16.msra.mxu1 %v14880_v55  ;;  %v14977_v45 = vcombine.high %v3061_v39, %v3065_v40  ;;  %v2925_v46 = vld [vmem:[#allocation2 + $0x8] sm:$0xff]  ;;  %v14976_v52 = vcombine.low %v3061_v39, %v3065_v40 }
 0x708   :  { %9444 = vmatprep.subr.bf16.mxu1 %v14873_v60  ;;  %v3053_v49 = vld [vmem:[#allocation2 + $0x408] sm:$0xff]  ;;  %v14841_v54 = vcombine.high %v2925_v46, %v2929_v56 }
 0x709   :  { %9484 = vmatpush1.bf16.msra.mxu0 %v15008_v59  ;;  %v3057_v50 = vld [vmem:[#allocation2 + $0x428] sm:$0xff] }
 0x70a   :  { %9485 = vmatprep.subr.bf16.mxu0 %v15001_v57  ;;  %v14969_v55 = vcombine.high %v3053_v49, %v3057_v50  ;;  %v3045_v58 = vld [vmem:[#allocation2 + $0x3c8] sm:$0xff]  ;;  %v14840_v57 = vcombine.low %v2925_v46, %v2929_v56  ;;  %v14968_v32 = vcombine.low %v3053_v49, %v3057_v50 }
 0x70b   :  { %9445 = vmatpush1.bf16.msra.mxu1 %v14872_v2  ;;  %v3049_v59 = vld [vmem:[#allocation2 + $0x3e8] sm:$0xff] }
 0x70c   :  { %9446 = vmatprep.subr.bf16.mxu1 %v14865_v4  ;;  %v3173_v60 = vld [vmem:[#allocation2 + $0x7c8] sm:$0xff]  ;;  %v14961_v63 = vcombine.high %v3045_v58, %v3049_v59 }
 0x70d   :  { %9486 = vmatpush1.bf16.msra.mxu0 %v15000_v3  ;;  %v3177_v61 = vld [vmem:[#allocation2 + $0x7e8] sm:$0xff] }
 0x70e   :  { %9487 = vmatprep.subr.bf16.mxu0 %v14993_v5  ;;  %v15089_v0 = vcombine.high %v3173_v60, %v3177_v61  ;;  %v3037_v1 = vld [vmem:[#allocation2 + $0x388] sm:$0xff]  ;;  %v14960_v5 = vcombine.low %v3045_v58, %v3049_v59  ;;  %v15088_v9 = vcombine.low %v3173_v60, %v3177_v61 }
 0x70f   :  { %9447 = vmatpush1.bf16.msra.mxu1 %v14864_v23  ;;  %v3041_v2 = vld [vmem:[#allocation2 + $0x3a8] sm:$0xff] }
 0x710   :  { %9448 = vmatprep.subr.bf16.mxu1 %v14857_v33  ;;  %v3165_v3 = vld [vmem:[#allocation2 + $0x788] sm:$0xff]  ;;  %v14953_v10 = vcombine.high %v3037_v1, %v3041_v2 }
 0x711   :  { %9488 = vmatpush1.bf16.msra.mxu0 %v14992_v27  ;;  %v3169_v4 = vld [vmem:[#allocation2 + $0x7a8] sm:$0xff] }
 0x712   :  { %9489 = vmatprep.subr.bf16.mxu0 %v14985_v35  ;;  %v15081_v11 = vcombine.high %v3165_v3, %v3169_v4  ;;  %v3029_v17 = vld [vmem:[#allocation2 + $0x348] sm:$0xff]  ;;  %v14952_v35 = vcombine.low %v3037_v1, %v3041_v2  ;;  %v15080_v36 = vcombine.low %v3165_v3, %v3169_v4 }
 0x713   :  { %9449 = vmatpush1.bf16.msra.mxu1 %v14856_v41  ;;  %v3033_v23 = vld [vmem:[#allocation2 + $0x368] sm:$0xff] }
 0x714   :  { %9450 = vmatprep.subr.bf16.mxu1 %v14849_v44  ;;  %v3157_v27 = vld [vmem:[#allocation2 + $0x748] sm:$0xff]  ;;  %v14945_v37 = vcombine.high %v3029_v17, %v3033_v23 }
 0x715   :  { %9490 = vmatpush1.bf16.msra.mxu0 %v14984_v42  ;;  %v3161_v33 = vld [vmem:[#allocation2 + $0x768] sm:$0xff] }
 0x716   :  { %9491 = vmatprep.subr.bf16.mxu0 %v14977_v45  ;;  %v15073_v39 = vcombine.high %v3157_v27, %v3161_v33  ;;  %v3021_v40 = vld [vmem:[#allocation2 + $0x308] sm:$0xff]  ;;  %v14944_v45 = vcombine.low %v3029_v17, %v3033_v23  ;;  %v15072_v46 = vcombine.low %v3157_v27, %v3161_v33 }
 0x717   :  { %9451 = vmatpush1.bf16.msra.mxu1 %v14848_v38  ;;  %v3025_v41 = vld [vmem:[#allocation2 + $0x328] sm:$0xff] }
 0x718   :  { %9452 = vmatprep.subr.bf16.mxu1 %v14841_v54  ;;  %v3149_v42 = vld [vmem:[#allocation2 + $0x708] sm:$0xff]  ;;  %v14937_v56 = vcombine.high %v3021_v40, %v3025_v41 }
 0x719   :  { %9492 = vmatpush1.bf16.msra.mxu0 %v14976_v52  ;;  %v3153_v44 = vld [vmem:[#allocation2 + $0x728] sm:$0xff] }
 0x71a   :  { %9493 = vmatprep.subr.bf16.mxu0 %v14969_v55  ;;  %v15065_v49 = vcombine.high %v3149_v42, %v3153_v44  ;;  %v3013_v50 = vld [vmem:[#allocation2 + $0x2c8] sm:$0xff]  ;;  %v14936_v55 = vcombine.low %v3021_v40, %v3025_v41  ;;  %v15064_v58 = vcombine.low %v3149_v42, %v3153_v44 }
 0x71b   :  { %9453 = vmatpush1.bf16.msra.mxu1 %v14840_v57  ;;  %v3017_v38 = vld [vmem:[#allocation2 + $0x2e8] sm:$0xff] }
 0x71c   :  { %9454 = vmatprep.subr.bf16.mxu1 %v14961_v63  ;;  %v3141_v52 = vld [vmem:[#allocation2 + $0x6c8] sm:$0xff]  ;;  %v14929_v59 = vcombine.high %v3013_v50, %v3017_v38 }
 0x71d   :  { %9494 = vmatpush1.bf16.msra.mxu0 %v14968_v32  ;;  %v3145_v54 = vld [vmem:[#allocation2 + $0x6e8] sm:$0xff] }
 0x71e   :  { %9495 = vmatprep.subr.bf16.mxu0 %v15089_v0  ;;  %v15057_v60 = vcombine.high %v3141_v52, %v3145_v54  ;;  %v3005_v61 = vld [vmem:[#allocation2 + $0x288] sm:$0xff]  ;;  %v14928_v0 = vcombine.low %v3013_v50, %v3017_v38  ;;  %v15056_v1 = vcombine.low %v3141_v52, %v3145_v54 }
 0x71f   :  { %9455 = vmatpush2.bf16.msra.mxu1 %v14960_v5  ;;  %v3009_v57 = vld [vmem:[#allocation2 + $0x2a8] sm:$0xff] }
 0x720   :  { %9456 = vmatprep.subr.bf16.mxu1 %v14953_v10  ;;  %v3133_v32 = vld [vmem:[#allocation2 + $0x688] sm:$0xff]  ;;  %v14921_v2 = vcombine.high %v3005_v61, %v3009_v57 }
 0x721   :  { %9496 = vmatpush2.bf16.msra.mxu0 %v15088_v9  ;;  %v3137_v63 = vld [vmem:[#allocation2 + $0x6a8] sm:$0xff] }
 0x722   :  { %9497 = vmatprep.subr.bf16.mxu0 %v15081_v11  ;;  %v15049_v3 = vcombine.high %v3133_v32, %v3137_v63  ;;  %v2997_v4 = vld [vmem:[#allocation2 + $0x248] sm:$0xff]  ;;  %v14920_v11 = vcombine.low %v3005_v61, %v3009_v57  ;;  %v15048_v17 = vcombine.low %v3133_v32, %v3137_v63 }
 0x723   :  { %9457 = vmatpush2.bf16.msra.mxu1 %v14952_v35  ;;  %v3001_v5 = vld [vmem:[#allocation2 + $0x268] sm:$0xff] }
 0x724   :  { %9458 = vmatprep.subr.bf16.mxu1 %v14945_v37  ;;  %v3125_v9 = vld [vmem:[#allocation2 + $0x648] sm:$0xff]  ;;  %v14913_v23 = vcombine.high %v2997_v4, %v3001_v5 }
 0x725   :  { %9498 = vmatpush2.bf16.msra.mxu0 %v15080_v36  ;;  %v3129_v10 = vld [vmem:[#allocation2 + $0x668] sm:$0xff] }
 0x726   :  { %9499 = vmatprep.subr.bf16.mxu0 %v15073_v39  ;;  %v15041_v27 = vcombine.high %v3125_v9, %v3129_v10  ;;  %v2989_v33 = vld [vmem:[#allocation2 + $0x208] sm:$0xff]  ;;  %v14912_v39 = vcombine.low %v2997_v4, %v3001_v5  ;;  %v15040_v40 = vcombine.low %v3125_v9, %v3129_v10 }
 0x727   :  { %9459 = vmatpush2.bf16.msra.mxu1 %v14944_v45  ;;  %v2993_v35 = vld [vmem:[#allocation2 + $0x228] sm:$0xff] }
 0x728   :  { %9460 = vmatprep.subr.bf16.mxu1 %v14937_v56  ;;  %v3117_v36 = vld [vmem:[#allocation2 + $0x608] sm:$0xff]  ;;  %v14905_v41 = vcombine.high %v2989_v33, %v2993_v35 }
 0x729   :  { %9500 = vmatpush2.bf16.msra.mxu0 %v15072_v46  ;;  %v3121_v37 = vld [vmem:[#allocation2 + $0x628] sm:$0xff] }
 0x72a   :  { %9501 = vmatprep.subr.bf16.mxu0 %v15065_v49  ;;  %v15033_v42 = vcombine.high %v3117_v36, %v3121_v37  ;;  %v3237_v44 = vld [vmem:[#allocation2 + $0x9c8] sm:$0xff]  ;;  %v14904_v49 = vcombine.low %v2989_v33, %v2993_v35  ;;  %v15032_v50 = vcombine.low %v3117_v36, %v3121_v37 }
 0x72b   :  { %9461 = vmatpush2.bf16.msra.mxu1 %v14936_v55  ;;  %v3241_v45 = vld [vmem:[#allocation2 + $0x9e8] sm:$0xff] }
 0x72c   :  { %9462 = vmatprep.subr.bf16.mxu1 %v14929_v59  ;;  %v3365_v46 = vld [vmem:[#allocation2 + $0xdc8] sm:$0xff]  ;;  %v15153_v38 = vcombine.high %v3237_v44, %v3241_v45 }
 0x72d   :  { %9502 = vmatpush2.bf16.msra.mxu0 %v15064_v58  ;;  %v3369_v56 = vld [vmem:[#allocation2 + $0xde8] sm:$0xff] }
 0x72e   :  { %9503 = vmatprep.subr.bf16.mxu0 %v15057_v60  ;;  %v15281_v52 = vcombine.high %v3365_v46, %v3369_v56  ;;  %v3229_v54 = vld [vmem:[#allocation2 + $0x988] sm:$0xff]  ;;  %v15152_v60 = vcombine.low %v3237_v44, %v3241_v45  ;;  %v15280_v61 = vcombine.low %v3365_v46, %v3369_v56 }
 0x72f   :  { %9463 = vmatpush2.bf16.msra.mxu1 %v14928_v0  ;;  %v3233_v55 = vld [vmem:[#allocation2 + $0x9a8] sm:$0xff] }
 0x730   :  { %9464 = vmatprep.subr.bf16.mxu1 %v14921_v2  ;;  %v3357_v58 = vld [vmem:[#allocation2 + $0xd88] sm:$0xff]  ;;  %v15145_v57 = vcombine.high %v3229_v54, %v3233_v55  ;;  %v15144_v9 = vcombine.low %v3229_v54, %v3233_v55 }
 0x731   :  { %9504 = vmatpush2.bf16.msra.mxu0 %v15056_v1  ;;  %v3361_v59 = vld [vmem:[#allocation2 + $0xda8] sm:$0xff] }
 0x732   :  { %9505 = vmatprep.subr.bf16.mxu0 %v15049_v3  ;;  %v15273_v32 = vcombine.high %v3357_v58, %v3361_v59  ;;  %v3221_v63 = vld [vmem:[#allocation2 + $0x948] sm:$0xff] }
 0x733   :  { %9465 = vmatpush2.bf16.msra.mxu1 %v14920_v11  ;;  %v3225_v0 = vld [vmem:[#allocation2 + $0x968] sm:$0xff]  ;;  %v15272_v11 = vcombine.low %v3357_v58, %v3361_v59 }
 0x734   :  { %9466 = vmatprep.subr.bf16.mxu1 %v14913_v23  ;;  %v3349_v2 = vld [vmem:[#allocation2 + $0xd48] sm:$0xff]  ;;  %v15136_v44 = vcombine.low %v3221_v63, %v3225_v0 }
 0x735   :  { %9506 = vmatpush2.bf16.msra.mxu0 %v15048_v17  ;;  %v3353_v3 = vld [vmem:[#allocation2 + $0xd68] sm:$0xff]  ;;  %v15137_v17 = vcombine.high %v3221_v63, %v3225_v0 }
 0x736   :  { %9507 = vmatprep.subr.bf16.mxu0 %v15041_v27  ;;  %v15265_v35 = vcombine.high %v3349_v2, %v3353_v3  ;;  %v3213_v36 = vld [vmem:[#allocation2 + $0x908] sm:$0xff] }
 0x737   :  { %9467 = vmatpush2.bf16.msra.mxu1 %v14912_v39  ;;  %v3217_v37 = vld [vmem:[#allocation2 + $0x928] sm:$0xff] }
 0x738   :  { %9468 = vmatprep.subr.bf16.mxu1 %v14905_v41  ;;  %v3341_v39 = vld [vmem:[#allocation2 + $0xd08] sm:$0xff]  ;;  %v15129_v46 = vcombine.high %v3213_v36, %v3217_v37  ;;  %v15128_v55 = vcombine.low %v3213_v36, %v3217_v37 }
 0x739   :  { %9508 = vmatpush2.bf16.msra.mxu0 %v15040_v40  ;;  %v3345_v40 = vld [vmem:[#allocation2 + $0xd28] sm:$0xff] }
 0x73a   :  { %9509 = vmatprep.subr.bf16.mxu0 %v15033_v42  ;;  %v3337_v54 = vld [vmem:[#allocation2 + $0xce8] sm:$0xff]  ;;  %v15256_v58 = vcombine.low %v3341_v39, %v3345_v40 }
 0x73b   :  { %9469 = vmatpush2.bf16.msra.mxu1 %v14904_v49  ;;  %v15257_v49 = vcombine.high %v3341_v39, %v3345_v40  ;;  %v3329_v63 = vld [vmem:[#allocation2 + $0xca8] sm:$0xff] }
 0x73c   :  { %9520 = vmatprep.subr.bf16.mxu1 %v15153_v38  ;;  %v3209_v38 = vld [vmem:[#allocation2 + $0x8e8] sm:$0xff] }
 0x73d   :  { %9510 = vmatpush2.bf16.msra.mxu0 %v15032_v50  ;;  %v3205_v50 = vld [vmem:[#allocation2 + $0x8c8] sm:$0xff] }
 0x73e   :  { %9561 = vmatprep.subr.bf16.mxu0 %v15281_v52  ;;  %v9226_v1 = vpop.f32.mrf.mxu1  ;;  %9471 = vmatmul.mubr.bf16.vlgmr.msra.gmra.mxu1 %v18066_v6  ;;  %v3333_v52 = vld [vmem:[#allocation2 + $0xcc8] sm:$0xff]  ;;  %v15121_v59 = vcombine.high %v3205_v50, %v3209_v38  ;;  %v15120_v0 = vcombine.low %v3205_v50, %v3209_v38 }
 0x73f   :  { %v9227_v4 = vadd.f32 %v9226_v1, %v18260_v43  ;;  %9521 = vmatpush1.bf16.msra.mxu1 %v15152_v60  ;;  %9552 = vmatprep.mubr.bf16.mxu1 %v18076_v14  ;;  %v15249_v60 = vcombine.high %v3333_v52, %v3337_v54  ;;  %v15248_v1 = vcombine.low %v3333_v52, %v3337_v54  ;;  %v3185_v36 = vld [vmem:[#allocation2 + $0x828] sm:$0xff] }
 0x740   :  { %v9267_v5 = vpop.f32.mrf.mxu0  ;;  %9512 = vmatmul.mubr.bf16.vlgmr.msra.gmra.mxu0 %v18070_v8  ;;  %v9228_v10 = vpop.f32.mrf.mxu1  ;;  %9522 = vmatprep.subr.bf16.mxu1 %v15145_v57  ;;  %v3201_v57 = vld [vmem:[#allocation2 + $0x8a8] sm:$0xff] }
 0x741   :  { %9562 = vmatpush1.bf16.msra.mxu0 %v15280_v61  ;;  %v18269_v23 = vadd.f32 %v9267_v5, %v9227_v4  ;;  %v9229_v27 = vadd.f32 %v9228_v10, %v18264_v53  ;;  %9593 = vmatprep.mubr.bf16.mxu0 %v18080_v19  ;;  %v15264_v53 = vcombine.low %v3349_v2, %v3353_v3  ;;  %v3197_v61 = vld [vmem:[#allocation2 + $0x888] sm:$0xff] }
 0x742   :  { %v9269_v33 = vpop.f32.mrf.mxu0  ;;  %9563 = vmatprep.subr.bf16.mxu0 %v15273_v32  ;;  %v9230_v43 = vpop.f32.mrf.mxu1  ;;  %v3325_v32 = vld [vmem:[#allocation2 + $0xc88] sm:$0xff]  ;;  %v15113_v2 = vcombine.high %v3197_v61, %v3201_v57 }
 0x743   :  { %v18274_v41 = vadd.f32 %v9269_v33, %v9229_v27  ;;  %9523 = vmatpush1.bf16.msra.mxu1 %v15144_v9  ;;  %v15241_v3 = vcombine.high %v3325_v32, %v3329_v63  ;;  %v3189_v4 = vld [vmem:[#allocation2 + $0x848] sm:$0xff] }
 0x744   :  { %v9271_v42 = vpop.f32.mrf.mxu0  ;;  %v9231_v45 = vpop.f32.mrf.mxu1  ;;  %9524 = vmatprep.subr.bf16.mxu1 %v15137_v17  ;;  %v3193_v5 = vld [vmem:[#allocation2 + $0x868] sm:$0xff]  ;;  %v15240_v17 = vcombine.low %v3325_v32, %v3329_v63 }
 0x745   :  { %9564 = vmatpush1.bf16.msra.mxu0 %v15272_v11  ;;  %v3317_v9 = vld [vmem:[#allocation2 + $0xc48] sm:$0xff]  ;;  %v15112_v11 = vcombine.low %v3197_v61, %v3201_v57  ;;  %v15105_v27 = vcombine.high %v3189_v4, %v3193_v5  ;;  %v15104_v39 = vcombine.low %v3189_v4, %v3193_v5 }
 0x746   :  { %v9272_v56 = vpop.f32.mrf.mxu0  ;;  %9565 = vmatprep.subr.bf16.mxu0 %v15265_v35  ;;  %v3321_v10 = vld [vmem:[#allocation2 + $0xc68] sm:$0xff] }
 0x747   :  { %9525 = vmatpush1.bf16.msra.mxu1 %v15136_v44  ;;  %v15233_v33 = vcombine.high %v3317_v9, %v3321_v10  ;;  %v3181_v35 = vld [vmem:[#allocation2 + $0x808] sm:$0xff]  ;;  %v15232_v40 = vcombine.low %v3317_v9, %v3321_v10 }
 0x748   :  { %9526 = vmatprep.subr.bf16.mxu1 %v15129_v46  ;;  %v3309_v37 = vld [vmem:[#allocation2 + $0xc08] sm:$0xff]  ;;  %v15097_v42 = vcombine.high %v3181_v35, %v3185_v36 }
 0x749   :  { %9566 = vmatpush1.bf16.msra.mxu0 %v15264_v53  ;;  %v3313_v43 = vld [vmem:[#allocation2 + $0xc28] sm:$0xff] }
 0x74a   :  { %9567 = vmatprep.subr.bf16.mxu0 %v15257_v49  ;;  %v15225_v44 = vcombine.high %v3309_v37, %v3313_v43  ;;  %v3301_v45 = vld [vmem:[#allocation2 + $0xbc8] sm:$0xff]  ;;  %v15096_v49 = vcombine.low %v3181_v35, %v3185_v36  ;;  %v15224_v50 = vcombine.low %v3309_v37, %v3313_v43 }
 0x74b   :  { %9527 = vmatpush1.bf16.msra.mxu1 %v15128_v55  ;;  %v3305_v53 = vld [vmem:[#allocation2 + $0xbe8] sm:$0xff] }
 0x74c   :  { %9528 = vmatprep.subr.bf16.mxu1 %v15121_v59  ;;  %v3429_v46 = vld [vmem:[#allocation2 + $0xfc8] sm:$0xff]  ;;  %v15217_v38 = vcombine.high %v3301_v45, %v3305_v53 }
 0x74d   :  { %9568 = vmatpush1.bf16.msra.mxu0 %v15256_v58  ;;  %v3433_v56 = vld [vmem:[#allocation2 + $0xfe8] sm:$0xff] }
 0x74e   :  { %9569 = vmatprep.subr.bf16.mxu0 %v15249_v60  ;;  %v15345_v52 = vcombine.high %v3429_v46, %v3433_v56  ;;  %v3293_v54 = vld [vmem:[#allocation2 + $0xb88] sm:$0xff]  ;;  %v15216_v60 = vcombine.low %v3301_v45, %v3305_v53  ;;  %v15344_v61 = vcombine.low %v3429_v46, %v3433_v56 }
 0x74f   :  { %9529 = vmatpush1.bf16.msra.mxu1 %v15120_v0  ;;  %v3297_v55 = vld [vmem:[#allocation2 + $0xba8] sm:$0xff] }
 0x750   :  { %9530 = vmatprep.subr.bf16.mxu1 %v15113_v2  ;;  %v3421_v58 = vld [vmem:[#allocation2 + $0xf88] sm:$0xff]  ;;  %v15209_v57 = vcombine.high %v3293_v54, %v3297_v55 }
 0x751   :  { %9570 = vmatpush1.bf16.msra.mxu0 %v15248_v1  ;;  %v3425_v59 = vld [vmem:[#allocation2 + $0xfa8] sm:$0xff] }
 0x752   :  { %9571 = vmatprep.subr.bf16.mxu0 %v15241_v3  ;;  %v15337_v32 = vcombine.high %v3421_v58, %v3425_v59  ;;  %v3285_v63 = vld [vmem:[#allocation2 + $0xb48] sm:$0xff]  ;;  %v15208_v3 = vcombine.low %v3293_v54, %v3297_v55  ;;  %v15336_v4 = vcombine.low %v3421_v58, %v3425_v59 }
 0x753   :  { %9531 = vmatpush1.bf16.msra.mxu1 %v15112_v11  ;;  %v3289_v0 = vld [vmem:[#allocation2 + $0xb68] sm:$0xff] }
 0x754   :  { %9532 = vmatprep.subr.bf16.mxu1 %v15105_v27  ;;  %v3413_v1 = vld [vmem:[#allocation2 + $0xf48] sm:$0xff]  ;;  %v15201_v5 = vcombine.high %v3285_v63, %v3289_v0 }
 0x755   :  { %9572 = vmatpush1.bf16.msra.mxu0 %v15240_v17  ;;  %v3417_v2 = vld [vmem:[#allocation2 + $0xf68] sm:$0xff] }
 0x756   :  { %9573 = vmatprep.subr.bf16.mxu0 %v15233_v33  ;;  %v15329_v9 = vcombine.high %v3413_v1, %v3417_v2  ;;  %v3277_v10 = vld [vmem:[#allocation2 + $0xb08] sm:$0xff]  ;;  %v15200_v33 = vcombine.low %v3285_v63, %v3289_v0  ;;  %v15328_v35 = vcombine.low %v3413_v1, %v3417_v2 }
 0x757   :  { %9533 = vmatpush1.bf16.msra.mxu1 %v15104_v39  ;;  %v3281_v11 = vld [vmem:[#allocation2 + $0xb28] sm:$0xff] }
 0x758   :  { %9534 = vmatprep.subr.bf16.mxu1 %v15097_v42  ;;  %v3405_v17 = vld [vmem:[#allocation2 + $0xf08] sm:$0xff]  ;;  %v15193_v36 = vcombine.high %v3277_v10, %v3281_v11 }
 0x759   :  { %9574 = vmatpush1.bf16.msra.mxu0 %v15232_v40  ;;  %v3409_v27 = vld [vmem:[#allocation2 + $0xf28] sm:$0xff] }
 0x75a   :  { %9575 = vmatprep.subr.bf16.mxu0 %v15225_v44  ;;  %v15321_v37 = vcombine.high %v3405_v17, %v3409_v27  ;;  %v3269_v43 = vld [vmem:[#allocation2 + $0xac8] sm:$0xff]  ;;  %v15192_v44 = vcombine.low %v3277_v10, %v3281_v11  ;;  %v15320_v45 = vcombine.low %v3405_v17, %v3409_v27 }
 0x75b   :  { %9535 = vmatpush1.bf16.msra.mxu1 %v15096_v49  ;;  %v3273_v39 = vld [vmem:[#allocation2 + $0xae8] sm:$0xff] }
 0x75c   :  { %9536 = vmatprep.subr.bf16.mxu1 %v15217_v38  ;;  %v3397_v40 = vld [vmem:[#allocation2 + $0xec8] sm:$0xff]  ;;  %v15185_v53 = vcombine.high %v3269_v43, %v3273_v39 }
 0x75d   :  { %9576 = vmatpush1.bf16.msra.mxu0 %v15224_v50  ;;  %v3401_v42 = vld [vmem:[#allocation2 + $0xee8] sm:$0xff] }
 0x75e   :  { %9577 = vmatprep.subr.bf16.mxu0 %v15345_v52  ;;  %v15313_v46 = vcombine.high %v3397_v40, %v3401_v42  ;;  %v3261_v56 = vld [vmem:[#allocation2 + $0xa88] sm:$0xff]  ;;  %v15184_v52 = vcombine.low %v3269_v43, %v3273_v39  ;;  %v15312_v54 = vcombine.low %v3397_v40, %v3401_v42 }
 0x75f   :  { %9537 = vmatpush2.bf16.msra.mxu1 %v15216_v60  ;;  %v3265_v49 = vld [vmem:[#allocation2 + $0xaa8] sm:$0xff] }
 0x760   :  { %9538 = vmatprep.subr.bf16.mxu1 %v15209_v57  ;;  %v3389_v50 = vld [vmem:[#allocation2 + $0xe88] sm:$0xff]  ;;  %v15177_v55 = vcombine.high %v3261_v56, %v3265_v49 }
 0x761   :  { %9578 = vmatpush2.bf16.msra.mxu0 %v15344_v61  ;;  %v3393_v38 = vld [vmem:[#allocation2 + $0xea8] sm:$0xff] }
 0x762   :  { %9579 = vmatprep.subr.bf16.mxu0 %v15337_v32  ;;  %v15305_v58 = vcombine.high %v3389_v50, %v3393_v38  ;;  %v3253_v59 = vld [vmem:[#allocation2 + $0xa48] sm:$0xff]  ;;  %v15176_v32 = vcombine.low %v3261_v56, %v3265_v49  ;;  %v15304_v63 = vcombine.low %v3389_v50, %v3393_v38 }
 0x763   :  { %9539 = vmatpush2.bf16.msra.mxu1 %v15208_v3  ;;  %v3257_v60 = vld [vmem:[#allocation2 + $0xa68] sm:$0xff] }
 0x764   :  { %9540 = vmatprep.subr.bf16.mxu1 %v15201_v5  ;;  %v3381_v61 = vld [vmem:[#allocation2 + $0xe48] sm:$0xff]  ;;  %v15169_v0 = vcombine.high %v3253_v59, %v3257_v60 }
 0x765   :  { %9580 = vmatpush2.bf16.msra.mxu0 %v15336_v4  ;;  %v3385_v57 = vld [vmem:[#allocation2 + $0xe68] sm:$0xff] }
 0x766   :  { %9581 = vmatprep.subr.bf16.mxu0 %v15329_v9  ;;  %v15297_v1 = vcombine.high %v3381_v61, %v3385_v57  ;;  %v3245_v2 = vld [vmem:[#allocation2 + $0xa08] sm:$0xff]  ;;  %v15168_v9 = vcombine.low %v3253_v59, %v3257_v60  ;;  %v15296_v10 = vcombine.low %v3381_v61, %v3385_v57 }
 0x767   :  { %9541 = vmatpush2.bf16.msra.mxu1 %v15200_v33  ;;  %v3249_v3 = vld [vmem:[#allocation2 + $0xa28] sm:$0xff] }
 0x768   :  { %9542 = vmatprep.subr.bf16.mxu1 %v15193_v36  ;;  %v3373_v4 = vld [vmem:[#allocation2 + $0xe08] sm:$0xff]  ;;  %v15161_v11 = vcombine.high %v3245_v2, %v3249_v3 }
 0x769   :  { %9582 = vmatpush2.bf16.msra.mxu0 %v15328_v35  ;;  %v3377_v5 = vld [vmem:[#allocation2 + $0xe28] sm:$0xff] }
 0x76a   :  { %9583 = vmatprep.subr.bf16.mxu0 %v15321_v37  ;;  %v15289_v17 = vcombine.high %v3373_v4, %v3377_v5  ;;  %v3493_v27 = vld [vmem:[#allocation2 + $0x11c8] sm:$0xff]  ;;  %v15160_v37 = vcombine.low %v3245_v2, %v3249_v3  ;;  %v15288_v43 = vcombine.low %v3373_v4, %v3377_v5 }
 0x76b   :  { %9543 = vmatpush2.bf16.msra.mxu1 %v15192_v44  ;;  %v3497_v33 = vld [vmem:[#allocation2 + $0x11e8] sm:$0xff] }
 0x76c   :  { %9544 = vmatprep.subr.bf16.mxu1 %v15185_v53  ;;  %v3621_v35 = vld [vmem:[#allocation2 + $0x15c8] sm:$0xff]  ;;  %v15409_v39 = vcombine.high %v3493_v27, %v3497_v33 }
 0x76d   :  { %9584 = vmatpush2.bf16.msra.mxu0 %v15320_v45  ;;  %v3625_v36 = vld [vmem:[#allocation2 + $0x15e8] sm:$0xff] }
 0x76e   :  { %9585 = vmatprep.subr.bf16.mxu0 %v15313_v46  ;;  %v15537_v40 = vcombine.high %v3621_v35, %v3625_v36  ;;  %v3485_v42 = vld [vmem:[#allocation2 + $0x1188] sm:$0xff]  ;;  %v15408_v46 = vcombine.low %v3493_v27, %v3497_v33  ;;  %v15536_v56 = vcombine.low %v3621_v35, %v3625_v36 }
 0x76f   :  { %9545 = vmatpush2.bf16.msra.mxu1 %v15184_v52  ;;  %v3489_v44 = vld [vmem:[#allocation2 + $0x11a8] sm:$0xff] }
 0x770   :  { %9546 = vmatprep.subr.bf16.mxu1 %v15177_v55  ;;  %v3613_v45 = vld [vmem:[#allocation2 + $0x1588] sm:$0xff]  ;;  %v15401_v49 = vcombine.high %v3485_v42, %v3489_v44  ;;  %v15400_v61 = vcombine.low %v3485_v42, %v3489_v44 }
 0x771   :  { %9586 = vmatpush2.bf16.msra.mxu0 %v15312_v54  ;;  %v3617_v53 = vld [vmem:[#allocation2 + $0x15a8] sm:$0xff] }
 0x772   :  { %9587 = vmatprep.subr.bf16.mxu0 %v15305_v58  ;;  %v15529_v50 = vcombine.high %v3613_v45, %v3617_v53  ;;  %v3477_v38 = vld [vmem:[#allocation2 + $0x1148] sm:$0xff] }
 0x773   :  { %9547 = vmatpush2.bf16.msra.mxu1 %v15176_v32  ;;  %v3481_v52 = vld [vmem:[#allocation2 + $0x1168] sm:$0xff]  ;;  %v15528_v32 = vcombine.low %v3613_v45, %v3617_v53 }
 0x774   :  { %9548 = vmatprep.subr.bf16.mxu1 %v15169_v0  ;;  %v3605_v55 = vld [vmem:[#allocation2 + $0x1548] sm:$0xff]  ;;  %v15392_v27 = vcombine.low %v3477_v38, %v3481_v52 }
 0x775   :  { %9588 = vmatpush2.bf16.msra.mxu0 %v15304_v63  ;;  %v3609_v58 = vld [vmem:[#allocation2 + $0x1568] sm:$0xff]  ;;  %v15393_v63 = vcombine.high %v3477_v38, %v3481_v52 }
 0x776   :  { %9589 = vmatprep.subr.bf16.mxu0 %v15297_v1  ;;  %v15521_v3 = vcombine.high %v3605_v55, %v3609_v58  ;;  %v3469_v4 = vld [vmem:[#allocation2 + $0x1108] sm:$0xff] }
 0x777   :  { %9549 = vmatpush2.bf16.msra.mxu1 %v15168_v9  ;;  %v3473_v5 = vld [vmem:[#allocation2 + $0x1128] sm:$0xff] }
 0x778   :  { %9550 = vmatprep.subr.bf16.mxu1 %v15161_v11  ;;  %v3597_v9 = vld [vmem:[#allocation2 + $0x1508] sm:$0xff]  ;;  %v15385_v35 = vcombine.high %v3469_v4, %v3473_v5  ;;  %v15384_v44 = vcombine.low %v3469_v4, %v3473_v5 }
 0x779   :  { %9590 = vmatpush2.bf16.msra.mxu0 %v15296_v10  ;;  %v3601_v10 = vld [vmem:[#allocation2 + $0x1528] sm:$0xff] }
 0x77a   :  { %9591 = vmatprep.subr.bf16.mxu0 %v15289_v17  ;;  %v3593_v42 = vld [vmem:[#allocation2 + $0x14e8] sm:$0xff]  ;;  %v15512_v45 = vcombine.low %v3597_v9, %v3601_v10 }
 0x77b   :  { %9551 = vmatpush2.bf16.msra.mxu1 %v15160_v37  ;;  %v15513_v37 = vcombine.high %v3597_v9, %v3601_v10  ;;  %v3585_v38 = vld [vmem:[#allocation2 + $0x14a8] sm:$0xff] }
 0x77c   :  { %9602 = vmatprep.subr.bf16.mxu1 %v15409_v39  ;;  %v3465_v39 = vld [vmem:[#allocation2 + $0x10e8] sm:$0xff] }
 0x77d   :  { %9592 = vmatpush2.bf16.msra.mxu0 %v15288_v43  ;;  %v3461_v43 = vld [vmem:[#allocation2 + $0x10c8] sm:$0xff] }
 0x77e   :  { %9643 = vmatprep.subr.bf16.mxu0 %v15537_v40  ;;  %v9308_v54 = vpop.f32.mrf.mxu1  ;;  %9553 = vmatmul.mubr.bf16.vlgmr.msra.gmra.mxu1 %v18074_v13  ;;  %v3589_v40 = vld [vmem:[#allocation2 + $0x14c8] sm:$0xff]  ;;  %v15377_v53 = vcombine.high %v3461_v43, %v3465_v39  ;;  %v15376_v52 = vcombine.low %v3461_v43, %v3465_v39 }
 0x77f   :  { %v9309_v59 = vadd.f32 %v9308_v54, %v18269_v23  ;;  %9603 = vmatpush1.bf16.msra.mxu1 %v15408_v46  ;;  %9634 = vmatprep.mubr.bf16.mxu1 %v18084_v24  ;;  %v15505_v46 = vcombine.high %v3589_v40, %v3593_v42  ;;  %v15504_v54 = vcombine.low %v3589_v40, %v3593_v42  ;;  %v3441_v4 = vld [vmem:[#allocation2 + $0x1028] sm:$0xff] }
 0x780   :  { %v9349_v60 = vpop.f32.mrf.mxu0  ;;  %9594 = vmatmul.mubr.bf16.vlgmr.msra.gmra.mxu0 %v18078_v18  ;;  %v9310_v57 = vpop.f32.mrf.mxu1  ;;  %9604 = vmatprep.subr.bf16.mxu1 %v15401_v49  ;;  %v3457_v49 = vld [vmem:[#allocation2 + $0x10a8] sm:$0xff] }
 0x781   :  { %9644 = vmatpush1.bf16.msra.mxu0 %v15536_v56  ;;  %v18279_v0 = vadd.f32 %v9349_v60, %v9309_v59  ;;  %v9311_v1 = vadd.f32 %v9310_v57, %v18274_v41  ;;  %9675 = vmatprep.mubr.bf16.mxu0 %v18088_v26  ;;  %v15520_v41 = vcombine.low %v3605_v55, %v3609_v58  ;;  %v3453_v56 = vld [vmem:[#allocation2 + $0x1088] sm:$0xff] }
 0x782   :  { %v9351_v2 = vpop.f32.mrf.mxu0  ;;  %9645 = vmatprep.subr.bf16.mxu0 %v15529_v50  ;;  %v9312_v23 = vpop.f32.mrf.mxu1  ;;  %v3581_v50 = vld [vmem:[#allocation2 + $0x1488] sm:$0xff]  ;;  %v15369_v55 = vcombine.high %v3453_v56, %v3457_v49 }
 0x783   :  { %v18284_v11 = vadd.f32 %v9351_v2, %v9311_v1  ;;  %9605 = vmatpush1.bf16.msra.mxu1 %v15400_v61  ;;  %v15497_v58 = vcombine.high %v3581_v50, %v3585_v38  ;;  %v3445_v59 = vld [vmem:[#allocation2 + $0x1048] sm:$0xff] }
 0x784   :  { %v9353_v17 = vpop.f32.mrf.mxu0  ;;  %v9313_v33 = vpop.f32.mrf.mxu1  ;;  %9606 = vmatprep.subr.bf16.mxu1 %v15393_v63  ;;  %v3449_v60 = vld [vmem:[#allocation2 + $0x1068] sm:$0xff]  ;;  %v15496_v63 = vcombine.low %v3581_v50, %v3585_v38 }
 0x785   :  { %9646 = vmatpush1.bf16.msra.mxu0 %v15528_v32  ;;  %v3573_v61 = vld [vmem:[#allocation2 + $0x1448] sm:$0xff]  ;;  %v15368_v32 = vcombine.low %v3453_v56, %v3457_v49  ;;  %v15361_v1 = vcombine.high %v3445_v59, %v3449_v60  ;;  %v15360_v9 = vcombine.low %v3445_v59, %v3449_v60 }
 0x786   :  { %v9354_v36 = vpop.f32.mrf.mxu0  ;;  %9647 = vmatprep.subr.bf16.mxu0 %v15521_v3  ;;  %v3577_v57 = vld [vmem:[#allocation2 + $0x1468] sm:$0xff] }
 0x787   :  { %9607 = vmatpush1.bf16.msra.mxu1 %v15392_v27  ;;  %v15489_v2 = vcombine.high %v3573_v61, %v3577_v57  ;;  %v3437_v3 = vld [vmem:[#allocation2 + $0x1008] sm:$0xff]  ;;  %v15488_v10 = vcombine.low %v3573_v61, %v3577_v57 }
 0x788   :  { %9608 = vmatprep.subr.bf16.mxu1 %v15385_v35  ;;  %v3565_v5 = vld [vmem:[#allocation2 + $0x1408] sm:$0xff]  ;;  %v15353_v17 = vcombine.high %v3437_v3, %v3441_v4 }
 0x789   :  { %9648 = vmatpush1.bf16.msra.mxu0 %v15520_v41  ;;  %v3569_v23 = vld [vmem:[#allocation2 + $0x1428] sm:$0xff] }
 0x78a   :  { %9649 = vmatprep.subr.bf16.mxu0 %v15513_v37  ;;  %v15481_v27 = vcombine.high %v3565_v5, %v3569_v23  ;;  %v3557_v33 = vld [vmem:[#allocation2 + $0x13c8] sm:$0xff]  ;;  %v15352_v37 = vcombine.low %v3437_v3, %v3441_v4  ;;  %v15480_v43 = vcombine.low %v3565_v5, %v3569_v23 }
 0x78b   :  { %9609 = vmatpush1.bf16.msra.mxu1 %v15384_v44  ;;  %v3561_v41 = vld [vmem:[#allocation2 + $0x13e8] sm:$0xff] }
 0x78c   :  { %9610 = vmatprep.subr.bf16.mxu1 %v15377_v53  ;;  %v3685_v35 = vld [vmem:[#allocation2 + $0x17c8] sm:$0xff]  ;;  %v15473_v39 = vcombine.high %v3557_v33, %v3561_v41 }
 0x78d   :  { %9650 = vmatpush1.bf16.msra.mxu0 %v15512_v45  ;;  %v3689_v36 = vld [vmem:[#allocation2 + $0x17e8] sm:$0xff] }
 0x78e   :  { %9651 = vmatprep.subr.bf16.mxu0 %v15505_v46  ;;  %v15601_v40 = vcombine.high %v3685_v35, %v3689_v36  ;;  %v3549_v42 = vld [vmem:[#allocation2 + $0x1388] sm:$0xff]  ;;  %v15472_v46 = vcombine.low %v3557_v33, %v3561_v41  ;;  %v15600_v56 = vcombine.low %v3685_v35, %v3689_v36 }
 0x78f   :  { %9611 = vmatpush1.bf16.msra.mxu1 %v15376_v52  ;;  %v3553_v44 = vld [vmem:[#allocation2 + $0x13a8] sm:$0xff] }
 0x790   :  { %9612 = vmatprep.subr.bf16.mxu1 %v15369_v55  ;;  %v3677_v45 = vld [vmem:[#allocation2 + $0x1788] sm:$0xff]  ;;  %v15465_v49 = vcombine.high %v3549_v42, %v3553_v44 }
 0x791   :  { %9652 = vmatpush1.bf16.msra.mxu0 %v15504_v54  ;;  %v3681_v53 = vld [vmem:[#allocation2 + $0x17a8] sm:$0xff] }
 0x792   :  { %9653 = vmatprep.subr.bf16.mxu0 %v15497_v58  ;;  %v15593_v50 = vcombine.high %v3677_v45, %v3681_v53  ;;  %v3541_v38 = vld [vmem:[#allocation2 + $0x1348] sm:$0xff]  ;;  %v15464_v58 = vcombine.low %v3549_v42, %v3553_v44  ;;  %v15592_v59 = vcombine.low %v3677_v45, %v3681_v53 }
 0x793   :  { %9613 = vmatpush1.bf16.msra.mxu1 %v15368_v32  ;;  %v3545_v52 = vld [vmem:[#allocation2 + $0x1368] sm:$0xff] }
 0x794   :  { %9614 = vmatprep.subr.bf16.mxu1 %v15361_v1  ;;  %v3669_v54 = vld [vmem:[#allocation2 + $0x1748] sm:$0xff]  ;;  %v15457_v60 = vcombine.high %v3541_v38, %v3545_v52 }
 0x795   :  { %9654 = vmatpush1.bf16.msra.mxu0 %v15496_v63  ;;  %v3673_v55 = vld [vmem:[#allocation2 + $0x1768] sm:$0xff] }
 0x796   :  { %9655 = vmatprep.subr.bf16.mxu0 %v15489_v2  ;;  %v15585_v61 = vcombine.high %v3669_v54, %v3673_v55  ;;  %v3533_v57 = vld [vmem:[#allocation2 + $0x1308] sm:$0xff]  ;;  %v15456_v2 = vcombine.low %v3541_v38, %v3545_v52  ;;  %v15584_v3 = vcombine.low %v3669_v54, %v3673_v55 }
 0x797   :  { %9615 = vmatpush1.bf16.msra.mxu1 %v15360_v9  ;;  %v3537_v32 = vld [vmem:[#allocation2 + $0x1328] sm:$0xff] }
 0x798   :  { %9616 = vmatprep.subr.bf16.mxu1 %v15353_v17  ;;  %v3661_v63 = vld [vmem:[#allocation2 + $0x1708] sm:$0xff]  ;;  %v15449_v4 = vcombine.high %v3533_v57, %v3537_v32 }
 0x799   :  { %9656 = vmatpush1.bf16.msra.mxu0 %v15488_v10  ;;  %v3665_v1 = vld [vmem:[#allocation2 + $0x1728] sm:$0xff] }
 0x79a   :  { %9657 = vmatprep.subr.bf16.mxu0 %v15481_v27  ;;  %v15577_v5 = vcombine.high %v3661_v63, %v3665_v1  ;;  %v3525_v23 = vld [vmem:[#allocation2 + $0x12c8] sm:$0xff]  ;;  %v15448_v27 = vcombine.low %v3533_v57, %v3537_v32  ;;  %v15576_v33 = vcombine.low %v3661_v63, %v3665_v1 }
 0x79b   :  { %9617 = vmatpush1.bf16.msra.mxu1 %v15352_v37  ;;  %v3529_v9 = vld [vmem:[#allocation2 + $0x12e8] sm:$0xff] }
 0x79c   :  { %9618 = vmatprep.subr.bf16.mxu1 %v15473_v39  ;;  %v3653_v10 = vld [vmem:[#allocation2 + $0x16c8] sm:$0xff]  ;;  %v15441_v41 = vcombine.high %v3525_v23, %v3529_v9 }
 0x79d   :  { %9658 = vmatpush1.bf16.msra.mxu0 %v15480_v43  ;;  %v3657_v17 = vld [vmem:[#allocation2 + $0x16e8] sm:$0xff] }
 0x79e   :  { %9659 = vmatprep.subr.bf16.mxu0 %v15601_v40  ;;  %v15569_v35 = vcombine.high %v3653_v10, %v3657_v17  ;;  %v3517_v36 = vld [vmem:[#allocation2 + $0x1288] sm:$0xff]  ;;  %v15440_v40 = vcombine.low %v3525_v23, %v3529_v9  ;;  %v15568_v42 = vcombine.low %v3653_v10, %v3657_v17 }
 0x79f   :  { %9619 = vmatpush2.bf16.msra.mxu1 %v15472_v46  ;;  %v3521_v37 = vld [vmem:[#allocation2 + $0x12a8] sm:$0xff] }
 0x7a0   :  { %9620 = vmatprep.subr.bf16.mxu1 %v15465_v49  ;;  %v3645_v43 = vld [vmem:[#allocation2 + $0x1688] sm:$0xff]  ;;  %v15433_v44 = vcombine.high %v3517_v36, %v3521_v37 }
 0x7a1   :  { %9660 = vmatpush2.bf16.msra.mxu0 %v15600_v56  ;;  %v3649_v39 = vld [vmem:[#allocation2 + $0x16a8] sm:$0xff] }
 0x7a2   :  { %9661 = vmatprep.subr.bf16.mxu0 %v15593_v50  ;;  %v15561_v45 = vcombine.high %v3645_v43, %v3649_v39  ;;  %v3509_v53 = vld [vmem:[#allocation2 + $0x1248] sm:$0xff]  ;;  %v15432_v50 = vcombine.low %v3517_v36, %v3521_v37  ;;  %v15560_v38 = vcombine.low %v3645_v43, %v3649_v39 }
 0x7a3   :  { %9621 = vmatpush2.bf16.msra.mxu1 %v15464_v58  ;;  %v3513_v46 = vld [vmem:[#allocation2 + $0x1268] sm:$0xff] }
 0x7a4   :  { %9622 = vmatprep.subr.bf16.mxu1 %v15457_v60  ;;  %v3637_v56 = vld [vmem:[#allocation2 + $0x1648] sm:$0xff]  ;;  %v15425_v52 = vcombine.high %v3509_v53, %v3513_v46 }
 0x7a5   :  { %9662 = vmatpush2.bf16.msra.mxu0 %v15592_v59  ;;  %v3641_v49 = vld [vmem:[#allocation2 + $0x1668] sm:$0xff] }
 0x7a6   :  { %9663 = vmatprep.subr.bf16.mxu0 %v15585_v61  ;;  %v15553_v54 = vcombine.high %v3637_v56, %v3641_v49  ;;  %v3501_v55 = vld [vmem:[#allocation2 + $0x1208] sm:$0xff]  ;;  %v15424_v61 = vcombine.low %v3509_v53, %v3513_v46  ;;  %v15552_v57 = vcombine.low %v3637_v56, %v3641_v49 }
 0x7a7   :  { %9623 = vmatpush2.bf16.msra.mxu1 %v15456_v2  ;;  %v3505_v58 = vld [vmem:[#allocation2 + $0x1228] sm:$0xff] }
 0x7a8   :  { %9624 = vmatprep.subr.bf16.mxu1 %v15449_v4  ;;  %v3629_v59 = vld [vmem:[#allocation2 + $0x1608] sm:$0xff]  ;;  %v15417_v32 = vcombine.high %v3501_v55, %v3505_v58 }
 0x7a9   :  { %9664 = vmatpush2.bf16.msra.mxu0 %v15584_v3  ;;  %v3633_v60 = vld [vmem:[#allocation2 + $0x1628] sm:$0xff] }
 0x7aa   :  { %9665 = vmatprep.subr.bf16.mxu0 %v15577_v5  ;;  %v15545_v63 = vcombine.high %v3629_v59, %v3633_v60  ;;  %v3749_v1 = vld [vmem:[#allocation2 + $0x19c8] sm:$0xff]  ;;  %v15416_v5 = vcombine.low %v3501_v55, %v3505_v58  ;;  %v15544_v23 = vcombine.low %v3629_v59, %v3633_v60 }
 0x7ab   :  { %9625 = vmatpush2.bf16.msra.mxu1 %v15448_v27  ;;  %v3753_v2 = vld [vmem:[#allocation2 + $0x19e8] sm:$0xff] }
 0x7ac   :  { %9626 = vmatprep.subr.bf16.mxu1 %v15441_v41  ;;  %v3877_v3 = vld [vmem:[#allocation2 + $0x1dc8] sm:$0xff]  ;;  %v15665_v9 = vcombine.high %v3749_v1, %v3753_v2 }
 0x7ad   :  { %9666 = vmatpush2.bf16.msra.mxu0 %v15576_v33  ;;  %v3881_v4 = vld [vmem:[#allocation2 + $0x1de8] sm:$0xff] }
 0x7ae   :  { %9667 = vmatprep.subr.bf16.mxu0 %v15569_v35  ;;  %v15793_v10 = vcombine.high %v3877_v3, %v3881_v4  ;;  %v3741_v17 = vld [vmem:[#allocation2 + $0x1988] sm:$0xff]  ;;  %v15664_v35 = vcombine.low %v3749_v1, %v3753_v2  ;;  %v15792_v36 = vcombine.low %v3877_v3, %v3881_v4 }
 0x7af   :  { %9627 = vmatpush2.bf16.msra.mxu1 %v15440_v40  ;;  %v3745_v27 = vld [vmem:[#allocation2 + $0x19a8] sm:$0xff] }
 0x7b0   :  { %9628 = vmatprep.subr.bf16.mxu1 %v15433_v44  ;;  %v3869_v33 = vld [vmem:[#allocation2 + $0x1d88] sm:$0xff]  ;;  %v15657_v37 = vcombine.high %v3741_v17, %v3745_v27  ;;  %v15656_v56 = vcombine.low %v3741_v17, %v3745_v27 }
 0x7b1   :  { %9668 = vmatpush2.bf16.msra.mxu0 %v15568_v42  ;;  %v3873_v41 = vld [vmem:[#allocation2 + $0x1da8] sm:$0xff] }
 0x7b2   :  { %9669 = vmatprep.subr.bf16.mxu0 %v15561_v45  ;;  %v15785_v43 = vcombine.high %v3869_v33, %v3873_v41  ;;  %v3733_v39 = vld [vmem:[#allocation2 + $0x1948] sm:$0xff] }
 0x7b3   :  { %9629 = vmatpush2.bf16.msra.mxu1 %v15432_v50  ;;  %v3737_v40 = vld [vmem:[#allocation2 + $0x1968] sm:$0xff]  ;;  %v15784_v50 = vcombine.low %v3869_v33, %v3873_v41 }
 0x7b4   :  { %9630 = vmatprep.subr.bf16.mxu1 %v15425_v52  ;;  %v3861_v44 = vld [vmem:[#allocation2 + $0x1d48] sm:$0xff]  ;;  %v15648_v2 = vcombine.low %v3733_v39, %v3737_v40 }
 0x7b5   :  { %9670 = vmatpush2.bf16.msra.mxu0 %v15560_v38  ;;  %v3865_v45 = vld [vmem:[#allocation2 + $0x1d68] sm:$0xff]  ;;  %v15649_v38 = vcombine.high %v3733_v39, %v3737_v40 }
 0x7b6   :  { %9671 = vmatprep.subr.bf16.mxu0 %v15553_v54  ;;  %v15777_v58 = vcombine.high %v3861_v44, %v3865_v45  ;;  %v3725_v59 = vld [vmem:[#allocation2 + $0x1908] sm:$0xff] }
 0x7b7   :  { %9631 = vmatpush2.bf16.msra.mxu1 %v15424_v61  ;;  %v3729_v60 = vld [vmem:[#allocation2 + $0x1928] sm:$0xff] }
 0x7b8   :  { %9632 = vmatprep.subr.bf16.mxu1 %v15417_v32  ;;  %v3853_v61 = vld [vmem:[#allocation2 + $0x1d08] sm:$0xff]  ;;  %v15641_v4 = vcombine.high %v3725_v59, %v3729_v60 }
 0x7b9   :  { %9672 = vmatpush2.bf16.msra.mxu0 %v15552_v57  ;;  %v3857_v57 = vld [vmem:[#allocation2 + $0x1d28] sm:$0xff] }
 0x7ba   :  { %9673 = vmatprep.subr.bf16.mxu0 %v15545_v63  ;;  %v3717_v17 = vld [vmem:[#allocation2 + $0x18c8] sm:$0xff] }
 0x7bb   :  { %9633 = vmatpush2.bf16.msra.mxu1 %v15416_v5  ;;  %v3721_v27 = vld [vmem:[#allocation2 + $0x18e8] sm:$0xff] }
 0x7bc   :  { %9684 = vmatprep.subr.bf16.mxu1 %v15665_v9  ;;  %v3845_v33 = vld [vmem:[#allocation2 + $0x1cc8] sm:$0xff] }
 0x7bd   :  { %9674 = vmatpush2.bf16.msra.mxu0 %v15544_v23  ;;  %v3849_v41 = vld [vmem:[#allocation2 + $0x1ce8] sm:$0xff] }
 0x7be   :  { %9725 = vmatprep.subr.bf16.mxu0 %v15793_v10  ;;  %v9390_v42 = vpop.f32.mrf.mxu1  ;;  %9635 = vmatmul.mubr.bf16.vlgmr.msra.gmra.mxu1 %v18082_v20  ;;  %v15769_v10 = vcombine.high %v3853_v61, %v3857_v57  ;;  %v15761_v39 = vcombine.high %v3845_v33, %v3849_v41  ;;  %v3709_v40 = vld [vmem:[#allocation2 + $0x1888] sm:$0xff] }
 0x7bf   :  { %v9391_v53 = vadd.f32 %v9390_v42, %v18279_v0  ;;  %9685 = vmatpush1.bf16.msra.mxu1 %v15664_v35  ;;  %9716 = vmatprep.mubr.bf16.mxu1 %v18092_v29  ;;  %v3713_v42 = vld [vmem:[#allocation2 + $0x18a8] sm:$0xff] }
 0x7c0   :  { %v9431_v46 = vpop.f32.mrf.mxu0  ;;  %9676 = vmatmul.mubr.bf16.vlgmr.msra.gmra.mxu0 %v18086_v25  ;;  %v9392_v49 = vpop.f32.mrf.mxu1  ;;  %9686 = vmatprep.subr.bf16.mxu1 %v15657_v37  ;;  %v15768_v37 = vcombine.low %v3853_v61, %v3857_v57  ;;  %v3697_v61 = vld [vmem:[#allocation2 + $0x1828] sm:$0xff] }
 0x7c1   :  { %9726 = vmatpush1.bf16.msra.mxu0 %v15792_v36  ;;  %v9432_v52 = vadd.f32 %v9431_v46, %v9391_v53  ;;  %v9393_v54 = vadd.f32 %v9392_v49, %v18284_v11  ;;  %9757 = vmatprep.mubr.bf16.mxu0 %v18096_v31  ;;  %v15776_v11 = vcombine.low %v3861_v44, %v3865_v45  ;;  %v3837_v44 = vld [vmem:[#allocation2 + $0x1c88] sm:$0xff] }
 0x7c2   :  { %v9433_v55 = vpop.f32.mrf.mxu0  ;;  %9727 = vmatprep.subr.bf16.mxu0 %v15785_v43  ;;  %v9394_v0 = vpop.f32.mrf.mxu1  ;;  %v15640_v36 = vcombine.low %v3725_v59, %v3729_v60  ;;  %v15633_v43 = vcombine.high %v3717_v17, %v3721_v27  ;;  %v3841_v45 = vld [vmem:[#allocation2 + $0x1ca8] sm:$0xff]  ;;  %v15632_v53 = vcombine.low %v3717_v17, %v3721_v27  ;;  %v15760_v46 = vcombine.low %v3845_v33, %v3849_v41 }
 0x7c3   :  { %v10422_v32 = vmax.f32 %v9432_v52, 0.0  ;;  %v9434_v63 = vadd.f32 %v9433_v55, %v9393_v54  ;;  %9687 = vmatpush1.bf16.msra.mxu1 %v15656_v56  ;;  %v15625_v56 = vcombine.high %v3709_v40, %v3713_v42  ;;  %v15753_v49 = vcombine.high %v3837_v44, %v3841_v45  ;;  %v3829_v52 = vld [vmem:[#allocation2 + $0x1c48] sm:$0xff] }
 0x7c4   :  { %v9435_v1 = vpop.f32.mrf.mxu0  ;;  %v9395_v3 = vpop.f32.mrf.mxu1  ;;  %9688 = vmatprep.subr.bf16.mxu1 %v15649_v38  ;;  %v3705_v38 = vld [vmem:[#allocation2 + $0x1868] sm:$0xff]  ;;  %v15624_v55 = vcombine.low %v3709_v40, %v3713_v42 }
 0x7c5   :  { %9728 = vmatpush1.bf16.msra.mxu0 %v15784_v50  ;;  %v18292_v5 = vpack.c.bf16 %v10422_v32, %v10422_v32  ;;  %v10423_v23 = vmax.f32 %v9434_v63, 0.0  ;;  %v3701_v50 = vld [vmem:[#allocation2 + $0x1848] sm:$0xff] }
 0x7c6   :  { %v9436_v9 = vpop.f32.mrf.mxu0  ;;  %9729 = vmatprep.subr.bf16.mxu0 %v15777_v58  ;;  %v3833_v54 = vld [vmem:[#allocation2 + $0x1c68] sm:$0xff]  ;;  %v15752_v58 = vcombine.low %v3837_v44, %v3841_v45  ;;  %v15617_v59 = vcombine.high %v3701_v50, %v3705_v38  ;;  %v15616_v63 = vcombine.low %v3701_v50, %v3705_v38 }
 0x7c7   :  { %v18294_v35 = vpack.c.bf16 %v10423_v23, %v10423_v23  ;;  %9689 = vmatpush1.bf16.msra.mxu1 %v15648_v2  ;;  %v15745_v60 = vcombine.high %v3829_v52, %v3833_v54  ;;  %v3693_v0 = vld [vmem:[#allocation2 + $0x1808] sm:$0xff]  ;;  %v15744_v1 = vcombine.low %v3829_v52, %v3833_v54 }
 0x7c8   :  { %9690 = vmatprep.subr.bf16.mxu1 %v15641_v4  ;;  %v3821_v57 = vld [vmem:[#allocation2 + $0x1c08] sm:$0xff]  ;;  %v15609_v2 = vcombine.high %v3693_v0, %v3697_v61 }
 0x7c9   :  { %9730 = vmatpush1.bf16.msra.mxu0 %v15776_v11  ;;  %v3825_v32 = vld [vmem:[#allocation2 + $0x1c28] sm:$0xff] }
 0x7ca   :  { %9731 = vmatprep.subr.bf16.mxu0 %v15769_v10  ;;  %v15737_v3 = vcombine.high %v3821_v57, %v3825_v32  ;;  %v3813_v11 = vld [vmem:[#allocation2 + $0x1bc8] sm:$0xff]  ;;  %v15608_v10 = vcombine.low %v3693_v0, %v3697_v61  ;;  %v15736_v17 = vcombine.low %v3821_v57, %v3825_v32 }
 0x7cb   :  { %9691 = vmatpush1.bf16.msra.mxu1 %v15640_v36  ;;  %v3817_v4 = vld [vmem:[#allocation2 + $0x1be8] sm:$0xff] }
 0x7cc   :  { %9692 = vmatprep.subr.bf16.mxu1 %v15633_v43  ;;  %v3941_v23 = vld [vmem:[#allocation2 + $0x1fc8] sm:$0xff]  ;;  %v15729_v27 = vcombine.high %v3813_v11, %v3817_v4 }
 0x7cd   :  { %9732 = vmatpush1.bf16.msra.mxu0 %v15768_v37  ;;  %v3945_v9 = vld [vmem:[#allocation2 + $0x1fe8] sm:$0xff] }
 0x7ce   :  { %9733 = vmatprep.subr.bf16.mxu0 %v15761_v39  ;;  %v15857_v33 = vcombine.high %v3941_v23, %v3945_v9  ;;  %v3805_v41 = vld [vmem:[#allocation2 + $0x1b88] sm:$0xff]  ;;  %v15728_v39 = vcombine.low %v3813_v11, %v3817_v4  ;;  %v15856_v40 = vcombine.low %v3941_v23, %v3945_v9 }
 0x7cf   :  { %9693 = vmatpush1.bf16.msra.mxu1 %v15632_v53  ;;  %v3809_v36 = vld [vmem:[#allocation2 + $0x1ba8] sm:$0xff] }
 0x7d0   :  { %9694 = vmatprep.subr.bf16.mxu1 %v15625_v56  ;;  %v3933_v37 = vld [vmem:[#allocation2 + $0x1f88] sm:$0xff]  ;;  %v15721_v42 = vcombine.high %v3805_v41, %v3809_v36 }
 0x7d1   :  { %9734 = vmatpush1.bf16.msra.mxu0 %v15760_v46  ;;  %v3937_v43 = vld [vmem:[#allocation2 + $0x1fa8] sm:$0xff] }
 0x7d2   :  { %9735 = vmatprep.subr.bf16.mxu0 %v15753_v49  ;;  %v15849_v44 = vcombine.high %v3933_v37, %v3937_v43  ;;  %v3797_v45 = vld [vmem:[#allocation2 + $0x1b48] sm:$0xff]  ;;  %v15720_v49 = vcombine.low %v3805_v41, %v3809_v36  ;;  %v15848_v50 = vcombine.low %v3933_v37, %v3937_v43 }
 0x7d3   :  { %9695 = vmatpush1.bf16.msra.mxu1 %v15624_v55  ;;  %v3801_v53 = vld [vmem:[#allocation2 + $0x1b68] sm:$0xff] }
 0x7d4   :  { %9696 = vmatprep.subr.bf16.mxu1 %v15617_v59  ;;  %v3925_v46 = vld [vmem:[#allocation2 + $0x1f48] sm:$0xff]  ;;  %v15713_v38 = vcombine.high %v3797_v45, %v3801_v53 }
 0x7d5   :  { %9736 = vmatpush1.bf16.msra.mxu0 %v15752_v58  ;;  %v3929_v56 = vld [vmem:[#allocation2 + $0x1f68] sm:$0xff] }
 0x7d6   :  { %9737 = vmatprep.subr.bf16.mxu0 %v15745_v60  ;;  %v15841_v52 = vcombine.high %v3925_v46, %v3929_v56  ;;  %v3789_v54 = vld [vmem:[#allocation2 + $0x1b08] sm:$0xff]  ;;  %v15712_v60 = vcombine.low %v3797_v45, %v3801_v53  ;;  %v15840_v0 = vcombine.low %v3925_v46, %v3929_v56 }
 0x7d7   :  { %9697 = vmatpush1.bf16.msra.mxu1 %v15616_v63  ;;  %v3793_v55 = vld [vmem:[#allocation2 + $0x1b28] sm:$0xff] }
 0x7d8   :  { %9698 = vmatprep.subr.bf16.mxu1 %v15609_v2  ;;  %v3917_v58 = vld [vmem:[#allocation2 + $0x1f08] sm:$0xff]  ;;  %v15705_v61 = vcombine.high %v3789_v54, %v3793_v55 }
 0x7d9   :  { %9738 = vmatpush1.bf16.msra.mxu0 %v15744_v1  ;;  %v3921_v59 = vld [vmem:[#allocation2 + $0x1f28] sm:$0xff] }
 0x7da   :  { %9739 = vmatprep.subr.bf16.mxu0 %v15737_v3  ;;  %v15833_v57 = vcombine.high %v3917_v58, %v3921_v59  ;;  %v3781_v32 = vld [vmem:[#allocation2 + $0x1ac8] sm:$0xff]  ;;  %v15704_v3 = vcombine.low %v3789_v54, %v3793_v55  ;;  %v15832_v11 = vcombine.low %v3917_v58, %v3921_v59  ;;  %v2982_v59 = vld [vmem:[#allocation2 + $0x1d0] sm:$0xff] }
 0x7db   :  { %9699 = vmatpush1.bf16.msra.mxu1 %v15608_v10  ;;  %v3785_v63 = vld [vmem:[#allocation2 + $0x1ae8] sm:$0xff] }
 0x7dc   :  { %9700 = vmatprep.subr.bf16.mxu1 %v15729_v27  ;;  %v3909_v1 = vld [vmem:[#allocation2 + $0x1ec8] sm:$0xff]  ;;  %v15697_v4 = vcombine.high %v3781_v32, %v3785_v63 }
 0x7dd   :  { %9740 = vmatpush1.bf16.msra.mxu0 %v15736_v17  ;;  %v3913_v2 = vld [vmem:[#allocation2 + $0x1ee8] sm:$0xff] }
 0x7de   :  { %9741 = vmatprep.subr.bf16.mxu0 %v15857_v33  ;;  %v15825_v23 = vcombine.high %v3909_v1, %v3913_v2  ;;  %v3773_v9 = vld [vmem:[#allocation2 + $0x1a88] sm:$0xff]  ;;  %v15696_v33 = vcombine.low %v3781_v32, %v3785_v63  ;;  %v15824_v41 = vcombine.low %v3909_v1, %v3913_v2  ;;  %v2974_v2 = vld [vmem:[#allocation2 + $0x190] sm:$0xff] }
 0x7df   :  { %9701 = vmatpush2.bf16.msra.mxu1 %v15728_v39  ;;  %v3777_v10 = vld [vmem:[#allocation2 + $0x1aa8] sm:$0xff] }
 0x7e0   :  { %9702 = vmatprep.subr.bf16.mxu1 %v15721_v42  ;;  %v3901_v17 = vld [vmem:[#allocation2 + $0x1e88] sm:$0xff]  ;;  %v15689_v36 = vcombine.high %v3773_v9, %v3777_v10 }
 0x7e1   :  { %9742 = vmatpush2.bf16.msra.mxu0 %v15856_v40  ;;  %v3905_v27 = vld [vmem:[#allocation2 + $0x1ea8] sm:$0xff] }
 0x7e2   :  { %9743 = vmatprep.subr.bf16.mxu0 %v15849_v44  ;;  %v15817_v37 = vcombine.high %v3901_v17, %v3905_v27  ;;  %v3765_v43 = vld [vmem:[#allocation2 + $0x1a48] sm:$0xff]  ;;  %v15688_v44 = vcombine.low %v3773_v9, %v3777_v10  ;;  %v15816_v45 = vcombine.low %v3901_v17, %v3905_v27 }
 0x7e3   :  { %9703 = vmatpush2.bf16.msra.mxu1 %v15720_v49  ;;  %v3769_v39 = vld [vmem:[#allocation2 + $0x1a68] sm:$0xff] }
 0x7e4   :  { %9704 = vmatprep.subr.bf16.mxu1 %v15713_v38  ;;  %v3893_v40 = vld [vmem:[#allocation2 + $0x1e48] sm:$0xff]  ;;  %v15681_v53 = vcombine.high %v3765_v43, %v3769_v39 }
 0x7e5   :  { %9744 = vmatpush2.bf16.msra.mxu0 %v15848_v50  ;;  %v3897_v42 = vld [vmem:[#allocation2 + $0x1e68] sm:$0xff] }
 0x7e6   :  { %9745 = vmatprep.subr.bf16.mxu0 %v15841_v52  ;;  %v15809_v46 = vcombine.high %v3893_v40, %v3897_v42  ;;  %v3757_v56 = vld [vmem:[#allocation2 + $0x1a08] sm:$0xff]  ;;  %v15680_v52 = vcombine.low %v3765_v43, %v3769_v39  ;;  %v15808_v54 = vcombine.low %v3893_v40, %v3897_v42  ;;  %v3094_v39 = vld [vmem:[#allocation2 + $0x550] sm:$0xff] }
 0x7e7   :  { %9705 = vmatpush2.bf16.msra.mxu1 %v15712_v60  ;;  %v3761_v49 = vld [vmem:[#allocation2 + $0x1a28] sm:$0xff]  ;;  %v2986_v60 = vld [vmem:[#allocation2 + $0x1f0] sm:$0xff] }
 0x7e8   :  { %9706 = vmatprep.subr.bf16.mxu1 %v15705_v61  ;;  %v3885_v50 = vld [vmem:[#allocation2 + $0x1e08] sm:$0xff]  ;;  %v15673_v55 = vcombine.high %v3757_v56, %v3761_v49  ;;  %v3114_v61 = vld [vmem:[#allocation2 + $0x5f0] sm:$0xff]  ;;  %v14899_v63 = vcombine.high %v2982_v59, %v2986_v60  ;;  %v14898_v10 = vcombine.low %v2982_v59, %v2986_v60 }
 0x7e9   :  { %9746 = vmatpush2.bf16.msra.mxu0 %v15840_v0  ;;  %v3889_v38 = vld [vmem:[#allocation2 + $0x1e28] sm:$0xff]  ;;  %v3110_v0 = vld [vmem:[#allocation2 + $0x5d0] sm:$0xff] }
 0x7ea   :  { %9747 = vmatprep.subr.bf16.mxu0 %v15833_v57  ;;  %v15801_v58 = vcombine.high %v3885_v50, %v3889_v38  ;;  %v15672_v57 = vcombine.low %v3757_v56, %v3761_v49  ;;  %v15800_v32 = vcombine.low %v3885_v50, %v3889_v38  ;;  %v15027_v1 = vcombine.high %v3110_v0, %v3114_v61  ;;  %v3098_v40 = vld [vmem:[#allocation2 + $0x570] sm:$0xff] }
 0x7eb   :  { %9707 = vmatpush2.bf16.msra.mxu1 %v15704_v3  ;;  %v2978_v3 = vld [vmem:[#allocation2 + $0x1b0] sm:$0xff]  ;;  %v15026_v17 = vcombine.low %v3110_v0, %v3114_v61 }
 0x7ec   :  { %9708 = vmatprep.subr.bf16.mxu1 %v15697_v4  ;;  %v3106_v4 = vld [vmem:[#allocation2 + $0x5b0] sm:$0xff]  ;;  %v14891_v27 = vcombine.high %v2974_v2, %v2978_v3 }
 0x7ed   :  { %9748 = vmatpush2.bf16.msra.mxu0 %v15832_v11  ;;  %v3102_v11 = vld [vmem:[#allocation2 + $0x590] sm:$0xff] }
 0x7ee   :  { %9749 = vmatprep.subr.bf16.mxu0 %v15825_v23  ;;  %v17045_v23 = vld [vmem:[#allocation16 + $0x8] sm:$0xff]  ;;  %v3086_v59 = vld [vmem:[#allocation2 + $0x510] sm:$0xff] }
 0x7ef   :  { %9709 = vmatpush2.bf16.msra.mxu1 %v15696_v33  ;;  %v3961_v9 = vrot.slane %v17045_v23, %v18133_v34  ;;  %v3965_v33 = vrot.slane %v17045_v23, %v18136_v51  ;;  %v3090_v60 = vld [vmem:[#allocation2 + $0x530] sm:$0xff] }
 0x7f0   :  { %9710 = vmatprep.subr.bf16.mxu1 %v15689_v36  ;;  %v2966_v36 = vld [vmem:[#allocation2 + $0x150] sm:$0xff] }
 0x7f1   :  { %9750 = vmatpush2.bf16.msra.mxu0 %v15824_v41  ;;  %v15019_v41 = vcombine.high %v3102_v11, %v3106_v4  ;;  %v3078_v23 = vld [vmem:[#allocation2 + $0x4d0] sm:$0xff] }
 0x7f2   :  { %9751 = vmatprep.subr.bf16.mxu0 %v15817_v37  ;;  %v2970_v37 = vld [vmem:[#allocation2 + $0x170] sm:$0xff] }
 0x7f3   :  { %9711 = vmatpush2.bf16.msra.mxu1 %v15688_v44  ;;  %v14883_v56 = vcombine.high %v2966_v36, %v2970_v37 }
 0x7f4   :  { %9712 = vmatprep.subr.bf16.mxu1 %v15681_v53 }
 0x7f5   :  { %9752 = vmatpush2.bf16.msra.mxu0 %v15816_v45  ;;  %v14890_v45 = vcombine.low %v2974_v2, %v2978_v3  ;;  %v15003_v3 = vcombine.high %v3086_v59, %v3090_v60 }
 0x7f6   :  { %9753 = vmatprep.subr.bf16.mxu0 %v15809_v46  ;;  %v15018_v46 = vcombine.low %v3102_v11, %v3106_v4  ;;  %v2950_v11 = vld [vmem:[#allocation2 + $0xd0] sm:$0xff] }
 0x7f7   :  { %9713 = vmatpush2.bf16.msra.mxu1 %v15680_v52  ;;  %v15011_v52 = vcombine.high %v3094_v39, %v3098_v40  ;;  %v2954_v4 = vld [vmem:[#allocation2 + $0xf0] sm:$0xff] }
 0x7f8   :  { %9714 = vmatprep.subr.bf16.mxu1 %v15673_v55  ;;  %v2962_v55 = vld [vmem:[#allocation2 + $0x130] sm:$0xff] }
 0x7f9   :  { %9754 = vmatpush2.bf16.msra.mxu0 %v15808_v54  ;;  %v2958_v54 = vld [vmem:[#allocation2 + $0x110] sm:$0xff] }
 0x7fa   :  { %9755 = vmatprep.subr.bf16.mxu0 %v15801_v58 }
 0x7fb   :  { %9715 = vmatpush2.bf16.msra.mxu1 %v15672_v57  ;;  %v14882_v57 = vcombine.low %v2966_v36, %v2970_v37  ;;  %v2946_v36 = vld [vmem:[#allocation2 + $0xb0] sm:$0xff] }
 0x7fc   :  { %9766 = vmatprep.subr.bf16.mxu1 %v14899_v63  ;;  %v15010_v63 = vcombine.low %v3094_v39, %v3098_v40  ;;  %v3070_v37 = vld [vmem:[#allocation2 + $0x490] sm:$0xff]  ;;  %v14866_v39 = vcombine.low %v2950_v11, %v2954_v4 }
 0x7fd   :  { %9756 = vmatpush2.bf16.msra.mxu0 %v15800_v32 }
 0x7fe   :  { %9807 = vmatprep.subr.bf16.mxu0 %v15027_v1  ;;  %v9472_v43 = vpop.f32.mrf.mxu1  ;;  %9717 = vmatmul.mubr.bf16.vlgmr.msra.gmra.mxu1 %v18090_v28  ;;  %v14875_v1 = vcombine.high %v2958_v54, %v2962_v55 }
 0x7ff   :  { %v9473_v42 = vadd.f32 %v9472_v43, %v3961_v9  ;;  %9767 = vmatpush1.bf16.msra.mxu1 %v14898_v10  ;;  %9798 = vmatprep.mubr.bf16.mxu1 %v18068_v7  ;;  %v3082_v9 = vld [vmem:[#allocation2 + $0x4f0] sm:$0xff]  ;;  %v14874_v10 = vcombine.low %v2958_v54, %v2962_v55 }
 0x800   :  { %v9513_v44 = vpop.f32.mrf.mxu0  ;;  %9758 = vmatmul.mubr.bf16.vlgmr.msra.gmra.mxu0 %v18094_v30  ;;  %v9474_v53 = vpop.f32.mrf.mxu1  ;;  %9768 = vmatprep.subr.bf16.mxu1 %v14891_v27  ;;  %v14867_v27 = vcombine.high %v2950_v11, %v2954_v4  ;;  %v3074_v43 = vld [vmem:[#allocation2 + $0x4b0] sm:$0xff]  ;;  %v14994_v40 = vcombine.low %v3078_v23, %v3082_v9 }
 0x801   :  { %9808 = vmatpush1.bf16.msra.mxu0 %v15026_v17  ;;  %v18300_v49 = vadd.f32 %v9513_v44, %v9473_v42  ;;  %v9475_v50 = vadd.f32 %v9474_v53, %v3965_v33  ;;  %9839 = vmatprep.mubr.bf16.mxu0 %v18072_v12  ;;  %v15002_v17 = vcombine.low %v3086_v59, %v3090_v60  ;;  %v2938_v53 = vld [vmem:[#allocation2 + $0x70] sm:$0xff] }
 0x802   :  { %v9515_v38 = vpop.f32.mrf.mxu0  ;;  %9809 = vmatprep.subr.bf16.mxu0 %v15019_v41  ;;  %v9476_v58 = vpop.f32.mrf.mxu1  ;;  %v14995_v33 = vcombine.high %v3078_v23, %v3082_v9  ;;  %v2942_v41 = vld [vmem:[#allocation2 + $0x90] sm:$0xff]  ;;  %v14987_v44 = vcombine.high %v3070_v37, %v3074_v43 }
 0x803   :  { %v18304_v0 = vadd.f32 %v9515_v38, %v9475_v50  ;;  %9769 = vmatpush1.bf16.msra.mxu1 %v14890_v45  ;;  %v14859_v42 = vcombine.high %v2942_v41, %v2946_v36  ;;  %v2934_v45 = vld [vmem:[#allocation2 + $0x50] sm:$0xff]  ;;  %v14858_v50 = vcombine.low %v2942_v41, %v2946_v36  ;;  %v14986_v38 = vcombine.low %v3070_v37, %v3074_v43 }
 0x804   :  { %v9517_v61 = vpop.f32.mrf.mxu0  ;;  %v9477_v32 = vpop.f32.mrf.mxu1  ;;  %9770 = vmatprep.subr.bf16.mxu1 %v14883_v56  ;;  %v3066_v56 = vld [vmem:[#allocation2 + $0x470] sm:$0xff] }
 0x805   :  { %9810 = vmatpush1.bf16.msra.mxu0 %v15018_v46  ;;  %v3062_v46 = vld [vmem:[#allocation2 + $0x450] sm:$0xff]  ;;  %v14850_v61 = vcombine.low %v2934_v45, %v2938_v53 }
 0x806   :  { %v9518_v2 = vpop.f32.mrf.mxu0  ;;  %9811 = vmatprep.subr.bf16.mxu0 %v15011_v52  ;;  %v14851_v52 = vcombine.high %v2934_v45, %v2938_v53  ;;  %v14979_v54 = vcombine.high %v3062_v46, %v3066_v56  ;;  %v2926_v55 = vld [vmem:[#allocation2 + $0x10] sm:$0xff] }
 0x807   :  { %9771 = vmatpush1.bf16.msra.mxu1 %v14882_v57  ;;  %v2930_v58 = vld [vmem:[#allocation2 + $0x30] sm:$0xff]  ;;  %v14978_v57 = vcombine.low %v3062_v46, %v3066_v56 }
 0x808   :  { %9772 = vmatprep.subr.bf16.mxu1 %v14875_v1  ;;  %v3054_v59 = vld [vmem:[#allocation2 + $0x410] sm:$0xff]  ;;  %v14843_v32 = vcombine.high %v2926_v55, %v2930_v58  ;;  %v14842_v4 = vcombine.low %v2926_v55, %v2930_v58 }
 0x809   :  { %9812 = vmatpush1.bf16.msra.mxu0 %v15010_v63  ;;  %v3058_v60 = vld [vmem:[#allocation2 + $0x430] sm:$0xff] }
 0x80a   :  { %9813 = vmatprep.subr.bf16.mxu0 %v15003_v3  ;;  %v14971_v63 = vcombine.high %v3054_v59, %v3058_v60  ;;  %v3046_v1 = vld [vmem:[#allocation2 + $0x3d0] sm:$0xff]  ;;  %v14970_v23 = vcombine.low %v3054_v59, %v3058_v60 }
 0x80b   :  { %9773 = vmatpush1.bf16.msra.mxu1 %v14874_v10  ;;  %v3050_v2 = vld [vmem:[#allocation2 + $0x3f0] sm:$0xff] }
 0x80c   :  { %9774 = vmatprep.subr.bf16.mxu1 %v14867_v27  ;;  %v3174_v3 = vld [vmem:[#allocation2 + $0x7d0] sm:$0xff]  ;;  %v14963_v9 = vcombine.high %v3046_v1, %v3050_v2  ;;  %v14962_v36 = vcombine.low %v3046_v1, %v3050_v2 }
 0x80d   :  { %9814 = vmatpush1.bf16.msra.mxu0 %v15002_v17  ;;  %v3178_v11 = vld [vmem:[#allocation2 + $0x7f0] sm:$0xff] }
 0x80e   :  { %9815 = vmatprep.subr.bf16.mxu0 %v14995_v33  ;;  %v15091_v10 = vcombine.high %v3174_v3, %v3178_v11  ;;  %v3038_v17 = vld [vmem:[#allocation2 + $0x390] sm:$0xff]  ;;  %v15090_v37 = vcombine.low %v3174_v3, %v3178_v11 }
 0x80f   :  { %9775 = vmatpush1.bf16.msra.mxu1 %v14866_v39  ;;  %v3042_v27 = vld [vmem:[#allocation2 + $0x3b0] sm:$0xff] }
 0x810   :  { %9776 = vmatprep.subr.bf16.mxu1 %v14859_v42  ;;  %v3166_v33 = vld [vmem:[#allocation2 + $0x790] sm:$0xff]  ;;  %v14955_v43 = vcombine.high %v3038_v17, %v3042_v27  ;;  %v14954_v53 = vcombine.low %v3038_v17, %v3042_v27 }
 0x811   :  { %9816 = vmatpush1.bf16.msra.mxu0 %v14994_v40  ;;  %v3170_v41 = vld [vmem:[#allocation2 + $0x7b0] sm:$0xff] }
 0x812   :  { %9817 = vmatprep.subr.bf16.mxu0 %v14987_v44  ;;  %v15083_v39 = vcombine.high %v3166_v33, %v3170_v41  ;;  %v3030_v40 = vld [vmem:[#allocation2 + $0x350] sm:$0xff]  ;;  %v15082_v46 = vcombine.low %v3166_v33, %v3170_v41 }
 0x813   :  { %9777 = vmatpush1.bf16.msra.mxu1 %v14858_v50  ;;  %v3034_v42 = vld [vmem:[#allocation2 + $0x370] sm:$0xff] }
 0x814   :  { %9778 = vmatprep.subr.bf16.mxu1 %v14851_v52  ;;  %v3158_v44 = vld [vmem:[#allocation2 + $0x750] sm:$0xff]  ;;  %v14947_v56 = vcombine.high %v3030_v40, %v3034_v42  ;;  %v14946_v58 = vcombine.low %v3030_v40, %v3034_v42 }
 0x815   :  { %9818 = vmatpush1.bf16.msra.mxu0 %v14986_v38  ;;  %v3162_v45 = vld [vmem:[#allocation2 + $0x770] sm:$0xff] }
 0x816   :  { %9819 = vmatprep.subr.bf16.mxu0 %v14979_v54  ;;  %v15075_v50 = vcombine.high %v3158_v44, %v3162_v45  ;;  %v3022_v38 = vld [vmem:[#allocation2 + $0x310] sm:$0xff]  ;;  %v15074_v59 = vcombine.low %v3158_v44, %v3162_v45 }
 0x817   :  { %9779 = vmatpush1.bf16.msra.mxu1 %v14850_v61  ;;  %v3026_v52 = vld [vmem:[#allocation2 + $0x330] sm:$0xff] }
 0x818   :  { %9780 = vmatprep.subr.bf16.mxu1 %v14843_v32  ;;  %v3150_v54 = vld [vmem:[#allocation2 + $0x710] sm:$0xff]  ;;  %v14939_v60 = vcombine.high %v3022_v38, %v3026_v52  ;;  %v14938_v2 = vcombine.low %v3022_v38, %v3026_v52 }
 0x819   :  { %9820 = vmatpush1.bf16.msra.mxu0 %v14978_v57  ;;  %v3154_v55 = vld [vmem:[#allocation2 + $0x730] sm:$0xff] }
 0x81a   :  { %9821 = vmatprep.subr.bf16.mxu0 %v14971_v63  ;;  %v15067_v61 = vcombine.high %v3150_v54, %v3154_v55  ;;  %v3014_v57 = vld [vmem:[#allocation2 + $0x2d0] sm:$0xff]  ;;  %v15066_v3 = vcombine.low %v3150_v54, %v3154_v55 }
 0x81b   :  { %9781 = vmatpush1.bf16.msra.mxu1 %v14842_v4  ;;  %v3018_v32 = vld [vmem:[#allocation2 + $0x2f0] sm:$0xff] }
 0x81c   :  { %9782 = vmatprep.subr.bf16.mxu1 %v14963_v9  ;;  %v3142_v63 = vld [vmem:[#allocation2 + $0x6d0] sm:$0xff]  ;;  %v14931_v11 = vcombine.high %v3014_v57, %v3018_v32  ;;  %v14930_v27 = vcombine.low %v3014_v57, %v3018_v32 }
 0x81d   :  { %9822 = vmatpush1.bf16.msra.mxu0 %v14970_v23  ;;  %v3146_v1 = vld [vmem:[#allocation2 + $0x6f0] sm:$0xff] }
 0x81e   :  { %9823 = vmatprep.subr.bf16.mxu0 %v15091_v10  ;;  %v15059_v4 = vcombine.high %v3142_v63, %v3146_v1  ;;  %v3006_v23 = vld [vmem:[#allocation2 + $0x290] sm:$0xff]  ;;  %v15058_v33 = vcombine.low %v3142_v63, %v3146_v1 }
 0x81f   :  { %9783 = vmatpush2.bf16.msra.mxu1 %v14962_v36  ;;  %v3010_v9 = vld [vmem:[#allocation2 + $0x2b0] sm:$0xff] }
 0x820   :  { %9784 = vmatprep.subr.bf16.mxu1 %v14955_v43  ;;  %v3134_v10 = vld [vmem:[#allocation2 + $0x690] sm:$0xff]  ;;  %v14923_v41 = vcombine.high %v3006_v23, %v3010_v9  ;;  %v14922_v42 = vcombine.low %v3006_v23, %v3010_v9 }
 0x821   :  { %9824 = vmatpush2.bf16.msra.mxu0 %v15090_v37  ;;  %v3138_v17 = vld [vmem:[#allocation2 + $0x6b0] sm:$0xff] }
 0x822   :  { %9825 = vmatprep.subr.bf16.mxu0 %v15083_v39  ;;  %v15051_v36 = vcombine.high %v3134_v10, %v3138_v17  ;;  %v2998_v37 = vld [vmem:[#allocation2 + $0x250] sm:$0xff]  ;;  %v15050_v44 = vcombine.low %v3134_v10, %v3138_v17 }
 0x823   :  { %9785 = vmatpush2.bf16.msra.mxu1 %v14954_v53  ;;  %v3002_v43 = vld [vmem:[#allocation2 + $0x270] sm:$0xff] }
 0x824   :  { %9786 = vmatprep.subr.bf16.mxu1 %v14947_v56  ;;  %v3126_v39 = vld [vmem:[#allocation2 + $0x650] sm:$0xff]  ;;  %v14915_v45 = vcombine.high %v2998_v37, %v3002_v43  ;;  %v14914_v52 = vcombine.low %v2998_v37, %v3002_v43 }
 0x825   :  { %9826 = vmatpush2.bf16.msra.mxu0 %v15082_v46  ;;  %v3130_v40 = vld [vmem:[#allocation2 + $0x670] sm:$0xff] }
 0x826   :  { %9827 = vmatprep.subr.bf16.mxu0 %v15075_v50  ;;  %v15043_v53 = vcombine.high %v3126_v39, %v3130_v40  ;;  %v2990_v46 = vld [vmem:[#allocation2 + $0x210] sm:$0xff]  ;;  %v15042_v54 = vcombine.low %v3126_v39, %v3130_v40 }
 0x827   :  { %9787 = vmatpush2.bf16.msra.mxu1 %v14946_v58  ;;  %v2994_v56 = vld [vmem:[#allocation2 + $0x230] sm:$0xff] }
 0x828   :  { %9788 = vmatprep.subr.bf16.mxu1 %v14939_v60  ;;  %v3118_v50 = vld [vmem:[#allocation2 + $0x610] sm:$0xff]  ;;  %v14907_v55 = vcombine.high %v2990_v46, %v2994_v56  ;;  %v14906_v32 = vcombine.low %v2990_v46, %v2994_v56 }
 0x829   :  { %9828 = vmatpush2.bf16.msra.mxu0 %v15074_v59  ;;  %v3122_v38 = vld [vmem:[#allocation2 + $0x630] sm:$0xff] }
 0x82a   :  { %9829 = vmatprep.subr.bf16.mxu0 %v15067_v61  ;;  %v15035_v58 = vcombine.high %v3118_v50, %v3122_v38  ;;  %v3238_v59 = vld [vmem:[#allocation2 + $0x9d0] sm:$0xff]  ;;  %v15034_v63 = vcombine.low %v3118_v50, %v3122_v38 }
 0x82b   :  { %9789 = vmatpush2.bf16.msra.mxu1 %v14938_v2  ;;  %v3242_v60 = vld [vmem:[#allocation2 + $0x9f0] sm:$0xff] }
 0x82c   :  { %9790 = vmatprep.subr.bf16.mxu1 %v14931_v11  ;;  %v3366_v61 = vld [vmem:[#allocation2 + $0xdd0] sm:$0xff]  ;;  %v15155_v1 = vcombine.high %v3238_v59, %v3242_v60  ;;  %v15154_v9 = vcombine.low %v3238_v59, %v3242_v60 }
 0x82d   :  { %9830 = vmatpush2.bf16.msra.mxu0 %v15066_v3  ;;  %v3370_v57 = vld [vmem:[#allocation2 + $0xdf0] sm:$0xff] }
 0x82e   :  { %9831 = vmatprep.subr.bf16.mxu0 %v15059_v4  ;;  %v15283_v2 = vcombine.high %v3366_v61, %v3370_v57  ;;  %v3230_v3 = vld [vmem:[#allocation2 + $0x990] sm:$0xff]  ;;  %v15282_v10 = vcombine.low %v3366_v61, %v3370_v57 }
 0x82f   :  { %9791 = vmatpush2.bf16.msra.mxu1 %v14930_v27  ;;  %v3234_v11 = vld [vmem:[#allocation2 + $0x9b0] sm:$0xff] }
 0x830   :  { %9792 = vmatprep.subr.bf16.mxu1 %v14923_v41  ;;  %v3358_v4 = vld [vmem:[#allocation2 + $0xd90] sm:$0xff]  ;;  %v15147_v17 = vcombine.high %v3230_v3, %v3234_v11 }
 0x831   :  { %9832 = vmatpush2.bf16.msra.mxu0 %v15058_v33  ;;  %v3362_v23 = vld [vmem:[#allocation2 + $0xdb0] sm:$0xff] }
 0x832   :  { %9833 = vmatprep.subr.bf16.mxu0 %v15051_v36  ;;  %v15275_v27 = vcombine.high %v3358_v4, %v3362_v23  ;;  %v3222_v33 = vld [vmem:[#allocation2 + $0x950] sm:$0xff] }
 0x833   :  { %9793 = vmatpush2.bf16.msra.mxu1 %v14922_v42  ;;  %v3226_v41 = vld [vmem:[#allocation2 + $0x970] sm:$0xff]  ;;  %v15146_v42 = vcombine.low %v3230_v3, %v3234_v11 }
 0x834   :  { %9794 = vmatprep.subr.bf16.mxu1 %v14915_v45  ;;  %v3350_v37 = vld [vmem:[#allocation2 + $0xd50] sm:$0xff]  ;;  %v15274_v45 = vcombine.low %v3358_v4, %v3362_v23  ;;  %v15138_v61 = vcombine.low %v3222_v33, %v3226_v41 }
 0x835   :  { %9834 = vmatpush2.bf16.msra.mxu0 %v15050_v44  ;;  %v3354_v43 = vld [vmem:[#allocation2 + $0xd70] sm:$0xff] }
 0x836   :  { %9835 = vmatprep.subr.bf16.mxu0 %v15043_v53  ;;  %v15139_v53 = vcombine.high %v3222_v33, %v3226_v41  ;;  %v15267_v38 = vcombine.high %v3350_v37, %v3354_v43  ;;  %v3210_v3 = vld [vmem:[#allocation2 + $0x8f0] sm:$0xff] }
 0x837   :  { %9795 = vmatpush2.bf16.msra.mxu1 %v14914_v52  ;;  %v3214_v52 = vld [vmem:[#allocation2 + $0x910] sm:$0xff] }
 0x838   :  { %9796 = vmatprep.subr.bf16.mxu1 %v14907_v55  ;;  %v3342_v55 = vld [vmem:[#allocation2 + $0xd10] sm:$0xff] }
 0x839   :  { %9836 = vmatpush2.bf16.msra.mxu0 %v15042_v54  ;;  %v3218_v54 = vld [vmem:[#allocation2 + $0x930] sm:$0xff] }
 0x83a   :  { %9837 = vmatprep.subr.bf16.mxu0 %v15035_v58  ;;  %v3346_v58 = vld [vmem:[#allocation2 + $0xd30] sm:$0xff]  ;;  %v15130_v23 = vcombine.low %v3214_v52, %v3218_v54 }
 0x83b   :  { %9797 = vmatpush2.bf16.msra.mxu1 %v14906_v32  ;;  %v15131_v32 = vcombine.high %v3214_v52, %v3218_v54  ;;  %v3334_v11 = vld [vmem:[#allocation2 + $0xcd0] sm:$0xff] }
 0x83c   :  { %9848 = vmatprep.subr.bf16.mxu1 %v15155_v1  ;;  %v15259_v1 = vcombine.high %v3342_v55, %v3346_v58  ;;  %v3338_v4 = vld [vmem:[#allocation2 + $0xcf0] sm:$0xff] }
 0x83d   :  { %9838 = vmatpush2.bf16.msra.mxu0 %v15034_v63  ;;  %v3202_v33 = vld [vmem:[#allocation2 + $0x8b0] sm:$0xff] }
 0x83e   :  { %9889 = vmatprep.subr.bf16.mxu0 %v15283_v2  ;;  %v9554_v36 = vpop.f32.mrf.mxu1  ;;  %9799 = vmatmul.mubr.bf16.vlgmr.msra.gmra.mxu1 %v18066_v6  ;;  %v3206_v2 = vld [vmem:[#allocation2 + $0x8d0] sm:$0xff] }
 0x83f   :  { %v9555_v39 = vadd.f32 %v9554_v36, %v18300_v49  ;;  %9849 = vmatpush1.bf16.msra.mxu1 %v15154_v9  ;;  %9880 = vmatprep.mubr.bf16.mxu1 %v18076_v14  ;;  %v15258_v9 = vcombine.low %v3342_v55, %v3346_v58  ;;  %v3326_v41 = vld [vmem:[#allocation2 + $0xc90] sm:$0xff] }
 0x840   :  { %v9595_v40 = vpop.f32.mrf.mxu0  ;;  %9840 = vmatmul.mubr.bf16.vlgmr.msra.gmra.mxu0 %v18070_v8  ;;  %v9556_v44 = vpop.f32.mrf.mxu1  ;;  %9850 = vmatprep.subr.bf16.mxu1 %v15147_v17  ;;  %v15251_v17 = vcombine.high %v3334_v11, %v3338_v4  ;;  %v3330_v36 = vld [vmem:[#allocation2 + $0xcb0] sm:$0xff] }
 0x841   :  { %9890 = vmatpush1.bf16.msra.mxu0 %v15282_v10  ;;  %v18309_v46 = vadd.f32 %v9595_v40, %v9555_v39  ;;  %v9557_v56 = vadd.f32 %v9556_v44, %v18304_v0  ;;  %9921 = vmatprep.mubr.bf16.mxu0 %v18080_v19  ;;  %v15266_v0 = vcombine.low %v3350_v37, %v3354_v43  ;;  %v3194_v44 = vld [vmem:[#allocation2 + $0x870] sm:$0xff] }
 0x842   :  { %v9597_v50 = vpop.f32.mrf.mxu0  ;;  %9891 = vmatprep.subr.bf16.mxu0 %v15275_v27  ;;  %v9558_v49 = vpop.f32.mrf.mxu1  ;;  %v15123_v10 = vcombine.high %v3206_v2, %v3210_v3  ;;  %v3198_v27 = vld [vmem:[#allocation2 + $0x890] sm:$0xff]  ;;  %v15122_v37 = vcombine.low %v3206_v2, %v3210_v3  ;;  %v15250_v43 = vcombine.low %v3334_v11, %v3338_v4  ;;  %v15243_v40 = vcombine.high %v3326_v41, %v3330_v36 }
 0x843   :  { %v18314_v59 = vadd.f32 %v9597_v50, %v9557_v56  ;;  %9851 = vmatpush1.bf16.msra.mxu1 %v15146_v42  ;;  %v15115_v39 = vcombine.high %v3198_v27, %v3202_v33  ;;  %v3190_v42 = vld [vmem:[#allocation2 + $0x850] sm:$0xff]  ;;  %v15114_v56 = vcombine.low %v3198_v27, %v3202_v33  ;;  %v15242_v50 = vcombine.low %v3326_v41, %v3330_v36 }
 0x844   :  { %v9599_v60 = vpop.f32.mrf.mxu0  ;;  %v9559_v57 = vpop.f32.mrf.mxu1  ;;  %9852 = vmatprep.subr.bf16.mxu1 %v15139_v53  ;;  %v3322_v53 = vld [vmem:[#allocation2 + $0xc70] sm:$0xff] }
 0x845   :  { %9892 = vmatpush1.bf16.msra.mxu0 %v15274_v45  ;;  %v3318_v45 = vld [vmem:[#allocation2 + $0xc50] sm:$0xff]  ;;  %v15106_v60 = vcombine.low %v3190_v42, %v3194_v44 }
 0x846   :  { %v9600_v63 = vpop.f32.mrf.mxu0  ;;  %9893 = vmatprep.subr.bf16.mxu0 %v15267_v38  ;;  %v15107_v38 = vcombine.high %v3190_v42, %v3194_v44  ;;  %v15235_v52 = vcombine.high %v3318_v45, %v3322_v53  ;;  %v3182_v54 = vld [vmem:[#allocation2 + $0x810] sm:$0xff] }
 0x847   :  { %9853 = vmatpush1.bf16.msra.mxu1 %v15138_v61  ;;  %v3186_v49 = vld [vmem:[#allocation2 + $0x830] sm:$0xff]  ;;  %v15234_v61 = vcombine.low %v3318_v45, %v3322_v53 }
 0x848   :  { %9854 = vmatprep.subr.bf16.mxu1 %v15131_v32  ;;  %v3310_v55 = vld [vmem:[#allocation2 + $0xc10] sm:$0xff]  ;;  %v15099_v57 = vcombine.high %v3182_v54, %v3186_v49  ;;  %v15098_v3 = vcombine.low %v3182_v54, %v3186_v49 }
 0x849   :  { %9894 = vmatpush1.bf16.msra.mxu0 %v15266_v0  ;;  %v3314_v58 = vld [vmem:[#allocation2 + $0xc30] sm:$0xff] }
 0x84a   :  { %9895 = vmatprep.subr.bf16.mxu0 %v15259_v1  ;;  %v15227_v0 = vcombine.high %v3310_v55, %v3314_v58  ;;  %v3302_v32 = vld [vmem:[#allocation2 + $0xbd0] sm:$0xff]  ;;  %v15226_v11 = vcombine.low %v3310_v55, %v3314_v58 }
 0x84b   :  { %9855 = vmatpush1.bf16.msra.mxu1 %v15130_v23  ;;  %v3306_v63 = vld [vmem:[#allocation2 + $0xbf0] sm:$0xff] }
 0x84c   :  { %9856 = vmatprep.subr.bf16.mxu1 %v15123_v10  ;;  %v3430_v1 = vld [vmem:[#allocation2 + $0xfd0] sm:$0xff]  ;;  %v15219_v4 = vcombine.high %v3302_v32, %v3306_v63  ;;  %v15218_v33 = vcombine.low %v3302_v32, %v3306_v63 }
 0x84d   :  { %9896 = vmatpush1.bf16.msra.mxu0 %v15258_v9  ;;  %v3434_v2 = vld [vmem:[#allocation2 + $0xff0] sm:$0xff] }
 0x84e   :  { %9897 = vmatprep.subr.bf16.mxu0 %v15251_v17  ;;  %v15347_v23 = vcombine.high %v3430_v1, %v3434_v2  ;;  %v3294_v9 = vld [vmem:[#allocation2 + $0xb90] sm:$0xff]  ;;  %v15346_v41 = vcombine.low %v3430_v1, %v3434_v2 }
 0x84f   :  { %9857 = vmatpush1.bf16.msra.mxu1 %v15122_v37  ;;  %v3298_v10 = vld [vmem:[#allocation2 + $0xbb0] sm:$0xff] }
 0x850   :  { %9858 = vmatprep.subr.bf16.mxu1 %v15115_v39  ;;  %v3422_v17 = vld [vmem:[#allocation2 + $0xf90] sm:$0xff]  ;;  %v15211_v36 = vcombine.high %v3294_v9, %v3298_v10  ;;  %v15210_v44 = vcombine.low %v3294_v9, %v3298_v10 }
 0x851   :  { %9898 = vmatpush1.bf16.msra.mxu0 %v15250_v43  ;;  %v3426_v27 = vld [vmem:[#allocation2 + $0xfb0] sm:$0xff] }
 0x852   :  { %9899 = vmatprep.subr.bf16.mxu0 %v15243_v40  ;;  %v15339_v37 = vcombine.high %v3422_v17, %v3426_v27  ;;  %v3286_v43 = vld [vmem:[#allocation2 + $0xb50] sm:$0xff]  ;;  %v15338_v45 = vcombine.low %v3422_v17, %v3426_v27 }
 0x853   :  { %9859 = vmatpush1.bf16.msra.mxu1 %v15114_v56  ;;  %v3290_v39 = vld [vmem:[#allocation2 + $0xb70] sm:$0xff] }
 0x854   :  { %9860 = vmatprep.subr.bf16.mxu1 %v15107_v38  ;;  %v3414_v40 = vld [vmem:[#allocation2 + $0xf50] sm:$0xff]  ;;  %v15203_v53 = vcombine.high %v3286_v43, %v3290_v39  ;;  %v15202_v49 = vcombine.low %v3286_v43, %v3290_v39 }
 0x855   :  { %9900 = vmatpush1.bf16.msra.mxu0 %v15242_v50  ;;  %v3418_v42 = vld [vmem:[#allocation2 + $0xf70] sm:$0xff] }
 0x856   :  { %9901 = vmatprep.subr.bf16.mxu0 %v15235_v52  ;;  %v15331_v56 = vcombine.high %v3414_v40, %v3418_v42  ;;  %v3278_v50 = vld [vmem:[#allocation2 + $0xb10] sm:$0xff]  ;;  %v15330_v55 = vcombine.low %v3414_v40, %v3418_v42 }
 0x857   :  { %9861 = vmatpush1.bf16.msra.mxu1 %v15106_v60  ;;  %v3282_v38 = vld [vmem:[#allocation2 + $0xb30] sm:$0xff] }
 0x858   :  { %9862 = vmatprep.subr.bf16.mxu1 %v15099_v57  ;;  %v3406_v52 = vld [vmem:[#allocation2 + $0xf10] sm:$0xff]  ;;  %v15195_v58 = vcombine.high %v3278_v50, %v3282_v38  ;;  %v15194_v63 = vcombine.low %v3278_v50, %v3282_v38 }
 0x859   :  { %9902 = vmatpush1.bf16.msra.mxu0 %v15234_v61  ;;  %v3410_v54 = vld [vmem:[#allocation2 + $0xf30] sm:$0xff] }
 0x85a   :  { %9903 = vmatprep.subr.bf16.mxu0 %v15227_v0  ;;  %v15323_v60 = vcombine.high %v3406_v52, %v3410_v54  ;;  %v3270_v61 = vld [vmem:[#allocation2 + $0xad0] sm:$0xff]  ;;  %v15322_v1 = vcombine.low %v3406_v52, %v3410_v54 }
 0x85b   :  { %9863 = vmatpush1.bf16.msra.mxu1 %v15098_v3  ;;  %v3274_v57 = vld [vmem:[#allocation2 + $0xaf0] sm:$0xff] }
 0x85c   :  { %9864 = vmatprep.subr.bf16.mxu1 %v15219_v4  ;;  %v3398_v0 = vld [vmem:[#allocation2 + $0xed0] sm:$0xff]  ;;  %v15187_v2 = vcombine.high %v3270_v61, %v3274_v57  ;;  %v15186_v10 = vcombine.low %v3270_v61, %v3274_v57 }
 0x85d   :  { %9904 = vmatpush1.bf16.msra.mxu0 %v15226_v11  ;;  %v3402_v32 = vld [vmem:[#allocation2 + $0xef0] sm:$0xff] }
 0x85e   :  { %9905 = vmatprep.subr.bf16.mxu0 %v15347_v23  ;;  %v15315_v3 = vcombine.high %v3398_v0, %v3402_v32  ;;  %v3262_v11 = vld [vmem:[#allocation2 + $0xa90] sm:$0xff]  ;;  %v15314_v17 = vcombine.low %v3398_v0, %v3402_v32 }
 0x85f   :  { %9865 = vmatpush2.bf16.msra.mxu1 %v15218_v33  ;;  %v3266_v4 = vld [vmem:[#allocation2 + $0xab0] sm:$0xff] }
 0x860   :  { %9866 = vmatprep.subr.bf16.mxu1 %v15211_v36  ;;  %v3390_v23 = vld [vmem:[#allocation2 + $0xe90] sm:$0xff]  ;;  %v15179_v27 = vcombine.high %v3262_v11, %v3266_v4  ;;  %v15178_v39 = vcombine.low %v3262_v11, %v3266_v4 }
 0x861   :  { %9906 = vmatpush2.bf16.msra.mxu0 %v15346_v41  ;;  %v3394_v9 = vld [vmem:[#allocation2 + $0xeb0] sm:$0xff] }
 0x862   :  { %9907 = vmatprep.subr.bf16.mxu0 %v15339_v37  ;;  %v15307_v33 = vcombine.high %v3390_v23, %v3394_v9  ;;  %v3254_v41 = vld [vmem:[#allocation2 + $0xa50] sm:$0xff]  ;;  %v15306_v40 = vcombine.low %v3390_v23, %v3394_v9 }
 0x863   :  { %9867 = vmatpush2.bf16.msra.mxu1 %v15210_v44  ;;  %v3258_v36 = vld [vmem:[#allocation2 + $0xa70] sm:$0xff] }
 0x864   :  { %9868 = vmatprep.subr.bf16.mxu1 %v15203_v53  ;;  %v3382_v37 = vld [vmem:[#allocation2 + $0xe50] sm:$0xff]  ;;  %v15171_v42 = vcombine.high %v3254_v41, %v3258_v36  ;;  %v15170_v38 = vcombine.low %v3254_v41, %v3258_v36 }
 0x865   :  { %9908 = vmatpush2.bf16.msra.mxu0 %v15338_v45  ;;  %v3386_v43 = vld [vmem:[#allocation2 + $0xe70] sm:$0xff] }
 0x866   :  { %9909 = vmatprep.subr.bf16.mxu0 %v15331_v56  ;;  %v15299_v44 = vcombine.high %v3382_v37, %v3386_v43  ;;  %v3246_v45 = vld [vmem:[#allocation2 + $0xa10] sm:$0xff]  ;;  %v15298_v52 = vcombine.low %v3382_v37, %v3386_v43 }
 0x867   :  { %9869 = vmatpush2.bf16.msra.mxu1 %v15202_v49  ;;  %v3250_v53 = vld [vmem:[#allocation2 + $0xa30] sm:$0xff] }
 0x868   :  { %9870 = vmatprep.subr.bf16.mxu1 %v15195_v58  ;;  %v3374_v56 = vld [vmem:[#allocation2 + $0xe10] sm:$0xff]  ;;  %v15163_v54 = vcombine.high %v3246_v45, %v3250_v53  ;;  %v15162_v57 = vcombine.low %v3246_v45, %v3250_v53 }
 0x869   :  { %9910 = vmatpush2.bf16.msra.mxu0 %v15330_v55  ;;  %v3378_v50 = vld [vmem:[#allocation2 + $0xe30] sm:$0xff] }
 0x86a   :  { %9911 = vmatprep.subr.bf16.mxu0 %v15323_v60  ;;  %v15291_v49 = vcombine.high %v3374_v56, %v3378_v50  ;;  %v3494_v55 = vld [vmem:[#allocation2 + $0x11d0] sm:$0xff]  ;;  %v15290_v0 = vcombine.low %v3374_v56, %v3378_v50 }
 0x86b   :  { %9871 = vmatpush2.bf16.msra.mxu1 %v15194_v63  ;;  %v3498_v58 = vld [vmem:[#allocation2 + $0x11f0] sm:$0xff] }
 0x86c   :  { %9872 = vmatprep.subr.bf16.mxu1 %v15187_v2  ;;  %v3622_v60 = vld [vmem:[#allocation2 + $0x15d0] sm:$0xff]  ;;  %v15411_v32 = vcombine.high %v3494_v55, %v3498_v58  ;;  %v15410_v4 = vcombine.low %v3494_v55, %v3498_v58 }
 0x86d   :  { %9912 = vmatpush2.bf16.msra.mxu0 %v15322_v1  ;;  %v3626_v61 = vld [vmem:[#allocation2 + $0x15f0] sm:$0xff] }
 0x86e   :  { %9913 = vmatprep.subr.bf16.mxu0 %v15315_v3  ;;  %v15539_v63 = vcombine.high %v3622_v60, %v3626_v61  ;;  %v3486_v1 = vld [vmem:[#allocation2 + $0x1190] sm:$0xff]  ;;  %v15538_v23 = vcombine.low %v3622_v60, %v3626_v61 }
 0x86f   :  { %9873 = vmatpush2.bf16.msra.mxu1 %v15186_v10  ;;  %v3490_v2 = vld [vmem:[#allocation2 + $0x11b0] sm:$0xff] }
 0x870   :  { %9874 = vmatprep.subr.bf16.mxu1 %v15179_v27  ;;  %v3614_v3 = vld [vmem:[#allocation2 + $0x1590] sm:$0xff]  ;;  %v15403_v9 = vcombine.high %v3486_v1, %v3490_v2 }
 0x871   :  { %9914 = vmatpush2.bf16.msra.mxu0 %v15314_v17  ;;  %v3618_v11 = vld [vmem:[#allocation2 + $0x15b0] sm:$0xff] }
 0x872   :  { %9915 = vmatprep.subr.bf16.mxu0 %v15307_v33  ;;  %v15531_v10 = vcombine.high %v3614_v3, %v3618_v11  ;;  %v3478_v17 = vld [vmem:[#allocation2 + $0x1150] sm:$0xff] }
 0x873   :  { %9875 = vmatpush2.bf16.msra.mxu1 %v15178_v39  ;;  %v3482_v27 = vld [vmem:[#allocation2 + $0x1170] sm:$0xff]  ;;  %v15402_v39 = vcombine.low %v3486_v1, %v3490_v2 }
 0x874   :  { %9876 = vmatprep.subr.bf16.mxu1 %v15171_v42  ;;  %v3606_v41 = vld [vmem:[#allocation2 + $0x1550] sm:$0xff]  ;;  %v15530_v42 = vcombine.low %v3614_v3, %v3618_v11  ;;  %v15394_v60 = vcombine.low %v3478_v17, %v3482_v27 }
 0x875   :  { %9916 = vmatpush2.bf16.msra.mxu0 %v15306_v40  ;;  %v3610_v36 = vld [vmem:[#allocation2 + $0x1570] sm:$0xff] }
 0x876   :  { %9917 = vmatprep.subr.bf16.mxu0 %v15299_v44  ;;  %v15395_v44 = vcombine.high %v3478_v17, %v3482_v27  ;;  %v15523_v50 = vcombine.high %v3606_v41, %v3610_v36  ;;  %v3466_v1 = vld [vmem:[#allocation2 + $0x10f0] sm:$0xff] }
 0x877   :  { %9877 = vmatpush2.bf16.msra.mxu1 %v15170_v38  ;;  %v3470_v38 = vld [vmem:[#allocation2 + $0x1110] sm:$0xff] }
 0x878   :  { %9878 = vmatprep.subr.bf16.mxu1 %v15163_v54  ;;  %v3598_v54 = vld [vmem:[#allocation2 + $0x1510] sm:$0xff] }
 0x879   :  { %9918 = vmatpush2.bf16.msra.mxu0 %v15298_v52  ;;  %v3474_v52 = vld [vmem:[#allocation2 + $0x1130] sm:$0xff] }
 0x87a   :  { %9919 = vmatprep.subr.bf16.mxu0 %v15291_v49  ;;  %v3602_v49 = vld [vmem:[#allocation2 + $0x1530] sm:$0xff]  ;;  %v15386_v11 = vcombine.low %v3470_v38, %v3474_v52 }
 0x87b   :  { %9879 = vmatpush2.bf16.msra.mxu1 %v15162_v57  ;;  %v15387_v57 = vcombine.high %v3470_v38, %v3474_v52  ;;  %v3590_v2 = vld [vmem:[#allocation2 + $0x14d0] sm:$0xff] }
 0x87c   :  { %9930 = vmatprep.subr.bf16.mxu1 %v15411_v32  ;;  %v15515_v32 = vcombine.high %v3598_v54, %v3602_v49  ;;  %v3594_v3 = vld [vmem:[#allocation2 + $0x14f0] sm:$0xff] }
 0x87d   :  { %9920 = vmatpush2.bf16.msra.mxu0 %v15290_v0  ;;  %v3458_v17 = vld [vmem:[#allocation2 + $0x10b0] sm:$0xff] }
 0x87e   :  { %9971 = vmatprep.subr.bf16.mxu0 %v15539_v63  ;;  %v9636_v33 = vpop.f32.mrf.mxu1  ;;  %9881 = vmatmul.mubr.bf16.vlgmr.msra.gmra.mxu1 %v18074_v13  ;;  %v3462_v63 = vld [vmem:[#allocation2 + $0x10d0] sm:$0xff] }
 0x87f   :  { %v9637_v37 = vadd.f32 %v9636_v33, %v18309_v46  ;;  %9931 = vmatpush1.bf16.msra.mxu1 %v15410_v4  ;;  %9962 = vmatprep.mubr.bf16.mxu1 %v18084_v24  ;;  %v15514_v4 = vcombine.low %v3598_v54, %v3602_v49  ;;  %v3582_v27 = vld [vmem:[#allocation2 + $0x1490] sm:$0xff] }
 0x880   :  { %v9677_v43 = vpop.f32.mrf.mxu0  ;;  %9922 = vmatmul.mubr.bf16.vlgmr.msra.gmra.mxu0 %v18078_v18  ;;  %v9638_v40 = vpop.f32.mrf.mxu1  ;;  %9932 = vmatprep.subr.bf16.mxu1 %v15403_v9  ;;  %v15507_v9 = vcombine.high %v3590_v2, %v3594_v3  ;;  %v3586_v33 = vld [vmem:[#allocation2 + $0x14b0] sm:$0xff] }
 0x881   :  { %9972 = vmatpush1.bf16.msra.mxu0 %v15538_v23  ;;  %v18319_v45 = vadd.f32 %v9677_v43, %v9637_v37  ;;  %v9639_v53 = vadd.f32 %v9638_v40, %v18314_v59  ;;  %10003 = vmatprep.mubr.bf16.mxu0 %v18088_v26  ;;  %v15522_v59 = vcombine.low %v3606_v41, %v3610_v36  ;;  %v3450_v40 = vld [vmem:[#allocation2 + $0x1070] sm:$0xff] }
 0x882   :  { %v9679_v56 = vpop.f32.mrf.mxu0  ;;  %9973 = vmatprep.subr.bf16.mxu0 %v15531_v10  ;;  %v9640_v46 = vpop.f32.mrf.mxu1  ;;  %v15379_v23 = vcombine.high %v3462_v63, %v3466_v1  ;;  %v3454_v10 = vld [vmem:[#allocation2 + $0x1090] sm:$0xff]  ;;  %v15378_v41 = vcombine.low %v3462_v63, %v3466_v1  ;;  %v15506_v36 = vcombine.low %v3590_v2, %v3594_v3  ;;  %v15499_v43 = vcombine.high %v3582_v27, %v3586_v33 }
 0x883   :  { %v18324_v55 = vadd.f32 %v9679_v56, %v9639_v53  ;;  %9933 = vmatpush1.bf16.msra.mxu1 %v15402_v39  ;;  %v15371_v37 = vcombine.high %v3454_v10, %v3458_v17  ;;  %v3446_v39 = vld [vmem:[#allocation2 + $0x1050] sm:$0xff]  ;;  %v15370_v53 = vcombine.low %v3454_v10, %v3458_v17  ;;  %v15498_v56 = vcombine.low %v3582_v27, %v3586_v33 }
 0x884   :  { %v9681_v58 = vpop.f32.mrf.mxu0  ;;  %v9641_v61 = vpop.f32.mrf.mxu1  ;;  %9934 = vmatprep.subr.bf16.mxu1 %v15395_v44  ;;  %v3578_v44 = vld [vmem:[#allocation2 + $0x1470] sm:$0xff] }
 0x885   :  { %9974 = vmatpush1.bf16.msra.mxu0 %v15530_v42  ;;  %v3574_v42 = vld [vmem:[#allocation2 + $0x1450] sm:$0xff]  ;;  %v15362_v58 = vcombine.low %v3446_v39, %v3450_v40 }
 0x886   :  { %v9682_v0 = vpop.f32.mrf.mxu0  ;;  %9975 = vmatprep.subr.bf16.mxu0 %v15523_v50  ;;  %v15363_v50 = vcombine.high %v3446_v39, %v3450_v40  ;;  %v15491_v38 = vcombine.high %v3574_v42, %v3578_v44  ;;  %v3438_v52 = vld [vmem:[#allocation2 + $0x1010] sm:$0xff] }
 0x887   :  { %9935 = vmatpush1.bf16.msra.mxu1 %v15394_v60  ;;  %v3442_v46 = vld [vmem:[#allocation2 + $0x1030] sm:$0xff]  ;;  %v15490_v60 = vcombine.low %v3574_v42, %v3578_v44 }
 0x888   :  { %9936 = vmatprep.subr.bf16.mxu1 %v15387_v57  ;;  %v3566_v54 = vld [vmem:[#allocation2 + $0x1410] sm:$0xff]  ;;  %v15355_v61 = vcombine.high %v3438_v52, %v3442_v46  ;;  %v15354_v1 = vcombine.low %v3438_v52, %v3442_v46 }
 0x889   :  { %9976 = vmatpush1.bf16.msra.mxu0 %v15522_v59  ;;  %v3570_v49 = vld [vmem:[#allocation2 + $0x1430] sm:$0xff] }
 0x88a   :  { %9977 = vmatprep.subr.bf16.mxu0 %v15515_v32  ;;  %v15483_v59 = vcombine.high %v3566_v54, %v3570_v49  ;;  %v3558_v57 = vld [vmem:[#allocation2 + $0x13d0] sm:$0xff]  ;;  %v15482_v2 = vcombine.low %v3566_v54, %v3570_v49 }
 0x88b   :  { %9937 = vmatpush1.bf16.msra.mxu1 %v15386_v11  ;;  %v3562_v0 = vld [vmem:[#allocation2 + $0x13f0] sm:$0xff] }
 0x88c   :  { %9938 = vmatprep.subr.bf16.mxu1 %v15379_v23  ;;  %v3686_v32 = vld [vmem:[#allocation2 + $0x17d0] sm:$0xff]  ;;  %v15475_v3 = vcombine.high %v3558_v57, %v3562_v0  ;;  %v15474_v17 = vcombine.low %v3558_v57, %v3562_v0 }
 0x88d   :  { %9978 = vmatpush1.bf16.msra.mxu0 %v15514_v4  ;;  %v3690_v63 = vld [vmem:[#allocation2 + $0x17f0] sm:$0xff] }
 0x88e   :  { %9979 = vmatprep.subr.bf16.mxu0 %v15507_v9  ;;  %v15603_v11 = vcombine.high %v3686_v32, %v3690_v63  ;;  %v3550_v4 = vld [vmem:[#allocation2 + $0x1390] sm:$0xff]  ;;  %v15602_v27 = vcombine.low %v3686_v32, %v3690_v63 }
 0x88f   :  { %9939 = vmatpush1.bf16.msra.mxu1 %v15378_v41  ;;  %v3554_v23 = vld [vmem:[#allocation2 + $0x13b0] sm:$0xff] }
 0x890   :  { %9940 = vmatprep.subr.bf16.mxu1 %v15371_v37  ;;  %v3678_v9 = vld [vmem:[#allocation2 + $0x1790] sm:$0xff]  ;;  %v15467_v33 = vcombine.high %v3550_v4, %v3554_v23  ;;  %v15466_v40 = vcombine.low %v3550_v4, %v3554_v23 }
 0x891   :  { %9980 = vmatpush1.bf16.msra.mxu0 %v15506_v36  ;;  %v3682_v10 = vld [vmem:[#allocation2 + $0x17b0] sm:$0xff] }
 0x892   :  { %9981 = vmatprep.subr.bf16.mxu0 %v15499_v43  ;;  %v15595_v41 = vcombine.high %v3678_v9, %v3682_v10  ;;  %v3542_v36 = vld [vmem:[#allocation2 + $0x1350] sm:$0xff]  ;;  %v15594_v42 = vcombine.low %v3678_v9, %v3682_v10 }
 0x893   :  { %9941 = vmatpush1.bf16.msra.mxu1 %v15370_v53  ;;  %v3546_v37 = vld [vmem:[#allocation2 + $0x1370] sm:$0xff] }
 0x894   :  { %9942 = vmatprep.subr.bf16.mxu1 %v15363_v50  ;;  %v3670_v43 = vld [vmem:[#allocation2 + $0x1750] sm:$0xff]  ;;  %v15459_v44 = vcombine.high %v3542_v36, %v3546_v37  ;;  %v15458_v46 = vcombine.low %v3542_v36, %v3546_v37 }
 0x895   :  { %9982 = vmatpush1.bf16.msra.mxu0 %v15498_v56  ;;  %v3674_v39 = vld [vmem:[#allocation2 + $0x1770] sm:$0xff] }
 0x896   :  { %9983 = vmatprep.subr.bf16.mxu0 %v15491_v38  ;;  %v15587_v53 = vcombine.high %v3670_v43, %v3674_v39  ;;  %v3534_v56 = vld [vmem:[#allocation2 + $0x1310] sm:$0xff]  ;;  %v15586_v54 = vcombine.low %v3670_v43, %v3674_v39 }
 0x897   :  { %9943 = vmatpush1.bf16.msra.mxu1 %v15362_v58  ;;  %v3538_v50 = vld [vmem:[#allocation2 + $0x1330] sm:$0xff] }
 0x898   :  { %9944 = vmatprep.subr.bf16.mxu1 %v15355_v61  ;;  %v3662_v38 = vld [vmem:[#allocation2 + $0x1710] sm:$0xff]  ;;  %v15451_v49 = vcombine.high %v3534_v56, %v3538_v50  ;;  %v15450_v0 = vcombine.low %v3534_v56, %v3538_v50 }
 0x899   :  { %9984 = vmatpush1.bf16.msra.mxu0 %v15490_v60  ;;  %v3666_v52 = vld [vmem:[#allocation2 + $0x1730] sm:$0xff] }
 0x89a   :  { %9985 = vmatprep.subr.bf16.mxu0 %v15483_v59  ;;  %v15579_v58 = vcombine.high %v3662_v38, %v3666_v52  ;;  %v3526_v60 = vld [vmem:[#allocation2 + $0x12d0] sm:$0xff]  ;;  %v15578_v32 = vcombine.low %v3662_v38, %v3666_v52 }
 0x89b   :  { %9945 = vmatpush1.bf16.msra.mxu1 %v15354_v1  ;;  %v3530_v61 = vld [vmem:[#allocation2 + $0x12f0] sm:$0xff] }
 0x89c   :  { %9946 = vmatprep.subr.bf16.mxu1 %v15475_v3  ;;  %v3654_v59 = vld [vmem:[#allocation2 + $0x16d0] sm:$0xff]  ;;  %v15443_v63 = vcombine.high %v3526_v60, %v3530_v61  ;;  %v15442_v23 = vcombine.low %v3526_v60, %v3530_v61 }
 0x89d   :  { %9986 = vmatpush1.bf16.msra.mxu0 %v15482_v2  ;;  %v3658_v57 = vld [vmem:[#allocation2 + $0x16f0] sm:$0xff] }
 0x89e   :  { %9987 = vmatprep.subr.bf16.mxu0 %v15603_v11  ;;  %v15571_v1 = vcombine.high %v3654_v59, %v3658_v57  ;;  %v3518_v2 = vld [vmem:[#allocation2 + $0x1290] sm:$0xff]  ;;  %v15570_v9 = vcombine.low %v3654_v59, %v3658_v57 }
 0x89f   :  { %9947 = vmatpush2.bf16.msra.mxu1 %v15474_v17  ;;  %v3522_v3 = vld [vmem:[#allocation2 + $0x12b0] sm:$0xff] }
 0x8a0   :  { %9948 = vmatprep.subr.bf16.mxu1 %v15467_v33  ;;  %v3646_v11 = vld [vmem:[#allocation2 + $0x1690] sm:$0xff]  ;;  %v15435_v10 = vcombine.high %v3518_v2, %v3522_v3  ;;  %v15434_v37 = vcombine.low %v3518_v2, %v3522_v3 }
 0x8a1   :  { %9988 = vmatpush2.bf16.msra.mxu0 %v15602_v27  ;;  %v3650_v4 = vld [vmem:[#allocation2 + $0x16b0] sm:$0xff] }
 0x8a2   :  { %9989 = vmatprep.subr.bf16.mxu0 %v15595_v41  ;;  %v15563_v17 = vcombine.high %v3646_v11, %v3650_v4  ;;  %v3510_v27 = vld [vmem:[#allocation2 + $0x1250] sm:$0xff]  ;;  %v15562_v43 = vcombine.low %v3646_v11, %v3650_v4 }
 0x8a3   :  { %9949 = vmatpush2.bf16.msra.mxu1 %v15466_v40  ;;  %v3514_v33 = vld [vmem:[#allocation2 + $0x1270] sm:$0xff] }
 0x8a4   :  { %9950 = vmatprep.subr.bf16.mxu1 %v15459_v44  ;;  %v3638_v41 = vld [vmem:[#allocation2 + $0x1650] sm:$0xff]  ;;  %v15427_v39 = vcombine.high %v3510_v27, %v3514_v33  ;;  %v15426_v50 = vcombine.low %v3510_v27, %v3514_v33 }
 0x8a5   :  { %9990 = vmatpush2.bf16.msra.mxu0 %v15594_v42  ;;  %v3642_v36 = vld [vmem:[#allocation2 + $0x1670] sm:$0xff] }
 0x8a6   :  { %9991 = vmatprep.subr.bf16.mxu0 %v15587_v53  ;;  %v15555_v40 = vcombine.high %v3638_v41, %v3642_v36  ;;  %v3502_v42 = vld [vmem:[#allocation2 + $0x1210] sm:$0xff]  ;;  %v15554_v38 = vcombine.low %v3638_v41, %v3642_v36 }
 0x8a7   :  { %9951 = vmatpush2.bf16.msra.mxu1 %v15458_v46  ;;  %v3506_v44 = vld [vmem:[#allocation2 + $0x1230] sm:$0xff] }
 0x8a8   :  { %9952 = vmatprep.subr.bf16.mxu1 %v15451_v49  ;;  %v3630_v53 = vld [vmem:[#allocation2 + $0x1610] sm:$0xff]  ;;  %v15419_v52 = vcombine.high %v3502_v42, %v3506_v44  ;;  %v15418_v61 = vcombine.low %v3502_v42, %v3506_v44 }
 0x8a9   :  { %9992 = vmatpush2.bf16.msra.mxu0 %v15586_v54  ;;  %v3634_v56 = vld [vmem:[#allocation2 + $0x1630] sm:$0xff] }
 0x8aa   :  { %9993 = vmatprep.subr.bf16.mxu0 %v15579_v58  ;;  %v15547_v46 = vcombine.high %v3630_v53, %v3634_v56  ;;  %v3750_v54 = vld [vmem:[#allocation2 + $0x19d0] sm:$0xff]  ;;  %v15546_v59 = vcombine.low %v3630_v53, %v3634_v56 }
 0x8ab   :  { %9953 = vmatpush2.bf16.msra.mxu1 %v15450_v0  ;;  %v3754_v49 = vld [vmem:[#allocation2 + $0x19f0] sm:$0xff] }
 0x8ac   :  { %9954 = vmatprep.subr.bf16.mxu1 %v15443_v63  ;;  %v3878_v58 = vld [vmem:[#allocation2 + $0x1dd0] sm:$0xff]  ;;  %v15667_v57 = vcombine.high %v3750_v54, %v3754_v49  ;;  %v15666_v3 = vcombine.low %v3750_v54, %v3754_v49 }
 0x8ad   :  { %9994 = vmatpush2.bf16.msra.mxu0 %v15578_v32  ;;  %v3882_v60 = vld [vmem:[#allocation2 + $0x1df0] sm:$0xff] }
 0x8ae   :  { %9995 = vmatprep.subr.bf16.mxu0 %v15571_v1  ;;  %v15795_v0 = vcombine.high %v3878_v58, %v3882_v60  ;;  %v3742_v32 = vld [vmem:[#allocation2 + $0x1990] sm:$0xff]  ;;  %v15794_v11 = vcombine.low %v3878_v58, %v3882_v60 }
 0x8af   :  { %9955 = vmatpush2.bf16.msra.mxu1 %v15442_v23  ;;  %v3746_v63 = vld [vmem:[#allocation2 + $0x19b0] sm:$0xff] }
 0x8b0   :  { %9956 = vmatprep.subr.bf16.mxu1 %v15435_v10  ;;  %v3870_v1 = vld [vmem:[#allocation2 + $0x1d90] sm:$0xff]  ;;  %v15659_v4 = vcombine.high %v3742_v32, %v3746_v63 }
 0x8b1   :  { %9996 = vmatpush2.bf16.msra.mxu0 %v15570_v9  ;;  %v3874_v2 = vld [vmem:[#allocation2 + $0x1db0] sm:$0xff] }
 0x8b2   :  { %9997 = vmatprep.subr.bf16.mxu0 %v15563_v17  ;;  %v15787_v23 = vcombine.high %v3870_v1, %v3874_v2  ;;  %v3734_v9 = vld [vmem:[#allocation2 + $0x1950] sm:$0xff] }
 0x8b3   :  { %9957 = vmatpush2.bf16.msra.mxu1 %v15434_v37  ;;  %v3738_v10 = vld [vmem:[#allocation2 + $0x1970] sm:$0xff]  ;;  %v15658_v37 = vcombine.low %v3742_v32, %v3746_v63 }
 0x8b4   :  { %9958 = vmatprep.subr.bf16.mxu1 %v15427_v39  ;;  %v3862_v27 = vld [vmem:[#allocation2 + $0x1d50] sm:$0xff]  ;;  %v15786_v39 = vcombine.low %v3870_v1, %v3874_v2  ;;  %v15650_v60 = vcombine.low %v3734_v9, %v3738_v10 }
 0x8b5   :  { %9998 = vmatpush2.bf16.msra.mxu0 %v15562_v43  ;;  %v3866_v33 = vld [vmem:[#allocation2 + $0x1d70] sm:$0xff] }
 0x8b6   :  { %9999 = vmatprep.subr.bf16.mxu0 %v15555_v40  ;;  %v15651_v40 = vcombine.high %v3734_v9, %v3738_v10  ;;  %v15779_v56 = vcombine.high %v3862_v27, %v3866_v33  ;;  %v3718_v1 = vld [vmem:[#allocation2 + $0x18d0] sm:$0xff] }
 0x8b7   :  { %9959 = vmatpush2.bf16.msra.mxu1 %v15426_v50  ;;  %v3726_v50 = vld [vmem:[#allocation2 + $0x1910] sm:$0xff] }
 0x8b8   :  { %9960 = vmatprep.subr.bf16.mxu1 %v15419_v52  ;;  %v3854_v52 = vld [vmem:[#allocation2 + $0x1d10] sm:$0xff] }
 0x8b9   :  { %10000 = vmatpush2.bf16.msra.mxu0 %v15554_v38  ;;  %v3730_v38 = vld [vmem:[#allocation2 + $0x1930] sm:$0xff] }
 0x8ba   :  { %10001 = vmatprep.subr.bf16.mxu0 %v15547_v46  ;;  %v3858_v46 = vld [vmem:[#allocation2 + $0x1d30] sm:$0xff] }
 0x8bb   :  { %9961 = vmatpush2.bf16.msra.mxu1 %v15418_v61  ;;  %v15771_v63 = vcombine.high %v3854_v52, %v3858_v46  ;;  %v3722_v2 = vld [vmem:[#allocation2 + $0x18f0] sm:$0xff]  ;;  %v15770_v9 = vcombine.low %v3854_v52, %v3858_v46 }
 0x8bc   :  { %10012 = vmatprep.subr.bf16.mxu1 %v15667_v57  ;;  %v15635_v10 = vcombine.high %v3718_v1, %v3722_v2  ;;  %v3694_v46 = vld [vmem:[#allocation2 + $0x1810] sm:$0xff] }
 0x8bd   :  { %10002 = vmatpush2.bf16.msra.mxu0 %v15546_v59  ;;  %v15643_v59 = vcombine.high %v3726_v50, %v3730_v38 }
 0x8be   :  { %10053 = vmatprep.subr.bf16.mxu0 %v15795_v0  ;;  %v9718_v17 = vpop.f32.mrf.mxu1  ;;  %9963 = vmatmul.mubr.bf16.vlgmr.msra.gmra.mxu1 %v18082_v20 }
 0x8bf   :  { %v9719_v41 = vadd.f32 %v9718_v17, %v18319_v45  ;;  %10013 = vmatpush1.bf16.msra.mxu1 %v15666_v3  ;;  %10044 = vmatprep.mubr.bf16.mxu1 %v18092_v29  ;;  %v3846_v3 = vld [vmem:[#allocation2 + $0x1cd0] sm:$0xff] }
 0x8c0   :  { %v9759_v36 = vpop.f32.mrf.mxu0  ;;  %10004 = vmatmul.mubr.bf16.vlgmr.msra.gmra.mxu0 %v18086_v25  ;;  %v9720_v43 = vpop.f32.mrf.mxu1  ;;  %10014 = vmatprep.subr.bf16.mxu1 %v15659_v4 }
 0x8c1   :  { %10054 = vmatpush1.bf16.msra.mxu0 %v15794_v11  ;;  %v9760_v42 = vadd.f32 %v9759_v36, %v9719_v41  ;;  %v9721_v44 = vadd.f32 %v9720_v43, %v18324_v55  ;;  %10085 = vmatprep.mubr.bf16.mxu0 %v18096_v31  ;;  %v15778_v55 = vcombine.low %v3862_v27, %v3866_v33  ;;  %v3850_v11 = vld [vmem:[#allocation2 + $0x1cf0] sm:$0xff] }
 0x8c2   :  { %v9761_v53 = vpop.f32.mrf.mxu0  ;;  %10055 = vmatprep.subr.bf16.mxu0 %v15787_v23  ;;  %v9722_v45 = vpop.f32.mrf.mxu1  ;;  %v15642_v23 = vcombine.low %v3726_v50, %v3730_v38  ;;  %v15763_v17 = vcombine.high %v3846_v3, %v3850_v11  ;;  %v3710_v27 = vld [vmem:[#allocation2 + $0x1890] sm:$0xff]  ;;  %v15762_v43 = vcombine.low %v3846_v3, %v3850_v11 }
 0x8c3   :  { %v10424_v54 = vmax.f32 %v9760_v42, 0.0  ;;  %v9762_v49 = vadd.f32 %v9761_v53, %v9721_v44  ;;  %10015 = vmatpush1.bf16.msra.mxu1 %v15658_v37  ;;  %v3714_v33 = vld [vmem:[#allocation2 + $0x18b0] sm:$0xff]  ;;  %v15634_v37 = vcombine.low %v3718_v1, %v3722_v2 }
 0x8c4   :  { %v9763_v58 = vpop.f32.mrf.mxu0  ;;  %v9723_v61 = vpop.f32.mrf.mxu1  ;;  %10016 = vmatprep.subr.bf16.mxu1 %v15651_v40  ;;  %v3838_v41 = vld [vmem:[#allocation2 + $0x1c90] sm:$0xff]  ;;  %v15626_v50 = vcombine.low %v3710_v27, %v3714_v33 }
 0x8c5   :  { %10056 = vmatpush1.bf16.msra.mxu0 %v15786_v39  ;;  %v18332_v57 = vpack.c.bf16 %v10424_v54, %v10424_v54  ;;  %v10425_v0 = vmax.f32 %v9762_v49, 0.0  ;;  %v3842_v36 = vld [vmem:[#allocation2 + $0x1cb0] sm:$0xff]  ;;  %v15627_v39 = vcombine.high %v3710_v27, %v3714_v33 }
 0x8c6   :  { %v9764_v32 = vpop.f32.mrf.mxu0  ;;  %10057 = vmatprep.subr.bf16.mxu0 %v15779_v56  ;;  %v15755_v40 = vcombine.high %v3838_v41, %v3842_v36  ;;  %v3702_v42 = vld [vmem:[#allocation2 + $0x1850] sm:$0xff]  ;;  %v15754_v38 = vcombine.low %v3838_v41, %v3842_v36 }
 0x8c7   :  { %v18334_v4 = vpack.c.bf16 %v10425_v0, %v10425_v0  ;;  %10017 = vmatpush1.bf16.msra.mxu1 %v15650_v60  ;;  %v3706_v44 = vld [vmem:[#allocation2 + $0x1870] sm:$0xff] }
 0x8c8   :  { %10018 = vmatprep.subr.bf16.mxu1 %v15643_v59  ;;  %v3830_v53 = vld [vmem:[#allocation2 + $0x1c50] sm:$0xff]  ;;  %v15619_v45 = vcombine.high %v3702_v42, %v3706_v44  ;;  %v15618_v60 = vcombine.low %v3702_v42, %v3706_v44 }
 0x8c9   :  { %10058 = vmatpush1.bf16.msra.mxu0 %v15778_v55  ;;  %v3834_v56 = vld [vmem:[#allocation2 + $0x1c70] sm:$0xff] }
 0x8ca   :  { %10059 = vmatprep.subr.bf16.mxu0 %v15771_v63  ;;  %v15747_v52 = vcombine.high %v3830_v53, %v3834_v56  ;;  %v3698_v54 = vld [vmem:[#allocation2 + $0x1830] sm:$0xff]  ;;  %v15746_v61 = vcombine.low %v3830_v53, %v3834_v56 }
 0x8cb   :  { %10019 = vmatpush1.bf16.msra.mxu1 %v15642_v23  ;;  %v3822_v49 = vld [vmem:[#allocation2 + $0x1c10] sm:$0xff]  ;;  %v15611_v55 = vcombine.high %v3694_v46, %v3698_v54  ;;  %v15610_v2 = vcombine.low %v3694_v46, %v3698_v54 }
 0x8cc   :  { %10020 = vmatprep.subr.bf16.mxu1 %v15635_v10  ;;  %v3826_v58 = vld [vmem:[#allocation2 + $0x1c30] sm:$0xff] }
 0x8cd   :  { %10060 = vmatpush1.bf16.msra.mxu0 %v15770_v9  ;;  %v15739_v59 = vcombine.high %v3822_v49, %v3826_v58  ;;  %v3814_v0 = vld [vmem:[#allocation2 + $0x1bd0] sm:$0xff]  ;;  %v15738_v3 = vcombine.low %v3822_v49, %v3826_v58 }
 0x8ce   :  { %10061 = vmatprep.subr.bf16.mxu0 %v15763_v17  ;;  %v3818_v32 = vld [vmem:[#allocation2 + $0x1bf0] sm:$0xff] }
 0x8cf   :  { %10021 = vmatpush1.bf16.msra.mxu1 %v15634_v37  ;;  %v3942_v63 = vld [vmem:[#allocation2 + $0x1fd0] sm:$0xff]  ;;  %v15731_v11 = vcombine.high %v3814_v0, %v3818_v32  ;;  %v15730_v33 = vcombine.low %v3814_v0, %v3818_v32 }
 0x8d0   :  { %10022 = vmatprep.subr.bf16.mxu1 %v15627_v39  ;;  %v3946_v1 = vld [vmem:[#allocation2 + $0x1ff0] sm:$0xff] }
 0x8d1   :  { %10062 = vmatpush1.bf16.msra.mxu0 %v15762_v43  ;;  %v15859_v23 = vcombine.high %v3942_v63, %v3946_v1  ;;  %v3806_v9 = vld [vmem:[#allocation2 + $0x1b90] sm:$0xff]  ;;  %v15858_v41 = vcombine.low %v3942_v63, %v3946_v1 }
 0x8d2   :  { %10063 = vmatprep.subr.bf16.mxu0 %v15755_v40  ;;  %v3810_v10 = vld [vmem:[#allocation2 + $0x1bb0] sm:$0xff] }
 0x8d3   :  { %10023 = vmatpush1.bf16.msra.mxu1 %v15626_v50  ;;  %v3934_v17 = vld [vmem:[#allocation2 + $0x1f90] sm:$0xff]  ;;  %v15723_v36 = vcombine.high %v3806_v9, %v3810_v10  ;;  %v15722_v44 = vcombine.low %v3806_v9, %v3810_v10 }
 0x8d4   :  { %10024 = vmatprep.subr.bf16.mxu1 %v15619_v45  ;;  %v3938_v27 = vld [vmem:[#allocation2 + $0x1fb0] sm:$0xff] }
 0x8d5   :  { %10064 = vmatpush1.bf16.msra.mxu0 %v15754_v38  ;;  %v15851_v37 = vcombine.high %v3934_v17, %v3938_v27  ;;  %v3798_v43 = vld [vmem:[#allocation2 + $0x1b50] sm:$0xff]  ;;  %v15850_v53 = vcombine.low %v3934_v17, %v3938_v27 }
 0x8d6   :  { %10065 = vmatprep.subr.bf16.mxu0 %v15747_v52  ;;  %v3802_v39 = vld [vmem:[#allocation2 + $0x1b70] sm:$0xff] }
 0x8d7   :  { %10025 = vmatpush1.bf16.msra.mxu1 %v15618_v60  ;;  %v3926_v40 = vld [vmem:[#allocation2 + $0x1f50] sm:$0xff]  ;;  %v15715_v56 = vcombine.high %v3798_v43, %v3802_v39  ;;  %v15714_v54 = vcombine.low %v3798_v43, %v3802_v39 }
 0x8d8   :  { %10026 = vmatprep.subr.bf16.mxu1 %v15611_v55  ;;  %v3930_v42 = vld [vmem:[#allocation2 + $0x1f70] sm:$0xff] }
 0x8d9   :  { %10066 = vmatpush1.bf16.msra.mxu0 %v15746_v61  ;;  %v15843_v50 = vcombine.high %v3926_v40, %v3930_v42  ;;  %v3790_v38 = vld [vmem:[#allocation2 + $0x1b10] sm:$0xff]  ;;  %v15842_v49 = vcombine.low %v3926_v40, %v3930_v42 }
 0x8da   :  { %10067 = vmatprep.subr.bf16.mxu0 %v15739_v59  ;;  %v3794_v45 = vld [vmem:[#allocation2 + $0x1b30] sm:$0xff] }
 0x8db   :  { %10027 = vmatpush1.bf16.msra.mxu1 %v15610_v2  ;;  %v3918_v52 = vld [vmem:[#allocation2 + $0x1f10] sm:$0xff]  ;;  %v15707_v58 = vcombine.high %v3790_v38, %v3794_v45  ;;  %v15706_v32 = vcombine.low %v3790_v38, %v3794_v45 }
 0x8dc   :  { %10028 = vmatprep.subr.bf16.mxu1 %v15731_v11  ;;  %v3922_v46 = vld [vmem:[#allocation2 + $0x1f30] sm:$0xff] }
 0x8dd   :  { %10068 = vmatpush1.bf16.msra.mxu0 %v15738_v3  ;;  %v15835_v60 = vcombine.high %v3918_v52, %v3922_v46  ;;  %v3782_v61 = vld [vmem:[#allocation2 + $0x1ad0] sm:$0xff]  ;;  %v15834_v63 = vcombine.low %v3918_v52, %v3922_v46 }
 0x8de   :  { %10069 = vmatprep.subr.bf16.mxu0 %v15859_v23  ;;  %v3786_v55 = vld [vmem:[#allocation2 + $0x1af0] sm:$0xff] }
 0x8df   :  { %10029 = vmatpush2.bf16.msra.mxu1 %v15730_v33  ;;  %v3910_v59 = vld [vmem:[#allocation2 + $0x1ed0] sm:$0xff]  ;;  %v15699_v1 = vcombine.high %v3782_v61, %v3786_v55  ;;  %v15698_v10 = vcombine.low %v3782_v61, %v3786_v55  ;;  %v3115_v61 = vld [vmem:[#allocation2 + $0x5f8] sm:$0xff] }
 0x8e0   :  { %10030 = vmatprep.subr.bf16.mxu1 %v15723_v36  ;;  %v3914_v0 = vld [vmem:[#allocation2 + $0x1ef0] sm:$0xff] }
 0x8e1   :  { %10070 = vmatpush2.bf16.msra.mxu0 %v15858_v41  ;;  %v15827_v2 = vcombine.high %v3910_v59, %v3914_v0  ;;  %v3774_v3 = vld [vmem:[#allocation2 + $0x1a90] sm:$0xff]  ;;  %v15826_v17 = vcombine.low %v3910_v59, %v3914_v0  ;;  %v3968_v59 = vsub.s32 4, %v18122_v15 }
 0x8e2   :  { %10071 = vmatprep.subr.bf16.mxu0 %v15851_v37  ;;  %v3778_v11 = vld [vmem:[#allocation2 + $0x1ab0] sm:$0xff] }
 0x8e3   :  { %10031 = vmatpush2.bf16.msra.mxu1 %v15722_v44  ;;  %v3902_v23 = vld [vmem:[#allocation2 + $0x1e90] sm:$0xff]  ;;  %v15691_v27 = vcombine.high %v3774_v3, %v3778_v11  ;;  %v15690_v39 = vcombine.low %v3774_v3, %v3778_v11  ;;  %v2979_v3 = vld [vmem:[#allocation2 + $0x1b8] sm:$0xff] }
 0x8e4   :  { %10032 = vmatprep.subr.bf16.mxu1 %v15715_v56  ;;  %v3906_v9 = vld [vmem:[#allocation2 + $0x1eb0] sm:$0xff]  ;;  %v3103_v11 = vld [vmem:[#allocation2 + $0x598] sm:$0xff] }
 0x8e5   :  { %10072 = vmatpush2.bf16.msra.mxu0 %v15850_v53  ;;  %v15819_v33 = vcombine.high %v3902_v23, %v3906_v9  ;;  %v3766_v41 = vld [vmem:[#allocation2 + $0x1a50] sm:$0xff]  ;;  %v15818_v40 = vcombine.low %v3902_v23, %v3906_v9  ;;  %v3107_v23 = vld [vmem:[#allocation2 + $0x5b8] sm:$0xff]  ;;  %v17046_v9 = vld [vmem:[#allocation16 + $0x8] sm:$0xff] }
 0x8e6   :  { %10073 = vmatprep.subr.bf16.mxu0 %v15843_v50  ;;  %v3770_v36 = vld [vmem:[#allocation2 + $0x1a70] sm:$0xff] }
 0x8e7   :  { %10033 = vmatpush2.bf16.msra.mxu1 %v15714_v54  ;;  %v3894_v37 = vld [vmem:[#allocation2 + $0x1e50] sm:$0xff]  ;;  %v15683_v42 = vcombine.high %v3766_v41, %v3770_v36  ;;  %v15682_v45 = vcombine.low %v3766_v41, %v3770_v36  ;;  %v15021_v36 = vcombine.high %v3103_v11, %v3107_v23 }
 0x8e8   :  { %10034 = vmatprep.subr.bf16.mxu1 %v15707_v58  ;;  %v3898_v43 = vld [vmem:[#allocation2 + $0x1e70] sm:$0xff]  ;;  %v2987_v58 = vld [vmem:[#allocation2 + $0x1f8] sm:$0xff] }
 0x8e9   :  { %10074 = vmatpush2.bf16.msra.mxu0 %v15842_v49  ;;  %v15811_v44 = vcombine.high %v3894_v37, %v3898_v43  ;;  %v3758_v53 = vld [vmem:[#allocation2 + $0x1a10] sm:$0xff]  ;;  %v15810_v52 = vcombine.low %v3894_v37, %v3898_v43  ;;  %v2983_v49 = vld [vmem:[#allocation2 + $0x1d8] sm:$0xff] }
 0x8ea   :  { %10075 = vmatprep.subr.bf16.mxu0 %v15835_v60  ;;  %v3762_v56 = vld [vmem:[#allocation2 + $0x1a30] sm:$0xff]  ;;  %v3111_v60 = vld [vmem:[#allocation2 + $0x5d8] sm:$0xff] }
 0x8eb   :  { %10035 = vmatpush2.bf16.msra.mxu1 %v15706_v32  ;;  %v3886_v50 = vld [vmem:[#allocation2 + $0x1e10] sm:$0xff]  ;;  %v15675_v46 = vcombine.high %v3758_v53, %v3762_v56  ;;  %v15674_v55 = vcombine.low %v3758_v53, %v3762_v56  ;;  %v14901_v32 = vcombine.high %v2983_v49, %v2987_v58  ;;  %v2967_v37 = vld [vmem:[#allocation2 + $0x158] sm:$0xff] }
 0x8ec   :  { %10036 = vmatprep.subr.bf16.mxu1 %v15699_v1  ;;  %v3890_v38 = vld [vmem:[#allocation2 + $0x1e30] sm:$0xff]  ;;  %v3972_v1 = vsub.s32 5, %v18122_v15  ;;  %v2971_v43 = vld [vmem:[#allocation2 + $0x178] sm:$0xff] }
 0x8ed   :  { %10076 = vmatpush2.bf16.msra.mxu0 %v15834_v63  ;;  %v15803_v54 = vcombine.high %v3886_v50, %v3890_v38  ;;  %v15802_v0 = vcombine.low %v3886_v50, %v3890_v38  ;;  %v15029_v63 = vcombine.high %v3111_v60, %v3115_v61  ;;  %v15020_v38 = vcombine.low %v3103_v11, %v3107_v23 }
 0x8ee   :  { %10077 = vmatprep.subr.bf16.mxu0 %v15827_v2  ;;  %v2975_v2 = vld [vmem:[#allocation2 + $0x198] sm:$0xff]  ;;  %v3973_v41 = vrot.slane %v17046_v9, %v3972_v1 }
 0x8ef   :  { %10037 = vmatpush2.bf16.msra.mxu1 %v15698_v10  ;;  %v3969_v10 = vrot.slane %v17046_v9, %v3968_v59  ;;  %v14892_v56 = vcombine.low %v2975_v2, %v2979_v3  ;;  %v3091_v59 = vld [vmem:[#allocation2 + $0x538] sm:$0xff] }
 0x8f0   :  { %10038 = vmatprep.subr.bf16.mxu1 %v15691_v27  ;;  %v15028_v27 = vcombine.low %v3111_v60, %v3115_v61  ;;  %v2963_v60 = vld [vmem:[#allocation2 + $0x138] sm:$0xff] }
 0x8f1   :  { %10078 = vmatpush2.bf16.msra.mxu0 %v15826_v17  ;;  %v14900_v17 = vcombine.low %v2983_v49, %v2987_v58  ;;  %v2959_v58 = vld [vmem:[#allocation2 + $0x118] sm:$0xff] }
 0x8f2   :  { %10079 = vmatprep.subr.bf16.mxu0 %v15819_v33  ;;  %v14893_v33 = vcombine.high %v2975_v2, %v2979_v3  ;;  %v14877_v3 = vcombine.high %v2959_v58, %v2963_v60  ;;  %v2951_v9 = vld [vmem:[#allocation2 + $0xd8] sm:$0xff] }
 0x8f3   :  { %10039 = vmatpush2.bf16.msra.mxu1 %v15690_v39 }
 0x8f4   :  { %10040 = vmatprep.subr.bf16.mxu1 %v15683_v42  ;;  %v3099_v42 = vld [vmem:[#allocation2 + $0x578] sm:$0xff] }
 0x8f5   :  { %10080 = vmatpush2.bf16.msra.mxu0 %v15818_v40  ;;  %v3095_v40 = vld [vmem:[#allocation2 + $0x558] sm:$0xff] }
 0x8f6   :  { %10081 = vmatprep.subr.bf16.mxu0 %v15811_v44  ;;  %v15013_v49 = vcombine.high %v3095_v40, %v3099_v42  ;;  %v15012_v2 = vcombine.low %v3095_v40, %v3099_v42 }
 0x8f7   :  { %10041 = vmatpush2.bf16.msra.mxu1 %v15682_v45  ;;  %v14885_v45 = vcombine.high %v2967_v37, %v2971_v43 }
 0x8f8   :  { %10042 = vmatprep.subr.bf16.mxu1 %v15675_v46 }
 0x8f9   :  { %10082 = vmatpush2.bf16.msra.mxu0 %v15810_v52 }
 0x8fa   :  { %10083 = vmatprep.subr.bf16.mxu0 %v15803_v54 }
 0x8fb   :  { %10043 = vmatpush2.bf16.msra.mxu1 %v15674_v55  ;;  %v3087_v55 = vld [vmem:[#allocation2 + $0x518] sm:$0xff] }
 0x8fc   :  { %10094 = vmatprep.subr.bf16.mxu1 %v14901_v32  ;;  %v15005_v23 = vcombine.high %v3087_v55, %v3091_v59 }
 0x8fd   :  { %10084 = vmatpush2.bf16.msra.mxu0 %v15802_v0 }
 0x8fe   :  { %10135 = vmatprep.subr.bf16.mxu0 %v15029_v63  ;;  %v9800_v39 = vpop.f32.mrf.mxu1  ;;  %10045 = vmatmul.mubr.bf16.vlgmr.msra.gmra.mxu1 %v18090_v28  ;;  %v14884_v63 = vcombine.low %v2967_v37, %v2971_v43  ;;  %v2947_v37 = vld [vmem:[#allocation2 + $0xb8] sm:$0xff] }
 0x8ff   :  { %v9801_v44 = vadd.f32 %v9800_v39, %v3969_v10  ;;  %10095 = vmatpush1.bf16.msra.mxu1 %v14900_v17  ;;  %10126 = vmatprep.mubr.bf16.mxu1 %v18068_v7  ;;  %v2955_v7 = vld [vmem:[#allocation2 + $0xf8] sm:$0xff] }
 0x900   :  { %v9841_v53 = vpop.f32.mrf.mxu0  ;;  %10086 = vmatmul.mubr.bf16.vlgmr.msra.gmra.mxu0 %v18094_v30  ;;  %v9802_v50 = vpop.f32.mrf.mxu1  ;;  %10096 = vmatprep.subr.bf16.mxu1 %v14893_v33  ;;  %v3079_v10 = vld [vmem:[#allocation2 + $0x4d8] sm:$0xff]  ;;  %v14869_v33 = vcombine.high %v2951_v9, %v2955_v7  ;;  %v14868_v40 = vcombine.low %v2951_v9, %v2955_v7 }
 0x901   :  { %10136 = vmatpush1.bf16.msra.mxu0 %v15028_v27  ;;  %v18340_v52 = vadd.f32 %v9841_v53, %v9801_v44  ;;  %v9803_v46 = vadd.f32 %v9802_v50, %v3973_v41  ;;  %10167 = vmatprep.mubr.bf16.mxu0 %v18072_v12  ;;  %v3083_v17 = vld [vmem:[#allocation2 + $0x4f8] sm:$0xff]  ;;  %v14876_v27 = vcombine.low %v2959_v58, %v2963_v60 }
 0x902   :  { %v9843_v54 = vpop.f32.mrf.mxu0  ;;  %10137 = vmatprep.subr.bf16.mxu0 %v15021_v36  ;;  %v9804_v61 = vpop.f32.mrf.mxu1  ;;  %v15004_v12 = vcombine.low %v3087_v55, %v3091_v59  ;;  %v14997_v41 = vcombine.high %v3079_v10, %v3083_v17  ;;  %v2943_v36 = vld [vmem:[#allocation2 + $0x98] sm:$0xff]  ;;  %v14996_v42 = vcombine.low %v3079_v10, %v3083_v17 }
 0x903   :  { %v18344_v0 = vadd.f32 %v9843_v54, %v9803_v46  ;;  %10097 = vmatpush1.bf16.msra.mxu1 %v14892_v56  ;;  %v3071_v43 = vld [vmem:[#allocation2 + $0x498] sm:$0xff]  ;;  %v14861_v44 = vcombine.high %v2943_v36, %v2947_v37  ;;  %v14860_v46 = vcombine.low %v2943_v36, %v2947_v37 }
 0x904   :  { %v9845_v32 = vpop.f32.mrf.mxu0  ;;  %v9805_v1 = vpop.f32.mrf.mxu1  ;;  %10098 = vmatprep.subr.bf16.mxu1 %v14885_v45  ;;  %v3075_v39 = vld [vmem:[#allocation2 + $0x4b8] sm:$0xff] }
 0x905   :  { %10138 = vmatpush1.bf16.msra.mxu0 %v15020_v38  ;;  %v14989_v53 = vcombine.high %v3071_v43, %v3075_v39  ;;  %v2935_v56 = vld [vmem:[#allocation2 + $0x58] sm:$0xff]  ;;  %v14988_v54 = vcombine.low %v3071_v43, %v3075_v39 }
 0x906   :  { %v9846_v11 = vpop.f32.mrf.mxu0  ;;  %10139 = vmatprep.subr.bf16.mxu0 %v15013_v49  ;;  %v2939_v50 = vld [vmem:[#allocation2 + $0x78] sm:$0xff] }
 0x907   :  { %10099 = vmatpush1.bf16.msra.mxu1 %v14884_v63  ;;  %v3063_v38 = vld [vmem:[#allocation2 + $0x458] sm:$0xff]  ;;  %v14853_v49 = vcombine.high %v2935_v56, %v2939_v50  ;;  %v14852_v32 = vcombine.low %v2935_v56, %v2939_v50 }
 0x908   :  { %10100 = vmatprep.subr.bf16.mxu1 %v14877_v3  ;;  %v3067_v45 = vld [vmem:[#allocation2 + $0x478] sm:$0xff] }
 0x909   :  { %10140 = vmatpush1.bf16.msra.mxu0 %v15012_v2  ;;  %v14981_v58 = vcombine.high %v3063_v38, %v3067_v45  ;;  %v2927_v60 = vld [vmem:[#allocation2 + $0x18] sm:$0xff]  ;;  %v14980_v63 = vcombine.low %v3063_v38, %v3067_v45 }
 0x90a   :  { %10141 = vmatprep.subr.bf16.mxu0 %v15005_v23  ;;  %v2931_v61 = vld [vmem:[#allocation2 + $0x38] sm:$0xff] }
 0x90b   :  { %10101 = vmatpush1.bf16.msra.mxu1 %v14876_v27  ;;  %v3055_v55 = vld [vmem:[#allocation2 + $0x418] sm:$0xff]  ;;  %v14845_v1 = vcombine.high %v2927_v60, %v2931_v61  ;;  %v14844_v7 = vcombine.low %v2927_v60, %v2931_v61 }
 0x90c   :  { %10102 = vmatprep.subr.bf16.mxu1 %v14869_v33  ;;  %v3059_v59 = vld [vmem:[#allocation2 + $0x438] sm:$0xff] }
 0x90d   :  { %10142 = vmatpush1.bf16.msra.mxu0 %v15004_v12  ;;  %v14973_v2 = vcombine.high %v3055_v55, %v3059_v59  ;;  %v3047_v3 = vld [vmem:[#allocation2 + $0x3d8] sm:$0xff]  ;;  %v14972_v10 = vcombine.low %v3055_v55, %v3059_v59 }
 0x90e   :  { %10143 = vmatprep.subr.bf16.mxu0 %v14997_v41  ;;  %v3051_v11 = vld [vmem:[#allocation2 + $0x3f8] sm:$0xff] }
 0x90f   :  { %10103 = vmatpush1.bf16.msra.mxu1 %v14868_v40  ;;  %v3175_v23 = vld [vmem:[#allocation2 + $0x7d8] sm:$0xff]  ;;  %v14965_v17 = vcombine.high %v3047_v3, %v3051_v11  ;;  %v14964_v37 = vcombine.low %v3047_v3, %v3051_v11 }
 0x910   :  { %10104 = vmatprep.subr.bf16.mxu1 %v14861_v44  ;;  %v3179_v9 = vld [vmem:[#allocation2 + $0x7f8] sm:$0xff] }
 0x911   :  { %10144 = vmatpush1.bf16.msra.mxu0 %v14996_v42  ;;  %v15093_v27 = vcombine.high %v3175_v23, %v3179_v9  ;;  %v3039_v12 = vld [vmem:[#allocation2 + $0x398] sm:$0xff]  ;;  %v15092_v43 = vcombine.low %v3175_v23, %v3179_v9 }
 0x912   :  { %10145 = vmatprep.subr.bf16.mxu0 %v14989_v53  ;;  %v3043_v33 = vld [vmem:[#allocation2 + $0x3b8] sm:$0xff] }
 0x913   :  { %10105 = vmatpush1.bf16.msra.mxu1 %v14860_v46  ;;  %v3167_v41 = vld [vmem:[#allocation2 + $0x798] sm:$0xff]  ;;  %v14957_v39 = vcombine.high %v3039_v12, %v3043_v33  ;;  %v14956_v50 = vcombine.low %v3039_v12, %v3043_v33 }
 0x914   :  { %10106 = vmatprep.subr.bf16.mxu1 %v14853_v49  ;;  %v3171_v36 = vld [vmem:[#allocation2 + $0x7b8] sm:$0xff] }
 0x915   :  { %10146 = vmatpush1.bf16.msra.mxu0 %v14988_v54  ;;  %v15085_v40 = vcombine.high %v3167_v41, %v3171_v36  ;;  %v3031_v42 = vld [vmem:[#allocation2 + $0x358] sm:$0xff]  ;;  %v15084_v38 = vcombine.low %v3167_v41, %v3171_v36 }
 0x916   :  { %10147 = vmatprep.subr.bf16.mxu0 %v14981_v58  ;;  %v3035_v44 = vld [vmem:[#allocation2 + $0x378] sm:$0xff] }
 0x917   :  { %10107 = vmatpush1.bf16.msra.mxu1 %v14852_v32  ;;  %v3159_v53 = vld [vmem:[#allocation2 + $0x758] sm:$0xff]  ;;  %v14949_v45 = vcombine.high %v3031_v42, %v3035_v44  ;;  %v14948_v61 = vcombine.low %v3031_v42, %v3035_v44 }
 0x918   :  { %10108 = vmatprep.subr.bf16.mxu1 %v14845_v1  ;;  %v3163_v56 = vld [vmem:[#allocation2 + $0x778] sm:$0xff] }
 0x919   :  { %10148 = vmatpush1.bf16.msra.mxu0 %v14980_v63  ;;  %v15077_v46 = vcombine.high %v3159_v53, %v3163_v56  ;;  %v3023_v54 = vld [vmem:[#allocation2 + $0x318] sm:$0xff]  ;;  %v15076_v55 = vcombine.low %v3159_v53, %v3163_v56 }
 0x91a   :  { %10149 = vmatprep.subr.bf16.mxu0 %v14973_v2  ;;  %v3027_v49 = vld [vmem:[#allocation2 + $0x338] sm:$0xff] }
 0x91b   :  { %10109 = vmatpush1.bf16.msra.mxu1 %v14844_v7  ;;  %v3151_v58 = vld [vmem:[#allocation2 + $0x718] sm:$0xff]  ;;  %v14941_v59 = vcombine.high %v3023_v54, %v3027_v49  ;;  %v14940_v11 = vcombine.low %v3023_v54, %v3027_v49 }
 0x91c   :  { %10110 = vmatprep.subr.bf16.mxu1 %v14965_v17  ;;  %v3155_v60 = vld [vmem:[#allocation2 + $0x738] sm:$0xff] }
 0x91d   :  { %10150 = vmatpush1.bf16.msra.mxu0 %v14972_v10  ;;  %v15069_v32 = vcombine.high %v3151_v58, %v3155_v60  ;;  %v3015_v63 = vld [vmem:[#allocation2 + $0x2d8] sm:$0xff]  ;;  %v15068_v23 = vcombine.low %v3151_v58, %v3155_v60 }
 0x91e   :  { %10151 = vmatprep.subr.bf16.mxu0 %v15093_v27  ;;  %v3019_v1 = vld [vmem:[#allocation2 + $0x2f8] sm:$0xff] }
 0x91f   :  { %10111 = vmatpush2.bf16.msra.mxu1 %v14964_v37  ;;  %v3143_v2 = vld [vmem:[#allocation2 + $0x6d8] sm:$0xff]  ;;  %v14933_v9 = vcombine.high %v3015_v63, %v3019_v1  ;;  %v14932_v33 = vcombine.low %v3015_v63, %v3019_v1 }
 0x920   :  { %10112 = vmatprep.subr.bf16.mxu1 %v14957_v39  ;;  %v3147_v3 = vld [vmem:[#allocation2 + $0x6f8] sm:$0xff] }
 0x921   :  { %10152 = vmatpush2.bf16.msra.mxu0 %v15092_v43  ;;  %v15061_v7 = vcombine.high %v3143_v2, %v3147_v3  ;;  %v3007_v10 = vld [vmem:[#allocation2 + $0x298] sm:$0xff]  ;;  %v15060_v41 = vcombine.low %v3143_v2, %v3147_v3 }
 0x922   :  { %10153 = vmatprep.subr.bf16.mxu0 %v15085_v40  ;;  %v3011_v17 = vld [vmem:[#allocation2 + $0x2b8] sm:$0xff] }
 0x923   :  { %10113 = vmatpush2.bf16.msra.mxu1 %v14956_v50  ;;  %v3135_v27 = vld [vmem:[#allocation2 + $0x698] sm:$0xff]  ;;  %v14925_v36 = vcombine.high %v3007_v10, %v3011_v17  ;;  %v14924_v44 = vcombine.low %v3007_v10, %v3011_v17 }
 0x924   :  { %10114 = vmatprep.subr.bf16.mxu1 %v14949_v45  ;;  %v3139_v12 = vld [vmem:[#allocation2 + $0x6b8] sm:$0xff] }
 0x925   :  { %10154 = vmatpush2.bf16.msra.mxu0 %v15084_v38  ;;  %v15053_v37 = vcombine.high %v3135_v27, %v3139_v12  ;;  %v2999_v43 = vld [vmem:[#allocation2 + $0x258] sm:$0xff]  ;;  %v15052_v53 = vcombine.low %v3135_v27, %v3139_v12 }
 0x926   :  { %10155 = vmatprep.subr.bf16.mxu0 %v15077_v46  ;;  %v3003_v39 = vld [vmem:[#allocation2 + $0x278] sm:$0xff] }
 0x927   :  { %10115 = vmatpush2.bf16.msra.mxu1 %v14948_v61  ;;  %v3127_v40 = vld [vmem:[#allocation2 + $0x658] sm:$0xff]  ;;  %v14917_v56 = vcombine.high %v2999_v43, %v3003_v39  ;;  %v14916_v49 = vcombine.low %v2999_v43, %v3003_v39 }
 0x928   :  { %10116 = vmatprep.subr.bf16.mxu1 %v14941_v59  ;;  %v3131_v42 = vld [vmem:[#allocation2 + $0x678] sm:$0xff] }
 0x929   :  { %10156 = vmatpush2.bf16.msra.mxu0 %v15076_v55  ;;  %v15045_v50 = vcombine.high %v3127_v40, %v3131_v42  ;;  %v2991_v38 = vld [vmem:[#allocation2 + $0x218] sm:$0xff]  ;;  %v15044_v58 = vcombine.low %v3127_v40, %v3131_v42 }
 0x92a   :  { %10157 = vmatprep.subr.bf16.mxu0 %v15069_v32  ;;  %v2995_v45 = vld [vmem:[#allocation2 + $0x238] sm:$0xff] }
 0x92b   :  { %10117 = vmatpush2.bf16.msra.mxu1 %v14940_v11  ;;  %v3119_v46 = vld [vmem:[#allocation2 + $0x618] sm:$0xff]  ;;  %v14909_v60 = vcombine.high %v2991_v38, %v2995_v45  ;;  %v14908_v1 = vcombine.low %v2991_v38, %v2995_v45 }
 0x92c   :  { %10118 = vmatprep.subr.bf16.mxu1 %v14933_v9  ;;  %v3123_v54 = vld [vmem:[#allocation2 + $0x638] sm:$0xff] }
 0x92d   :  { %10158 = vmatpush2.bf16.msra.mxu0 %v15068_v23  ;;  %v15037_v61 = vcombine.high %v3119_v46, %v3123_v54  ;;  %v3239_v55 = vld [vmem:[#allocation2 + $0x9d8] sm:$0xff]  ;;  %v15036_v2 = vcombine.low %v3119_v46, %v3123_v54 }
 0x92e   :  { %10159 = vmatprep.subr.bf16.mxu0 %v15061_v7  ;;  %v3243_v59 = vld [vmem:[#allocation2 + $0x9f8] sm:$0xff] }
 0x92f   :  { %10119 = vmatpush2.bf16.msra.mxu1 %v14932_v33  ;;  %v3367_v32 = vld [vmem:[#allocation2 + $0xdd8] sm:$0xff]  ;;  %v15157_v3 = vcombine.high %v3239_v55, %v3243_v59  ;;  %v15156_v17 = vcombine.low %v3239_v55, %v3243_v59 }
 0x930   :  { %10120 = vmatprep.subr.bf16.mxu1 %v14925_v36  ;;  %v3371_v63 = vld [vmem:[#allocation2 + $0xdf8] sm:$0xff] }
 0x931   :  { %10160 = vmatpush2.bf16.msra.mxu0 %v15060_v41  ;;  %v15285_v11 = vcombine.high %v3367_v32, %v3371_v63  ;;  %v3231_v23 = vld [vmem:[#allocation2 + $0x998] sm:$0xff]  ;;  %v15284_v27 = vcombine.low %v3367_v32, %v3371_v63 }
 0x932   :  { %10161 = vmatprep.subr.bf16.mxu0 %v15053_v37  ;;  %v3235_v9 = vld [vmem:[#allocation2 + $0x9b8] sm:$0xff] }
 0x933   :  { %10121 = vmatpush2.bf16.msra.mxu1 %v14924_v44  ;;  %v3359_v7 = vld [vmem:[#allocation2 + $0xd98] sm:$0xff]  ;;  %v15149_v12 = vcombine.high %v3231_v23, %v3235_v9  ;;  %v15148_v44 = vcombine.low %v3231_v23, %v3235_v9 }
 0x934   :  { %10122 = vmatprep.subr.bf16.mxu1 %v14917_v56  ;;  %v3363_v10 = vld [vmem:[#allocation2 + $0xdb8] sm:$0xff] }
 0x935   :  { %10162 = vmatpush2.bf16.msra.mxu0 %v15052_v53  ;;  %v15277_v33 = vcombine.high %v3359_v7, %v3363_v10  ;;  %v3223_v41 = vld [vmem:[#allocation2 + $0x958] sm:$0xff]  ;;  %v15276_v56 = vcombine.low %v3359_v7, %v3363_v10 }
 0x936   :  { %10163 = vmatprep.subr.bf16.mxu0 %v15045_v50  ;;  %v3227_v36 = vld [vmem:[#allocation2 + $0x978] sm:$0xff] }
 0x937   :  { %10123 = vmatpush2.bf16.msra.mxu1 %v14916_v49  ;;  %v3351_v43 = vld [vmem:[#allocation2 + $0xd58] sm:$0xff]  ;;  %v15141_v50 = vcombine.high %v3223_v41, %v3227_v36  ;;  %v15140_v55 = vcombine.low %v3223_v41, %v3227_v36 }
 0x938   :  { %10124 = vmatprep.subr.bf16.mxu1 %v14909_v60  ;;  %v3355_v39 = vld [vmem:[#allocation2 + $0xd78] sm:$0xff] }
 0x939   :  { %10164 = vmatpush2.bf16.msra.mxu0 %v15044_v58  ;;  %v3215_v54 = vld [vmem:[#allocation2 + $0x918] sm:$0xff] }
 0x93a   :  { %10165 = vmatprep.subr.bf16.mxu0 %v15037_v61  ;;  %v3219_v49 = vld [vmem:[#allocation2 + $0x938] sm:$0xff] }
 0x93b   :  { %10125 = vmatpush2.bf16.msra.mxu1 %v14908_v1  ;;  %v3347_v58 = vld [vmem:[#allocation2 + $0xd38] sm:$0xff]  ;;  %v15133_v32 = vcombine.high %v3215_v54, %v3219_v49  ;;  %v15132_v23 = vcombine.low %v3215_v54, %v3219_v49 }
 0x93c   :  { %10176 = vmatprep.subr.bf16.mxu1 %v15157_v3  ;;  %v3335_v3 = vld [vmem:[#allocation2 + $0xcd8] sm:$0xff] }
 0x93d   :  { %10166 = vmatpush2.bf16.msra.mxu0 %v15036_v2  ;;  %v3207_v2 = vld [vmem:[#allocation2 + $0x8d8] sm:$0xff] }
 0x93e   :  { %10217 = vmatprep.subr.bf16.mxu0 %v15285_v11  ;;  %v9882_v37 = vpop.f32.mrf.mxu1  ;;  %10127 = vmatmul.mubr.bf16.vlgmr.msra.gmra.mxu1 %v18066_v6  ;;  %v15269_v6 = vcombine.high %v3351_v43, %v3355_v39  ;;  %v3339_v11 = vld [vmem:[#allocation2 + $0xcf8] sm:$0xff] }
 0x93f   :  { %v9883_v40 = vadd.f32 %v9882_v37, %v18340_v52  ;;  %10177 = vmatpush1.bf16.msra.mxu1 %v15156_v17  ;;  %10208 = vmatprep.mubr.bf16.mxu1 %v18076_v14  ;;  %v3211_v14 = vld [vmem:[#allocation2 + $0x8f8] sm:$0xff]  ;;  %v15253_v7 = vcombine.high %v3335_v3, %v3339_v11  ;;  %v15252_v41 = vcombine.low %v3335_v3, %v3339_v11 }
 0x940   :  { %v9923_v42 = vpop.f32.mrf.mxu0  ;;  %10168 = vmatmul.mubr.bf16.vlgmr.msra.gmra.mxu0 %v18070_v8  ;;  %v9884_v53 = vpop.f32.mrf.mxu1  ;;  %10178 = vmatprep.subr.bf16.mxu1 %v15149_v12  ;;  %v3343_v8 = vld [vmem:[#allocation2 + $0xd18] sm:$0xff]  ;;  %v15125_v9 = vcombine.high %v3207_v2, %v3211_v14 }
 0x941   :  { %10218 = vmatpush1.bf16.msra.mxu0 %v15284_v27  ;;  %v18349_v38 = vadd.f32 %v9923_v42, %v9883_v40  ;;  %v9885_v45 = vadd.f32 %v9884_v53, %v18344_v0  ;;  %10249 = vmatprep.mubr.bf16.mxu0 %v18080_v19  ;;  %v15268_v0 = vcombine.low %v3351_v43, %v3355_v39  ;;  %v3199_v10 = vld [vmem:[#allocation2 + $0x898] sm:$0xff] }
 0x942   :  { %v9925_v46 = vpop.f32.mrf.mxu0  ;;  %10219 = vmatprep.subr.bf16.mxu0 %v15277_v33  ;;  %v9886_v52 = vpop.f32.mrf.mxu1  ;;  %v15261_v1 = vcombine.high %v3343_v8, %v3347_v58  ;;  %v15260_v19 = vcombine.low %v3343_v8, %v3347_v58  ;;  %v3203_v17 = vld [vmem:[#allocation2 + $0x8b8] sm:$0xff]  ;;  %v15124_v33 = vcombine.low %v3207_v2, %v3211_v14 }
 0x943   :  { %v18354_v60 = vadd.f32 %v9925_v46, %v9885_v45  ;;  %10179 = vmatpush1.bf16.msra.mxu1 %v15148_v44  ;;  %v3327_v27 = vld [vmem:[#allocation2 + $0xc98] sm:$0xff]  ;;  %v15117_v36 = vcombine.high %v3199_v10, %v3203_v17  ;;  %v15116_v44 = vcombine.low %v3199_v10, %v3203_v17 }
 0x944   :  { %v9927_v61 = vpop.f32.mrf.mxu0  ;;  %v9887_v59 = vpop.f32.mrf.mxu1  ;;  %10180 = vmatprep.subr.bf16.mxu1 %v15141_v50  ;;  %v3331_v12 = vld [vmem:[#allocation2 + $0xcb8] sm:$0xff] }
 0x945   :  { %10220 = vmatpush1.bf16.msra.mxu0 %v15276_v56  ;;  %v15245_v37 = vcombine.high %v3327_v27, %v3331_v12  ;;  %v3191_v43 = vld [vmem:[#allocation2 + $0x858] sm:$0xff]  ;;  %v15244_v53 = vcombine.low %v3327_v27, %v3331_v12 }
 0x946   :  { %v9928_v63 = vpop.f32.mrf.mxu0  ;;  %10221 = vmatprep.subr.bf16.mxu0 %v15269_v6  ;;  %v3195_v39 = vld [vmem:[#allocation2 + $0x878] sm:$0xff] }
 0x947   :  { %10181 = vmatpush1.bf16.msra.mxu1 %v15140_v55  ;;  %v3319_v40 = vld [vmem:[#allocation2 + $0xc58] sm:$0xff]  ;;  %v15109_v56 = vcombine.high %v3191_v43, %v3195_v39  ;;  %v15108_v49 = vcombine.low %v3191_v43, %v3195_v39 }
 0x948   :  { %10182 = vmatprep.subr.bf16.mxu1 %v15133_v32  ;;  %v3323_v42 = vld [vmem:[#allocation2 + $0xc78] sm:$0xff] }
 0x949   :  { %10222 = vmatpush1.bf16.msra.mxu0 %v15268_v0  ;;  %v15237_v50 = vcombine.high %v3319_v40, %v3323_v42  ;;  %v3183_v45 = vld [vmem:[#allocation2 + $0x818] sm:$0xff]  ;;  %v15236_v52 = vcombine.low %v3319_v40, %v3323_v42 }
 0x94a   :  { %10223 = vmatprep.subr.bf16.mxu0 %v15261_v1  ;;  %v3187_v46 = vld [vmem:[#allocation2 + $0x838] sm:$0xff] }
 0x94b   :  { %10183 = vmatpush1.bf16.msra.mxu1 %v15132_v23  ;;  %v3311_v6 = vld [vmem:[#allocation2 + $0xc18] sm:$0xff]  ;;  %v15101_v8 = vcombine.high %v3183_v45, %v3187_v46  ;;  %v15100_v32 = vcombine.low %v3183_v45, %v3187_v46 }
 0x94c   :  { %10184 = vmatprep.subr.bf16.mxu1 %v15125_v9  ;;  %v3315_v54 = vld [vmem:[#allocation2 + $0xc38] sm:$0xff] }
 0x94d   :  { %10224 = vmatpush1.bf16.msra.mxu0 %v15260_v19  ;;  %v15229_v58 = vcombine.high %v3311_v6, %v3315_v54  ;;  %v3303_v61 = vld [vmem:[#allocation2 + $0xbd8] sm:$0xff]  ;;  %v15228_v63 = vcombine.low %v3311_v6, %v3315_v54 }
 0x94e   :  { %10225 = vmatprep.subr.bf16.mxu0 %v15253_v7  ;;  %v3307_v55 = vld [vmem:[#allocation2 + $0xbf8] sm:$0xff] }
 0x94f   :  { %10185 = vmatpush1.bf16.msra.mxu1 %v15124_v33  ;;  %v3431_v59 = vld [vmem:[#allocation2 + $0xfd8] sm:$0xff]  ;;  %v15221_v1 = vcombine.high %v3303_v61, %v3307_v55  ;;  %v15220_v19 = vcombine.low %v3303_v61, %v3307_v55 }
 0x950   :  { %10186 = vmatprep.subr.bf16.mxu1 %v15117_v36  ;;  %v3435_v0 = vld [vmem:[#allocation2 + $0xff8] sm:$0xff] }
 0x951   :  { %10226 = vmatpush1.bf16.msra.mxu0 %v15252_v41  ;;  %v15349_v2 = vcombine.high %v3431_v59, %v3435_v0  ;;  %v3295_v14 = vld [vmem:[#allocation2 + $0xb98] sm:$0xff]  ;;  %v15348_v9 = vcombine.low %v3431_v59, %v3435_v0 }
 0x952   :  { %10227 = vmatprep.subr.bf16.mxu0 %v15245_v37  ;;  %v3299_v3 = vld [vmem:[#allocation2 + $0xbb8] sm:$0xff] }
 0x953   :  { %10187 = vmatpush1.bf16.msra.mxu1 %v15116_v44  ;;  %v3423_v11 = vld [vmem:[#allocation2 + $0xf98] sm:$0xff]  ;;  %v15213_v7 = vcombine.high %v3295_v14, %v3299_v3  ;;  %v15212_v41 = vcombine.low %v3295_v14, %v3299_v3 }
 0x954   :  { %10188 = vmatprep.subr.bf16.mxu1 %v15109_v56  ;;  %v3427_v23 = vld [vmem:[#allocation2 + $0xfb8] sm:$0xff] }
 0x955   :  { %10228 = vmatpush1.bf16.msra.mxu0 %v15244_v53  ;;  %v15341_v10 = vcombine.high %v3423_v11, %v3427_v23  ;;  %v3287_v17 = vld [vmem:[#allocation2 + $0xb58] sm:$0xff]  ;;  %v15340_v36 = vcombine.low %v3423_v11, %v3427_v23 }
 0x956   :  { %10229 = vmatprep.subr.bf16.mxu0 %v15237_v50  ;;  %v3291_v27 = vld [vmem:[#allocation2 + $0xb78] sm:$0xff] }
 0x957   :  { %10189 = vmatpush1.bf16.msra.mxu1 %v15108_v49  ;;  %v3415_v12 = vld [vmem:[#allocation2 + $0xf58] sm:$0xff]  ;;  %v15205_v37 = vcombine.high %v3287_v17, %v3291_v27  ;;  %v15204_v53 = vcombine.low %v3287_v17, %v3291_v27 }
 0x958   :  { %10190 = vmatprep.subr.bf16.mxu1 %v15101_v8  ;;  %v3419_v33 = vld [vmem:[#allocation2 + $0xf78] sm:$0xff] }
 0x959   :  { %10230 = vmatpush1.bf16.msra.mxu0 %v15236_v52  ;;  %v15333_v43 = vcombine.high %v3415_v12, %v3419_v33  ;;  %v3279_v39 = vld [vmem:[#allocation2 + $0xb18] sm:$0xff]  ;;  %v15332_v56 = vcombine.low %v3415_v12, %v3419_v33 }
 0x95a   :  { %10231 = vmatprep.subr.bf16.mxu0 %v15229_v58  ;;  %v3283_v40 = vld [vmem:[#allocation2 + $0xb38] sm:$0xff] }
 0x95b   :  { %10191 = vmatpush1.bf16.msra.mxu1 %v15100_v32  ;;  %v3407_v42 = vld [vmem:[#allocation2 + $0xf18] sm:$0xff]  ;;  %v15197_v50 = vcombine.high %v3279_v39, %v3283_v40  ;;  %v15196_v52 = vcombine.low %v3279_v39, %v3283_v40 }
 0x95c   :  { %10192 = vmatprep.subr.bf16.mxu1 %v15221_v1  ;;  %v3411_v44 = vld [vmem:[#allocation2 + $0xf38] sm:$0xff] }
 0x95d   :  { %10232 = vmatpush1.bf16.msra.mxu0 %v15228_v63  ;;  %v15325_v45 = vcombine.high %v3407_v42, %v3411_v44  ;;  %v3271_v46 = vld [vmem:[#allocation2 + $0xad8] sm:$0xff]  ;;  %v15324_v8 = vcombine.low %v3407_v42, %v3411_v44 }
 0x95e   :  { %10233 = vmatprep.subr.bf16.mxu0 %v15349_v2  ;;  %v3275_v6 = vld [vmem:[#allocation2 + $0xaf8] sm:$0xff] }
 0x95f   :  { %10193 = vmatpush2.bf16.msra.mxu1 %v15220_v19  ;;  %v3399_v54 = vld [vmem:[#allocation2 + $0xed8] sm:$0xff]  ;;  %v15189_v58 = vcombine.high %v3271_v46, %v3275_v6  ;;  %v15188_v63 = vcombine.low %v3271_v46, %v3275_v6 }
 0x960   :  { %10194 = vmatprep.subr.bf16.mxu1 %v15213_v7  ;;  %v3403_v49 = vld [vmem:[#allocation2 + $0xef8] sm:$0xff] }
 0x961   :  { %10234 = vmatpush2.bf16.msra.mxu0 %v15348_v9  ;;  %v15317_v61 = vcombine.high %v3399_v54, %v3403_v49  ;;  %v3263_v55 = vld [vmem:[#allocation2 + $0xa98] sm:$0xff]  ;;  %v15316_v1 = vcombine.low %v3399_v54, %v3403_v49 }
 0x962   :  { %10235 = vmatprep.subr.bf16.mxu0 %v15341_v10  ;;  %v3267_v59 = vld [vmem:[#allocation2 + $0xab8] sm:$0xff] }
 0x963   :  { %10195 = vmatpush2.bf16.msra.mxu1 %v15212_v41  ;;  %v3391_v0 = vld [vmem:[#allocation2 + $0xe98] sm:$0xff]  ;;  %v15181_v2 = vcombine.high %v3263_v55, %v3267_v59  ;;  %v15180_v9 = vcombine.low %v3263_v55, %v3267_v59 }
 0x964   :  { %10196 = vmatprep.subr.bf16.mxu1 %v15205_v37  ;;  %v3395_v32 = vld [vmem:[#allocation2 + $0xeb8] sm:$0xff] }
 0x965   :  { %10236 = vmatpush2.bf16.msra.mxu0 %v15340_v36  ;;  %v15309_v14 = vcombine.high %v3391_v0, %v3395_v32  ;;  %v3255_v3 = vld [vmem:[#allocation2 + $0xa58] sm:$0xff]  ;;  %v15308_v7 = vcombine.low %v3391_v0, %v3395_v32 }
 0x966   :  { %10237 = vmatprep.subr.bf16.mxu0 %v15333_v43  ;;  %v3259_v11 = vld [vmem:[#allocation2 + $0xa78] sm:$0xff] }
 0x967   :  { %10197 = vmatpush2.bf16.msra.mxu1 %v15204_v53  ;;  %v3383_v23 = vld [vmem:[#allocation2 + $0xe58] sm:$0xff]  ;;  %v15173_v10 = vcombine.high %v3255_v3, %v3259_v11  ;;  %v15172_v36 = vcombine.low %v3255_v3, %v3259_v11 }
 0x968   :  { %10198 = vmatprep.subr.bf16.mxu1 %v15197_v50  ;;  %v3387_v19 = vld [vmem:[#allocation2 + $0xe78] sm:$0xff] }
 0x969   :  { %10238 = vmatpush2.bf16.msra.mxu0 %v15332_v56  ;;  %v15301_v17 = vcombine.high %v3383_v23, %v3387_v19  ;;  %v3247_v27 = vld [vmem:[#allocation2 + $0xa18] sm:$0xff]  ;;  %v15300_v37 = vcombine.low %v3383_v23, %v3387_v19 }
 0x96a   :  { %10239 = vmatprep.subr.bf16.mxu0 %v15325_v45  ;;  %v3251_v12 = vld [vmem:[#allocation2 + $0xa38] sm:$0xff] }
 0x96b   :  { %10199 = vmatpush2.bf16.msra.mxu1 %v15196_v52  ;;  %v3375_v33 = vld [vmem:[#allocation2 + $0xe18] sm:$0xff]  ;;  %v15165_v43 = vcombine.high %v3247_v27, %v3251_v12  ;;  %v15164_v56 = vcombine.low %v3247_v27, %v3251_v12 }
 0x96c   :  { %10200 = vmatprep.subr.bf16.mxu1 %v15189_v58  ;;  %v3379_v41 = vld [vmem:[#allocation2 + $0xe38] sm:$0xff] }
 0x96d   :  { %10240 = vmatpush2.bf16.msra.mxu0 %v15324_v8  ;;  %v15293_v39 = vcombine.high %v3375_v33, %v3379_v41  ;;  %v3495_v40 = vld [vmem:[#allocation2 + $0x11d8] sm:$0xff]  ;;  %v15292_v50 = vcombine.low %v3375_v33, %v3379_v41 }
 0x96e   :  { %10241 = vmatprep.subr.bf16.mxu0 %v15317_v61  ;;  %v3499_v42 = vld [vmem:[#allocation2 + $0x11f8] sm:$0xff] }
 0x96f   :  { %10201 = vmatpush2.bf16.msra.mxu1 %v15188_v63  ;;  %v3623_v44 = vld [vmem:[#allocation2 + $0x15d8] sm:$0xff]  ;;  %v15413_v45 = vcombine.high %v3495_v40, %v3499_v42  ;;  %v15412_v8 = vcombine.low %v3495_v40, %v3499_v42 }
 0x970   :  { %10202 = vmatprep.subr.bf16.mxu1 %v15181_v2  ;;  %v3627_v53 = vld [vmem:[#allocation2 + $0x15f8] sm:$0xff] }
 0x971   :  { %10242 = vmatpush2.bf16.msra.mxu0 %v15316_v1  ;;  %v15541_v46 = vcombine.high %v3623_v44, %v3627_v53  ;;  %v3487_v6 = vld [vmem:[#allocation2 + $0x1198] sm:$0xff]  ;;  %v15540_v58 = vcombine.low %v3623_v44, %v3627_v53 }
 0x972   :  { %10243 = vmatprep.subr.bf16.mxu0 %v15309_v14  ;;  %v3491_v54 = vld [vmem:[#allocation2 + $0x11b8] sm:$0xff] }
 0x973   :  { %10203 = vmatpush2.bf16.msra.mxu1 %v15180_v9  ;;  %v3615_v49 = vld [vmem:[#allocation2 + $0x1598] sm:$0xff]  ;;  %v15405_v61 = vcombine.high %v3487_v6, %v3491_v54  ;;  %v15404_v3 = vcombine.low %v3487_v6, %v3491_v54 }
 0x974   :  { %10204 = vmatprep.subr.bf16.mxu1 %v15173_v10  ;;  %v3619_v52 = vld [vmem:[#allocation2 + $0x15b8] sm:$0xff] }
 0x975   :  { %10244 = vmatpush2.bf16.msra.mxu0 %v15308_v7  ;;  %v15533_v55 = vcombine.high %v3615_v49, %v3619_v52  ;;  %v3479_v59 = vld [vmem:[#allocation2 + $0x1158] sm:$0xff]  ;;  %v15532_v23 = vcombine.low %v3615_v49, %v3619_v52 }
 0x976   :  { %10245 = vmatprep.subr.bf16.mxu0 %v15301_v17  ;;  %v3483_v0 = vld [vmem:[#allocation2 + $0x1178] sm:$0xff] }
 0x977   :  { %10205 = vmatpush2.bf16.msra.mxu1 %v15172_v36  ;;  %v3607_v63 = vld [vmem:[#allocation2 + $0x1558] sm:$0xff]  ;;  %v15397_v19 = vcombine.high %v3479_v59, %v3483_v0  ;;  %v15396_v36 = vcombine.low %v3479_v59, %v3483_v0 }
 0x978   :  { %10206 = vmatprep.subr.bf16.mxu1 %v15165_v43  ;;  %v3611_v1 = vld [vmem:[#allocation2 + $0x1578] sm:$0xff] }
 0x979   :  { %10246 = vmatpush2.bf16.msra.mxu0 %v15300_v37  ;;  %v3471_v17 = vld [vmem:[#allocation2 + $0x1118] sm:$0xff] }
 0x97a   :  { %10247 = vmatprep.subr.bf16.mxu0 %v15293_v39  ;;  %v3475_v27 = vld [vmem:[#allocation2 + $0x1138] sm:$0xff] }
 0x97b   :  { %10207 = vmatpush2.bf16.msra.mxu1 %v15164_v56  ;;  %v3603_v12 = vld [vmem:[#allocation2 + $0x1538] sm:$0xff]  ;;  %v15389_v43 = vcombine.high %v3471_v17, %v3475_v27  ;;  %v15388_v56 = vcombine.low %v3471_v17, %v3475_v27 }
 0x97c   :  { %10258 = vmatprep.subr.bf16.mxu1 %v15413_v45  ;;  %v3463_v42 = vld [vmem:[#allocation2 + $0x10d8] sm:$0xff] }
 0x97d   :  { %10248 = vmatpush2.bf16.msra.mxu0 %v15292_v50  ;;  %v3591_v44 = vld [vmem:[#allocation2 + $0x14d8] sm:$0xff] }
 0x97e   :  { %10299 = vmatprep.subr.bf16.mxu0 %v15541_v46  ;;  %v9964_v32 = vpop.f32.mrf.mxu1  ;;  %10209 = vmatmul.mubr.bf16.vlgmr.msra.gmra.mxu1 %v18074_v13  ;;  %v15525_v13 = vcombine.high %v3607_v63, %v3611_v1  ;;  %v3595_v53 = vld [vmem:[#allocation2 + $0x14f8] sm:$0xff] }
 0x97f   :  { %v9965_v2 = vadd.f32 %v9964_v32, %v18349_v38  ;;  %10259 = vmatpush1.bf16.msra.mxu1 %v15412_v8  ;;  %10290 = vmatprep.mubr.bf16.mxu1 %v18084_v24  ;;  %v3467_v24 = vld [vmem:[#allocation2 + $0x10f8] sm:$0xff]  ;;  %v15509_v45 = vcombine.high %v3591_v44, %v3595_v53  ;;  %v15508_v8 = vcombine.low %v3591_v44, %v3595_v53 }
 0x980   :  { %v10005_v14 = vpop.f32.mrf.mxu0  ;;  %10250 = vmatmul.mubr.bf16.vlgmr.msra.gmra.mxu0 %v18078_v18  ;;  %v9966_v11 = vpop.f32.mrf.mxu1  ;;  %10260 = vmatprep.subr.bf16.mxu1 %v15405_v61  ;;  %v3599_v18 = vld [vmem:[#allocation2 + $0x1518] sm:$0xff]  ;;  %v15381_v50 = vcombine.high %v3463_v42, %v3467_v24  ;;  %v15380_v52 = vcombine.low %v3463_v42, %v3467_v24 }
 0x981   :  { %10300 = vmatpush1.bf16.msra.mxu0 %v15540_v58  ;;  %v18359_v9 = vadd.f32 %v10005_v14, %v9965_v2  ;;  %v9967_v7 = vadd.f32 %v9966_v11, %v18354_v60  ;;  %10331 = vmatprep.mubr.bf16.mxu0 %v18088_v26  ;;  %v15524_v60 = vcombine.low %v3607_v63, %v3611_v1  ;;  %v3455_v46 = vld [vmem:[#allocation2 + $0x1098] sm:$0xff] }
 0x982   :  { %v10007_v10 = vpop.f32.mrf.mxu0  ;;  %10301 = vmatprep.subr.bf16.mxu0 %v15533_v55  ;;  %v9968_v38 = vpop.f32.mrf.mxu1  ;;  %v15517_v40 = vcombine.high %v3599_v18, %v3603_v12  ;;  %v15516_v26 = vcombine.low %v3599_v18, %v3603_v12  ;;  %v3459_v6 = vld [vmem:[#allocation2 + $0x10b8] sm:$0xff] }
 0x983   :  { %v18364_v33 = vadd.f32 %v10007_v10, %v9967_v7  ;;  %10261 = vmatpush1.bf16.msra.mxu1 %v15404_v3  ;;  %v3583_v54 = vld [vmem:[#allocation2 + $0x1498] sm:$0xff]  ;;  %v15373_v58 = vcombine.high %v3455_v46, %v3459_v6  ;;  %v15372_v63 = vcombine.low %v3455_v46, %v3459_v6 }
 0x984   :  { %v10009_v41 = vpop.f32.mrf.mxu0  ;;  %v9969_v37 = vpop.f32.mrf.mxu1  ;;  %10262 = vmatprep.subr.bf16.mxu1 %v15397_v19  ;;  %v3587_v49 = vld [vmem:[#allocation2 + $0x14b8] sm:$0xff] }
 0x985   :  { %10302 = vmatpush1.bf16.msra.mxu0 %v15532_v23  ;;  %v15501_v61 = vcombine.high %v3583_v54, %v3587_v49  ;;  %v3447_v55 = vld [vmem:[#allocation2 + $0x1058] sm:$0xff]  ;;  %v15500_v1 = vcombine.low %v3583_v54, %v3587_v49 }
 0x986   :  { %v10010_v39 = vpop.f32.mrf.mxu0  ;;  %10303 = vmatprep.subr.bf16.mxu0 %v15525_v13  ;;  %v3451_v59 = vld [vmem:[#allocation2 + $0x1078] sm:$0xff] }
 0x987   :  { %10263 = vmatpush1.bf16.msra.mxu1 %v15396_v36  ;;  %v3575_v0 = vld [vmem:[#allocation2 + $0x1458] sm:$0xff]  ;;  %v15365_v2 = vcombine.high %v3447_v55, %v3451_v59  ;;  %v15364_v7 = vcombine.low %v3447_v55, %v3451_v59 }
 0x988   :  { %10264 = vmatprep.subr.bf16.mxu1 %v15389_v43  ;;  %v3579_v32 = vld [vmem:[#allocation2 + $0x1478] sm:$0xff] }
 0x989   :  { %10304 = vmatpush1.bf16.msra.mxu0 %v15524_v60  ;;  %v15493_v14 = vcombine.high %v3575_v0, %v3579_v32  ;;  %v3439_v3 = vld [vmem:[#allocation2 + $0x1018] sm:$0xff]  ;;  %v15492_v10 = vcombine.low %v3575_v0, %v3579_v32 }
 0x98a   :  { %10305 = vmatprep.subr.bf16.mxu0 %v15517_v40  ;;  %v3443_v11 = vld [vmem:[#allocation2 + $0x1038] sm:$0xff] }
 0x98b   :  { %10265 = vmatpush1.bf16.msra.mxu1 %v15388_v56  ;;  %v3567_v23 = vld [vmem:[#allocation2 + $0x1418] sm:$0xff]  ;;  %v15357_v13 = vcombine.high %v3439_v3, %v3443_v11  ;;  %v15356_v41 = vcombine.low %v3439_v3, %v3443_v11 }
 0x98c   :  { %10266 = vmatprep.subr.bf16.mxu1 %v15381_v50  ;;  %v3571_v19 = vld [vmem:[#allocation2 + $0x1438] sm:$0xff] }
 0x98d   :  { %10306 = vmatpush1.bf16.msra.mxu0 %v15516_v26  ;;  %v15485_v17 = vcombine.high %v3567_v23, %v3571_v19  ;;  %v3559_v27 = vld [vmem:[#allocation2 + $0x13d8] sm:$0xff]  ;;  %v15484_v36 = vcombine.low %v3567_v23, %v3571_v19 }
 0x98e   :  { %10307 = vmatprep.subr.bf16.mxu0 %v15509_v45  ;;  %v3563_v38 = vld [vmem:[#allocation2 + $0x13f8] sm:$0xff] }
 0x98f   :  { %10267 = vmatpush1.bf16.msra.mxu1 %v15380_v52  ;;  %v3687_v18 = vld [vmem:[#allocation2 + $0x17d8] sm:$0xff]  ;;  %v15477_v37 = vcombine.high %v3559_v27, %v3563_v38  ;;  %v15476_v24 = vcombine.low %v3559_v27, %v3563_v38 }
 0x990   :  { %10268 = vmatprep.subr.bf16.mxu1 %v15373_v58  ;;  %v3691_v12 = vld [vmem:[#allocation2 + $0x17f8] sm:$0xff] }
 0x991   :  { %10308 = vmatpush1.bf16.msra.mxu0 %v15508_v8  ;;  %v15605_v60 = vcombine.high %v3687_v18, %v3691_v12  ;;  %v3551_v43 = vld [vmem:[#allocation2 + $0x1398] sm:$0xff]  ;;  %v15604_v44 = vcombine.low %v3687_v18, %v3691_v12 }
 0x992   :  { %10309 = vmatprep.subr.bf16.mxu0 %v15501_v61  ;;  %v3555_v39 = vld [vmem:[#allocation2 + $0x13b8] sm:$0xff] }
 0x993   :  { %10269 = vmatpush1.bf16.msra.mxu1 %v15372_v63  ;;  %v3679_v40 = vld [vmem:[#allocation2 + $0x1798] sm:$0xff]  ;;  %v15469_v53 = vcombine.high %v3551_v43, %v3555_v39  ;;  %v15468_v6 = vcombine.low %v3551_v43, %v3555_v39 }
 0x994   :  { %10270 = vmatprep.subr.bf16.mxu1 %v15365_v2  ;;  %v3683_v42 = vld [vmem:[#allocation2 + $0x17b8] sm:$0xff] }
 0x995   :  { %10310 = vmatpush1.bf16.msra.mxu0 %v15500_v1  ;;  %v15597_v56 = vcombine.high %v3679_v40, %v3683_v42  ;;  %v3543_v26 = vld [vmem:[#allocation2 + $0x1358] sm:$0xff]  ;;  %v15596_v54 = vcombine.low %v3679_v40, %v3683_v42 }
 0x996   :  { %10311 = vmatprep.subr.bf16.mxu0 %v15493_v14  ;;  %v3547_v50 = vld [vmem:[#allocation2 + $0x1378] sm:$0xff] }
 0x997   :  { %10271 = vmatpush1.bf16.msra.mxu1 %v15364_v7  ;;  %v3671_v45 = vld [vmem:[#allocation2 + $0x1758] sm:$0xff]  ;;  %v15461_v49 = vcombine.high %v3543_v26, %v3547_v50  ;;  %v15460_v59 = vcombine.low %v3543_v26, %v3547_v50 }
 0x998   :  { %10272 = vmatprep.subr.bf16.mxu1 %v15357_v13  ;;  %v3675_v46 = vld [vmem:[#allocation2 + $0x1778] sm:$0xff] }
 0x999   :  { %10312 = vmatpush1.bf16.msra.mxu0 %v15492_v10  ;;  %v15589_v52 = vcombine.high %v3671_v45, %v3675_v46  ;;  %v3535_v8 = vld [vmem:[#allocation2 + $0x1318] sm:$0xff]  ;;  %v15588_v0 = vcombine.low %v3671_v45, %v3675_v46 }
 0x99a   :  { %10313 = vmatprep.subr.bf16.mxu0 %v15485_v17  ;;  %v3539_v58 = vld [vmem:[#allocation2 + $0x1338] sm:$0xff] }
 0x99b   :  { %10273 = vmatpush1.bf16.msra.mxu1 %v15356_v41  ;;  %v3663_v61 = vld [vmem:[#allocation2 + $0x1718] sm:$0xff]  ;;  %v15453_v32 = vcombine.high %v3535_v8, %v3539_v58  ;;  %v15452_v11 = vcombine.low %v3535_v8, %v3539_v58 }
 0x99c   :  { %10274 = vmatprep.subr.bf16.mxu1 %v15477_v37  ;;  %v3667_v55 = vld [vmem:[#allocation2 + $0x1738] sm:$0xff] }
 0x99d   :  { %10314 = vmatpush1.bf16.msra.mxu0 %v15484_v36  ;;  %v15581_v63 = vcombine.high %v3663_v61, %v3667_v55  ;;  %v3527_v1 = vld [vmem:[#allocation2 + $0x12d8] sm:$0xff]  ;;  %v15580_v23 = vcombine.low %v3663_v61, %v3667_v55 }
 0x99e   :  { %10315 = vmatprep.subr.bf16.mxu0 %v15605_v60  ;;  %v3531_v2 = vld [vmem:[#allocation2 + $0x12f8] sm:$0xff] }
 0x99f   :  { %10275 = vmatpush2.bf16.msra.mxu1 %v15476_v24  ;;  %v3655_v14 = vld [vmem:[#allocation2 + $0x16d8] sm:$0xff]  ;;  %v15445_v19 = vcombine.high %v3527_v1, %v3531_v2  ;;  %v15444_v38 = vcombine.low %v3527_v1, %v3531_v2 }
 0x9a0   :  { %10276 = vmatprep.subr.bf16.mxu1 %v15469_v53  ;;  %v3659_v3 = vld [vmem:[#allocation2 + $0x16f8] sm:$0xff] }
 0x9a1   :  { %10316 = vmatpush2.bf16.msra.mxu0 %v15604_v44  ;;  %v15573_v7 = vcombine.high %v3655_v14, %v3659_v3  ;;  %v3519_v10 = vld [vmem:[#allocation2 + $0x1298] sm:$0xff]  ;;  %v15572_v18 = vcombine.low %v3655_v14, %v3659_v3 }
 0x9a2   :  { %10317 = vmatprep.subr.bf16.mxu0 %v15597_v56  ;;  %v3523_v13 = vld [vmem:[#allocation2 + $0x12b8] sm:$0xff] }
 0x9a3   :  { %10277 = vmatpush2.bf16.msra.mxu1 %v15468_v6  ;;  %v3647_v17 = vld [vmem:[#allocation2 + $0x1698] sm:$0xff]  ;;  %v15437_v12 = vcombine.high %v3519_v10, %v3523_v13  ;;  %v15436_v39 = vcombine.low %v3519_v10, %v3523_v13 }
 0x9a4   :  { %10278 = vmatprep.subr.bf16.mxu1 %v15461_v49  ;;  %v3651_v27 = vld [vmem:[#allocation2 + $0x16b8] sm:$0xff] }
 0x9a5   :  { %10318 = vmatpush2.bf16.msra.mxu0 %v15596_v54  ;;  %v15565_v41 = vcombine.high %v3647_v17, %v3651_v27  ;;  %v3511_v36 = vld [vmem:[#allocation2 + $0x1258] sm:$0xff]  ;;  %v15564_v40 = vcombine.low %v3647_v17, %v3651_v27 }
 0x9a6   :  { %10319 = vmatprep.subr.bf16.mxu0 %v15589_v52  ;;  %v3515_v37 = vld [vmem:[#allocation2 + $0x1278] sm:$0xff] }
 0x9a7   :  { %10279 = vmatpush2.bf16.msra.mxu1 %v15460_v59  ;;  %v3639_v60 = vld [vmem:[#allocation2 + $0x1658] sm:$0xff]  ;;  %v15429_v42 = vcombine.high %v3511_v36, %v3515_v37  ;;  %v15428_v50 = vcombine.low %v3511_v36, %v3515_v37 }
 0x9a8   :  { %10280 = vmatprep.subr.bf16.mxu1 %v15453_v32  ;;  %v3643_v43 = vld [vmem:[#allocation2 + $0x1678] sm:$0xff] }
 0x9a9   :  { %10320 = vmatpush2.bf16.msra.mxu0 %v15588_v0  ;;  %v15557_v24 = vcombine.high %v3639_v60, %v3643_v43  ;;  %v3503_v44 = vld [vmem:[#allocation2 + $0x1218] sm:$0xff]  ;;  %v15556_v45 = vcombine.low %v3639_v60, %v3643_v43 }
 0x9aa   :  { %10321 = vmatprep.subr.bf16.mxu0 %v15581_v63  ;;  %v3507_v53 = vld [vmem:[#allocation2 + $0x1238] sm:$0xff] }
 0x9ab   :  { %10281 = vmatpush2.bf16.msra.mxu1 %v15452_v11  ;;  %v3631_v56 = vld [vmem:[#allocation2 + $0x1618] sm:$0xff]  ;;  %v15421_v46 = vcombine.high %v3503_v44, %v3507_v53  ;;  %v15420_v58 = vcombine.low %v3503_v44, %v3507_v53 }
 0x9ac   :  { %10282 = vmatprep.subr.bf16.mxu1 %v15445_v19  ;;  %v3635_v26 = vld [vmem:[#allocation2 + $0x1638] sm:$0xff] }
 0x9ad   :  { %10322 = vmatpush2.bf16.msra.mxu0 %v15580_v23  ;;  %v15549_v6 = vcombine.high %v3631_v56, %v3635_v26  ;;  %v3751_v54 = vld [vmem:[#allocation2 + $0x19d8] sm:$0xff]  ;;  %v15548_v61 = vcombine.low %v3631_v56, %v3635_v26 }
 0x9ae   :  { %10323 = vmatprep.subr.bf16.mxu0 %v15573_v7  ;;  %v3755_v49 = vld [vmem:[#allocation2 + $0x19f8] sm:$0xff] }
 0x9af   :  { %10283 = vmatpush2.bf16.msra.mxu1 %v15444_v38  ;;  %v3879_v52 = vld [vmem:[#allocation2 + $0x1dd8] sm:$0xff]  ;;  %v15669_v55 = vcombine.high %v3751_v54, %v3755_v49  ;;  %v15668_v2 = vcombine.low %v3751_v54, %v3755_v49 }
 0x9b0   :  { %10284 = vmatprep.subr.bf16.mxu1 %v15437_v12  ;;  %v3883_v8 = vld [vmem:[#allocation2 + $0x1df8] sm:$0xff] }
 0x9b1   :  { %10324 = vmatpush2.bf16.msra.mxu0 %v15572_v18  ;;  %v15797_v59 = vcombine.high %v3879_v52, %v3883_v8  ;;  %v3743_v0 = vld [vmem:[#allocation2 + $0x1998] sm:$0xff]  ;;  %v15796_v14 = vcombine.low %v3879_v52, %v3883_v8 }
 0x9b2   :  { %10325 = vmatprep.subr.bf16.mxu0 %v15565_v41  ;;  %v3747_v32 = vld [vmem:[#allocation2 + $0x19b8] sm:$0xff] }
 0x9b3   :  { %10285 = vmatpush2.bf16.msra.mxu1 %v15436_v39  ;;  %v3871_v63 = vld [vmem:[#allocation2 + $0x1d98] sm:$0xff]  ;;  %v15661_v3 = vcombine.high %v3743_v0, %v3747_v32  ;;  %v15660_v38 = vcombine.low %v3743_v0, %v3747_v32 }
 0x9b4   :  { %10286 = vmatprep.subr.bf16.mxu1 %v15429_v42  ;;  %v3875_v1 = vld [vmem:[#allocation2 + $0x1db8] sm:$0xff] }
 0x9b5   :  { %10326 = vmatpush2.bf16.msra.mxu0 %v15564_v40  ;;  %v15789_v11 = vcombine.high %v3871_v63, %v3875_v1  ;;  %v3735_v23 = vld [vmem:[#allocation2 + $0x1958] sm:$0xff]  ;;  %v15788_v12 = vcombine.low %v3871_v63, %v3875_v1 }
 0x9b6   :  { %10327 = vmatprep.subr.bf16.mxu0 %v15557_v24  ;;  %v3739_v19 = vld [vmem:[#allocation2 + $0x1978] sm:$0xff] }
 0x9b7   :  { %10287 = vmatpush2.bf16.msra.mxu1 %v15428_v50  ;;  %v3863_v10 = vld [vmem:[#allocation2 + $0x1d58] sm:$0xff]  ;;  %v15653_v41 = vcombine.high %v3735_v23, %v3739_v19  ;;  %v15652_v53 = vcombine.low %v3735_v23, %v3739_v19 }
 0x9b8   :  { %10288 = vmatprep.subr.bf16.mxu1 %v15421_v46  ;;  %v3867_v13 = vld [vmem:[#allocation2 + $0x1d78] sm:$0xff] }
 0x9b9   :  { %10328 = vmatpush2.bf16.msra.mxu0 %v15556_v45  ;;  %v3727_v43 = vld [vmem:[#allocation2 + $0x1918] sm:$0xff] }
 0x9ba   :  { %10329 = vmatprep.subr.bf16.mxu0 %v15549_v6  ;;  %v3731_v39 = vld [vmem:[#allocation2 + $0x1938] sm:$0xff] }
 0x9bb   :  { %10289 = vmatpush2.bf16.msra.mxu1 %v15420_v58  ;;  %v3855_v40 = vld [vmem:[#allocation2 + $0x1d18] sm:$0xff]  ;;  %v15645_v26 = vcombine.high %v3727_v43, %v3731_v39  ;;  %v15644_v8 = vcombine.low %v3727_v43, %v3731_v39 }
 0x9bc   :  { %10340 = vmatprep.subr.bf16.mxu1 %v15669_v55  ;;  %v3719_v6 = vld [vmem:[#allocation2 + $0x18d8] sm:$0xff] }
 0x9bd   :  { %10330 = vmatpush2.bf16.msra.mxu0 %v15548_v61  ;;  %v3723_v54 = vld [vmem:[#allocation2 + $0x18f8] sm:$0xff] }
 0x9be   :  { %10381 = vmatprep.subr.bf16.mxu0 %v15797_v59  ;;  %v10046_v7 = vpop.f32.mrf.mxu1  ;;  %10291 = vmatmul.mubr.bf16.vlgmr.msra.gmra.mxu1 %v18082_v20  ;;  %v15781_v20 = vcombine.high %v3863_v10, %v3867_v13  ;;  %v3847_v49 = vld [vmem:[#allocation2 + $0x1cd8] sm:$0xff]  ;;  %v15637_v61 = vcombine.high %v3719_v6, %v3723_v54  ;;  %v15636_v1 = vcombine.low %v3719_v6, %v3723_v54 }
 0x9bf   :  { %v10047_v17 = vadd.f32 %v10046_v7, %v18359_v9  ;;  %10341 = vmatpush1.bf16.msra.mxu1 %v15668_v2  ;;  %10372 = vmatprep.mubr.bf16.mxu1 %v18092_v29  ;;  %v3711_v59 = vld [vmem:[#allocation2 + $0x1898] sm:$0xff] }
 0x9c0   :  { %v10087_v27 = vpop.f32.mrf.mxu0  ;;  %10332 = vmatmul.mubr.bf16.vlgmr.msra.gmra.mxu0 %v18086_v25  ;;  %v10048_v18 = vpop.f32.mrf.mxu1  ;;  %10342 = vmatprep.subr.bf16.mxu1 %v15661_v3  ;;  %v3859_v25 = vld [vmem:[#allocation2 + $0x1d38] sm:$0xff] }
 0x9c1   :  { %10382 = vmatpush1.bf16.msra.mxu0 %v15796_v14  ;;  %v10088_v36 = vadd.f32 %v10087_v27, %v10047_v17  ;;  %v10049_v37 = vadd.f32 %v10048_v18, %v18364_v33  ;;  %10413 = vmatprep.mubr.bf16.mxu0 %v18096_v31  ;;  %v15780_v33 = vcombine.low %v3863_v10, %v3867_v13  ;;  %v3851_v31 = vld [vmem:[#allocation2 + $0x1cf8] sm:$0xff] }
 0x9c2   :  { %v10089_v60 = vpop.f32.mrf.mxu0  ;;  %10383 = vmatprep.subr.bf16.mxu0 %v15789_v11  ;;  %v10050_v9 = vpop.f32.mrf.mxu1  ;;  %v15773_v29 = vcombine.high %v3855_v40, %v3859_v25  ;;  %v15772_v58 = vcombine.low %v3855_v40, %v3859_v25  ;;  %v15765_v55 = vcombine.high %v3847_v49, %v3851_v31  ;;  %v3715_v0 = vld [vmem:[#allocation2 + $0x18b8] sm:$0xff]  ;;  %v15764_v2 = vcombine.low %v3847_v49, %v3851_v31 }
 0x9c3   :  { %v10426_v42 = vmax.f32 %v10088_v36, 0.0  ;;  %v10090_v24 = vadd.f32 %v10089_v60, %v10049_v37  ;;  %10343 = vmatpush1.bf16.msra.mxu1 %v15660_v38  ;;  %v3839_v32 = vld [vmem:[#allocation2 + $0x1c98] sm:$0xff]  ;;  %v15629_v14 = vcombine.high %v3711_v59, %v3715_v0  ;;  %v15628_v10 = vcombine.low %v3711_v59, %v3715_v0 }
 0x9c4   :  { %v10091_v44 = vpop.f32.mrf.mxu0  ;;  %v10051_v56 = vpop.f32.mrf.mxu1  ;;  %10344 = vmatprep.subr.bf16.mxu1 %v15653_v41  ;;  %v3843_v63 = vld [vmem:[#allocation2 + $0x1cb8] sm:$0xff] }
 0x9c5   :  { %10384 = vmatpush1.bf16.msra.mxu0 %v15788_v12  ;;  %v18372_v50 = vpack.c.bf16 %v10426_v42, %v10426_v42  ;;  %v10427_v45 = vmax.f32 %v10090_v24, 0.0  ;;  %v15757_v3 = vcombine.high %v3839_v32, %v3843_v63  ;;  %v3703_v11 = vld [vmem:[#allocation2 + $0x1858] sm:$0xff]  ;;  %v15756_v13 = vcombine.low %v3839_v32, %v3843_v63 }
 0x9c6   :  { %v10092_v46 = vpop.f32.mrf.mxu0  ;;  %10385 = vmatprep.subr.bf16.mxu0 %v15781_v20  ;;  %v3707_v23 = vld [vmem:[#allocation2 + $0x1878] sm:$0xff] }
 0x9c7   :  { %v18374_v52 = vpack.c.bf16 %v10427_v45, %v10427_v45  ;;  %10345 = vmatpush1.bf16.msra.mxu1 %v15652_v53  ;;  %v3831_v19 = vld [vmem:[#allocation2 + $0x1c58] sm:$0xff]  ;;  %v15621_v17 = vcombine.high %v3703_v11, %v3707_v23  ;;  %v15620_v36 = vcombine.low %v3703_v11, %v3707_v23 }
 0x9c8   :  { %10346 = vmatprep.subr.bf16.mxu1 %v15645_v26  ;;  %v3835_v7 = vld [vmem:[#allocation2 + $0x1c78] sm:$0xff] }
 0x9c9   :  { %10386 = vmatpush1.bf16.msra.mxu0 %v15780_v33  ;;  %v15749_v27 = vcombine.high %v3831_v19, %v3835_v7  ;;  %v3695_v38 = vld [vmem:[#allocation2 + $0x1818] sm:$0xff]  ;;  %v15748_v37 = vcombine.low %v3831_v19, %v3835_v7 }
 0x9ca   :  { %10387 = vmatprep.subr.bf16.mxu0 %v15773_v29  ;;  %v3699_v18 = vld [vmem:[#allocation2 + $0x1838] sm:$0xff] }
 0x9cb   :  { %10347 = vmatpush1.bf16.msra.mxu1 %v15644_v8  ;;  %v3823_v12 = vld [vmem:[#allocation2 + $0x1c18] sm:$0xff]  ;;  %v15613_v60 = vcombine.high %v3695_v38, %v3699_v18  ;;  %v15612_v25 = vcombine.low %v3695_v38, %v3699_v18 }
 0x9cc   :  { %10348 = vmatprep.subr.bf16.mxu1 %v15637_v61  ;;  %v3827_v41 = vld [vmem:[#allocation2 + $0x1c38] sm:$0xff] }
 0x9cd   :  { %10388 = vmatpush1.bf16.msra.mxu0 %v15772_v58  ;;  %v15741_v20 = vcombine.high %v3823_v12, %v3827_v41  ;;  %v3815_v43 = vld [vmem:[#allocation2 + $0x1bd8] sm:$0xff]  ;;  %v15740_v42 = vcombine.low %v3823_v12, %v3827_v41 }
 0x9ce   :  { %10389 = vmatprep.subr.bf16.mxu0 %v15765_v55  ;;  %v3819_v39 = vld [vmem:[#allocation2 + $0x1bf8] sm:$0xff] }
 0x9cf   :  { %10349 = vmatpush1.bf16.msra.mxu1 %v15636_v1  ;;  %v3943_v9 = vld [vmem:[#allocation2 + $0x1fd8] sm:$0xff]  ;;  %v15733_v24 = vcombine.high %v3815_v43, %v3819_v39  ;;  %v15732_v45 = vcombine.low %v3815_v43, %v3819_v39 }
 0x9d0   :  { %10350 = vmatprep.subr.bf16.mxu1 %v15629_v14  ;;  %v3947_v40 = vld [vmem:[#allocation2 + $0x1ff8] sm:$0xff] }
 0x9d1   :  { %10390 = vmatpush1.bf16.msra.mxu0 %v15764_v2  ;;  %v15861_v44 = vcombine.high %v3943_v9, %v3947_v40  ;;  %v3807_v53 = vld [vmem:[#allocation2 + $0x1b98] sm:$0xff]  ;;  %v15860_v46 = vcombine.low %v3943_v9, %v3947_v40 }
 0x9d2   :  { %10391 = vmatprep.subr.bf16.mxu0 %v15757_v3  ;;  %v3811_v56 = vld [vmem:[#allocation2 + $0x1bb8] sm:$0xff] }
 0x9d3   :  { %10351 = vmatpush1.bf16.msra.mxu1 %v15628_v10  ;;  %v3935_v33 = vld [vmem:[#allocation2 + $0x1f98] sm:$0xff]  ;;  %v15725_v29 = vcombine.high %v3807_v53, %v3811_v56  ;;  %v15724_v58 = vcombine.low %v3807_v53, %v3811_v56 }
 0x9d4   :  { %10352 = vmatprep.subr.bf16.mxu1 %v15621_v17  ;;  %v3939_v26 = vld [vmem:[#allocation2 + $0x1fb8] sm:$0xff] }
 0x9d5   :  { %10392 = vmatpush1.bf16.msra.mxu0 %v15756_v13  ;;  %v15853_v6 = vcombine.high %v3935_v33, %v3939_v26  ;;  %v3799_v54 = vld [vmem:[#allocation2 + $0x1b58] sm:$0xff]  ;;  %v15852_v61 = vcombine.low %v3935_v33, %v3939_v26 }
 0x9d6   :  { %10393 = vmatprep.subr.bf16.mxu0 %v15749_v27  ;;  %v3803_v49 = vld [vmem:[#allocation2 + $0x1b78] sm:$0xff] }
 0x9d7   :  { %10353 = vmatpush1.bf16.msra.mxu1 %v15620_v36  ;;  %v3927_v31 = vld [vmem:[#allocation2 + $0x1f58] sm:$0xff]  ;;  %v15717_v55 = vcombine.high %v3799_v54, %v3803_v49  ;;  %v15716_v2 = vcombine.low %v3799_v54, %v3803_v49 }
 0x9d8   :  { %10354 = vmatprep.subr.bf16.mxu1 %v15613_v60  ;;  %v3931_v8 = vld [vmem:[#allocation2 + $0x1f78] sm:$0xff] }
 0x9d9   :  { %10394 = vmatpush1.bf16.msra.mxu0 %v15748_v37  ;;  %v15845_v59 = vcombine.high %v3927_v31, %v3931_v8  ;;  %v3791_v0 = vld [vmem:[#allocation2 + $0x1b18] sm:$0xff]  ;;  %v15844_v14 = vcombine.low %v3927_v31, %v3931_v8  ;;  %v3976_v31 = vsub.s32 6, %v18122_v15 }
 0x9da   :  { %10395 = vmatprep.subr.bf16.mxu0 %v15741_v20  ;;  %v3795_v32 = vld [vmem:[#allocation2 + $0x1b38] sm:$0xff] }
 0x9db   :  { %10355 = vmatpush1.bf16.msra.mxu1 %v15612_v25  ;;  %v3919_v63 = vld [vmem:[#allocation2 + $0x1f18] sm:$0xff]  ;;  %v15709_v3 = vcombine.high %v3791_v0, %v3795_v32  ;;  %v15708_v13 = vcombine.low %v3791_v0, %v3795_v32 }
 0x9dc   :  { %10356 = vmatprep.subr.bf16.mxu1 %v15733_v24  ;;  %v3923_v1 = vld [vmem:[#allocation2 + $0x1f38] sm:$0xff] }
 0x9dd   :  { %10396 = vmatpush1.bf16.msra.mxu0 %v15740_v42  ;;  %v15837_v11 = vcombine.high %v3919_v63, %v3923_v1  ;;  %v3783_v23 = vld [vmem:[#allocation2 + $0x1ad8] sm:$0xff]  ;;  %v15836_v17 = vcombine.low %v3919_v63, %v3923_v1 }
 0x9de   :  { %10397 = vmatprep.subr.bf16.mxu0 %v15861_v44  ;;  %v3787_v19 = vld [vmem:[#allocation2 + $0x1af8] sm:$0xff] }
 0x9df   :  { %10357 = vmatpush2.bf16.msra.mxu1 %v15732_v45  ;;  %v3911_v7 = vld [vmem:[#allocation2 + $0x1ed8] sm:$0xff]  ;;  %v15701_v27 = vcombine.high %v3783_v23, %v3787_v19  ;;  %v15700_v37 = vcombine.low %v3783_v23, %v3787_v19 }
 0x9e0   :  { %10358 = vmatprep.subr.bf16.mxu1 %v15725_v29  ;;  %v3915_v10 = vld [vmem:[#allocation2 + $0x1ef8] sm:$0xff] }
 0x9e1   :  { %10398 = vmatpush2.bf16.msra.mxu0 %v15860_v46  ;;  %v15829_v38 = vcombine.high %v3911_v7, %v3915_v10  ;;  %v3775_v18 = vld [vmem:[#allocation2 + $0x1a98] sm:$0xff]  ;;  %v15828_v60 = vcombine.low %v3911_v7, %v3915_v10 }
 0x9e2   :  { %10399 = vmatprep.subr.bf16.mxu0 %v15853_v6  ;;  %v3779_v12 = vld [vmem:[#allocation2 + $0x1ab8] sm:$0xff] }
 0x9e3   :  { %10359 = vmatpush2.bf16.msra.mxu1 %v15724_v58  ;;  %v3903_v41 = vld [vmem:[#allocation2 + $0x1e98] sm:$0xff]  ;;  %v15693_v20 = vcombine.high %v3775_v18, %v3779_v12  ;;  %v15692_v42 = vcombine.low %v3775_v18, %v3779_v12  ;;  %v3980_v58 = vsub.s32 7, %v18122_v15 }
 0x9e4   :  { %10360 = vmatprep.subr.bf16.mxu1 %v15717_v55  ;;  %v3907_v36 = vld [vmem:[#allocation2 + $0x1eb8] sm:$0xff] }
 0x9e5   :  { %10400 = vmatpush2.bf16.msra.mxu0 %v15852_v61  ;;  %v15821_v43 = vcombine.high %v3903_v41, %v3907_v36  ;;  %v3767_v39 = vld [vmem:[#allocation2 + $0x1a58] sm:$0xff]  ;;  %v15820_v24 = vcombine.low %v3903_v41, %v3907_v36  ;;  %v17047_v61 = vld [vmem:[#allocation16 + $0x8] sm:$0xff] }
 0x9e6   :  { %10401 = vmatprep.subr.bf16.mxu0 %v15845_v59  ;;  %v3771_v9 = vld [vmem:[#allocation2 + $0x1a78] sm:$0xff]  ;;  %v3977_v55 = vrot.slane %v17047_v61, %v3976_v31  ;;  %v3981_v59 = vrot.slane %v17047_v61, %v3980_v58 }
 0x9e7   :  { %10361 = vmatpush2.bf16.msra.mxu1 %v15716_v2  ;;  %v3895_v40 = vld [vmem:[#allocation2 + $0x1e58] sm:$0xff]  ;;  %v15685_v44 = vcombine.high %v3767_v39, %v3771_v9  ;;  %v15684_v46 = vcombine.low %v3767_v39, %v3771_v9 }
 0x9e8   :  { %10362 = vmatprep.subr.bf16.mxu1 %v15709_v3  ;;  %v3899_v25 = vld [vmem:[#allocation2 + $0x1e78] sm:$0xff] }
 0x9e9   :  { %10402 = vmatpush2.bf16.msra.mxu0 %v15844_v14  ;;  %v15813_v53 = vcombine.high %v3895_v40, %v3899_v25  ;;  %v3759_v56 = vld [vmem:[#allocation2 + $0x1a18] sm:$0xff]  ;;  %v15812_v29 = vcombine.low %v3895_v40, %v3899_v25 }
 0x9ea   :  { %10403 = vmatprep.subr.bf16.mxu0 %v15837_v11  ;;  %v3763_v33 = vld [vmem:[#allocation2 + $0x1a38] sm:$0xff] }
 0x9eb   :  { %10363 = vmatpush2.bf16.msra.mxu1 %v15708_v13  ;;  %v3887_v26 = vld [vmem:[#allocation2 + $0x1e18] sm:$0xff]  ;;  %v15677_v6 = vcombine.high %v3759_v56, %v3763_v33  ;;  %v15676_v49 = vcombine.low %v3759_v56, %v3763_v33 }
 0x9ec   :  { %10364 = vmatprep.subr.bf16.mxu1 %v15701_v27  ;;  %v3891_v45 = vld [vmem:[#allocation2 + $0x1e38] sm:$0xff] }
 0x9ed   :  { %10404 = vmatpush2.bf16.msra.mxu0 %v15836_v17  ;;  %v15805_v54 = vcombine.high %v3887_v26, %v3891_v45  ;;  %v15804_v8 = vcombine.low %v3887_v26, %v3891_v45 }
 0x9ee   :  { %10405 = vmatprep.subr.bf16.mxu0 %v15829_v38 }
 0x9ef   :  { %10365 = vmatpush2.bf16.msra.mxu1 %v15700_v37 }
 0x9f0   :  { %10366 = vmatprep.subr.bf16.mxu1 %v15693_v20 }
 0x9f1   :  { %10406 = vmatpush2.bf16.msra.mxu0 %v15828_v60 }
 0x9f2   :  { %10407 = vmatprep.subr.bf16.mxu0 %v15821_v43 }
 0x9f3   :  { %10367 = vmatpush2.bf16.msra.mxu1 %v15692_v42 }
 0x9f4   :  { %10368 = vmatprep.subr.bf16.mxu1 %v15685_v44 }
 0x9f5   :  { %10408 = vmatpush2.bf16.msra.mxu0 %v15820_v24 }
 0x9f6   :  { %10409 = vmatprep.subr.bf16.mxu0 %v15813_v53 }
 0x9f7   :  { %10369 = vmatpush2.bf16.msra.mxu1 %v15684_v46 }
 0x9f8   :  { %10370 = vmatprep.subr.bf16.mxu1 %v15677_v6 }
 0x9f9   :  { %10410 = vmatpush2.bf16.msra.mxu0 %v15812_v29 }
 0x9fa   :  { %10411 = vmatprep.subr.bf16.mxu0 %v15805_v54 }
 0x9fb   :  { %10371 = vmatpush2.bf16.msra.mxu1 %v15676_v49 }
 0x9fd   :  { %10412 = vmatpush2.bf16.msra.mxu0 %v15804_v8 }
 0x9fe   :  { %v10128_v0 = vpop.f32.mrf.mxu1  ;;  %10373 = vmatmul.mubr.bf16.vlgmr.msra.gmra.mxu1 %v18090_v28 }
 0x9ff   :  { %v10129_v32 = vadd.f32 %v10128_v0, %v3977_v55 }
 0xa00   :  { %v10169_v63 = vpop.f32.mrf.mxu0  ;;  %10414 = vmatmul.mubr.bf16.vlgmr.msra.gmra.mxu0 %v18094_v30  ;;  %v10130_v1 = vpop.f32.mrf.mxu1 }
 0xa01   :  { %v10170_v2 = vadd.f32 %v10169_v63, %v10129_v32  ;;  %v10131_v14 = vadd.f32 %v10130_v1, %v3981_v59 }
 0xa02   :  { %v10171_v3 = vpop.f32.mrf.mxu0  ;;  %v10132_v11 = vpop.f32.mrf.mxu1 }
 0xa03   :  { %v10172_v23 = vadd.f32 %v10171_v3, %v10131_v14 }
 0xa04   :  { %v10173_v19 = vpop.f32.mrf.mxu0  ;;  %v10133_v15 = vpop.f32.mrf.mxu1 }
 0xa06   :  { %v10174_v7 = vpop.f32.mrf.mxu0 }
 0xa3e   :  { %v10210_v10 = vpop.f32.mrf.mxu1 }
 0xa3f   :  { %v10211_v13 = vadd.f32 %v10210_v10, %v10170_v2 }
 0xa40   :  { %v10251_v17 = vpop.f32.mrf.mxu0  ;;  %v10212_v27 = vpop.f32.mrf.mxu1 }
 0xa41   :  { %v10252_v38 = vadd.f32 %v10251_v17, %v10211_v13  ;;  %v10213_v18 = vadd.f32 %v10212_v27, %v10172_v23 }
 0xa42   :  { %v10253_v28 = vpop.f32.mrf.mxu0  ;;  %v10214_v12 = vpop.f32.mrf.mxu1 }
 0xa43   :  { %v10254_v41 = vadd.f32 %v10253_v28, %v10213_v18 }
 0xa44   :  { %v10255_v36 = vpop.f32.mrf.mxu0  ;;  %v10215_v30 = vpop.f32.mrf.mxu1 }
 0xa46   :  { %v10256_v37 = vpop.f32.mrf.mxu0 }
 0xa7e   :  { %v10292_v60 = vpop.f32.mrf.mxu1 }
 0xa7f   :  { %v10293_v24 = vadd.f32 %v10292_v60, %v10252_v38 }
 0xa80   :  { %v10333_v20 = vpop.f32.mrf.mxu0  ;;  %v10294_v43 = vpop.f32.mrf.mxu1 }
 0xa81   :  { %v10295_v44 = vadd.f32 %v10294_v43, %v10254_v41  ;;  %v10334_v53 = vadd.f32 %v10333_v20, %v10293_v24 }
 0xa82   :  { %v10335_v39 = vpop.f32.mrf.mxu0  ;;  %v10296_v9 = vpop.f32.mrf.mxu1 }
 0xa83   :  { %v10336_v33 = vadd.f32 %v10335_v39, %v10295_v44 }
 0xa84   :  { %v10337_v40 = vpop.f32.mrf.mxu0  ;;  %v10297_v25 = vpop.f32.mrf.mxu1 }
 0xa86   :  { %v10338_v42 = vpop.f32.mrf.mxu0 }
 0xabe   :  { %v10374_v56 = vpop.f32.mrf.mxu1 }
 0xabf   :  { %v10375_v26 = vadd.f32 %v10374_v56, %v10334_v53 }
 0xac0   :  { %v10415_v45 = vpop.f32.mrf.mxu0  ;;  %v10376_v46 = vpop.f32.mrf.mxu1 }
 0xac1   :  { %v10416_v29 = vadd.f32 %v10415_v45, %v10375_v26  ;;  %v10377_v6 = vadd.f32 %v10376_v46, %v10336_v33 }
 0xac2   :  { %v10417_v54 = vpop.f32.mrf.mxu0  ;;  %v10378_v49 = vpop.f32.mrf.mxu1 }
 0xac3   :  { %v10428_v31 = vmax.f32 %v10416_v29, 0.0  ;;  %v10418_v8 = vadd.f32 %v10417_v54, %v10377_v6 }
 0xac4   :  { %v10419_v58 = vpop.f32.mrf.mxu0  ;;  %v10379_v61 = vpop.f32.mrf.mxu1 }
 0xac5   :  { %v18380_v55 = vpack.c.bf16 %v10428_v31, %v10428_v31  ;;  %v10429_v59 = vmax.f32 %v10418_v8, 0.0 }
 0xac6   :  { %v10420_v0 = vpop.f32.mrf.mxu0 }
 0xac7   :  { %v18382_v32 = vpack.c.bf16 %v10429_v59, %v10429_v59 }
 0xac8   :  { %17962 = dma.done.wait [#allocation4 + $0x1], 32768 }
 0xac9   :  { %17963 = vsyncadd [#allocation4 + $0x1], 4294934528  ;;  %12032 = vmatprep.mubr.bf16.mxu1 %v18294_v35  ;;  %12073 = vmatprep.mubr.bf16.mxu0 %v18334_v4  ;;  %v17048_v63 = vld [vmem:[#allocation3 + $0xe4] ss:$16 sps:$4 sm:$0xff]   ;;  %v17052_v2 = vld [vmem:[#allocation3 + $0xe0] ss:$16 sps:$4 sm:$0xff]  }
 0xaca   :  { %v17050_v1 = vld [vmem:[#allocation3 + $0x2e4] ss:$16 sps:$4 sm:$0xff]   ;;  %12000 = vmatprep.subr.bf16.mxu1 %v17048_v63  ;;  %v17053_v14 = vld [vmem:[#allocation3 + $0x2e0] ss:$16 sps:$4 sm:$0xff]   ;;  %vm13498_vm2 = vcmask 261120  }
 0xacb   :  { %12041 = vmatprep.subr.bf16.mxu0 %v17050_v1  ;;  %v17054_v3 = vld [vmem:[#allocation3 + $0xc4] ss:$16 sps:$4 sm:$0xff]   ;;  %12001 = vmatpush1.bf16.msra.mxu1 %v17052_v2  ;;  %v17058_v23 = vld [vmem:[#allocation3 + $0xc0] ss:$16 sps:$4 sm:$0xff]  }
 0xacc   :  { %12042 = vmatpush1.bf16.msra.mxu0 %v17053_v14  ;;  %v17056_v11 = vld [vmem:[#allocation3 + $0x2c4] ss:$16 sps:$4 sm:$0xff]   ;;  %12002 = vmatprep.subr.bf16.mxu1 %v17054_v3  ;;  %v17059_v19 = vld [vmem:[#allocation3 + $0x2c0] ss:$16 sps:$4 sm:$0xff]  }
 0xacd   :  { %12043 = vmatprep.subr.bf16.mxu0 %v17056_v11  ;;  %v17060_v15 = vld [vmem:[#allocation3 + $0xa4] ss:$16 sps:$4 sm:$0xff]   ;;  %v17064_v10 = vld [vmem:[#allocation3 + $0xa0] ss:$16 sps:$4 sm:$0xff]  }
 0xace   :  { %v17062_v7 = vld [vmem:[#allocation3 + $0x2a4] ss:$16 sps:$4 sm:$0xff]   ;;  %v17065_v13 = vld [vmem:[#allocation3 + $0x2a0] ss:$16 sps:$4 sm:$0xff]  }
 0xacf   :  { %12003 = vmatpush1.bf16.msra.mxu1 %v17058_v23  ;;  %v17066_v17 = vld [vmem:[#allocation3 + $0x84] ss:$16 sps:$4 sm:$0xff]   ;;  %v17070_v38 = vld [vmem:[#allocation3 + $0x80] ss:$16 sps:$4 sm:$0xff]  }
 0xad0   :  { %12044 = vmatpush1.bf16.msra.mxu0 %v17059_v19  ;;  %12004 = vmatprep.subr.bf16.mxu1 %v17060_v15  ;;  %v17068_v27 = vld [vmem:[#allocation3 + $0x284] ss:$16 sps:$4 sm:$0xff]   ;;  %v17071_v18 = vld [vmem:[#allocation3 + $0x280] ss:$16 sps:$4 sm:$0xff]  }
 0xad1   :  { %12045 = vmatprep.subr.bf16.mxu0 %v17062_v7  ;;  %v17072_v28 = vld [vmem:[#allocation3 + $0x64] ss:$16 sps:$4 sm:$0xff]   ;;  %v17076_v41 = vld [vmem:[#allocation3 + $0x60] ss:$16 sps:$4 sm:$0xff]  }
 0xad2   :  { %v17074_v12 = vld [vmem:[#allocation3 + $0x264] ss:$16 sps:$4 sm:$0xff]   ;;  %v17077_v36 = vld [vmem:[#allocation3 + $0x260] ss:$16 sps:$4 sm:$0xff]  }
 0xad3   :  { %12005 = vmatpush1.bf16.msra.mxu1 %v17064_v10  ;;  %v17078_v30 = vld [vmem:[#allocation3 + $0x44] ss:$16 sps:$4 sm:$0xff]   ;;  %v17082_v60 = vld [vmem:[#allocation3 + $0x40] ss:$16 sps:$4 sm:$0xff]  }
 0xad4   :  { %12046 = vmatpush1.bf16.msra.mxu0 %v17065_v13  ;;  %12006 = vmatprep.subr.bf16.mxu1 %v17066_v17  ;;  %v17080_v37 = vld [vmem:[#allocation3 + $0x244] ss:$16 sps:$4 sm:$0xff]   ;;  %v17083_v20 = vld [vmem:[#allocation3 + $0x240] ss:$16 sps:$4 sm:$0xff]  }
 0xad5   :  { %12047 = vmatprep.subr.bf16.mxu0 %v17068_v27  ;;  %v17084_v43 = vld [vmem:[#allocation3 + $0x24] ss:$16 sps:$4 sm:$0xff]   ;;  %v17088_v9 = vld [vmem:[#allocation3 + $0x20] ss:$16 sps:$4 sm:$0xff]  }
 0xad6   :  { %v17086_v39 = vld [vmem:[#allocation3 + $0x224] ss:$16 sps:$4 sm:$0xff]   ;;  %v17089_v40 = vld [vmem:[#allocation3 + $0x220] ss:$16 sps:$4 sm:$0xff]  }
 0xad7   :  { %12007 = vmatpush1.bf16.msra.mxu1 %v17070_v38  ;;  %v17090_v25 = vld [vmem:[#allocation3 + $0x4] ss:$16 sps:$4 sm:$0xff]   ;;  %v17094_v24 = vld [vmem:[#allocation3] ss:$16 sps:$4 sm:$0xff]  }
 0xad8   :  { %12048 = vmatpush1.bf16.msra.mxu0 %v17071_v18  ;;  %12008 = vmatprep.subr.bf16.mxu1 %v17072_v28  ;;  %v17092_v42 = vld [vmem:[#allocation3 + $0x204] ss:$16 sps:$4 sm:$0xff]   ;;  %v17095_v44 = vld [vmem:[#allocation3 + $0x200] ss:$16 sps:$4 sm:$0xff]  }
 0xad9   :  { %12049 = vmatprep.subr.bf16.mxu0 %v17074_v12  ;;  %v17096_v53 = vld [vmem:[#allocation3 + $0x1e4] ss:$16 sps:$4 sm:$0xff]   ;;  %v17100_v33 = vld [vmem:[#allocation3 + $0x1e0] ss:$16 sps:$4 sm:$0xff]  }
 0xada   :  { %v17098_v56 = vld [vmem:[#allocation3 + $0x3e4] ss:$16 sps:$4 sm:$0xff]   ;;  %v17101_v26 = vld [vmem:[#allocation3 + $0x3e0] ss:$16 sps:$4 sm:$0xff]  }
 0xadb   :  { %12009 = vmatpush1.bf16.msra.mxu1 %v17076_v41  ;;  %v17102_v45 = vld [vmem:[#allocation3 + $0x1c4] ss:$16 sps:$4 sm:$0xff]   ;;  %v17106_v29 = vld [vmem:[#allocation3 + $0x1c0] ss:$16 sps:$4 sm:$0xff]  }
 0xadc   :  { %12050 = vmatpush1.bf16.msra.mxu0 %v17077_v36  ;;  %12010 = vmatprep.subr.bf16.mxu1 %v17078_v30  ;;  %v17104_v46 = vld [vmem:[#allocation3 + $0x3c4] ss:$16 sps:$4 sm:$0xff]   ;;  %v17107_v6 = vld [vmem:[#allocation3 + $0x3c0] ss:$16 sps:$4 sm:$0xff]  }
 0xadd   :  { %12051 = vmatprep.subr.bf16.mxu0 %v17080_v37  ;;  %v17108_v54 = vld [vmem:[#allocation3 + $0x1a4] ss:$16 sps:$4 sm:$0xff]   ;;  %v17112_v31 = vld [vmem:[#allocation3 + $0x1a0] ss:$16 sps:$4 sm:$0xff]  }
 0xade   :  { %v17110_v49 = vld [vmem:[#allocation3 + $0x3a4] ss:$16 sps:$4 sm:$0xff]   ;;  %v17113_v8 = vld [vmem:[#allocation3 + $0x3a0] ss:$16 sps:$4 sm:$0xff]  }
 0xadf   :  { %12011 = vmatpush1.bf16.msra.mxu1 %v17082_v60  ;;  %v17114_v58 = vld [vmem:[#allocation3 + $0x184] ss:$16 sps:$4 sm:$0xff]   ;;  %v17118_v59 = vld [vmem:[#allocation3 + $0x180] ss:$16 sps:$4 sm:$0xff]  }
 0xae0   :  { %12052 = vmatpush1.bf16.msra.mxu0 %v17083_v20  ;;  %12012 = vmatprep.subr.bf16.mxu1 %v17084_v43  ;;  %v17116_v61 = vld [vmem:[#allocation3 + $0x384] ss:$16 sps:$4 sm:$0xff]   ;;  %v17119_v0 = vld [vmem:[#allocation3 + $0x380] ss:$16 sps:$4 sm:$0xff]  }
 0xae1   :  { %12053 = vmatprep.subr.bf16.mxu0 %v17086_v39  ;;  %v17120_v63 = vld [vmem:[#allocation3 + $0x164] ss:$16 sps:$4 sm:$0xff]   ;;  %v17124_v2 = vld [vmem:[#allocation3 + $0x160] ss:$16 sps:$4 sm:$0xff]  }
 0xae2   :  { %v17122_v1 = vld [vmem:[#allocation3 + $0x364] ss:$16 sps:$4 sm:$0xff]   ;;  %v17125_v14 = vld [vmem:[#allocation3 + $0x360] ss:$16 sps:$4 sm:$0xff]  }
 0xae3   :  { %12013 = vmatpush1.bf16.msra.mxu1 %v17088_v9  ;;  %v17126_v3 = vld [vmem:[#allocation3 + $0x144] ss:$16 sps:$4 sm:$0xff]   ;;  %v17130_v23 = vld [vmem:[#allocation3 + $0x140] ss:$16 sps:$4 sm:$0xff]  }
 0xae4   :  { %12054 = vmatpush1.bf16.msra.mxu0 %v17089_v40  ;;  %12014 = vmatprep.subr.bf16.mxu1 %v17090_v25  ;;  %v17128_v11 = vld [vmem:[#allocation3 + $0x344] ss:$16 sps:$4 sm:$0xff]   ;;  %v17131_v19 = vld [vmem:[#allocation3 + $0x340] ss:$16 sps:$4 sm:$0xff]  }
 0xae5   :  { %12055 = vmatprep.subr.bf16.mxu0 %v17092_v42  ;;  %v17132_v15 = vld [vmem:[#allocation3 + $0x124] ss:$16 sps:$4 sm:$0xff]   ;;  %v17136_v10 = vld [vmem:[#allocation3 + $0x120] ss:$16 sps:$4 sm:$0xff]  }
 0xae6   :  { %v17134_v7 = vld [vmem:[#allocation3 + $0x324] ss:$16 sps:$4 sm:$0xff]   ;;  %v17137_v13 = vld [vmem:[#allocation3 + $0x320] ss:$16 sps:$4 sm:$0xff]  }
 0xae7   :  { %12015 = vmatpush1.bf16.msra.mxu1 %v17094_v24  ;;  %v17138_v17 = vld [vmem:[#allocation3 + $0x104] ss:$16 sps:$4 sm:$0xff]   ;;  %v17142_v38 = vld [vmem:[#allocation3 + $0x100] ss:$16 sps:$4 sm:$0xff]  }
 0xae8   :  { %12056 = vmatpush1.bf16.msra.mxu0 %v17095_v44  ;;  %12016 = vmatprep.subr.bf16.mxu1 %v17096_v53  ;;  %v17140_v27 = vld [vmem:[#allocation3 + $0x304] ss:$16 sps:$4 sm:$0xff]   ;;  %v17143_v18 = vld [vmem:[#allocation3 + $0x300] ss:$16 sps:$4 sm:$0xff]  }
 0xae9   :  { %12057 = vmatprep.subr.bf16.mxu0 %v17098_v56  ;;  %v17146_v28 = vld [vmem:[#allocation3 + $0x4e4] ss:$16 sps:$4 sm:$0xff]   ;;  %v17144_v41 = vld [vmem:[#allocation3 + $0x4e0] ss:$16 sps:$4 sm:$0xff]  }
 0xaea   :  { %v17149_v12 = vld [vmem:[#allocation3 + $0x6e4] ss:$16 sps:$4 sm:$0xff]   ;;  %v17147_v36 = vld [vmem:[#allocation3 + $0x6e0] ss:$16 sps:$4 sm:$0xff]  }
 0xaeb   :  { %12017 = vmatpush2.bf16.msra.mxu1 %v17100_v33  ;;  %v17152_v30 = vld [vmem:[#allocation3 + $0x4c4] ss:$16 sps:$4 sm:$0xff]   ;;  %v17150_v60 = vld [vmem:[#allocation3 + $0x4c0] ss:$16 sps:$4 sm:$0xff]  }
 0xaec   :  { %12058 = vmatpush2.bf16.msra.mxu0 %v17101_v26  ;;  %12018 = vmatprep.subr.bf16.mxu1 %v17102_v45  ;;  %v17155_v37 = vld [vmem:[#allocation3 + $0x6c4] ss:$16 sps:$4 sm:$0xff]   ;;  %v17153_v20 = vld [vmem:[#allocation3 + $0x6c0] ss:$16 sps:$4 sm:$0xff]  }
 0xaed   :  { %12059 = vmatprep.subr.bf16.mxu0 %v17104_v46  ;;  %v17158_v43 = vld [vmem:[#allocation3 + $0x4a4] ss:$16 sps:$4 sm:$0xff]   ;;  %v17156_v9 = vld [vmem:[#allocation3 + $0x4a0] ss:$16 sps:$4 sm:$0xff]  }
 0xaee   :  { %v17161_v39 = vld [vmem:[#allocation3 + $0x6a4] ss:$16 sps:$4 sm:$0xff]   ;;  %v17159_v40 = vld [vmem:[#allocation3 + $0x6a0] ss:$16 sps:$4 sm:$0xff]  }
 0xaef   :  { %12019 = vmatpush2.bf16.msra.mxu1 %v17106_v29  ;;  %v17164_v25 = vld [vmem:[#allocation3 + $0x484] ss:$16 sps:$4 sm:$0xff]   ;;  %v17162_v24 = vld [vmem:[#allocation3 + $0x480] ss:$16 sps:$4 sm:$0xff]  }
 0xaf0   :  { %12060 = vmatpush2.bf16.msra.mxu0 %v17107_v6  ;;  %12020 = vmatprep.subr.bf16.mxu1 %v17108_v54  ;;  %v17167_v42 = vld [vmem:[#allocation3 + $0x684] ss:$16 sps:$4 sm:$0xff]   ;;  %v17165_v44 = vld [vmem:[#allocation3 + $0x680] ss:$16 sps:$4 sm:$0xff]  }
 0xaf1   :  { %12061 = vmatprep.subr.bf16.mxu0 %v17110_v49  ;;  %v17170_v53 = vld [vmem:[#allocation3 + $0x464] ss:$16 sps:$4 sm:$0xff]   ;;  %v17168_v33 = vld [vmem:[#allocation3 + $0x460] ss:$16 sps:$4 sm:$0xff]  }
 0xaf2   :  { %v17173_v56 = vld [vmem:[#allocation3 + $0x664] ss:$16 sps:$4 sm:$0xff]   ;;  %v17171_v26 = vld [vmem:[#allocation3 + $0x660] ss:$16 sps:$4 sm:$0xff]  }
 0xaf3   :  { %12021 = vmatpush2.bf16.msra.mxu1 %v17112_v31  ;;  %v17176_v45 = vld [vmem:[#allocation3 + $0x444] ss:$16 sps:$4 sm:$0xff]   ;;  %v17174_v29 = vld [vmem:[#allocation3 + $0x440] ss:$16 sps:$4 sm:$0xff]  }
 0xaf4   :  { %12062 = vmatpush2.bf16.msra.mxu0 %v17113_v8  ;;  %12022 = vmatprep.subr.bf16.mxu1 %v17114_v58  ;;  %v17179_v46 = vld [vmem:[#allocation3 + $0x644] ss:$16 sps:$4 sm:$0xff]   ;;  %v17177_v6 = vld [vmem:[#allocation3 + $0x640] ss:$16 sps:$4 sm:$0xff]  }
 0xaf5   :  { %12063 = vmatprep.subr.bf16.mxu0 %v17116_v61  ;;  %v17182_v54 = vld [vmem:[#allocation3 + $0x424] ss:$16 sps:$4 sm:$0xff]   ;;  %v17180_v31 = vld [vmem:[#allocation3 + $0x420] ss:$16 sps:$4 sm:$0xff]  }
 0xaf6   :  { %v17185_v49 = vld [vmem:[#allocation3 + $0x624] ss:$16 sps:$4 sm:$0xff]   ;;  %v17183_v8 = vld [vmem:[#allocation3 + $0x620] ss:$16 sps:$4 sm:$0xff]  }
 0xaf7   :  { %12023 = vmatpush2.bf16.msra.mxu1 %v17118_v59  ;;  %v17188_v58 = vld [vmem:[#allocation3 + $0x404] ss:$16 sps:$4 sm:$0xff]   ;;  %v17186_v59 = vld [vmem:[#allocation3 + $0x400] ss:$16 sps:$4 sm:$0xff]  }
 0xaf8   :  { %12064 = vmatpush2.bf16.msra.mxu0 %v17119_v0  ;;  %12024 = vmatprep.subr.bf16.mxu1 %v17120_v63  ;;  %v17191_v61 = vld [vmem:[#allocation3 + $0x604] ss:$16 sps:$4 sm:$0xff]   ;;  %v17189_v0 = vld [vmem:[#allocation3 + $0x600] ss:$16 sps:$4 sm:$0xff]  }
 0xaf9   :  { %12065 = vmatprep.subr.bf16.mxu0 %v17122_v1  ;;  %v17194_v63 = vld [vmem:[#allocation3 + $0x5e4] ss:$16 sps:$4 sm:$0xff]  }
 0xafa   :  { %v17197_v1 = vld [vmem:[#allocation3 + $0x7e4] ss:$16 sps:$4 sm:$0xff]  }
 0xafb   :  { %12025 = vmatpush2.bf16.msra.mxu1 %v17124_v2  ;;  %v17192_v2 = vld [vmem:[#allocation3 + $0x5e0] ss:$16 sps:$4 sm:$0xff]  }
 0xafc   :  { %12066 = vmatpush2.bf16.msra.mxu0 %v17125_v14  ;;  %12026 = vmatprep.subr.bf16.mxu1 %v17126_v3  ;;  %v17195_v14 = vld [vmem:[#allocation3 + $0x7e0] ss:$16 sps:$4 sm:$0xff]   ;;  %v17200_v3 = vld [vmem:[#allocation3 + $0x5c4] ss:$16 sps:$4 sm:$0xff]  }
 0xafd   :  { %12067 = vmatprep.subr.bf16.mxu0 %v17128_v11  ;;  %v17203_v11 = vld [vmem:[#allocation3 + $0x7c4] ss:$16 sps:$4 sm:$0xff]  }
 0xaff   :  { %12027 = vmatpush2.bf16.msra.mxu1 %v17130_v23  ;;  %v17198_v23 = vld [vmem:[#allocation3 + $0x5c0] ss:$16 sps:$4 sm:$0xff]  }
 0xb00   :  { %12068 = vmatpush2.bf16.msra.mxu0 %v17131_v19  ;;  %12028 = vmatprep.subr.bf16.mxu1 %v17132_v15  ;;  %v17201_v19 = vld [vmem:[#allocation3 + $0x7c0] ss:$16 sps:$4 sm:$0xff]   ;;  %v17206_v15 = vld [vmem:[#allocation3 + $0x5a4] ss:$16 sps:$4 sm:$0xff]  }
 0xb01   :  { %12069 = vmatprep.subr.bf16.mxu0 %v17134_v7  ;;  %v17209_v7 = vld [vmem:[#allocation3 + $0x7a4] ss:$16 sps:$4 sm:$0xff]  }
 0xb03   :  { %12029 = vmatpush2.bf16.msra.mxu1 %v17136_v10  ;;  %v17204_v10 = vld [vmem:[#allocation3 + $0x5a0] ss:$16 sps:$4 sm:$0xff]  }
 0xb04   :  { %12070 = vmatpush2.bf16.msra.mxu0 %v17137_v13  ;;  %12030 = vmatprep.subr.bf16.mxu1 %v17138_v17  ;;  %v17207_v13 = vld [vmem:[#allocation3 + $0x7a0] ss:$16 sps:$4 sm:$0xff]   ;;  %v17212_v17 = vld [vmem:[#allocation3 + $0x584] ss:$16 sps:$4 sm:$0xff]  }
 0xb05   :  { %12071 = vmatprep.subr.bf16.mxu0 %v17140_v27  ;;  %v17215_v27 = vld [vmem:[#allocation3 + $0x784] ss:$16 sps:$4 sm:$0xff]  }
 0xb07   :  { %12031 = vmatpush2.bf16.msra.mxu1 %v17142_v38  ;;  %v17210_v38 = vld [vmem:[#allocation3 + $0x580] ss:$16 sps:$4 sm:$0xff]  }
 0xb08   :  { %12072 = vmatpush2.bf16.msra.mxu0 %v17143_v18  ;;  %12082 = vmatprep.subr.bf16.mxu1 %v17146_v28  ;;  %v17213_v18 = vld [vmem:[#allocation3 + $0x780] ss:$16 sps:$4 sm:$0xff]   ;;  %v17218_v28 = vld [vmem:[#allocation3 + $0x564] ss:$16 sps:$4 sm:$0xff]  }
 0xb09   :  { %12123 = vmatprep.subr.bf16.mxu0 %v17149_v12  ;;  %v17221_v12 = vld [vmem:[#allocation3 + $0x764] ss:$16 sps:$4 sm:$0xff]  }
 0xb0a   :  { %12033 = vmatmul.mubr.bf16.vlgmr.msra.gmra.mxu1 %v18292_v5 }
 0xb0b   :  { %12074 = vmatmul.mubr.bf16.vlgmr.msra.gmra.mxu0 %v18332_v57  ;;  %12083 = vmatpush1.bf16.msra.mxu1 %v17144_v41  ;;  %v17216_v41 = vld [vmem:[#allocation3 + $0x560] ss:$16 sps:$4 sm:$0xff]  }
 0xb0c   :  { %12124 = vmatpush1.bf16.msra.mxu0 %v17147_v36  ;;  %12084 = vmatprep.subr.bf16.mxu1 %v17152_v30  ;;  %v17219_v36 = vld [vmem:[#allocation3 + $0x760] ss:$16 sps:$4 sm:$0xff]   ;;  %v17224_v30 = vld [vmem:[#allocation3 + $0x544] ss:$16 sps:$4 sm:$0xff]  }
 0xb0d   :  { %12125 = vmatprep.subr.bf16.mxu0 %v17155_v37  ;;  %12114 = vmatprep.mubr.bf16.mxu1 %v18374_v52  ;;  %v17227_v37 = vld [vmem:[#allocation3 + $0x744] ss:$16 sps:$4 sm:$0xff]  }
 0xb0e   :  { %12155 = vmatprep.mubr.bf16.mxu0 %v18382_v32 }
 0xb0f   :  { %12085 = vmatpush1.bf16.msra.mxu1 %v17150_v60  ;;  %v17222_v60 = vld [vmem:[#allocation3 + $0x540] ss:$16 sps:$4 sm:$0xff]  }
 0xb10   :  { %12126 = vmatpush1.bf16.msra.mxu0 %v17153_v20  ;;  %12086 = vmatprep.subr.bf16.mxu1 %v17158_v43  ;;  %v17225_v20 = vld [vmem:[#allocation3 + $0x740] ss:$16 sps:$4 sm:$0xff]   ;;  %v17230_v43 = vld [vmem:[#allocation3 + $0x524] ss:$16 sps:$4 sm:$0xff]  }
 0xb11   :  { %12127 = vmatprep.subr.bf16.mxu0 %v17161_v39  ;;  %v17233_v39 = vld [vmem:[#allocation3 + $0x724] ss:$16 sps:$4 sm:$0xff]  }
 0xb13   :  { %12087 = vmatpush1.bf16.msra.mxu1 %v17156_v9  ;;  %v17228_v9 = vld [vmem:[#allocation3 + $0x520] ss:$16 sps:$4 sm:$0xff]  }
 0xb14   :  { %12128 = vmatpush1.bf16.msra.mxu0 %v17159_v40  ;;  %12088 = vmatprep.subr.bf16.mxu1 %v17164_v25  ;;  %v17231_v40 = vld [vmem:[#allocation3 + $0x720] ss:$16 sps:$4 sm:$0xff]   ;;  %v17236_v25 = vld [vmem:[#allocation3 + $0x504] ss:$16 sps:$4 sm:$0xff]  }
 0xb15   :  { %12129 = vmatprep.subr.bf16.mxu0 %v17167_v42  ;;  %v17239_v42 = vld [vmem:[#allocation3 + $0x704] ss:$16 sps:$4 sm:$0xff]  }
 0xb17   :  { %12089 = vmatpush1.bf16.msra.mxu1 %v17162_v24  ;;  %v17234_v24 = vld [vmem:[#allocation3 + $0x500] ss:$16 sps:$4 sm:$0xff]  }
 0xb18   :  { %12130 = vmatpush1.bf16.msra.mxu0 %v17165_v44  ;;  %12090 = vmatprep.subr.bf16.mxu1 %v17170_v53  ;;  %v17237_v44 = vld [vmem:[#allocation3 + $0x700] ss:$16 sps:$4 sm:$0xff]   ;;  %v17242_v53 = vld [vmem:[#allocation3 + $0xec] ss:$16 sps:$4 sm:$0xff]  }
 0xb19   :  { %12131 = vmatprep.subr.bf16.mxu0 %v17173_v56  ;;  %v17245_v56 = vld [vmem:[#allocation3 + $0x2ec] ss:$16 sps:$4 sm:$0xff]  }
 0xb1b   :  { %12091 = vmatpush1.bf16.msra.mxu1 %v17168_v33  ;;  %v17240_v33 = vld [vmem:[#allocation3 + $0xe8] ss:$16 sps:$4 sm:$0xff]  }
 0xb1c   :  { %12132 = vmatpush1.bf16.msra.mxu0 %v17171_v26  ;;  %12092 = vmatprep.subr.bf16.mxu1 %v17176_v45  ;;  %v17243_v26 = vld [vmem:[#allocation3 + $0x2e8] ss:$16 sps:$4 sm:$0xff]   ;;  %v17248_v45 = vld [vmem:[#allocation3 + $0xcc] ss:$16 sps:$4 sm:$0xff]  }
 0xb1d   :  { %12133 = vmatprep.subr.bf16.mxu0 %v17179_v46  ;;  %v17251_v46 = vld [vmem:[#allocation3 + $0x2cc] ss:$16 sps:$4 sm:$0xff]  }
 0xb1f   :  { %12093 = vmatpush1.bf16.msra.mxu1 %v17174_v29  ;;  %v17246_v29 = vld [vmem:[#allocation3 + $0xc8] ss:$16 sps:$4 sm:$0xff]  }
 0xb20   :  { %12134 = vmatpush1.bf16.msra.mxu0 %v17177_v6  ;;  %12094 = vmatprep.subr.bf16.mxu1 %v17182_v54  ;;  %v17249_v6 = vld [vmem:[#allocation3 + $0x2c8] ss:$16 sps:$4 sm:$0xff]   ;;  %v17254_v54 = vld [vmem:[#allocation3 + $0xac] ss:$16 sps:$4 sm:$0xff]  }
 0xb21   :  { %12135 = vmatprep.subr.bf16.mxu0 %v17185_v49  ;;  %v17257_v49 = vld [vmem:[#allocation3 + $0x2ac] ss:$16 sps:$4 sm:$0xff]  }
 0xb23   :  { %12095 = vmatpush1.bf16.msra.mxu1 %v17180_v31  ;;  %v17252_v31 = vld [vmem:[#allocation3 + $0xa8] ss:$16 sps:$4 sm:$0xff]  }
 0xb24   :  { %12136 = vmatpush1.bf16.msra.mxu0 %v17183_v8  ;;  %12096 = vmatprep.subr.bf16.mxu1 %v17188_v58  ;;  %v17255_v8 = vld [vmem:[#allocation3 + $0x2a8] ss:$16 sps:$4 sm:$0xff]   ;;  %v17260_v58 = vld [vmem:[#allocation3 + $0x8c] ss:$16 sps:$4 sm:$0xff]  }
 0xb25   :  { %12137 = vmatprep.subr.bf16.mxu0 %v17191_v61  ;;  %v17263_v61 = vld [vmem:[#allocation3 + $0x28c] ss:$16 sps:$4 sm:$0xff]  }
 0xb27   :  { %12097 = vmatpush1.bf16.msra.mxu1 %v17186_v59  ;;  %v17258_v59 = vld [vmem:[#allocation3 + $0x88] ss:$16 sps:$4 sm:$0xff]  }
 0xb28   :  { %12138 = vmatpush1.bf16.msra.mxu0 %v17189_v0  ;;  %12098 = vmatprep.subr.bf16.mxu1 %v17194_v63  ;;  %v17261_v0 = vld [vmem:[#allocation3 + $0x288] ss:$16 sps:$4 sm:$0xff]   ;;  %v17266_v63 = vld [vmem:[#allocation3 + $0x6c] ss:$16 sps:$4 sm:$0xff]  }
 0xb29   :  { %12139 = vmatprep.subr.bf16.mxu0 %v17197_v1  ;;  %v17269_v1 = vld [vmem:[#allocation3 + $0x26c] ss:$16 sps:$4 sm:$0xff]  }
 0xb2b   :  { %12099 = vmatpush2.bf16.msra.mxu1 %v17192_v2  ;;  %v17264_v2 = vld [vmem:[#allocation3 + $0x68] ss:$16 sps:$4 sm:$0xff]  }
 0xb2c   :  { %12140 = vmatpush2.bf16.msra.mxu0 %v17195_v14  ;;  %12100 = vmatprep.subr.bf16.mxu1 %v17200_v3  ;;  %v17275_v14 = vld [vmem:[#allocation3 + $0x24c] ss:$16 sps:$4 sm:$0xff]   ;;  %v17270_v3 = vld [vmem:[#allocation3 + $0x48] ss:$16 sps:$4 sm:$0xff]  }
 0xb2d   :  { %12141 = vmatprep.subr.bf16.mxu0 %v17203_v11  ;;  %v17273_v11 = vld [vmem:[#allocation3 + $0x248] ss:$16 sps:$4 sm:$0xff]  }
 0xb2f   :  { %12101 = vmatpush2.bf16.msra.mxu1 %v17198_v23  ;;  %v17278_v23 = vld [vmem:[#allocation3 + $0x2c] ss:$16 sps:$4 sm:$0xff]  }
 0xb30   :  { %12142 = vmatpush2.bf16.msra.mxu0 %v17201_v19  ;;  %12102 = vmatprep.subr.bf16.mxu1 %v17206_v15  ;;  %v17281_v19 = vld [vmem:[#allocation3 + $0x22c] ss:$16 sps:$4 sm:$0xff]   ;;  %v17276_v15 = vld [vmem:[#allocation3 + $0x28] ss:$16 sps:$4 sm:$0xff]  }
 0xb31   :  { %12143 = vmatprep.subr.bf16.mxu0 %v17209_v7  ;;  %v17279_v7 = vld [vmem:[#allocation3 + $0x228] ss:$16 sps:$4 sm:$0xff]  }
 0xb33   :  { %12103 = vmatpush2.bf16.msra.mxu1 %v17204_v10  ;;  %v17284_v10 = vld [vmem:[#allocation3 + $0xc] ss:$16 sps:$4 sm:$0xff]  }
 0xb34   :  { %12144 = vmatpush2.bf16.msra.mxu0 %v17207_v13  ;;  %12104 = vmatprep.subr.bf16.mxu1 %v17212_v17  ;;  %v17287_v13 = vld [vmem:[#allocation3 + $0x20c] ss:$16 sps:$4 sm:$0xff]   ;;  %v17282_v17 = vld [vmem:[#allocation3 + $0x8] ss:$16 sps:$4 sm:$0xff]  }
 0xb35   :  { %12145 = vmatprep.subr.bf16.mxu0 %v17215_v27  ;;  %v17285_v27 = vld [vmem:[#allocation3 + $0x208] ss:$16 sps:$4 sm:$0xff]  }
 0xb37   :  { %12105 = vmatpush2.bf16.msra.mxu1 %v17210_v38  ;;  %v17290_v38 = vld [vmem:[#allocation3 + $0x1ec] ss:$16 sps:$4 sm:$0xff]  }
 0xb38   :  { %12146 = vmatpush2.bf16.msra.mxu0 %v17213_v18  ;;  %12106 = vmatprep.subr.bf16.mxu1 %v17218_v28  ;;  %v17293_v18 = vld [vmem:[#allocation3 + $0x3ec] ss:$16 sps:$4 sm:$0xff]   ;;  %v17288_v28 = vld [vmem:[#allocation3 + $0x1e8] ss:$16 sps:$4 sm:$0xff]  }
 0xb39   :  { %12147 = vmatprep.subr.bf16.mxu0 %v17221_v12  ;;  %v17291_v12 = vld [vmem:[#allocation3 + $0x3e8] ss:$16 sps:$4 sm:$0xff]  }
 0xb3b   :  { %12107 = vmatpush2.bf16.msra.mxu1 %v17216_v41  ;;  %v17296_v41 = vld [vmem:[#allocation3 + $0x1cc] ss:$16 sps:$4 sm:$0xff]  }
 0xb3c   :  { %12148 = vmatpush2.bf16.msra.mxu0 %v17219_v36  ;;  %12108 = vmatprep.subr.bf16.mxu1 %v17224_v30  ;;  %v17299_v36 = vld [vmem:[#allocation3 + $0x3cc] ss:$16 sps:$4 sm:$0xff]   ;;  %v17294_v30 = vld [vmem:[#allocation3 + $0x1c8] ss:$16 sps:$4 sm:$0xff]  }
 0xb3d   :  { %12149 = vmatprep.subr.bf16.mxu0 %v17227_v37  ;;  %v17297_v37 = vld [vmem:[#allocation3 + $0x3c8] ss:$16 sps:$4 sm:$0xff]  }
 0xb3f   :  { %12109 = vmatpush2.bf16.msra.mxu1 %v17222_v60  ;;  %v17302_v60 = vld [vmem:[#allocation3 + $0x1ac] ss:$16 sps:$4 sm:$0xff]  }
 0xb40   :  { %12150 = vmatpush2.bf16.msra.mxu0 %v17225_v20  ;;  %12110 = vmatprep.subr.bf16.mxu1 %v17230_v43  ;;  %v17305_v20 = vld [vmem:[#allocation3 + $0x3ac] ss:$16 sps:$4 sm:$0xff]   ;;  %v17300_v43 = vld [vmem:[#allocation3 + $0x1a8] ss:$16 sps:$4 sm:$0xff]  }
 0xb41   :  { %12151 = vmatprep.subr.bf16.mxu0 %v17233_v39  ;;  %v17303_v39 = vld [vmem:[#allocation3 + $0x3a8] ss:$16 sps:$4 sm:$0xff]  }
 0xb43   :  { %12111 = vmatpush2.bf16.msra.mxu1 %v17228_v9  ;;  %v17308_v9 = vld [vmem:[#allocation3 + $0x18c] ss:$16 sps:$4 sm:$0xff]  }
 0xb44   :  { %12152 = vmatpush2.bf16.msra.mxu0 %v17231_v40  ;;  %12112 = vmatprep.subr.bf16.mxu1 %v17236_v25  ;;  %v17311_v40 = vld [vmem:[#allocation3 + $0x38c] ss:$16 sps:$4 sm:$0xff]   ;;  %v17306_v25 = vld [vmem:[#allocation3 + $0x188] ss:$16 sps:$4 sm:$0xff]  }
 0xb45   :  { %12153 = vmatprep.subr.bf16.mxu0 %v17239_v42  ;;  %v17309_v42 = vld [vmem:[#allocation3 + $0x388] ss:$16 sps:$4 sm:$0xff]  }
 0xb47   :  { %12113 = vmatpush2.bf16.msra.mxu1 %v17234_v24  ;;  %v17314_v24 = vld [vmem:[#allocation3 + $0x16c] ss:$16 sps:$4 sm:$0xff]  }
 0xb48   :  { %12154 = vmatpush2.bf16.msra.mxu0 %v17237_v44  ;;  %12164 = vmatprep.subr.bf16.mxu1 %v17242_v53  ;;  %v17317_v44 = vld [vmem:[#allocation3 + $0x36c] ss:$16 sps:$4 sm:$0xff]   ;;  %v17312_v53 = vld [vmem:[#allocation3 + $0x168] ss:$16 sps:$4 sm:$0xff]  }
 0xb49   :  { %12205 = vmatprep.subr.bf16.mxu0 %v17245_v56  ;;  %v17315_v56 = vld [vmem:[#allocation3 + $0x368] ss:$16 sps:$4 sm:$0xff]  }
 0xb4a   :  { %12115 = vmatmul.mubr.bf16.vlgmr.msra.gmra.mxu1 %v18372_v50 }
 0xb4b   :  { %12156 = vmatmul.mubr.bf16.vlgmr.msra.gmra.mxu0 %v18380_v55  ;;  %12165 = vmatpush1.bf16.msra.mxu1 %v17240_v33  ;;  %v17320_v33 = vld [vmem:[#allocation3 + $0x14c] ss:$16 sps:$4 sm:$0xff]  }
 0xb4c   :  { %12206 = vmatpush1.bf16.msra.mxu0 %v17243_v26  ;;  %12166 = vmatprep.subr.bf16.mxu1 %v17248_v45  ;;  %v17323_v26 = vld [vmem:[#allocation3 + $0x34c] ss:$16 sps:$4 sm:$0xff]   ;;  %v17318_v45 = vld [vmem:[#allocation3 + $0x148] ss:$16 sps:$4 sm:$0xff]  }
 0xb4d   :  { %12207 = vmatprep.subr.bf16.mxu0 %v17251_v46  ;;  %12196 = vmatprep.mubr.bf16.mxu1 %v18294_v35  ;;  %v17267_v35 = vld [vmem:[#allocation3 + $0x268] ss:$16 sps:$4 sm:$0xff]  }
 0xb4e   :  { %12237 = vmatprep.mubr.bf16.mxu0 %v18334_v4  ;;  %v17272_v4 = vld [vmem:[#allocation3 + $0x4c] ss:$16 sps:$4 sm:$0xff]   ;;  %v17321_v46 = vld [vmem:[#allocation3 + $0x348] ss:$16 sps:$4 sm:$0xff]  }
 0xb4f   :  { %12167 = vmatpush1.bf16.msra.mxu1 %v17246_v29  ;;  %v17326_v29 = vld [vmem:[#allocation3 + $0x12c] ss:$16 sps:$4 sm:$0xff]  }
 0xb50   :  { %12208 = vmatpush1.bf16.msra.mxu0 %v17249_v6  ;;  %12168 = vmatprep.subr.bf16.mxu1 %v17254_v54  ;;  %v17329_v6 = vld [vmem:[#allocation3 + $0x32c] ss:$16 sps:$4 sm:$0xff]   ;;  %v17324_v54 = vld [vmem:[#allocation3 + $0x128] ss:$16 sps:$4 sm:$0xff]  }
 0xb51   :  { %12209 = vmatprep.subr.bf16.mxu0 %v17257_v49  ;;  %v17327_v49 = vld [vmem:[#allocation3 + $0x328] ss:$16 sps:$4 sm:$0xff]  }
 0xb53   :  { %12169 = vmatpush1.bf16.msra.mxu1 %v17252_v31  ;;  %v17332_v31 = vld [vmem:[#allocation3 + $0x10c] ss:$16 sps:$4 sm:$0xff]  }
 0xb54   :  { %12210 = vmatpush1.bf16.msra.mxu0 %v17255_v8  ;;  %12170 = vmatprep.subr.bf16.mxu1 %v17260_v58  ;;  %v17335_v8 = vld [vmem:[#allocation3 + $0x30c] ss:$16 sps:$4 sm:$0xff]   ;;  %v17330_v58 = vld [vmem:[#allocation3 + $0x108] ss:$16 sps:$4 sm:$0xff]  }
 0xb55   :  { %12211 = vmatprep.subr.bf16.mxu0 %v17263_v61  ;;  %v17333_v61 = vld [vmem:[#allocation3 + $0x308] ss:$16 sps:$4 sm:$0xff]  }
 0xb57   :  { %12171 = vmatpush1.bf16.msra.mxu1 %v17258_v59  ;;  %v17338_v59 = vld [vmem:[#allocation3 + $0x4ec] ss:$16 sps:$4 sm:$0xff]  }
 0xb58   :  { %12212 = vmatpush1.bf16.msra.mxu0 %v17261_v0  ;;  %12172 = vmatprep.subr.bf16.mxu1 %v17266_v63  ;;  %v17341_v0 = vld [vmem:[#allocation3 + $0x6ec] ss:$16 sps:$4 sm:$0xff]   ;;  %v17336_v63 = vld [vmem:[#allocation3 + $0x4e8] ss:$16 sps:$4 sm:$0xff]  }
 0xb59   :  { %12213 = vmatprep.subr.bf16.mxu0 %v17269_v1  ;;  %v17339_v1 = vld [vmem:[#allocation3 + $0x6e8] ss:$16 sps:$4 sm:$0xff]  }
 0xb5b   :  { %12173 = vmatpush1.bf16.msra.mxu1 %v17264_v2  ;;  %v17344_v2 = vld [vmem:[#allocation3 + $0x4cc] ss:$16 sps:$4 sm:$0xff]  }
 0xb5c   :  { %12214 = vmatpush1.bf16.msra.mxu0 %v17267_v35  ;;  %12174 = vmatprep.subr.bf16.mxu1 %v17272_v4  ;;  %v17347_v35 = vld [vmem:[#allocation3 + $0x6cc] ss:$16 sps:$4 sm:$0xff]   ;;  %v17342_v4 = vld [vmem:[#allocation3 + $0x4c8] ss:$16 sps:$4 sm:$0xff]  }
 0xb5d   :  { %12215 = vmatprep.subr.bf16.mxu0 %v17275_v14  ;;  %v17345_v14 = vld [vmem:[#allocation3 + $0x6c8] ss:$16 sps:$4 sm:$0xff]  }
 0xb5f   :  { %12175 = vmatpush1.bf16.msra.mxu1 %v17270_v3  ;;  %v17350_v3 = vld [vmem:[#allocation3 + $0x4ac] ss:$16 sps:$4 sm:$0xff]  }
 0xb60   :  { %12216 = vmatpush1.bf16.msra.mxu0 %v17273_v11  ;;  %12176 = vmatprep.subr.bf16.mxu1 %v17278_v23  ;;  %v17353_v11 = vld [vmem:[#allocation3 + $0x6ac] ss:$16 sps:$4 sm:$0xff]   ;;  %v17348_v23 = vld [vmem:[#allocation3 + $0x4a8] ss:$16 sps:$4 sm:$0xff]  }
 0xb61   :  { %12217 = vmatprep.subr.bf16.mxu0 %v17281_v19  ;;  %v17351_v19 = vld [vmem:[#allocation3 + $0x6a8] ss:$16 sps:$4 sm:$0xff]  }
 0xb63   :  { %12177 = vmatpush1.bf16.msra.mxu1 %v17276_v15  ;;  %v17356_v15 = vld [vmem:[#allocation3 + $0x48c] ss:$16 sps:$4 sm:$0xff]  }
 0xb64   :  { %12218 = vmatpush1.bf16.msra.mxu0 %v17279_v7  ;;  %12178 = vmatprep.subr.bf16.mxu1 %v17284_v10  ;;  %v17354_v7 = vld [vmem:[#allocation3 + $0x488] ss:$16 sps:$4 sm:$0xff]   ;;  %v17362_v10 = vld [vmem:[#allocation3 + $0x46c] ss:$16 sps:$4 sm:$0xff]  }
 0xb65   :  { %12219 = vmatprep.subr.bf16.mxu0 %v17287_v13  ;;  %v17365_v13 = vld [vmem:[#allocation3 + $0x66c] ss:$16 sps:$4 sm:$0xff]  }
 0xb67   :  { %12179 = vmatpush1.bf16.msra.mxu1 %v17282_v17  ;;  %v17360_v17 = vld [vmem:[#allocation3 + $0x468] ss:$16 sps:$4 sm:$0xff]  }
 0xb68   :  { %12220 = vmatpush1.bf16.msra.mxu0 %v17285_v27  ;;  %12180 = vmatprep.subr.bf16.mxu1 %v17290_v38  ;;  %v17363_v27 = vld [vmem:[#allocation3 + $0x668] ss:$16 sps:$4 sm:$0xff]   ;;  %v17368_v38 = vld [vmem:[#allocation3 + $0x44c] ss:$16 sps:$4 sm:$0xff]  }
 0xb69   :  { %12221 = vmatprep.subr.bf16.mxu0 %v17293_v18  ;;  %v17369_v18 = vld [vmem:[#allocation3 + $0x648] ss:$16 sps:$4 sm:$0xff]  }
 0xb6b   :  { %12181 = vmatpush2.bf16.msra.mxu1 %v17288_v28  ;;  %v17374_v28 = vld [vmem:[#allocation3 + $0x42c] ss:$16 sps:$4 sm:$0xff]  }
 0xb6c   :  { %12222 = vmatpush2.bf16.msra.mxu0 %v17291_v12  ;;  %12182 = vmatprep.subr.bf16.mxu1 %v17296_v41  ;;  %v17377_v12 = vld [vmem:[#allocation3 + $0x62c] ss:$16 sps:$4 sm:$0xff]   ;;  %v17372_v41 = vld [vmem:[#allocation3 + $0x428] ss:$16 sps:$4 sm:$0xff]  }
 0xb6d   :  { %12223 = vmatprep.subr.bf16.mxu0 %v17299_v36  ;;  %v17375_v36 = vld [vmem:[#allocation3 + $0x628] ss:$16 sps:$4 sm:$0xff]  }
 0xb6f   :  { %12183 = vmatpush2.bf16.msra.mxu1 %v17294_v30  ;;  %v17380_v30 = vld [vmem:[#allocation3 + $0x40c] ss:$16 sps:$4 sm:$0xff]  }
 0xb70   :  { %12224 = vmatpush2.bf16.msra.mxu0 %v17297_v37  ;;  %12184 = vmatprep.subr.bf16.mxu1 %v17302_v60  ;;  %v17383_v37 = vld [vmem:[#allocation3 + $0x60c] ss:$16 sps:$4 sm:$0xff]   ;;  %v17378_v60 = vld [vmem:[#allocation3 + $0x408] ss:$16 sps:$4 sm:$0xff]  }
 0xb71   :  { %12225 = vmatprep.subr.bf16.mxu0 %v17305_v20  ;;  %v17381_v20 = vld [vmem:[#allocation3 + $0x608] ss:$16 sps:$4 sm:$0xff]  }
 0xb73   :  { %12185 = vmatpush2.bf16.msra.mxu1 %v17300_v43  ;;  %v17386_v43 = vld [vmem:[#allocation3 + $0x5ec] ss:$16 sps:$4 sm:$0xff]  }
 0xb74   :  { %12226 = vmatpush2.bf16.msra.mxu0 %v17303_v39  ;;  %12186 = vmatprep.subr.bf16.mxu1 %v17308_v9  ;;  %v17389_v39 = vld [vmem:[#allocation3 + $0x7ec] ss:$16 sps:$4 sm:$0xff]   ;;  %v17384_v9 = vld [vmem:[#allocation3 + $0x5e8] ss:$16 sps:$4 sm:$0xff]  }
 0xb75   :  { %12227 = vmatprep.subr.bf16.mxu0 %v17311_v40  ;;  %v17387_v40 = vld [vmem:[#allocation3 + $0x7e8] ss:$16 sps:$4 sm:$0xff]  }
 0xb77   :  { %12187 = vmatpush2.bf16.msra.mxu1 %v17306_v25  ;;  %v17392_v25 = vld [vmem:[#allocation3 + $0x5cc] ss:$16 sps:$4 sm:$0xff]  }
 0xb78   :  { %12228 = vmatpush2.bf16.msra.mxu0 %v17309_v42  ;;  %12188 = vmatprep.subr.bf16.mxu1 %v17314_v24  ;;  %v17395_v42 = vld [vmem:[#allocation3 + $0x7cc] ss:$16 sps:$4 sm:$0xff]   ;;  %v17390_v24 = vld [vmem:[#allocation3 + $0x5c8] ss:$16 sps:$4 sm:$0xff]  }
 0xb79   :  { %12229 = vmatprep.subr.bf16.mxu0 %v17317_v44  ;;  %v17393_v44 = vld [vmem:[#allocation3 + $0x7c8] ss:$16 sps:$4 sm:$0xff]  }
 0xb7b   :  { %12189 = vmatpush2.bf16.msra.mxu1 %v17312_v53  ;;  %v17398_v53 = vld [vmem:[#allocation3 + $0x5ac] ss:$16 sps:$4 sm:$0xff]  }
 0xb7c   :  { %12230 = vmatpush2.bf16.msra.mxu0 %v17315_v56  ;;  %12190 = vmatprep.subr.bf16.mxu1 %v17320_v33  ;;  %v17401_v56 = vld [vmem:[#allocation3 + $0x7ac] ss:$16 sps:$4 sm:$0xff]   ;;  %v17396_v33 = vld [vmem:[#allocation3 + $0x5a8] ss:$16 sps:$4 sm:$0xff]  }
 0xb7d   :  { %12231 = vmatprep.subr.bf16.mxu0 %v17323_v26  ;;  %v17399_v26 = vld [vmem:[#allocation3 + $0x7a8] ss:$16 sps:$4 sm:$0xff]  }
 0xb7f   :  { %12191 = vmatpush2.bf16.msra.mxu1 %v17318_v45  ;;  %v17404_v45 = vld [vmem:[#allocation3 + $0x58c] ss:$16 sps:$4 sm:$0xff]  }
 0xb80   :  { %12232 = vmatpush2.bf16.msra.mxu0 %v17321_v46  ;;  %12192 = vmatprep.subr.bf16.mxu1 %v17326_v29  ;;  %v17407_v46 = vld [vmem:[#allocation3 + $0x78c] ss:$16 sps:$4 sm:$0xff]   ;;  %v17402_v29 = vld [vmem:[#allocation3 + $0x588] ss:$16 sps:$4 sm:$0xff]  }
 0xb81   :  { %12233 = vmatprep.subr.bf16.mxu0 %v17329_v6  ;;  %v17405_v6 = vld [vmem:[#allocation3 + $0x788] ss:$16 sps:$4 sm:$0xff]  }
 0xb83   :  { %12193 = vmatpush2.bf16.msra.mxu1 %v17324_v54  ;;  %v17410_v54 = vld [vmem:[#allocation3 + $0x56c] ss:$16 sps:$4 sm:$0xff]  }
 0xb84   :  { %12234 = vmatpush2.bf16.msra.mxu0 %v17327_v49  ;;  %12194 = vmatprep.subr.bf16.mxu1 %v17332_v31  ;;  %v17413_v49 = vld [vmem:[#allocation3 + $0x76c] ss:$16 sps:$4 sm:$0xff]   ;;  %v17408_v31 = vld [vmem:[#allocation3 + $0x568] ss:$16 sps:$4 sm:$0xff]  }
 0xb85   :  { %12235 = vmatprep.subr.bf16.mxu0 %v17335_v8  ;;  %v17411_v8 = vld [vmem:[#allocation3 + $0x768] ss:$16 sps:$4 sm:$0xff]  }
 0xb87   :  { %12195 = vmatpush2.bf16.msra.mxu1 %v17330_v58  ;;  %v17416_v58 = vld [vmem:[#allocation3 + $0x54c] ss:$16 sps:$4 sm:$0xff]  }
 0xb88   :  { %12236 = vmatpush2.bf16.msra.mxu0 %v17333_v61  ;;  %12246 = vmatprep.subr.bf16.mxu1 %v17338_v59  ;;  %v17419_v61 = vld [vmem:[#allocation3 + $0x74c] ss:$16 sps:$4 sm:$0xff]   ;;  %v17414_v59 = vld [vmem:[#allocation3 + $0x548] ss:$16 sps:$4 sm:$0xff]  }
 0xb89   :  { %12287 = vmatprep.subr.bf16.mxu0 %v17341_v0  ;;  %v17417_v0 = vld [vmem:[#allocation3 + $0x748] ss:$16 sps:$4 sm:$0xff]  }
 0xb8a   :  { %12197 = vmatmul.mubr.bf16.vlgmr.msra.gmra.mxu1 %v18292_v5  ;;  %v17359_v5 = vld [vmem:[#allocation3 + $0x68c] ss:$16 sps:$4 sm:$0xff]  }
 0xb8b   :  { %12238 = vmatmul.mubr.bf16.vlgmr.msra.gmra.mxu0 %v18332_v57  ;;  %12247 = vmatpush1.bf16.msra.mxu1 %v17336_v63  ;;  %v17357_v57 = vld [vmem:[#allocation3 + $0x688] ss:$16 sps:$4 sm:$0xff]   ;;  %v17422_v63 = vld [vmem:[#allocation3 + $0x52c] ss:$16 sps:$4 sm:$0xff]  }
 0xb8c   :  { %12288 = vmatpush1.bf16.msra.mxu0 %v17339_v1  ;;  %12248 = vmatprep.subr.bf16.mxu1 %v17344_v2  ;;  %v17425_v1 = vld [vmem:[#allocation3 + $0x72c] ss:$16 sps:$4 sm:$0xff]   ;;  %v17420_v2 = vld [vmem:[#allocation3 + $0x528] ss:$16 sps:$4 sm:$0xff]  }
 0xb8d   :  { %12289 = vmatprep.subr.bf16.mxu0 %v17347_v35  ;;  %12278 = vmatprep.mubr.bf16.mxu1 %v18374_v52  ;;  %v17371_v52 = vld [vmem:[#allocation3 + $0x64c] ss:$16 sps:$4 sm:$0xff]   ;;  %v17423_v35 = vld [vmem:[#allocation3 + $0x728] ss:$16 sps:$4 sm:$0xff]  }
 0xb8e   :  { %12319 = vmatprep.mubr.bf16.mxu0 %v18382_v32  ;;  %v17366_v32 = vld [vmem:[#allocation3 + $0x448] ss:$16 sps:$4 sm:$0xff]  }
 0xb8f   :  { %12249 = vmatpush1.bf16.msra.mxu1 %v17342_v4  ;;  %v17428_v4 = vld [vmem:[#allocation3 + $0x50c] ss:$16 sps:$4 sm:$0xff]  }
 0xb90   :  { %12290 = vmatpush1.bf16.msra.mxu0 %v17345_v14  ;;  %12250 = vmatprep.subr.bf16.mxu1 %v17350_v3  ;;  %v17431_v14 = vld [vmem:[#allocation3 + $0x70c] ss:$16 sps:$4 sm:$0xff]   ;;  %v17426_v3 = vld [vmem:[#allocation3 + $0x508] ss:$16 sps:$4 sm:$0xff]  }
 0xb91   :  { %12291 = vmatprep.subr.bf16.mxu0 %v17353_v11  ;;  %v17429_v11 = vld [vmem:[#allocation3 + $0x708] ss:$16 sps:$4 sm:$0xff]  }
 0xb93   :  { %12251 = vmatpush1.bf16.msra.mxu1 %v17348_v23  ;;  %v17434_v23 = vld [vmem:[#allocation13 + $0x274] ss:$8 sps:$4 sm:$0xff]  }
 0xb94   :  { %12292 = vmatpush1.bf16.msra.mxu0 %v17351_v19  ;;  %12252 = vmatprep.subr.bf16.mxu1 %v17356_v15  ;;  %v17432_v19 = vld [vmem:[#allocation13 + $0x270] ss:$8 sps:$4 sm:$0xff]   ;;  %v17437_v15 = vld [vmem:[#allocation13 + $0x264] ss:$8 sps:$4 sm:$0xff]  }
 0xb95   :  { %12293 = vmatprep.subr.bf16.mxu0 %v17359_v5  ;;  %v17435_v5 = vld [vmem:[#allocation13 + $0x260] ss:$8 sps:$4 sm:$0xff]  }
 0xb97   :  { %12253 = vmatpush1.bf16.msra.mxu1 %v17354_v7 }
 0xb98   :  { %12294 = vmatpush1.bf16.msra.mxu0 %v17357_v57  ;;  %12254 = vmatprep.subr.bf16.mxu1 %v17362_v10  ;;  %v17440_v10 = vld [vmem:[#allocation13 + $0x254] ss:$8 sps:$4 sm:$0xff]  }
 0xb99   :  { %12295 = vmatprep.subr.bf16.mxu0 %v17365_v13 }
 0xb9b   :  { %12255 = vmatpush1.bf16.msra.mxu1 %v17360_v17 }
 0xb9c   :  { %12296 = vmatpush1.bf16.msra.mxu0 %v17363_v27  ;;  %12256 = vmatprep.subr.bf16.mxu1 %v17368_v38  ;;  %v17438_v27 = vld [vmem:[#allocation13 + $0x250] ss:$8 sps:$4 sm:$0xff]  }
 0xb9d   :  { %12297 = vmatprep.subr.bf16.mxu0 %v17371_v52 }
 0xb9f   :  { %12257 = vmatpush1.bf16.msra.mxu1 %v17366_v32 }
 0xba0   :  { %12298 = vmatpush1.bf16.msra.mxu0 %v17369_v18  ;;  %12258 = vmatprep.subr.bf16.mxu1 %v17374_v28  ;;  %v17443_v28 = vld [vmem:[#allocation13 + $0x244] ss:$8 sps:$4 sm:$0xff]  }
 0xba1   :  { %12299 = vmatprep.subr.bf16.mxu0 %v17377_v12  ;;  %v17480_v12 = vld [vmem:[#allocation13 + $0x370] ss:$8 sps:$4 sm:$0xff]  }
 0xba3   :  { %12259 = vmatpush1.bf16.msra.mxu1 %v17372_v41  ;;  %v17482_v41 = vld [vmem:[#allocation13 + $0x374] ss:$8 sps:$4 sm:$0xff]  }
 0xba4   :  { %12300 = vmatpush1.bf16.msra.mxu0 %v17375_v36  ;;  %12260 = vmatprep.subr.bf16.mxu1 %v17380_v30  ;;  %v17483_v36 = vld [vmem:[#allocation13 + $0x360] ss:$8 sps:$4 sm:$0xff]   ;;  %v17446_v30 = vld [vmem:[#allocation13 + $0x234] ss:$8 sps:$4 sm:$0xff]  }
 0xba5   :  { %12301 = vmatprep.subr.bf16.mxu0 %v17383_v37  ;;  %v17488_v37 = vld [vmem:[#allocation13 + $0x354] ss:$8 sps:$4 sm:$0xff]  }
 0xba7   :  { %12261 = vmatpush1.bf16.msra.mxu1 %v17378_v60  ;;  %v17444_v60 = vld [vmem:[#allocation13 + $0x230] ss:$8 sps:$4 sm:$0xff]  }
 0xba8   :  { %12302 = vmatpush1.bf16.msra.mxu0 %v17381_v20  ;;  %12262 = vmatprep.subr.bf16.mxu1 %v17386_v43  ;;  %v17486_v20 = vld [vmem:[#allocation13 + $0x350] ss:$8 sps:$4 sm:$0xff]   ;;  %v17449_v43 = vld [vmem:[#allocation13 + $0x224] ss:$8 sps:$4 sm:$0xff]  }
 0xba9   :  { %12303 = vmatprep.subr.bf16.mxu0 %v17389_v39  ;;  %v17491_v39 = vld [vmem:[#allocation13 + $0x344] ss:$8 sps:$4 sm:$0xff]  }
 0xbab   :  { %12263 = vmatpush2.bf16.msra.mxu1 %v17384_v9  ;;  %v17447_v9 = vld [vmem:[#allocation13 + $0x220] ss:$8 sps:$4 sm:$0xff]  }
 0xbac   :  { %12304 = vmatpush2.bf16.msra.mxu0 %v17387_v40  ;;  %12264 = vmatprep.subr.bf16.mxu1 %v17392_v25  ;;  %v17489_v40 = vld [vmem:[#allocation13 + $0x340] ss:$8 sps:$4 sm:$0xff]   ;;  %v17452_v25 = vld [vmem:[#allocation13 + $0x214] ss:$8 sps:$4 sm:$0xff]  }
 0xbad   :  { %12305 = vmatprep.subr.bf16.mxu0 %v17395_v42  ;;  %v17494_v42 = vld [vmem:[#allocation13 + $0x334] ss:$8 sps:$4 sm:$0xff]  }
 0xbaf   :  { %12265 = vmatpush2.bf16.msra.mxu1 %v17390_v24  ;;  %v17450_v24 = vld [vmem:[#allocation13 + $0x210] ss:$8 sps:$4 sm:$0xff]  }
 0xbb0   :  { %12306 = vmatpush2.bf16.msra.mxu0 %v17393_v44  ;;  %12266 = vmatprep.subr.bf16.mxu1 %v17398_v53  ;;  %v17492_v44 = vld [vmem:[#allocation13 + $0x330] ss:$8 sps:$4 sm:$0xff]   ;;  %v17455_v53 = vld [vmem:[#allocation13 + $0x204] ss:$8 sps:$4 sm:$0xff]  }
 0xbb1   :  { %12307 = vmatprep.subr.bf16.mxu0 %v17401_v56  ;;  %v17497_v56 = vld [vmem:[#allocation13 + $0x324] ss:$8 sps:$4 sm:$0xff]  }
 0xbb3   :  { %12267 = vmatpush2.bf16.msra.mxu1 %v17396_v33  ;;  %v17453_v33 = vld [vmem:[#allocation13 + $0x200] ss:$8 sps:$4 sm:$0xff]  }
 0xbb4   :  { %12308 = vmatpush2.bf16.msra.mxu0 %v17399_v26  ;;  %12268 = vmatprep.subr.bf16.mxu1 %v17404_v45  ;;  %v17495_v26 = vld [vmem:[#allocation13 + $0x320] ss:$8 sps:$4 sm:$0xff]   ;;  %v17458_v45 = vld [vmem:[#allocation13 + $0x2f4] ss:$8 sps:$4 sm:$0xff]  }
 0xbb5   :  { %12309 = vmatprep.subr.bf16.mxu0 %v17407_v46  ;;  %v17500_v46 = vld [vmem:[#allocation13 + $0x314] ss:$8 sps:$4 sm:$0xff]  }
 0xbb7   :  { %12269 = vmatpush2.bf16.msra.mxu1 %v17402_v29  ;;  %v17456_v29 = vld [vmem:[#allocation13 + $0x2f0] ss:$8 sps:$4 sm:$0xff]  }
 0xbb8   :  { %12310 = vmatpush2.bf16.msra.mxu0 %v17405_v6  ;;  %12270 = vmatprep.subr.bf16.mxu1 %v17410_v54  ;;  %v17498_v6 = vld [vmem:[#allocation13 + $0x310] ss:$8 sps:$4 sm:$0xff]   ;;  %v17461_v54 = vld [vmem:[#allocation13 + $0x2e4] ss:$8 sps:$4 sm:$0xff]  }
 0xbb9   :  { %12311 = vmatprep.subr.bf16.mxu0 %v17413_v49  ;;  %v17503_v49 = vld [vmem:[#allocation13 + $0x304] ss:$8 sps:$4 sm:$0xff]  }
 0xbbb   :  { %12271 = vmatpush2.bf16.msra.mxu1 %v17408_v31  ;;  %v17459_v31 = vld [vmem:[#allocation13 + $0x2e0] ss:$8 sps:$4 sm:$0xff]  }
 0xbbc   :  { %12312 = vmatpush2.bf16.msra.mxu0 %v17411_v8  ;;  %12272 = vmatprep.subr.bf16.mxu1 %v17416_v58  ;;  %v17501_v8 = vld [vmem:[#allocation13 + $0x300] ss:$8 sps:$4 sm:$0xff]   ;;  %v17464_v58 = vld [vmem:[#allocation13 + $0x2d4] ss:$8 sps:$4 sm:$0xff]  }
 0xbbd   :  { %12313 = vmatprep.subr.bf16.mxu0 %v17419_v61  ;;  %v17506_v61 = vld [vmem:[#allocation13 + $0x3f4] ss:$8 sps:$4 sm:$0xff]  }
 0xbbf   :  { %12273 = vmatpush2.bf16.msra.mxu1 %v17414_v59  ;;  %v17462_v59 = vld [vmem:[#allocation13 + $0x2d0] ss:$8 sps:$4 sm:$0xff]  }
 0xbc0   :  { %12314 = vmatpush2.bf16.msra.mxu0 %v17417_v0  ;;  %12274 = vmatprep.subr.bf16.mxu1 %v17422_v63  ;;  %v17504_v0 = vld [vmem:[#allocation13 + $0x3f0] ss:$8 sps:$4 sm:$0xff]   ;;  %v17467_v63 = vld [vmem:[#allocation13 + $0x2c4] ss:$8 sps:$4 sm:$0xff]  }
 0xbc1   :  { %12315 = vmatprep.subr.bf16.mxu0 %v17425_v1  ;;  %v17509_v1 = vld [vmem:[#allocation13 + $0x3e4] ss:$8 sps:$4 sm:$0xff]  }
 0xbc3   :  { %12275 = vmatpush2.bf16.msra.mxu1 %v17420_v2  ;;  %v17465_v2 = vld [vmem:[#allocation13 + $0x2c0] ss:$8 sps:$4 sm:$0xff]  }
 0xbc4   :  { %12316 = vmatpush2.bf16.msra.mxu0 %v17423_v35  ;;  %12276 = vmatprep.subr.bf16.mxu1 %v17428_v4  ;;  %v17507_v35 = vld [vmem:[#allocation13 + $0x3e0] ss:$8 sps:$4 sm:$0xff]   ;;  %v17470_v4 = vld [vmem:[#allocation13 + $0x2b4] ss:$8 sps:$4 sm:$0xff]  }
 0xbc5   :  { %12317 = vmatprep.subr.bf16.mxu0 %v17431_v14  ;;  %v17512_v14 = vld [vmem:[#allocation13 + $0x3d4] ss:$8 sps:$4 sm:$0xff]  }
 0xbc7   :  { %12277 = vmatpush2.bf16.msra.mxu1 %v17426_v3  ;;  %v17468_v3 = vld [vmem:[#allocation13 + $0x2b0] ss:$8 sps:$4 sm:$0xff]  }
 0xbc8   :  { %12318 = vmatpush2.bf16.msra.mxu0 %v17429_v11  ;;  %12732 = vmatprep.subr.bf16.mxu1 %v17434_v23  ;;  %v17510_v11 = vld [vmem:[#allocation13 + $0x3d0] ss:$8 sps:$4 sm:$0xff]   ;;  %v17473_v23 = vld [vmem:[#allocation13 + $0x2a4] ss:$8 sps:$4 sm:$0xff]  }
 0xbc9   :  { %12773 = vmatprep.subr.bf16.mxu0 %v17482_v41  ;;  %v17477_v41 = vld [vmem:[#allocation13 + $0x280] ss:$8 sps:$4 sm:$0xff]  }
 0xbca   :  { %v18398_v7 = vpop.f32.mrf.mxu1  ;;  %12279 = vmatmul.mubr.bf16.vlgmr.msra.gmra.mxu1 %v18372_v50  ;;  %v17485_v50 = vld [vmem:[#allocation13 + $0x364] ss:$8 sps:$4 sm:$0xff]  }
 0xbcb   :  { %v18400_v57 = vpop.f32.mrf.mxu0  ;;  %12320 = vmatmul.mubr.bf16.vlgmr.msra.gmra.mxu0 %v18380_v55  ;;  %12733 = vmatpush1.bf16.msra.mxu1 %v17432_v19  ;;  %v17441_v55 = vld [vmem:[#allocation13 + $0x240] ss:$8 sps:$4 sm:$0xff]   ;;  %v17515_v19 = vld [vmem:[#allocation13 + $0x3c4] ss:$8 sps:$4 sm:$0xff]  }
 0xbcc   :  { %v18404_v13 = vpop.f32.mrf.mxu1  ;;  %12734 = vmatprep.subr.bf16.mxu1 %v17437_v15  ;;  %12774 = vmatpush1.bf16.msra.mxu0 %v17480_v12  ;;  %v17471_v15 = vld [vmem:[#allocation13 + $0x2a0] ss:$8 sps:$4 sm:$0xff]  }
 0xbcd   :  { %v18406_v17 = vpop.f32.mrf.mxu0  ;;  %12775 = vmatprep.subr.bf16.mxu0 %v17485_v50 }
 0xbce   :  { %v12038_v38 = vpop.f32.mrf.mxu1 }
 0xbcf   :  { %v12079_v52 = vpop.f32.mrf.mxu0  ;;  %12735 = vmatpush1.bf16.msra.mxu1 %v17435_v5  ;;  %v17513_v5 = vld [vmem:[#allocation13 + $0x3c0] ss:$8 sps:$4 sm:$0xff]   ;;  %v18408_v38 = vld [vmem:[#allocation16 + $0x10] sm:$0xf] }
 0xbd0   :  { %v12039_v32 = vpop.f32.mrf.mxu1  ;;  %12736 = vmatprep.subr.bf16.mxu1 %v17440_v10  ;;  %12776 = vmatpush1.bf16.msra.mxu0 %v17483_v36  ;;  %v17476_v10 = vld [vmem:[#allocation13 + $0x294] ss:$8 sps:$4 sm:$0xff]   ;;  %v17474_v52 = vld [vmem:[#allocation13 + $0x290] ss:$8 sps:$4 sm:$0xff]   ;;  %v10707_v12 = vrot.slane %v18408_v38, %v18128_v21  ;;  %v17521_v36 = vld [vmem:[#allocation13 + $0x3a4] ss:$8 sps:$4 sm:$0xff]  }
 0xbd1   :  { %v12080_v18 = vpop.f32.mrf.mxu0  ;;  %12777 = vmatprep.subr.bf16.mxu0 %v17488_v37  ;;  %v17516_v32 = vld [vmem:[#allocation13 + $0x3b0] ss:$8 sps:$4 sm:$0xff]   ;;  %v17519_v37 = vld [vmem:[#allocation13 + $0x3a0] ss:$8 sps:$4 sm:$0xff]  }
 0xbd2   :  { %v17479_v18 = vld [vmem:[#allocation13 + $0x284] ss:$8 sps:$4 sm:$0xff]  }
 0xbd3   :  { %12737 = vmatpush1.bf16.msra.mxu1 %v17438_v27  ;;  %v17518_v27 = vld [vmem:[#allocation13 + $0x3b4] ss:$8 sps:$4 sm:$0xff]  }
 0xbd4   :  { %12738 = vmatprep.subr.bf16.mxu1 %v17443_v28  ;;  %12778 = vmatpush1.bf16.msra.mxu0 %v17486_v20  ;;  %v10703_v28 = vrot.slane %v18408_v38, %v18125_v16 }
 0xbd5   :  { %12779 = vmatprep.subr.bf16.mxu0 %v17491_v39 }
 0xbd6   :  { %v12035_v50 = vadd.f32 %v18398_v7, %v10703_v28  ;;  %v17522_v7 = vld [vmem:[#allocation13 + $0x390] ss:$8 sps:$4 sm:$0xff]  }
 0xbd7   :  { %12739 = vmatpush1.bf16.msra.mxu1 %v17441_v55  ;;  %v12037_v55 = vadd.f32 %v18404_v13, %v10707_v12 }
 0xbd8   :  { %12740 = vmatprep.subr.bf16.mxu1 %v17446_v30  ;;  %12780 = vmatpush1.bf16.msra.mxu0 %v17489_v40  ;;  %v12076_v30 = vadd.f32 %v18400_v57, %v12035_v50 }
 0xbd9   :  { %12781 = vmatprep.subr.bf16.mxu0 %v17494_v42 }
 0xbdb   :  { %12741 = vmatpush1.bf16.msra.mxu1 %v17444_v60 }
 0xbdc   :  { %12742 = vmatprep.subr.bf16.mxu1 %v17449_v43  ;;  %12782 = vmatpush1.bf16.msra.mxu0 %v17492_v44  ;;  %v12078_v43 = vadd.f32 %v18406_v17, %v12037_v55 }
 0xbdd   :  { %12783 = vmatprep.subr.bf16.mxu0 %v17497_v56 }
 0xbdf   :  { %12743 = vmatpush1.bf16.msra.mxu1 %v17447_v9 }
 0xbe0   :  { %12744 = vmatprep.subr.bf16.mxu1 %v17452_v25  ;;  %12784 = vmatpush1.bf16.msra.mxu0 %v17495_v26  ;;  %v17524_v25 = vld [vmem:[#allocation13 + $0x394] ss:$8 sps:$4 sm:$0xff]   ;;  %v17527_v26 = vld [vmem:[#allocation13 + $0x384] ss:$8 sps:$4 sm:$0xff]  }
 0xbe1   :  { %12785 = vmatprep.subr.bf16.mxu0 %v17500_v46  ;;  %v17525_v46 = vld [vmem:[#allocation13 + $0x380] ss:$8 sps:$4 sm:$0xff]  }
 0xbe3   :  { %12745 = vmatpush1.bf16.msra.mxu1 %v17450_v24 }
 0xbe4   :  { %12746 = vmatprep.subr.bf16.mxu1 %v17455_v53  ;;  %12786 = vmatpush1.bf16.msra.mxu0 %v17498_v6 }
 0xbe5   :  { %12787 = vmatprep.subr.bf16.mxu0 %v17503_v49 }
 0xbe7   :  { %12747 = vmatpush1.bf16.msra.mxu1 %v17453_v33 }
 0xbe8   :  { %12748 = vmatprep.subr.bf16.mxu1 %v17458_v45  ;;  %12788 = vmatpush1.bf16.msra.mxu0 %v17501_v8 }
 0xbe9   :  { %12789 = vmatprep.subr.bf16.mxu0 %v17506_v61 }
 0xbeb   :  { %12749 = vmatpush2.bf16.msra.mxu1 %v17456_v29 }
 0xbec   :  { %12750 = vmatprep.subr.bf16.mxu1 %v17461_v54  ;;  %12790 = vmatpush2.bf16.msra.mxu0 %v17504_v0  ;;  %v17528_v0 = vld [vmem:[#allocation14 + $0xf8] sm:$0xff]  }
 0xbed   :  { %12791 = vmatprep.subr.bf16.mxu0 %v17509_v1  ;;  %v17530_v1 = vld [vmem:[#allocation14 + $0xf0] sm:$0xff]  }
 0xbef   :  { %12751 = vmatpush2.bf16.msra.mxu1 %v17459_v31 }
 0xbf0   :  { %12752 = vmatprep.subr.bf16.mxu1 %v17464_v58  ;;  %12792 = vmatpush2.bf16.msra.mxu0 %v17507_v35  ;;  %v17532_v35 = vld [vmem:[#allocation14 + $0xe8] sm:$0xff]  }
 0xbf1   :  { %12793 = vmatprep.subr.bf16.mxu0 %v17512_v14  ;;  %v17534_v14 = vld [vmem:[#allocation14 + $0xe0] sm:$0xff]  }
 0xbf3   :  { %12753 = vmatpush2.bf16.msra.mxu1 %v17462_v59 }
 0xbf4   :  { %12754 = vmatprep.subr.bf16.mxu1 %v17467_v63  ;;  %12794 = vmatpush2.bf16.msra.mxu0 %v17510_v11  ;;  %v17529_v63 = vld [vmem:[#allocation14 + $0xb8] sm:$0xff]  }
 0xbf5   :  { %12795 = vmatprep.subr.bf16.mxu0 %v17515_v19  ;;  %v17536_v11 = vld [vmem:[#allocation14 + $0xd8] sm:$0xff]   ;;  %v17538_v19 = vld [vmem:[#allocation14 + $0xd0] sm:$0xff]  }
 0xbf7   :  { %12755 = vmatpush2.bf16.msra.mxu1 %v17465_v2  ;;  %v17531_v2 = vld [vmem:[#allocation14 + $0xb0] sm:$0xff]  }
 0xbf8   :  { %12756 = vmatprep.subr.bf16.mxu1 %v17470_v4  ;;  %12796 = vmatpush2.bf16.msra.mxu0 %v17513_v5  ;;  %v17533_v4 = vld [vmem:[#allocation14 + $0xa8] sm:$0xff]   ;;  %v10711_v5 = vrot.slane %v18408_v38, %v18133_v34 }
 0xbf9   :  { %12797 = vmatprep.subr.bf16.mxu0 %v17518_v27 }
 0xbfb   :  { %12757 = vmatpush2.bf16.msra.mxu1 %v17468_v3  ;;  %v17535_v3 = vld [vmem:[#allocation14 + $0xa0] sm:$0xff]  }
 0xbfc   :  { %12758 = vmatprep.subr.bf16.mxu1 %v17473_v23  ;;  %12798 = vmatpush2.bf16.msra.mxu0 %v17516_v32  ;;  %v17537_v23 = vld [vmem:[#allocation14 + $0x98] sm:$0xff]  }
 0xbfd   :  { %12799 = vmatprep.subr.bf16.mxu0 %v17521_v36 }
 0xbff   :  { %12759 = vmatpush2.bf16.msra.mxu1 %v17471_v15  ;;  %v17539_v15 = vld [vmem:[#allocation14 + $0x90] sm:$0xff]  }
 0xc00   :  { %12760 = vmatprep.subr.bf16.mxu1 %v17476_v10  ;;  %12800 = vmatpush2.bf16.msra.mxu0 %v17519_v37  ;;  %v10715_v10 = vrot.slane %v18408_v38, %v18136_v51 }
 0xc01   :  { %12801 = vmatprep.subr.bf16.mxu0 %v17524_v25 }
 0xc03   :  { %12761 = vmatpush2.bf16.msra.mxu1 %v17474_v52 }
 0xc04   :  { %12762 = vmatprep.subr.bf16.mxu1 %v17479_v18  ;;  %12802 = vmatpush2.bf16.msra.mxu0 %v17522_v7  ;;  %v17541_v7 = vld [vmem:[#allocation14 + $0x88] sm:$0xff]  }
 0xc05   :  { %12803 = vmatprep.subr.bf16.mxu0 %v17527_v26  ;;  %v17546_v26 = vld [vmem:[#allocation11 + $0x764] ss:$16 sps:$4 sm:$0xff]  }
 0xc07   :  { %12763 = vmatpush2.bf16.msra.mxu1 %v17477_v41 }
 0xc08   :  { %12804 = vmatpush2.bf16.msra.mxu0 %v17525_v46  ;;  %16424 = vmatprep.subr.bf16.mxu1 %v17528_v0  ;;  %v17552_v46 = vld [vmem:[#allocation11 + $0x744] ss:$16 sps:$4 sm:$0xff]  }
 0xc09   :  { %13203 = vmatprep.subr.bf16.mxu0 %v17546_v26  ;;  %v17592_v26 = vld [vmem:[#allocation11 + $0x660] ss:$16 sps:$4 sm:$0xff]  }
 0xc0a   :  { %v12116_v60 = vpop.f32.mrf.mxu1 }
 0xc0b   :  { %v12157_v20 = vpop.f32.mrf.mxu0  ;;  %v12117_v39 = vadd.f32 %v12116_v60, %v12076_v30 }
 0xc0c   :  { %v12118_v9 = vpop.f32.mrf.mxu1 }
 0xc0d   :  { %v12159_v40 = vpop.f32.mrf.mxu0  ;;  %v12158_v42 = vadd.f32 %v12157_v20, %v12117_v39  ;;  %v12119_v24 = vadd.f32 %v12118_v9, %v12078_v43 }
 0xc0e   :  { %v12120_v44 = vpop.f32.mrf.mxu1 }
 0xc0f   :  { %v12161_v13 = vpop.f32.mrf.mxu0  ;;  %v12160_v53 = vadd.f32 %v12159_v40, %v12119_v24  ;;  %v12328_v57 = vmax.f32 %v12158_v42, 0.0  ;;  %v17540_v24 = vld [vmem:[#allocation14 + $0xc8] sm:$0xff]  }
 0xc10   :  { %v12121_v56 = vpop.f32.mrf.mxu1 }
 0xc11   :  { %v12162_v33 = vpop.f32.mrf.mxu0  ;;  %v12329_v45 = vmax.f32 %v12160_v53, 0.0  ;;  %v12332_v29 = vpack.c.bf16 %v12328_v57, %v12328_v57  ;;  %v17542_v53 = vld [vmem:[#allocation14 + $0xc0] sm:$0xff]  }
 0xc12   :  { %v17543_v57 = vld [vmem:[#allocation14 + $0x80] sm:$0xff]  }
 0xc13   :  { %v12333_v17 = vpack.c.bf16 %v12329_v45, %v12329_v45  ;;  %v17544_v33 = vld [vmem:[#allocation11 + $0x760] ss:$16 sps:$4 sm:$0xff]   ;;  %v17549_v45 = vld [vmem:[#allocation11 + $0x76c] ss:$16 sps:$4 sm:$0xff]  }
 0xc15   :  { %12764 = vmatprep.mubr.bf16.mxu1 %v12333_v17  ;;  %v17550_v17 = vld [vmem:[#allocation11 + $0x740] ss:$16 sps:$4 sm:$0xff]  }
 0xc16   :  { %12765 = vmatmul.mubr.bf16.vlgmr.msra.gmra.mxu1 %v12332_v29  ;;  %v17558_v29 = vld [vmem:[#allocation11 + $0x724] ss:$16 sps:$4 sm:$0xff]  }
 0xc17   :  { %16425 = vmatpush3.bf16.msra.mxu1 %v17529_v63 }
 0xc18   :  { %16426 = vmatprep.subr.bf16.mxu1 %v17530_v1 }
 0xc1b   :  { %16427 = vmatpush3.bf16.msra.mxu1 %v17531_v2 }
 0xc1c   :  { %16428 = vmatprep.subr.bf16.mxu1 %v17532_v35 }
 0xc1f   :  { %16429 = vmatpush3.bf16.msra.mxu1 %v17533_v4 }
 0xc20   :  { %16430 = vmatprep.subr.bf16.mxu1 %v17534_v14 }
 0xc23   :  { %16431 = vmatpush3.bf16.msra.mxu1 %v17535_v3 }
 0xc24   :  { %16432 = vmatprep.subr.bf16.mxu1 %v17536_v11 }
 0xc27   :  { %16433 = vmatpush3.bf16.msra.mxu1 %v17537_v23 }
 0xc28   :  { %16434 = vmatprep.subr.bf16.mxu1 %v17538_v19 }
 0xc2b   :  { %16435 = vmatpush3.bf16.msra.mxu1 %v17539_v15 }
 0xc2c   :  { %16436 = vmatprep.subr.bf16.mxu1 %v17540_v24 }
 0xc2f   :  { %16437 = vmatpush3.bf16.msra.mxu1 %v17541_v7  ;;  %v16182_v7 = vld [vmem:[#allocation16 + $0x16] ss:$0 sm:$0xff] }
 0xc30   :  { %16438 = vmatprep.subr.bf16.mxu1 %v17542_v53 }
 0xc33   :  { %16439 = vmatpush3.bf16.msra.mxu1 %v17543_v57 }
 0xc34   :  { %13244 = vmatprep.subr.bf16.mxu1 %v17549_v45  ;;  %v17601_v45 = vld [vmem:[#allocation11 + $0x7a0] ss:$16 sps:$4 sm:$0xff]  }
 0xc4a   :  { %v12198_v6 = vpop.f32.mrf.mxu1 }
 0xc4b   :  { %v12239_v54 = vpop.f32.mrf.mxu0  ;;  %v12199_v27 = vadd.f32 %v12198_v6, %v10711_v5  ;;  %v17556_v6 = vld [vmem:[#allocation11 + $0x720] ss:$16 sps:$4 sm:$0xff]  }
 0xc4c   :  { %v12200_v49 = vpop.f32.mrf.mxu1 }
 0xc4d   :  { %v12241_v31 = vpop.f32.mrf.mxu0  ;;  %v12201_v52 = vadd.f32 %v12200_v49, %v10715_v10  ;;  %v12240_v32 = vadd.f32 %v12239_v54, %v12199_v27  ;;  %v17564_v54 = vld [vmem:[#allocation11 + $0x704] ss:$16 sps:$4 sm:$0xff]   ;;  %v17562_v49 = vld [vmem:[#allocation11 + $0x700] ss:$16 sps:$4 sm:$0xff]   ;;  %v17547_v10 = vld [vmem:[#allocation11 + $0x768] ss:$16 sps:$4 sm:$0xff]  }
 0xc4e   :  { %v12202_v8 = vpop.f32.mrf.mxu1 }
 0xc4f   :  { %v12243_v58 = vpop.f32.mrf.mxu0  ;;  %v12242_v12 = vadd.f32 %v12241_v31, %v12201_v52  ;;  %v17570_v31 = vld [vmem:[#allocation11 + $0x6e4] ss:$16 sps:$4 sm:$0xff]   ;;  %v17568_v8 = vld [vmem:[#allocation11 + $0x6e0] ss:$16 sps:$4 sm:$0xff]   ;;  %v17555_v52 = vld [vmem:[#allocation11 + $0x74c] ss:$16 sps:$4 sm:$0xff]  }
 0xc50   :  { %v12203_v61 = vpop.f32.mrf.mxu1  ;;  %v17576_v58 = vld [vmem:[#allocation11 + $0x6c4] ss:$16 sps:$4 sm:$0xff]  }
 0xc51   :  { %v12244_v59 = vpop.f32.mrf.mxu0  ;;  %v17574_v61 = vld [vmem:[#allocation11 + $0x6c0] ss:$16 sps:$4 sm:$0xff]  }
 0xc52   :  { %v12400_v59 = vld [vmem:[#allocation16 + $0x14] sm:$0x3] }
 0xc53   :  { %v12405_v0 = vrot.slane %v12400_v59, %v18125_v16  ;;  %v12409_v63 = vrot.slane %v12400_v59, %v18128_v21  ;;  %v17624_v59 = vld [vmem:[#allocation11 + $0x78c] ss:$16 sps:$4 sm:$0xff]  }
 0xc8a   :  { %v12280_v18 = vpop.f32.mrf.mxu1 }
 0xc8b   :  { %v12321_v28 = vpop.f32.mrf.mxu0  ;;  %v12281_v41 = vadd.f32 %v12280_v18, %v12240_v32  ;;  %v17553_v32 = vld [vmem:[#allocation11 + $0x748] ss:$16 sps:$4 sm:$0xff]   ;;  %v17561_v18 = vld [vmem:[#allocation11 + $0x72c] ss:$16 sps:$4 sm:$0xff]  }
 0xc8c   :  { %v12282_v50 = vpop.f32.mrf.mxu1 }
 0xc8d   :  { %v12323_v55 = vpop.f32.mrf.mxu0  ;;  %v12322_v36 = vadd.f32 %v12321_v28, %v12281_v41  ;;  %v12283_v30 = vadd.f32 %v12282_v50, %v12242_v12  ;;  %v17559_v28 = vld [vmem:[#allocation11 + $0x728] ss:$16 sps:$4 sm:$0xff]   ;;  %v17567_v12 = vld [vmem:[#allocation11 + $0x70c] ss:$16 sps:$4 sm:$0xff]  }
 0xc8e   :  { %v12284_v37 = vpop.f32.mrf.mxu1  ;;  %v17565_v41 = vld [vmem:[#allocation11 + $0x708] ss:$16 sps:$4 sm:$0xff]   ;;  %v17573_v50 = vld [vmem:[#allocation11 + $0x6ec] ss:$16 sps:$4 sm:$0xff]  }
 0xc8f   :  { %v12325_v60 = vpop.f32.mrf.mxu0  ;;  %v12324_v20 = vadd.f32 %v12323_v55, %v12283_v30  ;;  %v12330_v43 = vmax.f32 %v12322_v36, 0.0  ;;  %v17571_v55 = vld [vmem:[#allocation11 + $0x6e8] ss:$16 sps:$4 sm:$0xff]   ;;  %v17579_v36 = vld [vmem:[#allocation11 + $0x6cc] ss:$16 sps:$4 sm:$0xff]  }
 0xc90   :  { %v12285_v39 = vpop.f32.mrf.mxu1  ;;  %v17577_v30 = vld [vmem:[#allocation11 + $0x6c8] ss:$16 sps:$4 sm:$0xff]   ;;  %v17582_v37 = vld [vmem:[#allocation11 + $0x6a4] ss:$16 sps:$4 sm:$0xff]   ;;  %v17580_v60 = vld [vmem:[#allocation11 + $0x6a0] ss:$16 sps:$4 sm:$0xff]  }
 0xc91   :  { %v12326_v9 = vpop.f32.mrf.mxu0  ;;  %v12331_v40 = vmax.f32 %v12324_v20, 0.0  ;;  %v12334_v38 = vpack.c.bf16 %v12330_v43, %v12330_v43  ;;  %v17585_v20 = vld [vmem:[#allocation11 + $0x6ac] ss:$16 sps:$4 sm:$0xff]   ;;  %v17583_v43 = vld [vmem:[#allocation11 + $0x6a8] ss:$16 sps:$4 sm:$0xff]  }
 0xc92   :  { %v17588_v39 = vld [vmem:[#allocation11 + $0x684] ss:$16 sps:$4 sm:$0xff]   ;;  %v17586_v9 = vld [vmem:[#allocation11 + $0x680] ss:$16 sps:$4 sm:$0xff]  }
 0xc93   :  { %v12335_v25 = vpack.c.bf16 %v12331_v40, %v12331_v40  ;;  %v17591_v40 = vld [vmem:[#allocation11 + $0x68c] ss:$16 sps:$4 sm:$0xff]  }
 0xc95   :  { %12805 = vmatprep.mubr.bf16.mxu0 %v12335_v25  ;;  %v17589_v25 = vld [vmem:[#allocation11 + $0x688] ss:$16 sps:$4 sm:$0xff]  }
 0xc96   :  { %12806 = vmatmul.mubr.bf16.vlgmr.msra.gmra.mxu0 %v12334_v38  ;;  %v17594_v38 = vld [vmem:[#allocation11 + $0x664] ss:$16 sps:$4 sm:$0xff]  }
 0xc97   :  { %13235 = vmatprep.mubr.bf16.mxu0 %v17980_v22  ;;  %13204 = vmatpush1.bf16.msra.mxu0 %v17544_v33 }
 0xc98   :  { %13205 = vmatprep.subr.bf16.mxu0 %v17552_v46 }
 0xc9b   :  { %13206 = vmatpush1.bf16.msra.mxu0 %v17550_v17  ;;  %v17597_v17 = vld [vmem:[#allocation11 + $0x644] ss:$16 sps:$4 sm:$0xff]  }
 0xc9c   :  { %13207 = vmatprep.subr.bf16.mxu0 %v17558_v29  ;;  %v17609_v29 = vld [vmem:[#allocation11 + $0x784] ss:$16 sps:$4 sm:$0xff]  }
 0xc9f   :  { %13208 = vmatpush1.bf16.msra.mxu0 %v17556_v6  ;;  %v17595_v6 = vld [vmem:[#allocation11 + $0x640] ss:$16 sps:$4 sm:$0xff]  }
 0xca0   :  { %13209 = vmatprep.subr.bf16.mxu0 %v17564_v54  ;;  %v17607_v54 = vld [vmem:[#allocation11 + $0x780] ss:$16 sps:$4 sm:$0xff]  }
 0xca3   :  { %13210 = vmatpush1.bf16.msra.mxu0 %v17562_v49  ;;  %v17600_v49 = vld [vmem:[#allocation11 + $0x624] ss:$16 sps:$4 sm:$0xff]  }
 0xca4   :  { %13211 = vmatprep.subr.bf16.mxu0 %v17570_v31  ;;  %v17618_v31 = vld [vmem:[#allocation11 + $0x7ac] ss:$16 sps:$4 sm:$0xff]  }
 0xca7   :  { %13212 = vmatpush1.bf16.msra.mxu0 %v17568_v8  ;;  %v17598_v8 = vld [vmem:[#allocation11 + $0x620] ss:$16 sps:$4 sm:$0xff]  }
 0xca8   :  { %13213 = vmatprep.subr.bf16.mxu0 %v17576_v58  ;;  %v17616_v58 = vld [vmem:[#allocation11 + $0x7a8] ss:$16 sps:$4 sm:$0xff]  }
 0xcab   :  { %13214 = vmatpush1.bf16.msra.mxu0 %v17574_v61  ;;  %v17606_v61 = vld [vmem:[#allocation11 + $0x604] ss:$16 sps:$4 sm:$0xff]  }
 0xcac   :  { %13215 = vmatprep.subr.bf16.mxu0 %v17582_v37  ;;  %v17637_v37 = vld [vmem:[#allocation13 + $0x4c0] ss:$8 sps:$4 sm:$0xff]  }
 0xcaf   :  { %13216 = vmatpush1.bf16.msra.mxu0 %v17580_v60  ;;  %v17642_v60 = vld [vmem:[#allocation13 + $0x4b4] ss:$8 sps:$4 sm:$0xff]  }
 0xcb0   :  { %13217 = vmatprep.subr.bf16.mxu0 %v17588_v39  ;;  %v17646_v39 = vld [vmem:[#allocation13 + $0x4a0] ss:$8 sps:$4 sm:$0xff]  }
 0xcb3   :  { %13218 = vmatpush1.bf16.msra.mxu0 %v17586_v9  ;;  %v17652_v9 = vld [vmem:[#allocation13 + $0x490] ss:$8 sps:$4 sm:$0xff]  }
 0xcb4   :  { %13376 = vmatprep.subr.bf16.mxu0 %v17594_v38  ;;  %v17666_v38 = vld [vmem:[#allocation13 + $0x574] ss:$8 sps:$4 sm:$0xff]  }
 0xcd6   :  { %v12766_v42 = vpop.f32.mrf.mxu1 }
 0xcd7   :  { %v12767_v1 = vadd.f32 %v12766_v42, %v12405_v0  ;;  %v17603_v42 = vld [vmem:[#allocation11 + $0x7a4] ss:$16 sps:$4 sm:$0xff]   ;;  %v17604_v0 = vld [vmem:[#allocation11 + $0x600] ss:$16 sps:$4 sm:$0xff]  }
 0xcd8   :  { %v12768_v44 = vpop.f32.mrf.mxu1 }
 0xcd9   :  { %v12769_v35 = vadd.f32 %v12768_v44, %v12409_v63  ;;  %v17622_v63 = vld [vmem:[#allocation11 + $0x788] ss:$16 sps:$4 sm:$0xff]  }
 0xcda   :  { %v12770_v13 = vpop.f32.mrf.mxu1 }
 0xcdc   :  { %v12771_v56 = vpop.f32.mrf.mxu1 }
 0xd56   :  { %v12807_v2 = vpop.f32.mrf.mxu0 }
 0xd57   :  { %v12808_v4 = vadd.f32 %v12807_v2, %v12767_v1  ;;  %v17612_v1 = vld [vmem:[#allocation11 + $0x66c] ss:$16 sps:$4 sm:$0xff]  }
 0xd58   :  { %v12809_v14 = vpop.f32.mrf.mxu0  ;;  %v17645_v2 = vld [vmem:[#allocation13 + $0x5f4] ss:$8 sps:$4 sm:$0xff]  }
 0xd59   :  { %v12810_v3 = vadd.f32 %v12809_v14, %v12769_v35  ;;  %v12814_v11 = vmax.f32 %v12808_v4, 0.0  ;;  %v17610_v35 = vld [vmem:[#allocation11 + $0x668] ss:$16 sps:$4 sm:$0xff]   ;;  %v17615_v4 = vld [vmem:[#allocation11 + $0x64c] ss:$16 sps:$4 sm:$0xff]  }
 0xd5a   :  { %v12811_v23 = vpop.f32.mrf.mxu0  ;;  %v17643_v14 = vld [vmem:[#allocation13 + $0x5f0] ss:$8 sps:$4 sm:$0xff]  }
 0xd5b   :  { %v12815_v19 = vmax.f32 %v12810_v3, 0.0  ;;  %v12816_v27 = vpack.c.bf16 %v12814_v11, %v12814_v11  ;;  %v17651_v3 = vld [vmem:[#allocation13 + $0x5e4] ss:$8 sps:$4 sm:$0xff]   ;;  %v17613_v11 = vld [vmem:[#allocation11 + $0x648] ss:$16 sps:$4 sm:$0xff]  }
 0xd5c   :  { %v12812_v15 = vpop.f32.mrf.mxu0  ;;  %v17621_v23 = vld [vmem:[#allocation11 + $0x62c] ss:$16 sps:$4 sm:$0xff]  }
 0xd5d   :  { %v12817_v5 = vpack.c.bf16 %v12815_v19, %v12815_v19  ;;  %v17649_v19 = vld [vmem:[#allocation13 + $0x5e0] ss:$8 sps:$4 sm:$0xff]   ;;  %v17657_v15 = vld [vmem:[#allocation13 + $0x5d4] ss:$8 sps:$4 sm:$0xff]  }
 0xd5f   :  { %12985 = vmatprep.mubr.bf16.mxu1 %v12817_v5  ;;  %v17619_v5 = vld [vmem:[#allocation11 + $0x628] ss:$16 sps:$4 sm:$0xff]  }
 0xd60   :  { %12986 = vmatmul.mubr.bf16.vlgmr.msra.gmra.mxu1 %v12816_v27  ;;  %v17655_v27 = vld [vmem:[#allocation13 + $0x5d0] ss:$8 sps:$4 sm:$0xff]  }
 0xd61   :  { %13245 = vmatpush1.bf16.msra.mxu1 %v17547_v10  ;;  %13276 = vmatprep.mubr.bf16.mxu1 %v17980_v22  ;;  %v17627_v10 = vld [vmem:[#allocation11 + $0x60c] ss:$16 sps:$4 sm:$0xff]  }
 0xd62   :  { %13246 = vmatprep.subr.bf16.mxu1 %v17555_v52  ;;  %v17663_v52 = vld [vmem:[#allocation13 + $0x5c4] ss:$8 sps:$4 sm:$0xff]  }
 0xd65   :  { %13247 = vmatpush1.bf16.msra.mxu1 %v17553_v32  ;;  %v17630_v32 = vld [vmem:[#allocation13 + $0x4f4] ss:$8 sps:$4 sm:$0xff]  }
 0xd66   :  { %13248 = vmatprep.subr.bf16.mxu1 %v17561_v18  ;;  %v17669_v18 = vld [vmem:[#allocation13 + $0x5b4] ss:$8 sps:$4 sm:$0xff]  }
 0xd69   :  { %13249 = vmatpush1.bf16.msra.mxu1 %v17559_v28  ;;  %v17628_v28 = vld [vmem:[#allocation13 + $0x4f0] ss:$8 sps:$4 sm:$0xff]  }
 0xd6a   :  { %13250 = vmatprep.subr.bf16.mxu1 %v17567_v12  ;;  %v17633_v12 = vld [vmem:[#allocation13 + $0x4e4] ss:$8 sps:$4 sm:$0xff]  }
 0xd6d   :  { %13251 = vmatpush1.bf16.msra.mxu1 %v17565_v41  ;;  %v17667_v41 = vld [vmem:[#allocation13 + $0x5b0] ss:$8 sps:$4 sm:$0xff]  }
 0xd6e   :  { %13252 = vmatprep.subr.bf16.mxu1 %v17573_v50  ;;  %v17631_v50 = vld [vmem:[#allocation13 + $0x4e0] ss:$8 sps:$4 sm:$0xff]  }
 0xd71   :  { %13253 = vmatpush1.bf16.msra.mxu1 %v17571_v55  ;;  %v17636_v55 = vld [vmem:[#allocation13 + $0x4d4] ss:$8 sps:$4 sm:$0xff]  }
 0xd72   :  { %13254 = vmatprep.subr.bf16.mxu1 %v17579_v36  ;;  %v17634_v36 = vld [vmem:[#allocation13 + $0x4d0] ss:$8 sps:$4 sm:$0xff]  }
 0xd75   :  { %13255 = vmatpush1.bf16.msra.mxu1 %v17577_v30  ;;  %v17639_v30 = vld [vmem:[#allocation13 + $0x4c4] ss:$8 sps:$4 sm:$0xff]  }
 0xd76   :  { %13256 = vmatprep.subr.bf16.mxu1 %v17585_v20  ;;  %v17640_v20 = vld [vmem:[#allocation13 + $0x4b0] ss:$8 sps:$4 sm:$0xff]  }
 0xd79   :  { %13257 = vmatpush1.bf16.msra.mxu1 %v17583_v43  ;;  %v17648_v43 = vld [vmem:[#allocation13 + $0x4a4] ss:$8 sps:$4 sm:$0xff]  }
 0xd7a   :  { %13258 = vmatprep.subr.bf16.mxu1 %v17591_v40  ;;  %v17660_v40 = vld [vmem:[#allocation13 + $0x484] ss:$8 sps:$4 sm:$0xff]  }
 0xd7d   :  { %13259 = vmatpush1.bf16.msra.mxu1 %v17589_v25  ;;  %v17658_v25 = vld [vmem:[#allocation13 + $0x480] ss:$8 sps:$4 sm:$0xff]  }
 0xd7e   :  { %13514 = vmatprep.subr.bf16.mxu1 %v17603_v42  ;;  %v17664_v42 = vld [vmem:[#allocation13 + $0x570] ss:$8 sps:$4 sm:$0xff]  }
 0xe20   :  { %v16440_v24 = vpop.f32.mrf.mxu1 }
 0xe22   :  { %v16441_v44 = vpop.f32.mrf.mxu1 }
 0xe23   :  { %v16442_v13 = vadd.f32 %v16441_v44, %v16440_v24  ;;  %v17672_v24 = vld [vmem:[#allocation13 + $0x564] ss:$8 sps:$4 sm:$0xff]   ;;  %v17670_v44 = vld [vmem:[#allocation13 + $0x560] ss:$8 sps:$4 sm:$0xff]  }
 0xe24   :  { %v16443_v53 = vpop.f32.mrf.mxu1 }
 0xe25   :  { %v12988_v57 = vadd.f32 %v16442_v13, %v16182_v7  ;;  %v17673_v7 = vld [vmem:[#allocation13 + $0x5a0] ss:$8 sps:$4 sm:$0xff]   ;;  %v17675_v13 = vld [vmem:[#allocation13 + $0x5a4] ss:$8 sps:$4 sm:$0xff]   ;;  %v17678_v53 = vld [vmem:[#allocation13 + $0x554] ss:$8 sps:$4 sm:$0xff]  }
 0xe26   :  { %v16444_v56 = vpop.f32.mrf.mxu1 }
 0xe27   :  { %v12993_v33 = vmax.f32 %v12988_v57, 0.0  ;;  %v17679_v57 = vld [vmem:[#allocation13 + $0x590] ss:$8 sps:$4 sm:$0xff]  }
 0xe28   :  { %v17676_v56 = vld [vmem:[#allocation13 + $0x550] ss:$8 sps:$4 sm:$0xff]  }
 0xe29   :  { %v12994_v46 = vpack.c.bf16 %v12993_v33, %v12993_v33  ;;  %v17681_v33 = vld [vmem:[#allocation13 + $0x594] ss:$8 sps:$4 sm:$0xff]  }
 0xe2b   :  { %13236 = vmatmul.mubr.bf16.vlgmr.msra.gmra.mxu0 %v12994_v46  ;;  %13277 = vmatmul.mubr.bf16.vlgmr.msra.gmra.mxu1 %v12994_v46  ;;  %v17685_v46 = vld [vmem:[#allocation13 + $0x580] ss:$8 sps:$4 sm:$0xff]  }
 0xe2c   :  { %13377 = vmatpush1.bf16.msra.mxu0 %v17592_v26  ;;  %13515 = vmatpush1.bf16.msra.mxu1 %v17601_v45  ;;  %v17684_v26 = vld [vmem:[#allocation13 + $0x544] ss:$8 sps:$4 sm:$0xff]  }
 0xe2d   :  { %13378 = vmatprep.subr.bf16.mxu0 %v17597_v17  ;;  %13516 = vmatprep.subr.bf16.mxu1 %v17609_v29  ;;  %v17687_v45 = vld [vmem:[#allocation13 + $0x584] ss:$8 sps:$4 sm:$0xff]   ;;  %v17682_v17 = vld [vmem:[#allocation13 + $0x540] ss:$8 sps:$4 sm:$0xff]   ;;  %v17693_v29 = vld [vmem:[#allocation13 + $0x674] ss:$8 sps:$4 sm:$0xff]  }
 0xe2e   :  { %13400 = vmatprep.mubr.bf16.mxu0 %v17980_v22  ;;  %13534 = vmatprep.mubr.bf16.mxu1 %v17980_v22 }
 0xe30   :  { %13379 = vmatpush1.bf16.msra.mxu0 %v17595_v6  ;;  %13517 = vmatpush1.bf16.msra.mxu1 %v17607_v54  ;;  %v17690_v6 = vld [vmem:[#allocation13 + $0x534] ss:$8 sps:$4 sm:$0xff]   ;;  %v17691_v54 = vld [vmem:[#allocation13 + $0x670] ss:$8 sps:$4 sm:$0xff]  }
 0xe31   :  { %13380 = vmatprep.subr.bf16.mxu0 %v17600_v49  ;;  %13555 = vmatprep.subr.bf16.mxu1 %v17618_v31  ;;  %v17688_v49 = vld [vmem:[#allocation13 + $0x530] ss:$8 sps:$4 sm:$0xff]   ;;  %v17696_v31 = vld [vmem:[#allocation13 + $0x524] ss:$8 sps:$4 sm:$0xff]  }
 0xe33   :  { %16257 = vmatmul.mubr.msk.bf16.vlgmr.msra.gmra.mxu1 %vm13498_vm2, %v18240_v48 }
 0xe34   :  { %13381 = vmatpush1.bf16.msra.mxu0 %v17598_v8  ;;  %13556 = vmatpush1.bf16.msra.mxu1 %v17616_v58  ;;  %v17699_v8 = vld [vmem:[#allocation13 + $0x664] ss:$8 sps:$4 sm:$0xff]   ;;  %v17694_v58 = vld [vmem:[#allocation13 + $0x520] ss:$8 sps:$4 sm:$0xff]  }
 0xe35   :  { %13382 = vmatprep.subr.bf16.mxu0 %v17606_v61  ;;  %13557 = vmatprep.subr.bf16.mxu1 %v17624_v59  ;;  %v17697_v61 = vld [vmem:[#allocation13 + $0x660] ss:$8 sps:$4 sm:$0xff]   ;;  %v17702_v59 = vld [vmem:[#allocation13 + $0x514] ss:$8 sps:$4 sm:$0xff]  }
 0xe36   :  { %13575 = vmatprep.mubr.bf16.mxu1 %v17980_v22 }
 0xe38   :  { %13383 = vmatpush1.bf16.msra.mxu0 %v17604_v0  ;;  %13558 = vmatpush1.bf16.msra.mxu1 %v17622_v63  ;;  %v17705_v0 = vld [vmem:[#allocation13 + $0x654] ss:$8 sps:$4 sm:$0xff]   ;;  %v17700_v63 = vld [vmem:[#allocation13 + $0x510] ss:$8 sps:$4 sm:$0xff]  }
 0xe39   :  { %13417 = vmatprep.subr.bf16.mxu0 %v17612_v1  ;;  %14059 = vmatprep.subr.bf16.mxu1 %v17645_v2  ;;  %v17703_v1 = vld [vmem:[#allocation13 + $0x650] ss:$8 sps:$4 sm:$0xff]   ;;  %v17708_v2 = vld [vmem:[#allocation13 + $0x504] ss:$8 sps:$4 sm:$0xff]  }
 0xe3b   :  { %16247 = vmatmul.mubr.msk.bf16.vlgmr.msra.gmra.mxu0 %vm2842_vm1, %v18224_v62  ;;  %16258 = vmatmul.mubr.msk.bf16.vlgmr.msra.gmra.mxu1 %vm13498_vm2, %v18240_v48  ;;  %v17625_v48 = vld [vmem:[#allocation11 + $0x608] ss:$16 sps:$4 sm:$0xff]  }
 0xe3c   :  { %13418 = vmatpush1.bf16.msra.mxu0 %v17610_v35  ;;  %13441 = vmatprep.mubr.bf16.mxu0 %v17980_v22  ;;  %v17661_v22 = vld [vmem:[#allocation13 + $0x5c0] ss:$8 sps:$4 sm:$0xff]   ;;  %v17711_v35 = vld [vmem:[#allocation13 + $0x644] ss:$8 sps:$4 sm:$0xff]  }
 0xe3d   :  { %13419 = vmatprep.subr.bf16.mxu0 %v17615_v4  ;;  %14060 = vmatpush1.bf16.msra.mxu1 %v17643_v14  ;;  %v17706_v4 = vld [vmem:[#allocation13 + $0x500] ss:$8 sps:$4 sm:$0xff]  }
 0xe3e   :  { %14061 = vmatprep.subr.bf16.mxu1 %v17651_v3  ;;  %v17709_v14 = vld [vmem:[#allocation13 + $0x640] ss:$8 sps:$4 sm:$0xff]   ;;  %v17714_v3 = vld [vmem:[#allocation13 + $0x634] ss:$8 sps:$4 sm:$0xff]  }
 0xe40   :  { %13420 = vmatpush1.bf16.msra.mxu0 %v17613_v11  ;;  %v17712_v11 = vld [vmem:[#allocation13 + $0x630] ss:$8 sps:$4 sm:$0xff]  }
 0xe41   :  { %13421 = vmatprep.subr.bf16.mxu0 %v17621_v23  ;;  %14062 = vmatpush1.bf16.msra.mxu1 %v17649_v19  ;;  %v17717_v23 = vld [vmem:[#allocation13 + $0x624] ss:$8 sps:$4 sm:$0xff]   ;;  %v17715_v19 = vld [vmem:[#allocation13 + $0x620] ss:$8 sps:$4 sm:$0xff]  }
 0xe42   :  { %14063 = vmatprep.subr.bf16.mxu1 %v17657_v15  ;;  %v17720_v15 = vld [vmem:[#allocation13 + $0x614] ss:$8 sps:$4 sm:$0xff]  }
 0xe44   :  { %13422 = vmatpush1.bf16.msra.mxu0 %v17619_v5  ;;  %v17718_v5 = vld [vmem:[#allocation13 + $0x610] ss:$8 sps:$4 sm:$0xff]  }
 0xe45   :  { %13423 = vmatprep.subr.bf16.mxu0 %v17627_v10  ;;  %14064 = vmatpush1.bf16.msra.mxu1 %v17655_v27  ;;  %v17723_v10 = vld [vmem:[#allocation13 + $0x604] ss:$8 sps:$4 sm:$0xff]   ;;  %v17721_v27 = vld [vmem:[#allocation13 + $0x600] ss:$8 sps:$4 sm:$0xff]  }
 0xe46   :  { %14065 = vmatprep.subr.bf16.mxu1 %v17663_v52  ;;  %v17724_v52 = vld [vmem:[#allocation14 + $0x1f8] sm:$0xff]  }
 0xe48   :  { %13424 = vmatpush1.bf16.msra.mxu0 %v17625_v48 }
 0xe49   :  { %14018 = vmatprep.subr.bf16.mxu0 %v17630_v32  ;;  %14066 = vmatpush1.bf16.msra.mxu1 %v17661_v22 }
 0xe4a   :  { %14067 = vmatprep.subr.bf16.mxu1 %v17669_v18 }
 0xe4b   :  { %16248 = vmatmul.mubr.msk.bf16.vlgmr.msra.gmra.mxu0 %vm2842_vm1, %v18224_v62  ;;  %v17654_v62 = vld [vmem:[#allocation13 + $0x494] ss:$8 sps:$4 sm:$0xff]  }
 0xe4c   :  { %14019 = vmatpush1.bf16.msra.mxu0 %v17628_v28 }
 0xe4d   :  { %14020 = vmatprep.subr.bf16.mxu0 %v17633_v12  ;;  %14068 = vmatpush1.bf16.msra.mxu1 %v17667_v41 }
 0xe4e   :  { %14069 = vmatprep.subr.bf16.mxu1 %v17675_v13 }
 0xe50   :  { %14021 = vmatpush1.bf16.msra.mxu0 %v17631_v50 }
 0xe51   :  { %14022 = vmatprep.subr.bf16.mxu0 %v17636_v55  ;;  %14070 = vmatpush1.bf16.msra.mxu1 %v17673_v7 }
 0xe52   :  { %14071 = vmatprep.subr.bf16.mxu1 %v17681_v33 }
 0xe54   :  { %14023 = vmatpush1.bf16.msra.mxu0 %v17634_v36 }
 0xe55   :  { %14024 = vmatprep.subr.bf16.mxu0 %v17639_v30  ;;  %14072 = vmatpush1.bf16.msra.mxu1 %v17679_v57 }
 0xe56   :  { %14073 = vmatprep.subr.bf16.mxu1 %v17687_v45 }
 0xe58   :  { %14025 = vmatpush1.bf16.msra.mxu0 %v17637_v37  ;;  %v13588_v37 = vld [vmem:[#allocation16 + $0x1c] sm:$0xf] }
 0xe59   :  { %14026 = vmatprep.subr.bf16.mxu0 %v17642_v60  ;;  %14074 = vmatpush1.bf16.msra.mxu1 %v17685_v46  ;;  %v17725_v46 = vld [vmem:[#allocation14 + $0x1b8] sm:$0xff]  }
 0xe5a   :  { %14075 = vmatprep.subr.bf16.mxu1 %v17693_v29  ;;  %v17726_v29 = vld [vmem:[#allocation14 + $0x1f0] sm:$0xff]  }
 0xe5c   :  { %14027 = vmatpush1.bf16.msra.mxu0 %v17640_v20 }
 0xe5d   :  { %14028 = vmatprep.subr.bf16.mxu0 %v17648_v43  ;;  %14076 = vmatpush2.bf16.msra.mxu1 %v17691_v54 }
 0xe5e   :  { %14077 = vmatprep.subr.bf16.mxu1 %v17699_v8 }
 0xe60   :  { %14029 = vmatpush1.bf16.msra.mxu0 %v17646_v39 }
 0xe61   :  { %14030 = vmatprep.subr.bf16.mxu0 %v17654_v62  ;;  %14078 = vmatpush2.bf16.msra.mxu1 %v17697_v61  ;;  %v13593_v62 = vrot.slane %v13588_v37, %v18125_v16 }
 0xe62   :  { %14079 = vmatprep.subr.bf16.mxu1 %v17705_v0 }
 0xe64   :  { %14031 = vmatpush1.bf16.msra.mxu0 %v17652_v9 }
 0xe65   :  { %14032 = vmatprep.subr.bf16.mxu0 %v17660_v40  ;;  %14080 = vmatpush2.bf16.msra.mxu1 %v17703_v1 }
 0xe66   :  { %14081 = vmatprep.subr.bf16.mxu1 %v17711_v35 }
 0xe68   :  { %14033 = vmatpush1.bf16.msra.mxu0 %v17658_v25 }
 0xe69   :  { %14034 = vmatprep.subr.bf16.mxu0 %v17666_v38  ;;  %14082 = vmatpush2.bf16.msra.mxu1 %v17709_v14 }
 0xe6a   :  { %14083 = vmatprep.subr.bf16.mxu1 %v17714_v3 }
 0xe6c   :  { %14035 = vmatpush2.bf16.msra.mxu0 %v17664_v42  ;;  %v13597_v42 = vrot.slane %v13588_v37, %v18128_v21 }
 0xe6d   :  { %14036 = vmatprep.subr.bf16.mxu0 %v17672_v24  ;;  %14084 = vmatpush2.bf16.msra.mxu1 %v17712_v11 }
 0xe6e   :  { %14085 = vmatprep.subr.bf16.mxu1 %v17717_v23  ;;  %v17729_v23 = vld [vmem:[#allocation14 + $0x1a8] sm:$0xff]  }
 0xe70   :  { %14037 = vmatpush2.bf16.msra.mxu0 %v17670_v44 }
 0xe71   :  { %14038 = vmatprep.subr.bf16.mxu0 %v17678_v53  ;;  %14086 = vmatpush2.bf16.msra.mxu1 %v17715_v19  ;;  %v17731_v19 = vld [vmem:[#allocation14 + $0x1a0] sm:$0xff]  }
 0xe72   :  { %14087 = vmatprep.subr.bf16.mxu1 %v17720_v15  ;;  %v17732_v15 = vld [vmem:[#allocation14 + $0x1d8] sm:$0xff]  }
 0xe74   :  { %14039 = vmatpush2.bf16.msra.mxu0 %v17676_v56 }
 0xe75   :  { %14040 = vmatprep.subr.bf16.mxu0 %v17684_v26  ;;  %14088 = vmatpush2.bf16.msra.mxu1 %v17718_v5  ;;  %v17733_v5 = vld [vmem:[#allocation14 + $0x198] sm:$0xff]  }
 0xe76   :  { %14089 = vmatprep.subr.bf16.mxu1 %v17723_v10  ;;  %v17734_v10 = vld [vmem:[#allocation14 + $0x1d0] sm:$0xff]  }
 0xe78   :  { %14041 = vmatpush2.bf16.msra.mxu0 %v17682_v17 }
 0xe79   :  { %14042 = vmatprep.subr.bf16.mxu0 %v17690_v6  ;;  %14090 = vmatpush2.bf16.msra.mxu1 %v17721_v27  ;;  %v17727_v6 = vld [vmem:[#allocation14 + $0x1b0] sm:$0xff]  }
 0xe7a   :  { %16534 = vmatprep.subr.bf16.mxu1 %v17979_v47  ;;  %v17735_v27 = vld [vmem:[#allocation14 + $0x190] sm:$0xff]  }
 0xe7c   :  { %14043 = vmatpush2.bf16.msra.mxu0 %v17688_v49 }
 0xe7d   :  { %14044 = vmatprep.subr.bf16.mxu0 %v17696_v31  ;;  %v13601_v31 = vrot.slane %v13588_v37, %v18133_v34  ;;  %v17728_v34 = vld [vmem:[#allocation14 + $0x1e8] sm:$0xff]  }
 0xe80   :  { %14045 = vmatpush2.bf16.msra.mxu0 %v17694_v58 }
 0xe81   :  { %14046 = vmatprep.subr.bf16.mxu0 %v17702_v59  ;;  %v13605_v59 = vrot.slane %v13588_v37, %v18136_v51  ;;  %v17730_v51 = vld [vmem:[#allocation14 + $0x1e0] sm:$0xff]  }
 0xe84   :  { %14047 = vmatpush2.bf16.msra.mxu0 %v17700_v63 }
 0xe85   :  { %14048 = vmatprep.subr.bf16.mxu0 %v17708_v2 }
 0xe88   :  { %14049 = vmatpush2.bf16.msra.mxu0 %v17706_v4 }
 0xe89   :  { %16446 = vmatprep.subr.bf16.mxu0 %v17724_v52  ;;  %v17736_v52 = vld [vmem:[#allocation14 + $0x1c8] sm:$0xff]  }
 0xeeb   :  { %v13237_v48 = vpop.f32.mrf.mxu0  ;;  %v13278_v32 = vpop.f32.mrf.mxu1 }
 0xeed   :  { %v13239_v22 = vpop.f32.mrf.mxu0  ;;  %v13280_v18 = vpop.f32.mrf.mxu1 }
 0xeef   :  { %v13241_v28 = vpop.f32.mrf.mxu0  ;;  %v13282_v12 = vpop.f32.mrf.mxu1 }
 0xef0   :  { %v17741_v28 = vld [vmem:[%s18496_s8 + $0xb0] sm:$0xff]   ;;  %v17742_v12 = vld [vmem:[%s18496_s8 + $0xa8] sm:$0xff]  }
 0xef1   :  { %v13242_v41 = vpop.f32.mrf.mxu0  ;;  %v13283_v50 = vpop.f32.mrf.mxu1 }
 0xef2   :  { %v17743_v41 = vld [vmem:[%s18496_s8 + $0xa0] sm:$0xff]   ;;  %v17744_v50 = vld [vmem:[%s18496_s8 + $0x98] sm:$0xff]  }
 0xef3   :  { %v13536_v55 = vpop.f32.mrf.mxu1 }
 0xef5   :  { %v13538_v36 = vpop.f32.mrf.mxu1 }
 0xef7   :  { %v13540_v30 = vpop.f32.mrf.mxu1 }
 0xef9   :  { %v13541_v60 = vpop.f32.mrf.mxu1 }
 0xefa   :  { %v13686_v60 = vld [vmem:[#allocation16 + $0x20] sm:$0x3] }
 0xefb   :  { %v13402_v20 = vpop.f32.mrf.mxu0  ;;  %v13577_v43 = vpop.f32.mrf.mxu1 }
 0xefc   :  { %v13403_v39 = vadd.f32 %v13402_v20, %v13237_v48  ;;  %v17737_v48 = vld [vmem:[#allocation14 + $0x188] sm:$0xff]   ;;  %v13691_v20 = vrot.slane %v13686_v60, %v18125_v16  ;;  %v17745_v16 = vld [vmem:[%s18496_s8 + $0x90] sm:$0xff]  }
 0xefd   :  { %v13404_v9 = vpop.f32.mrf.mxu0  ;;  %v13579_v40 = vpop.f32.mrf.mxu1 }
 0xefe   :  { %v13405_v25 = vadd.f32 %v13404_v9, %v13239_v22  ;;  %v13584_v38 = vadd.f32 %v13536_v55, %v13403_v39  ;;  %v17739_v22 = vld [vmem:[#allocation14 + $0x180] sm:$0xff]  }
 0xeff   :  { %v13406_v24 = vpop.f32.mrf.mxu0  ;;  %v13581_v7 = vpop.f32.mrf.mxu1 }
 0xf00   :  { %v13610_v44 = vadd.f32 %v13593_v62, %v13584_v38  ;;  %v13585_v13 = vadd.f32 %v13538_v36, %v13405_v25 }
 0xf01   :  { %v13407_v53 = vpop.f32.mrf.mxu0  ;;  %v13582_v57 = vpop.f32.mrf.mxu1 }
 0xf02   :  { %v13611_v56 = vadd.f32 %v13597_v42, %v13585_v13  ;;  %v13614_v33 = vmax.f32 %v13610_v44, 0.0  ;;  %v17747_v57 = vld [vmem:[%s18496_s8 + $0x80] sm:$0xff]  }
 0xf04   :  { %v13615_v26 = vmax.f32 %v13611_v56, 0.0  ;;  %v13618_v17 = vpack.c.bf16 %v13614_v33, %v13614_v33  ;;  %v17748_v56 = vld [vmem:[#allocation14 + $0x218] sm:$0xff]   ;;  %v17749_v33 = vld [vmem:[#allocation14 + $0x210] sm:$0xff]  }
 0xf06   :  { %v13619_v45 = vpack.c.bf16 %v13615_v26, %v13615_v26 }
 0xf08   :  { %14050 = vmatprep.mubr.bf16.mxu0 %v13619_v45  ;;  %v16323_v45 = vld [vmem:[#allocation16 + $0x22] ss:$0 sm:$0xff] }
 0xf09   :  { %14051 = vmatmul.mubr.bf16.vlgmr.msra.gmra.mxu0 %v13618_v17 }
 0xf0a   :  { %16447 = vmatpush3.bf16.msra.mxu0 %v17725_v46 }
 0xf0b   :  { %v13443_v54 = vpop.f32.mrf.mxu0  ;;  %16448 = vmatprep.subr.bf16.mxu0 %v17726_v29 }
 0xf0c   :  { %v13444_v49 = vadd.f32 %v13443_v54, %v13278_v32  ;;  %v17738_v32 = vld [vmem:[#allocation14 + $0x1c0] sm:$0xff]  }
 0xf0d   :  { %v13445_v8 = vpop.f32.mrf.mxu0 }
 0xf0e   :  { %v13586_v58 = vadd.f32 %v13577_v43, %v13444_v49  ;;  %v13446_v61 = vadd.f32 %v13445_v8, %v13280_v18  ;;  %16449 = vmatpush3.bf16.msra.mxu0 %v17727_v6  ;;  %v17740_v18 = vld [vmem:[%s18496_s8 + $0xb8] sm:$0xff]   ;;  %v13695_v43 = vrot.slane %v13686_v60, %v18128_v21  ;;  %v17746_v21 = vld [vmem:[%s18496_s8 + $0x88] sm:$0xff]   ;;  %v17750_v8 = vld [vmem:[#allocation14 + $0x208] sm:$0xff]   ;;  %s17984_s8 = smov [#allocation17]  }
 0xf0f   :  { %v13447_v0 = vpop.f32.mrf.mxu0  ;;  %16450 = vmatprep.subr.bf16.mxu0 %v17728_v34  ;;  %s14483_s7 = sshll.u32 %s17984_s8, 4  ;;  %s14484_s7 = int_to_ptr.vmem [resolvable:$true] %s14483_s7 }
 0xf10   :  { %v13612_v63 = vadd.f32 %v13601_v31, %v13586_v58  ;;  %v13587_v1 = vadd.f32 %v13579_v40, %v13446_v61  ;;  %v17751_v58 = vld [vmem:[#allocation14 + $0x200] sm:$0xff]   ;;  %s17932_s23 = scalar_lea.vmem %s14484_s7, 128  ;;  %p17937_p4 = scmp.lt.s32.totalorder %s14484_s7, %s14484_s7 }
 0xf11   :  { %v13448_v2 = vpop.f32.mrf.mxu0  ;;  %v16340_v61 = vld [vmem:[#allocation16 + $0x23] ss:$0 sm:$0xff]  ;;  %p17933_p3 = scmp.ne.s32.totalorder %s14484_s7, %s17932_s23  ;;  %p17938_p5 = scmp.lt.s32.totalorder %s17932_s23, %s17932_s23 }
 0xf12   :  { %v13613_v35 = vadd.f32 %v13605_v59, %v13587_v1  ;;  %v13616_v4 = vmax.f32 %v13612_v63, 0.0  ;;  %16451 = vmatpush3.bf16.msra.mxu0 %v17729_v23 }
 0xf13   :  { %16452 = vmatprep.subr.bf16.mxu0 %v17730_v51  ;;  %p17939_p6 = por %p17938_p5, %p17937_p4 }
 0xf14   :  { %v13617_v14 = vmax.f32 %v13613_v35, 0.0  ;;  %v13620_v11 = vpack.c.bf16 %v13616_v4, %v13616_v4 }
 0xf15   :  { %p17940_p7 = pnand %p17939_p6, %p17933_p3 }
 0xf16   :  { %v13621_v3 = vpack.c.bf16 %v13617_v14, %v13617_v14  ;;  %16453 = vmatpush3.bf16.msra.mxu0 %v17731_v19  ;;  %v16349_v14 = vld [vmem:[#allocation16 + $0x24] ss:$0 sm:$0xff] }
 0xf17   :  { %16454 = vmatprep.subr.bf16.mxu0 %v17732_v15 }
 0xf18   :  { %14091 = vmatprep.mubr.bf16.mxu1 %v13621_v3 }
 0xf19   :  { %14092 = vmatmul.mubr.bf16.vlgmr.msra.gmra.mxu1 %v13620_v11 }
 0xf1a   :  { %16550 = vmatprep.mubr.msk.bf16.mxu1 %vm17981_vm0, %v17979_v47  ;;  %16455 = vmatpush3.bf16.msra.mxu0 %v17733_v5 }
 0xf1b   :  { %16456 = vmatprep.subr.bf16.mxu0 %v17734_v10  ;;  %16535 = vmatpush3.bf16.msra.mxu1 %v17740_v18 }
 0xf1c   :  { %16536 = vmatprep.subr.bf16.mxu1 %v17979_v47 }
 0xf1e   :  { %16457 = vmatpush3.bf16.msra.mxu0 %v17735_v27 }
 0xf1f   :  { %16458 = vmatprep.subr.bf16.mxu0 %v17736_v52  ;;  %16537 = vmatpush3.bf16.msra.mxu1 %v17741_v28 }
 0xf20   :  { %16538 = vmatprep.subr.bf16.mxu1 %v17979_v47 }
 0xf22   :  { %16459 = vmatpush3.bf16.msra.mxu0 %v17737_v48 }
 0xf23   :  { %16460 = vmatprep.subr.bf16.mxu0 %v17738_v32  ;;  %16539 = vmatpush3.bf16.msra.mxu1 %v17742_v12 }
 0xf24   :  { %16540 = vmatprep.subr.bf16.mxu1 %v17979_v47 }
 0xf26   :  { %16461 = vmatpush3.bf16.msra.mxu0 %v17739_v22 }
 0xf27   :  { %16554 = vmatprep.subr.bf16.mxu0 %v17979_v47  ;;  %16541 = vmatpush3.bf16.msra.mxu1 %v17743_v41 }
 0xf28   :  { %16542 = vmatprep.subr.bf16.mxu1 %v17979_v47 }
 0xf2b   :  { %16543 = vmatpush3.bf16.msra.mxu1 %v17744_v50 }
 0xf2c   :  { %16544 = vmatprep.subr.bf16.mxu1 %v17979_v47 }
 0xf2f   :  { %16545 = vmatpush3.bf16.msra.mxu1 %v17745_v16 }
 0xf30   :  { %16546 = vmatprep.subr.bf16.mxu1 %v17979_v47 }
 0xf33   :  { %16547 = vmatpush3.bf16.msra.mxu1 %v17746_v21 }
 0xf34   :  { %16548 = vmatprep.subr.bf16.mxu1 %v17979_v47 }
 0xf37   :  { %16549 = vmatpush3.bf16.msra.mxu1 %v17747_v57 }
 0xfc9   :  { %v14052_v55 = vpop.f32.mrf.mxu0 }
 0xfca   :  { %v14053_v39 = vadd.f32 %v14052_v55, %v13691_v20 }
 0xfcb   :  { %v14054_v36 = vpop.f32.mrf.mxu0 }
 0xfcc   :  { %v14055_v9 = vadd.f32 %v14054_v36, %v13695_v43 }
 0xfcd   :  { %v14056_v30 = vpop.f32.mrf.mxu0 }
 0xfcf   :  { %v14057_v37 = vpop.f32.mrf.mxu0 }
 0xfd9   :  { %v14093_v62 = vpop.f32.mrf.mxu1 }
 0xfda   :  { %v14094_v40 = vadd.f32 %v14093_v62, %v14053_v39 }
 0xfdb   :  { %v14095_v25 = vpop.f32.mrf.mxu1 }
 0xfdc   :  { %v14096_v38 = vadd.f32 %v14095_v25, %v14055_v9  ;;  %v14100_v42 = vmax.f32 %v14094_v40, 0.0 }
 0xfdd   :  { %v14097_v24 = vpop.f32.mrf.mxu1 }
 0xfde   :  { %v14101_v7 = vmax.f32 %v14096_v38, 0.0  ;;  %v14102_v53 = vpack.c.bf16 %v14100_v42, %v14100_v42 }
 0xfdf   :  { %v14098_v44 = vpop.f32.mrf.mxu1 }
 0xfe0   :  { %v14103_v13 = vpack.c.bf16 %v14101_v7, %v14101_v7 }
 0xfe2   :  { %14271 = vmatprep.mubr.bf16.mxu0 %v14103_v13 }
 0xfe3   :  { %14272 = vmatmul.mubr.bf16.vlgmr.msra.gmra.mxu0 %v14102_v53 }
 0xfe4   :  { %16562 = vmatprep.mubr.msk.bf16.mxu0 %vm17981_vm0, %v17979_v47  ;;  %16555 = vmatpush3.bf16.msra.mxu0 %v17748_v56 }
 0xfe5   :  { %16556 = vmatprep.subr.bf16.mxu0 %v17979_v47 }
 0xfe8   :  { %16557 = vmatpush3.bf16.msra.mxu0 %v17749_v33 }
 0xfe9   :  { %16558 = vmatprep.subr.bf16.mxu0 %v17979_v47 }
 0xfec   :  { %16559 = vmatpush3.bf16.msra.mxu0 %v17750_v8 }
 0xfed   :  { %16560 = vmatprep.subr.bf16.mxu0 %v17979_v47 }
 0xff0   :  { %16561 = vmatpush3.bf16.msra.mxu0 %v17751_v58 }
0x10a3   :  { %v16462_v26 = vpop.f32.mrf.mxu0 }
0x10a5   :  { %v16463_v46 = vpop.f32.mrf.mxu0 }
0x10a6   :  { %v16464_v17 = vadd.f32 %v16463_v46, %v16462_v26 }
0x10a7   :  { %v16465_v29 = vpop.f32.mrf.mxu0 }
0x10a8   :  { %v14274_v6 = vadd.f32 %v16464_v17, %v16323_v45 }
0x10a9   :  { %v16466_v54 = vpop.f32.mrf.mxu0 }
0x10aa   :  { %v14279_v49 = vmax.f32 %v14274_v6, 0.0 }
0x10ac   :  { %v14280_v31 = vpack.c.bf16 %v14279_v49, %v14279_v49 }
0x10ae   :  { %16551 = vmatmul.mubr.bf16.vlgmr.msra.gmra.mxu1 %v14280_v31 }
0x116e   :  { %v14386_v59 = vpop.f32.mrf.mxu1 }
0x116f   :  { %v14387_v0 = vadd.f32 %v16340_v61, %v14386_v59 }
0x1170   :  { %v16552_v63 = vpop.f32.mrf.mxu1 }
0x1171   :  { %v14392_v1 = vmax.f32 %v14387_v0, 0.0 }
0x1172   :  { %v14389_v2 = vpop.f32.mrf.mxu1 }
0x1173   :  { %v14393_v35 = vpack.c.bf16 %v14392_v1, %v14392_v1 }
0x1174   :  { %v16553_v4 = vpop.f32.mrf.mxu1 }
0x1175   :  { %16563 = vmatmul.mubr.msk.bf16.vlgmr.msra.gmra.mxu0 %vm2842_vm1, %v14393_v35 }
0x1235   :  { %v14470_v3 = vpop.f32.mrf.mxu0 }
0x1236   :  { %v14471_v11 = vadd.f32 %v16349_v14, %v14470_v3 }
0x1237   :  { %v16564_v34 = vpop.f32.mrf.mxu0 }
0x1238   :  { %14476 = vst [vmem:[#allocation17] sm:$0xff] %v14471_v11 }
0x1239   :  { %v14473_v47 = vpop.f32.mrf.mxu0 }
0x123a   :  { %17943 = shalt.err (!%p17940_p7)
}
0x123b   :  { %14486 = dma.vmem_to_hbm [thread:$0]  %s14484_s7, 128, %s18499_s11, [#allocation7]   ;;  %v16565_v23 = vpop.f32.mrf.mxu0 }
0x123c   :  { %17964 = dma.done.wait [#allocation7], 128  }
0x123d   :  { %17965 = vsyncadd [#allocation7], 4294967168 }
0x123e   :  { %14490 = vsyncpa [#allocation6], 1 }
0x123f   :  { %14491 = vsyncpa [#allocation9], 1 }
0x1240   :  { %14492 = vsyncpa [#allocation12], 1 }
0x1241   :  { %14493 = vsyncpa [#allocation15], 1 }
0x1242   :  { %14494 = vsyncpa [#allocation7], 1 }
0x1243   :  { %14495 = vsyncmov [#allocation4] }
0x1246   :  { %s14496_s26 = vpop.sfrf %14495 }
0x1247   :  { %p16355_p8 = scmp.ne.s32.totalorder %s14496_s26, 0 }
0x1249   :  { %14500 = shalt.err (%p16355_p8)  }
0x124a   :  { %14502 = vsyncmov [#allocation4 + $0x1] }
0x124d   :  { %s14503_s0 = vpop.sfrf %14502 }
0x124e   :  { %p16356_p9 = scmp.ne.s32.totalorder %s14503_s0, 0 }
0x1250   :  { %14507 = shalt.err (%p16356_p9)  }

</bundles_post_ra>
